<compile_context>
chip_gen: v5e
topology: v5e:2x2
jax: 0.10.0
libtpu: 0.0.40
codegen_flags: <defaults>
</compile_context>

<pallas_src>
import jax
import jax.numpy as jnp
from jax import lax
from jax.experimental import pallas as pl
from jax.experimental.pallas import tpu as pltpu

SEQ_LEN = 8
BATCH = 2
PAD_B = 8          # batch rows padded to the f32 sublane count
IN_DIM = 256
HID = 128
OUT_DIM = 2
BN_EPS = 1e-5


def _gru_step(h_prev, gx, w_hh_rz_ref, w_hh_n_ref, b_n):
    """One GRU step on PAD_B rows.

    gx       : (PAD_B, 3H) input projection; r/z biases (b_ih+b_hh) and b_ih_n
               already folded in.  Gate order is PyTorch's [r | z | n].
    h_prev   : (PAD_B, H) previous hidden state, or None for the zero state.
    w_hh_*   : refs to the recurrent weights, split so the r/z block is a
               separate MXU push that pops before the n block.
    b_n      : (PAD_B, H) pre-broadcast b_hh_n (must stay inside r*(...)).
    """
    if h_prev is None:
        # h_{-1} == 0 (PyTorch default init) -> recurrent matmuls vanish.
        r = jax.nn.sigmoid(gx[:, 0:HID])
        z = jax.nn.sigmoid(gx[:, HID:2 * HID])
        n = jnp.tanh(gx[:, 2 * HID:3 * HID] + r * b_n)
        return (1.0 - z) * n
    gh_rz = jnp.dot(h_prev, w_hh_rz_ref[...], preferred_element_type=jnp.float32)
    gh_n = jnp.dot(h_prev, w_hh_n_ref[...], preferred_element_type=jnp.float32)
    r = jax.nn.sigmoid(gx[:, 0:HID] + gh_rz[:, 0:HID])
    z = jax.nn.sigmoid(gx[:, HID:2 * HID] + gh_rz[:, HID:2 * HID])
    n = jnp.tanh(gx[:, 2 * HID:3 * HID] + r * (gh_n + b_n))
    return (1.0 - z) * n + z * h_prev


def model_kernel(x_ref,
                 w_ih1_ref, w_hh1_rz_ref, w_hh1_n_ref, b_gx1_ref, b_hhn1_ref,
                 w_ih2_ref, w_hh2_rz_ref, w_hh2_n_ref, b_gx2_ref, b_hhn2_ref,
                 conv_w_ref, conv_b_ref,
                 gamma_ref, beta_ref,
                 lin_w_ref, lin_b_ref,
                 out_ref,
                 gx1_scr):
    # ---- Layer-1 input projections for all timesteps, staged in VMEM scratch
    #      (keeps the (64,384) result out of the vreg file; per-step reads are
    #      aligned (8,384) loads hidden under the serial chain).
    gx1_scr[...] = (jnp.dot(x_ref[...], w_ih1_ref[...],
                            preferred_element_type=jnp.float32)
                    + b_gx1_ref[...])

    # Hoist the n-gate bias broadcasts out of the wave loop.
    b_n1 = jnp.broadcast_to(b_hhn1_ref[...], (PAD_B, HID))
    b_n2 = jnp.broadcast_to(b_hhn2_ref[...], (PAD_B, HID))

    h1 = None        # most recent layer-1 hidden state
    h2 = None        # most recent layer-2 hidden state
    gx2 = None       # layer-2 input projection for its next step
    conv_acc = jnp.zeros((PAD_B, HID), jnp.float32)

    # ---- Wavefront schedule: wave w computes layer-1 step w (if w < T) and
    #      layer-2 step w-1 (if w >= 1).  The two halves of a wave are
    #      independent, so their recurrent matmuls interleave.
    #      (A further v5e-only option would pack both recurrent matmuls of a
    #      wave into one MXU push; skipped here — marginal on v6e/v7x.)
    for w in range(SEQ_LEN + 1):
        new_h1 = None
        new_gx2 = None
        if w < SEQ_LEN:
            gx1 = gx1_scr[w * PAD_B:(w + 1) * PAD_B, :]
            new_h1 = _gru_step(h1, gx1, w_hh1_rz_ref, w_hh1_n_ref, b_n1)
            # Layer-2 input projection for step w — off the critical path.
            new_gx2 = (jnp.dot(new_h1, w_ih2_ref[...],
                               preferred_element_type=jnp.float32)
                       + b_gx2_ref[...])
        if w >= 1:
            t2 = w - 1
            h2 = _gru_step(h2, gx2, w_hh2_rz_ref, w_hh2_n_ref, b_n2)
            # Conv1d(kernel_size == seq_len) folded into the recurrence: the
            # per-step (8,128)@(128,128) accumulate hides under idle MXU slots.
            conv_acc = conv_acc + jnp.dot(
                h2, conv_w_ref[t2 * HID:(t2 + 1) * HID, :],
                preferred_element_type=jnp.float32)
        h1 = new_h1
        gx2 = new_gx2

    # ---- Tail: only the BATCH real rows (padded rows carry finite garbage).
    conv_out = conv_acc[0:BATCH, :] + conv_b_ref[...]

    # BatchNorm1d (training mode: batch statistics, biased variance) over the
    # 2 real rows only.
    mean = jnp.mean(conv_out, axis=0, keepdims=True)
    var = jnp.mean((conv_out - mean) ** 2, axis=0, keepdims=True)
    xhat = (conv_out - mean) * lax.rsqrt(var + BN_EPS)
    bn = xhat * gamma_ref[...] + beta_ref[...]

    # Linear + Tanh.
    y = (jnp.dot(bn, lin_w_ref[...], preferred_element_type=jnp.float32)
         + lin_b_ref[...])
    out_ref[...] = jnp.tanh(y)


def gru_model_b1(x, params):
    """x: (B, T, 256) float32 (PyTorch batch_first layout)."""
    # batch_first -> time-major, rows padded 2 -> 8 so every per-step row
    # slice inside the kernel is a full aligned (8, *) sublane tile.
    x_tm = jnp.transpose(x, (1, 0, 2)).astype(jnp.float32)        # (T, B, 256)
    x_pad = jnp.pad(x_tm, ((0, 0), (0, PAD_B - BATCH), (0, 0)))    # (T, 8, 256)
    x_pad = x_pad.reshape(SEQ_LEN * PAD_B, IN_DIM)

    inputs = (
        x_pad,
        params["w_ih1_t"], params["w_hh1_rz_t"], params["w_hh1_n_t"],
        params["b_gx1"], params["b_hhn1"],
        params["w_ih2_t"], params["w_hh2_rz_t"], params["w_hh2_n_t"],
        params["b_gx2"], params["b_hhn2"],
        params["conv_w_flat"], params["conv_b"],
        params["gamma"], params["beta"],
        params["lin_w_t"], params["lin_b"],
    )
    vmem = pl.BlockSpec(memory_space=pltpu.MemorySpace.VMEM)
    return pl.pallas_call(
        model_kernel,
        out_shape=jax.ShapeDtypeStruct((BATCH, OUT_DIM), jnp.float32),
        in_specs=[vmem] * len(inputs),
        out_specs=vmem,
        scratch_shapes=[pltpu.VMEM((SEQ_LEN * PAD_B, 3 * HID), jnp.float32)],
    )(*inputs)


def init_params(key):
    """Deterministic synthetic parameters matching the PyTorch module shapes,
    pre-transposed / pre-split / pre-folded for the kernel."""
    ks = jax.random.split(key, 12)
    scale = 1.0 / jnp.sqrt(HID)

    def u(k, shape):
        return jax.random.uniform(k, shape, jnp.float32, -scale, scale)

    # GRU layer 1: weight_ih_l0 (384, 256), weight_hh_l0 (384, 128), biases (384,)
    w_ih1 = u(ks[0], (3 * HID, IN_DIM))
    w_hh1 = u(ks[1], (3 * HID, HID))
    b_ih1 = u(ks[2], (3 * HID,))
    b_hh1 = u(ks[3], (3 * HID,))
    # GRU layer 2: weight_ih_l1 (384, 128), weight_hh_l1 (384, 128)
    w_ih2 = u(ks[4], (3 * HID, HID))
    w_hh2 = u(ks[5], (3 * HID, HID))
    b_ih2 = u(ks[6], (3 * HID,))
    b_hh2 = u(ks[7], (3 * HID,))
    # Conv1d: weight (128, 128, seq_len), bias (128,)
    conv_w = u(ks[8], (HID, HID, SEQ_LEN))
    conv_b = u(ks[9], (HID,))
    # BatchNorm1d: gamma=1, beta=0 (default init)
    gamma = jnp.ones((HID,), jnp.float32)
    beta = jnp.zeros((HID,), jnp.float32)
    # Linear: weight (2, 128), bias (2,)
    lin_w = u(ks[10], (OUT_DIM, HID))
    lin_b = u(ks[11], (OUT_DIM,))

    def fold_bias(b_ih, b_hh):
        # r/z gates: b_ih + b_hh summed up-front (goes into gx).
        # n gate: b_ih_n goes into gx; b_hh_n must stay inside r*(...).
        b_gx = jnp.concatenate(
            [b_ih[:2 * HID] + b_hh[:2 * HID], b_ih[2 * HID:]])
        return b_gx.reshape(1, 3 * HID), b_hh[2 * HID:].reshape(1, HID)

    b_gx1, b_hhn1 = fold_bias(b_ih1, b_hh1)
    b_gx2, b_hhn2 = fold_bias(b_ih2, b_hh2)

    return {
        "w_ih1_t": w_ih1.T,
        "w_hh1_rz_t": w_hh1[:2 * HID, :].T,   # (128, 256)
        "w_hh1_n_t": w_hh1[2 * HID:, :].T,    # (128, 128)
        "b_gx1": b_gx1, "b_hhn1": b_hhn1,
        "w_ih2_t": w_ih2.T,
        "w_hh2_rz_t": w_hh2[:2 * HID, :].T,
        "w_hh2_n_t": w_hh2[2 * HID:, :].T,
        "b_gx2": b_gx2, "b_hhn2": b_hhn2,
        # conv_w_flat[t*HID + c_in, c_out] = W[c_out, c_in, t]
        "conv_w_flat": jnp.transpose(conv_w, (2, 1, 0)).reshape(SEQ_LEN * HID, HID),
        "conv_b": conv_b.reshape(1, -1),
        "gamma": gamma.reshape(1, -1), "beta": beta.reshape(1, -1),
        "lin_w_t": lin_w.T, "lin_b": lin_b.reshape(1, -1),
    }


if __name__ == "__main__":
    key = jax.random.PRNGKey(0)
    k_x, k_p = jax.random.split(key)
    x = jax.random.normal(k_x, (BATCH, SEQ_LEN, IN_DIM), jnp.float32)
    params = init_params(k_p)

    out = gru_model_b1(x, params)
    out = jax.block_until_ready(out)
    assert out.shape == (BATCH, OUT_DIM)
    print("KERNEL_OK")
</pallas_src>

<mosaic_0001>
module attributes {stable_mosaic.version = 11 : i64} {
  func.func @model_kernel(%arg0: memref<64x256xf32, #tpu.memory_space<vmem>>, %arg1: memref<256x384xf32, #tpu.memory_space<vmem>>, %arg2: memref<128x256xf32, #tpu.memory_space<vmem>>, %arg3: memref<128x128xf32, #tpu.memory_space<vmem>>, %arg4: memref<1x384xf32, #tpu.memory_space<vmem>>, %arg5: memref<1x128xf32, #tpu.memory_space<vmem>>, %arg6: memref<128x384xf32, #tpu.memory_space<vmem>>, %arg7: memref<128x256xf32, #tpu.memory_space<vmem>>, %arg8: memref<128x128xf32, #tpu.memory_space<vmem>>, %arg9: memref<1x384xf32, #tpu.memory_space<vmem>>, %arg10: memref<1x128xf32, #tpu.memory_space<vmem>>, %arg11: memref<1024x128xf32, #tpu.memory_space<vmem>>, %arg12: memref<1x128xf32, #tpu.memory_space<vmem>>, %arg13: memref<1x128xf32, #tpu.memory_space<vmem>>, %arg14: memref<1x128xf32, #tpu.memory_space<vmem>>, %arg15: memref<128x2xf32, #tpu.memory_space<vmem>>, %arg16: memref<1x2xf32, #tpu.memory_space<vmem>>, %arg17: memref<2x2xf32, #tpu.memory_space<vmem>>, %arg18: memref<64x384xf32, #tpu.memory_space<vmem>>) attributes {dimension_semantics = [], scalar_prefetch = 0 : i64, scratch_operands = 1 : i64, tpu.core_type = #tpu.core_type<tc>} {
    %c0 = arith.constant 0 : index
    %c0_0 = arith.constant 0 : index
    %0 = vector.load %arg0[%c0, %c0_0] : memref<64x256xf32, #tpu.memory_space<vmem>>, vector<64x256xf32>
    %c0_1 = arith.constant 0 : index
    %c0_2 = arith.constant 0 : index
    %1 = vector.load %arg1[%c0_1, %c0_2] : memref<256x384xf32, #tpu.memory_space<vmem>>, vector<256x384xf32>
    %cst = arith.constant dense<0.000000e+00> : vector<64x384xf32>
    %2 = tpu.matmul %0, %1, %cst {dimension_numbers = #tpu.dot_dimension_numbers<[1], [0], [0], [1], [0, 0, 1, 1], [], []>} : vector<64x256xf32>, vector<256x384xf32>, vector<64x384xf32> -> vector<64x384xf32>
    %c0_3 = arith.constant 0 : index
    %c0_4 = arith.constant 0 : index
    %3 = vector.load %arg4[%c0_3, %c0_4] : memref<1x384xf32, #tpu.memory_space<vmem>>, vector<1x384xf32>
    %4 = vector.broadcast %3 : vector<1x384xf32> to vector<64x384xf32>
    %5 = arith.addf %2, %4 : vector<64x384xf32>
    %c0_5 = arith.constant 0 : index
    %c0_6 = arith.constant 0 : index
    %6 = vector.load %arg18[%c0_5, %c0_6] : memref<64x384xf32, #tpu.memory_space<vmem>>, vector<64x384xf32>
    tpu.vector_store %arg18[%c0_5, %c0_6], %5 {strides = array<i32>} : memref<64x384xf32, #tpu.memory_space<vmem>>, vector<64x384xf32>,
    %c0_7 = arith.constant 0 : index
    %c0_8 = arith.constant 0 : index
    %7 = vector.load %arg5[%c0_7, %c0_8] : memref<1x128xf32, #tpu.memory_space<vmem>>, vector<1x128xf32>
    %8 = vector.shape_cast %7 : vector<1x128xf32> to vector<1x128xf32>
    %9 = vector.broadcast %8 : vector<1x128xf32> to vector<8x128xf32>
    %c0_9 = arith.constant 0 : index
    %c0_10 = arith.constant 0 : index
    %10 = vector.load %arg10[%c0_9, %c0_10] : memref<1x128xf32, #tpu.memory_space<vmem>>, vector<1x128xf32>
    %11 = vector.shape_cast %10 : vector<1x128xf32> to vector<1x128xf32>
    %12 = vector.broadcast %11 : vector<1x128xf32> to vector<8x128xf32>
    %cst_11 = arith.constant 0.000000e+00 : f32
    %13 = vector.broadcast %cst_11 : f32 to vector<8x128xf32>
    %c0_12 = arith.constant 0 : index
    %c0_13 = arith.constant 0 : index
    %14 = vector.load %arg18[%c0_12, %c0_13] : memref<64x384xf32, #tpu.memory_space<vmem>>, vector<8x384xf32>
    %15 = vector.extract_strided_slice %14 {offsets = [0, 0], sizes = [8, 128], strides = [1, 1]} : vector<8x384xf32> to vector<8x128xf32>
    %16 = arith.negf %15 : vector<8x128xf32>
    %17 = math.exp %16 : vector<8x128xf32>
    %cst_14 = arith.constant 1.000000e+00 : f32
    %18 = vector.broadcast %cst_14 : f32 to vector<8x128xf32>
    %19 = arith.addf %18, %17 : vector<8x128xf32>
    %20 = arith.divf %18, %19 : vector<8x128xf32>
    %21 = vector.extract_strided_slice %14 {offsets = [0, 128], sizes = [8, 128], strides = [1, 1]} : vector<8x384xf32> to vector<8x128xf32>
    %22 = arith.negf %21 : vector<8x128xf32>
    %23 = math.exp %22 : vector<8x128xf32>
    %cst_15 = arith.constant 1.000000e+00 : f32
    %24 = vector.broadcast %cst_15 : f32 to vector<8x128xf32>
    %25 = arith.addf %24, %23 : vector<8x128xf32>
    %26 = arith.divf %24, %25 : vector<8x128xf32>
    %27 = vector.extract_strided_slice %14 {offsets = [0, 256], sizes = [8, 128], strides = [1, 1]} : vector<8x384xf32> to vector<8x128xf32>
    %28 = arith.mulf %20, %9 : vector<8x128xf32>
    %29 = arith.addf %27, %28 : vector<8x128xf32>
    %30 = math.tanh %29 : vector<8x128xf32>
    %cst_16 = arith.constant 1.000000e+00 : f32
    %31 = vector.broadcast %cst_16 : f32 to vector<8x128xf32>
    %32 = arith.subf %31, %26 : vector<8x128xf32>
    %33 = arith.mulf %32, %30 : vector<8x128xf32>
    %c0_17 = arith.constant 0 : index
    %c0_18 = arith.constant 0 : index
    %34 = vector.load %arg6[%c0_17, %c0_18] : memref<128x384xf32, #tpu.memory_space<vmem>>, vector<128x384xf32>
    %cst_19 = arith.constant dense<0.000000e+00> : vector<8x384xf32>
    %35 = tpu.matmul %33, %34, %cst_19 {dimension_numbers = #tpu.dot_dimension_numbers<[1], [0], [0], [1], [0, 0, 1, 1], [], []>} : vector<8x128xf32>, vector<128x384xf32>, vector<8x384xf32> -> vector<8x384xf32>
    %c0_20 = arith.constant 0 : index
    %c0_21 = arith.constant 0 : index
    %36 = vector.load %arg9[%c0_20, %c0_21] : memref<1x384xf32, #tpu.memory_space<vmem>>, vector<1x384xf32>
    %37 = vector.broadcast %36 : vector<1x384xf32> to vector<8x384xf32>
    %38 = arith.addf %35, %37 : vector<8x384xf32>
    %c8 = arith.constant 8 : index
    %c0_22 = arith.constant 0 : index
    %39 = vector.load %arg18[%c8, %c0_22] : memref<64x384xf32, #tpu.memory_space<vmem>>, vector<8x384xf32>
    %c0_23 = arith.constant 0 : index
    %c0_24 = arith.constant 0 : index
    %40 = vector.load %arg2[%c0_23, %c0_24] : memref<128x256xf32, #tpu.memory_space<vmem>>, vector<128x256xf32>
    %cst_25 = arith.constant dense<0.000000e+00> : vector<8x256xf32>
    %41 = tpu.matmul %33, %40, %cst_25 {dimension_numbers = #tpu.dot_dimension_numbers<[1], [0], [0], [1], [0, 0, 1, 1], [], []>} : vector<8x128xf32>, vector<128x256xf32>, vector<8x256xf32> -> vector<8x256xf32>
    %c0_26 = arith.constant 0 : index
    %c0_27 = arith.constant 0 : index
    %42 = vector.load %arg3[%c0_26, %c0_27] : memref<128x128xf32, #tpu.memory_space<vmem>>, vector<128x128xf32>
    %cst_28 = arith.constant dense<0.000000e+00> : vector<8x128xf32>
    %43 = tpu.matmul %33, %42, %cst_28 {dimension_numbers = #tpu.dot_dimension_numbers<[1], [0], [0], [1], [0, 0, 1, 1], [], []>} : vector<8x128xf32>, vector<128x128xf32>, vector<8x128xf32> -> vector<8x128xf32>
    %44 = vector.extract_strided_slice %39 {offsets = [0, 0], sizes = [8, 128], strides = [1, 1]} : vector<8x384xf32> to vector<8x128xf32>
    %45 = vector.extract_strided_slice %41 {offsets = [0, 0], sizes = [8, 128], strides = [1, 1]} : vector<8x256xf32> to vector<8x128xf32>
    %46 = arith.addf %44, %45 : vector<8x128xf32>
    %47 = arith.negf %46 : vector<8x128xf32>
    %48 = math.exp %47 : vector<8x128xf32>
    %cst_29 = arith.constant 1.000000e+00 : f32
    %49 = vector.broadcast %cst_29 : f32 to vector<8x128xf32>
    %50 = arith.addf %49, %48 : vector<8x128xf32>
    %51 = arith.divf %49, %50 : vector<8x128xf32>
    %52 = vector.extract_strided_slice %39 {offsets = [0, 128], sizes = [8, 128], strides = [1, 1]} : vector<8x384xf32> to vector<8x128xf32>
    %53 = vector.extract_strided_slice %41 {offsets = [0, 128], sizes = [8, 128], strides = [1, 1]} : vector<8x256xf32> to vector<8x128xf32>
    %54 = arith.addf %52, %53 : vector<8x128xf32>
    %55 = arith.negf %54 : vector<8x128xf32>
    %56 = math.exp %55 : vector<8x128xf32>
    %cst_30 = arith.constant 1.000000e+00 : f32
    %57 = vector.broadcast %cst_30 : f32 to vector<8x128xf32>
    %58 = arith.addf %57, %56 : vector<8x128xf32>
    %59 = arith.divf %57, %58 : vector<8x128xf32>
    %60 = vector.extract_strided_slice %39 {offsets = [0, 256], sizes = [8, 128], strides = [1, 1]} : vector<8x384xf32> to vector<8x128xf32>
    %61 = arith.addf %43, %9 : vector<8x128xf32>
    %62 = arith.mulf %51, %61 : vector<8x128xf32>
    %63 = arith.addf %60, %62 : vector<8x128xf32>
    %64 = math.tanh %63 : vector<8x128xf32>
    %cst_31 = arith.constant 1.000000e+00 : f32
    %65 = vector.broadcast %cst_31 : f32 to vector<8x128xf32>
    %66 = arith.subf %65, %59 : vector<8x128xf32>
    %67 = arith.mulf %66, %64 : vector<8x128xf32>
    %68 = arith.mulf %59, %33 : vector<8x128xf32>
    %69 = arith.addf %67, %68 : vector<8x128xf32>
    %c0_32 = arith.constant 0 : index
    %c0_33 = arith.constant 0 : index
    %70 = vector.load %arg6[%c0_32, %c0_33] : memref<128x384xf32, #tpu.memory_space<vmem>>, vector<128x384xf32>
    %cst_34 = arith.constant dense<0.000000e+00> : vector<8x384xf32>
    %71 = tpu.matmul %69, %70, %cst_34 {dimension_numbers = #tpu.dot_dimension_numbers<[1], [0], [0], [1], [0, 0, 1, 1], [], []>} : vector<8x128xf32>, vector<128x384xf32>, vector<8x384xf32> -> vector<8x384xf32>
    %c0_35 = arith.constant 0 : index
    %c0_36 = arith.constant 0 : index
    %72 = vector.load %arg9[%c0_35, %c0_36] : memref<1x384xf32, #tpu.memory_space<vmem>>, vector<1x384xf32>
    %73 = vector.broadcast %72 : vector<1x384xf32> to vector<8x384xf32>
    %74 = arith.addf %71, %73 : vector<8x384xf32>
    %75 = vector.extract_strided_slice %38 {offsets = [0, 0], sizes = [8, 128], strides = [1, 1]} : vector<8x384xf32> to vector<8x128xf32>
    %76 = arith.negf %75 : vector<8x128xf32>
    %77 = math.exp %76 : vector<8x128xf32>
    %cst_37 = arith.constant 1.000000e+00 : f32
    %78 = vector.broadcast %cst_37 : f32 to vector<8x128xf32>
    %79 = arith.addf %78, %77 : vector<8x128xf32>
    %80 = arith.divf %78, %79 : vector<8x128xf32>
    %81 = vector.extract_strided_slice %38 {offsets = [0, 128], sizes = [8, 128], strides = [1, 1]} : vector<8x384xf32> to vector<8x128xf32>
    %82 = arith.negf %81 : vector<8x128xf32>
    %83 = math.exp %82 : vector<8x128xf32>
    %cst_38 = arith.constant 1.000000e+00 : f32
    %84 = vector.broadcast %cst_38 : f32 to vector<8x128xf32>
    %85 = arith.addf %84, %83 : vector<8x128xf32>
    %86 = arith.divf %84, %85 : vector<8x128xf32>
    %87 = vector.extract_strided_slice %38 {offsets = [0, 256], sizes = [8, 128], strides = [1, 1]} : vector<8x384xf32> to vector<8x128xf32>
    %88 = arith.mulf %80, %12 : vector<8x128xf32>
    %89 = arith.addf %87, %88 : vector<8x128xf32>
    %90 = math.tanh %89 : vector<8x128xf32>
    %cst_39 = arith.constant 1.000000e+00 : f32
    %91 = vector.broadcast %cst_39 : f32 to vector<8x128xf32>
    %92 = arith.subf %91, %86 : vector<8x128xf32>
    %93 = arith.mulf %92, %90 : vector<8x128xf32>
    %c0_40 = arith.constant 0 : index
    %c0_41 = arith.constant 0 : index
    %94 = vector.load %arg11[%c0_40, %c0_41] : memref<1024x128xf32, #tpu.memory_space<vmem>>, vector<128x128xf32>
    %cst_42 = arith.constant dense<0.000000e+00> : vector<8x128xf32>
    %95 = tpu.matmul %93, %94, %cst_42 {dimension_numbers = #tpu.dot_dimension_numbers<[1], [0], [0], [1], [0, 0, 1, 1], [], []>} : vector<8x128xf32>, vector<128x128xf32>, vector<8x128xf32> -> vector<8x128xf32>
    %96 = arith.addf %13, %95 : vector<8x128xf32>
    %c16 = arith.constant 16 : index
    %c0_43 = arith.constant 0 : index
    %97 = vector.load %arg18[%c16, %c0_43] : memref<64x384xf32, #tpu.memory_space<vmem>>, vector<8x384xf32>
    %c0_44 = arith.constant 0 : index
    %c0_45 = arith.constant 0 : index
    %98 = vector.load %arg2[%c0_44, %c0_45] : memref<128x256xf32, #tpu.memory_space<vmem>>, vector<128x256xf32>
    %cst_46 = arith.constant dense<0.000000e+00> : vector<8x256xf32>
    %99 = tpu.matmul %69, %98, %cst_46 {dimension_numbers = #tpu.dot_dimension_numbers<[1], [0], [0], [1], [0, 0, 1, 1], [], []>} : vector<8x128xf32>, vector<128x256xf32>, vector<8x256xf32> -> vector<8x256xf32>
    %c0_47 = arith.constant 0 : index
    %c0_48 = arith.constant 0 : index
    %100 = vector.load %arg3[%c0_47, %c0_48] : memref<128x128xf32, #tpu.memory_space<vmem>>, vector<128x128xf32>
    %cst_49 = arith.constant dense<0.000000e+00> : vector<8x128xf32>
    %101 = tpu.matmul %69, %100, %cst_49 {dimension_numbers = #tpu.dot_dimension_numbers<[1], [0], [0], [1], [0, 0, 1, 1], [], []>} : vector<8x128xf32>, vector<128x128xf32>, vector<8x128xf32> -> vector<8x128xf32>
    %102 = vector.extract_strided_slice %97 {offsets = [0, 0], sizes = [8, 128], strides = [1, 1]} : vector<8x384xf32> to vector<8x128xf32>
    %103 = vector.extract_strided_slice %99 {offsets = [0, 0], sizes = [8, 128], strides = [1, 1]} : vector<8x256xf32> to vector<8x128xf32>
    %104 = arith.addf %102, %103 : vector<8x128xf32>
    %105 = arith.negf %104 : vector<8x128xf32>
    %106 = math.exp %105 : vector<8x128xf32>
    %cst_50 = arith.constant 1.000000e+00 : f32
    %107 = vector.broadcast %cst_50 : f32 to vector<8x128xf32>
    %108 = arith.addf %107, %106 : vector<8x128xf32>
    %109 = arith.divf %107, %108 : vector<8x128xf32>
    %110 = vector.extract_strided_slice %97 {offsets = [0, 128], sizes = [8, 128], strides = [1, 1]} : vector<8x384xf32> to vector<8x128xf32>
    %111 = vector.extract_strided_slice %99 {offsets = [0, 128], sizes = [8, 128], strides = [1, 1]} : vector<8x256xf32> to vector<8x128xf32>
    %112 = arith.addf %110, %111 : vector<8x128xf32>
    %113 = arith.negf %112 : vector<8x128xf32>
    %114 = math.exp %113 : vector<8x128xf32>
    %cst_51 = arith.constant 1.000000e+00 : f32
    %115 = vector.broadcast %cst_51 : f32 to vector<8x128xf32>
    %116 = arith.addf %115, %114 : vector<8x128xf32>
    %117 = arith.divf %115, %116 : vector<8x128xf32>
    %118 = vector.extract_strided_slice %97 {offsets = [0, 256], sizes = [8, 128], strides = [1, 1]} : vector<8x384xf32> to vector<8x128xf32>
    %119 = arith.addf %101, %9 : vector<8x128xf32>
    %120 = arith.mulf %109, %119 : vector<8x128xf32>
    %121 = arith.addf %118, %120 : vector<8x128xf32>
    %122 = math.tanh %121 : vector<8x128xf32>
    %cst_52 = arith.constant 1.000000e+00 : f32
    %123 = vector.broadcast %cst_52 : f32 to vector<8x128xf32>
    %124 = arith.subf %123, %117 : vector<8x128xf32>
    %125 = arith.mulf %124, %122 : vector<8x128xf32>
    %126 = arith.mulf %117, %69 : vector<8x128xf32>
    %127 = arith.addf %125, %126 : vector<8x128xf32>
    %c0_53 = arith.constant 0 : index
    %c0_54 = arith.constant 0 : index
    %128 = vector.load %arg6[%c0_53, %c0_54] : memref<128x384xf32, #tpu.memory_space<vmem>>, vector<128x384xf32>
    %cst_55 = arith.constant dense<0.000000e+00> : vector<8x384xf32>
    %129 = tpu.matmul %127, %128, %cst_55 {dimension_numbers = #tpu.dot_dimension_numbers<[1], [0], [0], [1], [0, 0, 1, 1], [], []>} : vector<8x128xf32>, vector<128x384xf32>, vector<8x384xf32> -> vector<8x384xf32>
    %c0_56 = arith.constant 0 : index
    %c0_57 = arith.constant 0 : index
    %130 = vector.load %arg9[%c0_56, %c0_57] : memref<1x384xf32, #tpu.memory_space<vmem>>, vector<1x384xf32>
    %131 = vector.broadcast %130 : vector<1x384xf32> to vector<8x384xf32>
    %132 = arith.addf %129, %131 : vector<8x384xf32>
    %c0_58 = arith.constant 0 : index
    %c0_59 = arith.constant 0 : index
    %133 = vector.load %arg7[%c0_58, %c0_59] : memref<128x256xf32, #tpu.memory_space<vmem>>, vector<128x256xf32>
    %cst_60 = arith.constant dense<0.000000e+00> : vector<8x256xf32>
    %134 = tpu.matmul %93, %133, %cst_60 {dimension_numbers = #tpu.dot_dimension_numbers<[1], [0], [0], [1], [0, 0, 1, 1], [], []>} : vector<8x128xf32>, vector<128x256xf32>, vector<8x256xf32> -> vector<8x256xf32>
    %c0_61 = arith.constant 0 : index
    %c0_62 = arith.constant 0 : index
    %135 = vector.load %arg8[%c0_61, %c0_62] : memref<128x128xf32, #tpu.memory_space<vmem>>, vector<128x128xf32>
    %cst_63 = arith.constant dense<0.000000e+00> : vector<8x128xf32>
    %136 = tpu.matmul %93, %135, %cst_63 {dimension_numbers = #tpu.dot_dimension_numbers<[1], [0], [0], [1], [0, 0, 1, 1], [], []>} : vector<8x128xf32>, vector<128x128xf32>, vector<8x128xf32> -> vector<8x128xf32>
    %137 = vector.extract_strided_slice %74 {offsets = [0, 0], sizes = [8, 128], strides = [1, 1]} : vector<8x384xf32> to vector<8x128xf32>
    %138 = vector.extract_strided_slice %134 {offsets = [0, 0], sizes = [8, 128], strides = [1, 1]} : vector<8x256xf32> to vector<8x128xf32>
    %139 = arith.addf %137, %138 : vector<8x128xf32>
    %140 = arith.negf %139 : vector<8x128xf32>
    %141 = math.exp %140 : vector<8x128xf32>
    %cst_64 = arith.constant 1.000000e+00 : f32
    %142 = vector.broadcast %cst_64 : f32 to vector<8x128xf32>
    %143 = arith.addf %142, %141 : vector<8x128xf32>
    %144 = arith.divf %142, %143 : vector<8x128xf32>
    %145 = vector.extract_strided_slice %74 {offsets = [0, 128], sizes = [8, 128], strides = [1, 1]} : vector<8x384xf32> to vector<8x128xf32>
    %146 = vector.extract_strided_slice %134 {offsets = [0, 128], sizes = [8, 128], strides = [1, 1]} : vector<8x256xf32> to vector<8x128xf32>
    %147 = arith.addf %145, %146 : vector<8x128xf32>
    %148 = arith.negf %147 : vector<8x128xf32>
    %149 = math.exp %148 : vector<8x128xf32>
    %cst_65 = arith.constant 1.000000e+00 : f32
    %150 = vector.broadcast %cst_65 : f32 to vector<8x128xf32>
    %151 = arith.addf %150, %149 : vector<8x128xf32>
    %152 = arith.divf %150, %151 : vector<8x128xf32>
    %153 = vector.extract_strided_slice %74 {offsets = [0, 256], sizes = [8, 128], strides = [1, 1]} : vector<8x384xf32> to vector<8x128xf32>
    %154 = arith.addf %136, %12 : vector<8x128xf32>
    %155 = arith.mulf %144, %154 : vector<8x128xf32>
    %156 = arith.addf %153, %155 : vector<8x128xf32>
    %157 = math.tanh %156 : vector<8x128xf32>
    %cst_66 = arith.constant 1.000000e+00 : f32
    %158 = vector.broadcast %cst_66 : f32 to vector<8x128xf32>
    %159 = arith.subf %158, %152 : vector<8x128xf32>
    %160 = arith.mulf %159, %157 : vector<8x128xf32>
    %161 = arith.mulf %152, %93 : vector<8x128xf32>
    %162 = arith.addf %160, %161 : vector<8x128xf32>
    %c128 = arith.constant 128 : index
    %c0_67 = arith.constant 0 : index
    %163 = vector.load %arg11[%c128, %c0_67] : memref<1024x128xf32, #tpu.memory_space<vmem>>, vector<128x128xf32>
    %cst_68 = arith.constant dense<0.000000e+00> : vector<8x128xf32>
    %164 = tpu.matmul %162, %163, %cst_68 {dimension_numbers = #tpu.dot_dimension_numbers<[1], [0], [0], [1], [0, 0, 1, 1], [], []>} : vector<8x128xf32>, vector<128x128xf32>, vector<8x128xf32> -> vector<8x128xf32>
    %165 = arith.addf %96, %164 : vector<8x128xf32>
    %c24 = arith.constant 24 : index
    %c0_69 = arith.constant 0 : index
    %166 = vector.load %arg18[%c24, %c0_69] : memref<64x384xf32, #tpu.memory_space<vmem>>, vector<8x384xf32>
    %c0_70 = arith.constant 0 : index
    %c0_71 = arith.constant 0 : index
    %167 = vector.load %arg2[%c0_70, %c0_71] : memref<128x256xf32, #tpu.memory_space<vmem>>, vector<128x256xf32>
    %cst_72 = arith.constant dense<0.000000e+00> : vector<8x256xf32>
    %168 = tpu.matmul %127, %167, %cst_72 {dimension_numbers = #tpu.dot_dimension_numbers<[1], [0], [0], [1], [0, 0, 1, 1], [], []>} : vector<8x128xf32>, vector<128x256xf32>, vector<8x256xf32> -> vector<8x256xf32>
    %c0_73 = arith.constant 0 : index
    %c0_74 = arith.constant 0 : index
    %169 = vector.load %arg3[%c0_73, %c0_74] : memref<128x128xf32, #tpu.memory_space<vmem>>, vector<128x128xf32>
    %cst_75 = arith.constant dense<0.000000e+00> : vector<8x128xf32>
    %170 = tpu.matmul %127, %169, %cst_75 {dimension_numbers = #tpu.dot_dimension_numbers<[1], [0], [0], [1], [0, 0, 1, 1], [], []>} : vector<8x128xf32>, vector<128x128xf32>, vector<8x128xf32> -> vector<8x128xf32>
    %171 = vector.extract_strided_slice %166 {offsets = [0, 0], sizes = [8, 128], strides = [1, 1]} : vector<8x384xf32> to vector<8x128xf32>
    %172 = vector.extract_strided_slice %168 {offsets = [0, 0], sizes = [8, 128], strides = [1, 1]} : vector<8x256xf32> to vector<8x128xf32>
    %173 = arith.addf %171, %172 : vector<8x128xf32>
    %174 = arith.negf %173 : vector<8x128xf32>
    %175 = math.exp %174 : vector<8x128xf32>
    %cst_76 = arith.constant 1.000000e+00 : f32
    %176 = vector.broadcast %cst_76 : f32 to vector<8x128xf32>
    %177 = arith.addf %176, %175 : vector<8x128xf32>
    %178 = arith.divf %176, %177 : vector<8x128xf32>
    %179 = vector.extract_strided_slice %166 {offsets = [0, 128], sizes = [8, 128], strides = [1, 1]} : vector<8x384xf32> to vector<8x128xf32>
    %180 = vector.extract_strided_slice %168 {offsets = [0, 128], sizes = [8, 128], strides = [1, 1]} : vector<8x256xf32> to vector<8x128xf32>
    %181 = arith.addf %179, %180 : vector<8x128xf32>
    %182 = arith.negf %181 : vector<8x128xf32>
    %183 = math.exp %182 : vector<8x128xf32>
    %cst_77 = arith.constant 1.000000e+00 : f32
    %184 = vector.broadcast %cst_77 : f32 to vector<8x128xf32>
    %185 = arith.addf %184, %183 : vector<8x128xf32>
    %186 = arith.divf %184, %185 : vector<8x128xf32>
    %187 = vector.extract_strided_slice %166 {offsets = [0, 256], sizes = [8, 128], strides = [1, 1]} : vector<8x384xf32> to vector<8x128xf32>
    %188 = arith.addf %170, %9 : vector<8x128xf32>
    %189 = arith.mulf %178, %188 : vector<8x128xf32>
    %190 = arith.addf %187, %189 : vector<8x128xf32>
    %191 = math.tanh %190 : vector<8x128xf32>
    %cst_78 = arith.constant 1.000000e+00 : f32
    %192 = vector.broadcast %cst_78 : f32 to vector<8x128xf32>
    %193 = arith.subf %192, %186 : vector<8x128xf32>
    %194 = arith.mulf %193, %191 : vector<8x128xf32>
    %195 = arith.mulf %186, %127 : vector<8x128xf32>
    %196 = arith.addf %194, %195 : vector<8x128xf32>
    %c0_79 = arith.constant 0 : index
    %c0_80 = arith.constant 0 : index
    %197 = vector.load %arg6[%c0_79, %c0_80] : memref<128x384xf32, #tpu.memory_space<vmem>>, vector<128x384xf32>
    %cst_81 = arith.constant dense<0.000000e+00> : vector<8x384xf32>
    %198 = tpu.matmul %196, %197, %cst_81 {dimension_numbers = #tpu.dot_dimension_numbers<[1], [0], [0], [1], [0, 0, 1, 1], [], []>} : vector<8x128xf32>, vector<128x384xf32>, vector<8x384xf32> -> vector<8x384xf32>
    %c0_82 = arith.constant 0 : index
    %c0_83 = arith.constant 0 : index
    %199 = vector.load %arg9[%c0_82, %c0_83] : memref<1x384xf32, #tpu.memory_space<vmem>>, vector<1x384xf32>
    %200 = vector.broadcast %199 : vector<1x384xf32> to vector<8x384xf32>
    %201 = arith.addf %198, %200 : vector<8x384xf32>
    %c0_84 = arith.constant 0 : index
    %c0_85 = arith.constant 0 : index
    %202 = vector.load %arg7[%c0_84, %c0_85] : memref<128x256xf32, #tpu.memory_space<vmem>>, vector<128x256xf32>
    %cst_86 = arith.constant dense<0.000000e+00> : vector<8x256xf32>
    %203 = tpu.matmul %162, %202, %cst_86 {dimension_numbers = #tpu.dot_dimension_numbers<[1], [0], [0], [1], [0, 0, 1, 1], [], []>} : vector<8x128xf32>, vector<128x256xf32>, vector<8x256xf32> -> vector<8x256xf32>
    %c0_87 = arith.constant 0 : index
    %c0_88 = arith.constant 0 : index
    %204 = vector.load %arg8[%c0_87, %c0_88] : memref<128x128xf32, #tpu.memory_space<vmem>>, vector<128x128xf32>
    %cst_89 = arith.constant dense<0.000000e+00> : vector<8x128xf32>
    %205 = tpu.matmul %162, %204, %cst_89 {dimension_numbers = #tpu.dot_dimension_numbers<[1], [0], [0], [1], [0, 0, 1, 1], [], []>} : vector<8x128xf32>, vector<128x128xf32>, vector<8x128xf32> -> vector<8x128xf32>
    %206 = vector.extract_strided_slice %132 {offsets = [0, 0], sizes = [8, 128], strides = [1, 1]} : vector<8x384xf32> to vector<8x128xf32>
    %207 = vector.extract_strided_slice %203 {offsets = [0, 0], sizes = [8, 128], strides = [1, 1]} : vector<8x256xf32> to vector<8x128xf32>
    %208 = arith.addf %206, %207 : vector<8x128xf32>
    %209 = arith.negf %208 : vector<8x128xf32>
    %210 = math.exp %209 : vector<8x128xf32>
    %cst_90 = arith.constant 1.000000e+00 : f32
    %211 = vector.broadcast %cst_90 : f32 to vector<8x128xf32>
    %212 = arith.addf %211, %210 : vector<8x128xf32>
    %213 = arith.divf %211, %212 : vector<8x128xf32>
    %214 = vector.extract_strided_slice %132 {offsets = [0, 128], sizes = [8, 128], strides = [1, 1]} : vector<8x384xf32> to vector<8x128xf32>
    %215 = vector.extract_strided_slice %203 {offsets = [0, 128], sizes = [8, 128], strides = [1, 1]} : vector<8x256xf32> to vector<8x128xf32>
    %216 = arith.addf %214, %215 : vector<8x128xf32>
    %217 = arith.negf %216 : vector<8x128xf32>
    %218 = math.exp %217 : vector<8x128xf32>
    %cst_91 = arith.constant 1.000000e+00 : f32
    %219 = vector.broadcast %cst_91 : f32 to vector<8x128xf32>
    %220 = arith.addf %219, %218 : vector<8x128xf32>
    %221 = arith.divf %219, %220 : vector<8x128xf32>
    %222 = vector.extract_strided_slice %132 {offsets = [0, 256], sizes = [8, 128], strides = [1, 1]} : vector<8x384xf32> to vector<8x128xf32>
    %223 = arith.addf %205, %12 : vector<8x128xf32>
    %224 = arith.mulf %213, %223 : vector<8x128xf32>
    %225 = arith.addf %222, %224 : vector<8x128xf32>
    %226 = math.tanh %225 : vector<8x128xf32>
    %cst_92 = arith.constant 1.000000e+00 : f32
    %227 = vector.broadcast %cst_92 : f32 to vector<8x128xf32>
    %228 = arith.subf %227, %221 : vector<8x128xf32>
    %229 = arith.mulf %228, %226 : vector<8x128xf32>
    %230 = arith.mulf %221, %162 : vector<8x128xf32>
    %231 = arith.addf %229, %230 : vector<8x128xf32>
    %c256 = arith.constant 256 : index
    %c0_93 = arith.constant 0 : index
    %232 = vector.load %arg11[%c256, %c0_93] : memref<1024x128xf32, #tpu.memory_space<vmem>>, vector<128x128xf32>
    %cst_94 = arith.constant dense<0.000000e+00> : vector<8x128xf32>
    %233 = tpu.matmul %231, %232, %cst_94 {dimension_numbers = #tpu.dot_dimension_numbers<[1], [0], [0], [1], [0, 0, 1, 1], [], []>} : vector<8x128xf32>, vector<128x128xf32>, vector<8x128xf32> -> vector<8x128xf32>
    %234 = arith.addf %165, %233 : vector<8x128xf32>
    %c32 = arith.constant 32 : index
    %c0_95 = arith.constant 0 : index
    %235 = vector.load %arg18[%c32, %c0_95] : memref<64x384xf32, #tpu.memory_space<vmem>>, vector<8x384xf32>
    %c0_96 = arith.constant 0 : index
    %c0_97 = arith.constant 0 : index
    %236 = vector.load %arg2[%c0_96, %c0_97] : memref<128x256xf32, #tpu.memory_space<vmem>>, vector<128x256xf32>
    %cst_98 = arith.constant dense<0.000000e+00> : vector<8x256xf32>
    %237 = tpu.matmul %196, %236, %cst_98 {dimension_numbers = #tpu.dot_dimension_numbers<[1], [0], [0], [1], [0, 0, 1, 1], [], []>} : vector<8x128xf32>, vector<128x256xf32>, vector<8x256xf32> -> vector<8x256xf32>
    %c0_99 = arith.constant 0 : index
    %c0_100 = arith.constant 0 : index
    %238 = vector.load %arg3[%c0_99, %c0_100] : memref<128x128xf32, #tpu.memory_space<vmem>>, vector<128x128xf32>
    %cst_101 = arith.constant dense<0.000000e+00> : vector<8x128xf32>
    %239 = tpu.matmul %196, %238, %cst_101 {dimension_numbers = #tpu.dot_dimension_numbers<[1], [0], [0], [1], [0, 0, 1, 1], [], []>} : vector<8x128xf32>, vector<128x128xf32>, vector<8x128xf32> -> vector<8x128xf32>
    %240 = vector.extract_strided_slice %235 {offsets = [0, 0], sizes = [8, 128], strides = [1, 1]} : vector<8x384xf32> to vector<8x128xf32>
    %241 = vector.extract_strided_slice %237 {offsets = [0, 0], sizes = [8, 128], strides = [1, 1]} : vector<8x256xf32> to vector<8x128xf32>
    %242 = arith.addf %240, %241 : vector<8x128xf32>
    %243 = arith.negf %242 : vector<8x128xf32>
    %244 = math.exp %243 : vector<8x128xf32>
    %cst_102 = arith.constant 1.000000e+00 : f32
    %245 = vector.broadcast %cst_102 : f32 to vector<8x128xf32>
    %246 = arith.addf %245, %244 : vector<8x128xf32>
    %247 = arith.divf %245, %246 : vector<8x128xf32>
    %248 = vector.extract_strided_slice %235 {offsets = [0, 128], sizes = [8, 128], strides = [1, 1]} : vector<8x384xf32> to vector<8x128xf32>
    %249 = vector.extract_strided_slice %237 {offsets = [0, 128], sizes = [8, 128], strides = [1, 1]} : vector<8x256xf32> to vector<8x128xf32>
    %250 = arith.addf %248, %249 : vector<8x128xf32>
    %251 = arith.negf %250 : vector<8x128xf32>
    %252 = math.exp %251 : vector<8x128xf32>
    %cst_103 = arith.constant 1.000000e+00 : f32
    %253 = vector.broadcast %cst_103 : f32 to vector<8x128xf32>
    %254 = arith.addf %253, %252 : vector<8x128xf32>
    %255 = arith.divf %253, %254 : vector<8x128xf32>
    %256 = vector.extract_strided_slice %235 {offsets = [0, 256], sizes = [8, 128], strides = [1, 1]} : vector<8x384xf32> to vector<8x128xf32>
    %257 = arith.addf %239, %9 : vector<8x128xf32>
    %258 = arith.mulf %247, %257 : vector<8x128xf32>
    %259 = arith.addf %256, %258 : vector<8x128xf32>
    %260 = math.tanh %259 : vector<8x128xf32>
    %cst_104 = arith.constant 1.000000e+00 : f32
    %261 = vector.broadcast %cst_104 : f32 to vector<8x128xf32>
    %262 = arith.subf %261, %255 : vector<8x128xf32>
    %263 = arith.mulf %262, %260 : vector<8x128xf32>
    %264 = arith.mulf %255, %196 : vector<8x128xf32>
    %265 = arith.addf %263, %264 : vector<8x128xf32>
    %c0_105 = arith.constant 0 : index
    %c0_106 = arith.constant 0 : index
    %266 = vector.load %arg6[%c0_105, %c0_106] : memref<128x384xf32, #tpu.memory_space<vmem>>, vector<128x384xf32>
    %cst_107 = arith.constant dense<0.000000e+00> : vector<8x384xf32>
    %267 = tpu.matmul %265, %266, %cst_107 {dimension_numbers = #tpu.dot_dimension_numbers<[1], [0], [0], [1], [0, 0, 1, 1], [], []>} : vector<8x128xf32>, vector<128x384xf32>, vector<8x384xf32> -> vector<8x384xf32>
    %c0_108 = arith.constant 0 : index
    %c0_109 = arith.constant 0 : index
    %268 = vector.load %arg9[%c0_108, %c0_109] : memref<1x384xf32, #tpu.memory_space<vmem>>, vector<1x384xf32>
    %269 = vector.broadcast %268 : vector<1x384xf32> to vector<8x384xf32>
    %270 = arith.addf %267, %269 : vector<8x384xf32>
    %c0_110 = arith.constant 0 : index
    %c0_111 = arith.constant 0 : index
    %271 = vector.load %arg7[%c0_110, %c0_111] : memref<128x256xf32, #tpu.memory_space<vmem>>, vector<128x256xf32>
    %cst_112 = arith.constant dense<0.000000e+00> : vector<8x256xf32>
    %272 = tpu.matmul %231, %271, %cst_112 {dimension_numbers = #tpu.dot_dimension_numbers<[1], [0], [0], [1], [0, 0, 1, 1], [], []>} : vector<8x128xf32>, vector<128x256xf32>, vector<8x256xf32> -> vector<8x256xf32>
    %c0_113 = arith.constant 0 : index
    %c0_114 = arith.constant 0 : index
    %273 = vector.load %arg8[%c0_113, %c0_114] : memref<128x128xf32, #tpu.memory_space<vmem>>, vector<128x128xf32>
    %cst_115 = arith.constant dense<0.000000e+00> : vector<8x128xf32>
    %274 = tpu.matmul %231, %273, %cst_115 {dimension_numbers = #tpu.dot_dimension_numbers<[1], [0], [0], [1], [0, 0, 1, 1], [], []>} : vector<8x128xf32>, vector<128x128xf32>, vector<8x128xf32> -> vector<8x128xf32>
    %275 = vector.extract_strided_slice %201 {offsets = [0, 0], sizes = [8, 128], strides = [1, 1]} : vector<8x384xf32> to vector<8x128xf32>
    %276 = vector.extract_strided_slice %272 {offsets = [0, 0], sizes = [8, 128], strides = [1, 1]} : vector<8x256xf32> to vector<8x128xf32>
    %277 = arith.addf %275, %276 : vector<8x128xf32>
    %278 = arith.negf %277 : vector<8x128xf32>
    %279 = math.exp %278 : vector<8x128xf32>
    %cst_116 = arith.constant 1.000000e+00 : f32
    %280 = vector.broadcast %cst_116 : f32 to vector<8x128xf32>
    %281 = arith.addf %280, %279 : vector<8x128xf32>
    %282 = arith.divf %280, %281 : vector<8x128xf32>
    %283 = vector.extract_strided_slice %201 {offsets = [0, 128], sizes = [8, 128], strides = [1, 1]} : vector<8x384xf32> to vector<8x128xf32>
    %284 = vector.extract_strided_slice %272 {offsets = [0, 128], sizes = [8, 128], strides = [1, 1]} : vector<8x256xf32> to vector<8x128xf32>
    %285 = arith.addf %283, %284 : vector<8x128xf32>
    %286 = arith.negf %285 : vector<8x128xf32>
    %287 = math.exp %286 : vector<8x128xf32>
    %cst_117 = arith.constant 1.000000e+00 : f32
    %288 = vector.broadcast %cst_117 : f32 to vector<8x128xf32>
    %289 = arith.addf %288, %287 : vector<8x128xf32>
    %290 = arith.divf %288, %289 : vector<8x128xf32>
    %291 = vector.extract_strided_slice %201 {offsets = [0, 256], sizes = [8, 128], strides = [1, 1]} : vector<8x384xf32> to vector<8x128xf32>
    %292 = arith.addf %274, %12 : vector<8x128xf32>
    %293 = arith.mulf %282, %292 : vector<8x128xf32>
    %294 = arith.addf %291, %293 : vector<8x128xf32>
    %295 = math.tanh %294 : vector<8x128xf32>
    %cst_118 = arith.constant 1.000000e+00 : f32
    %296 = vector.broadcast %cst_118 : f32 to vector<8x128xf32>
    %297 = arith.subf %296, %290 : vector<8x128xf32>
    %298 = arith.mulf %297, %295 : vector<8x128xf32>
    %299 = arith.mulf %290, %231 : vector<8x128xf32>
    %300 = arith.addf %298, %299 : vector<8x128xf32>
    %c384 = arith.constant 384 : index
    %c0_119 = arith.constant 0 : index
    %301 = vector.load %arg11[%c384, %c0_119] : memref<1024x128xf32, #tpu.memory_space<vmem>>, vector<128x128xf32>
    %cst_120 = arith.constant dense<0.000000e+00> : vector<8x128xf32>
    %302 = tpu.matmul %300, %301, %cst_120 {dimension_numbers = #tpu.dot_dimension_numbers<[1], [0], [0], [1], [0, 0, 1, 1], [], []>} : vector<8x128xf32>, vector<128x128xf32>, vector<8x128xf32> -> vector<8x128xf32>
    %303 = arith.addf %234, %302 : vector<8x128xf32>
    %c40 = arith.constant 40 : index
    %c0_121 = arith.constant 0 : index
    %304 = vector.load %arg18[%c40, %c0_121] : memref<64x384xf32, #tpu.memory_space<vmem>>, vector<8x384xf32>
    %c0_122 = arith.constant 0 : index
    %c0_123 = arith.constant 0 : index
    %305 = vector.load %arg2[%c0_122, %c0_123] : memref<128x256xf32, #tpu.memory_space<vmem>>, vector<128x256xf32>
    %cst_124 = arith.constant dense<0.000000e+00> : vector<8x256xf32>
    %306 = tpu.matmul %265, %305, %cst_124 {dimension_numbers = #tpu.dot_dimension_numbers<[1], [0], [0], [1], [0, 0, 1, 1], [], []>} : vector<8x128xf32>, vector<128x256xf32>, vector<8x256xf32> -> vector<8x256xf32>
    %c0_125 = arith.constant 0 : index
    %c0_126 = arith.constant 0 : index
    %307 = vector.load %arg3[%c0_125, %c0_126] : memref<128x128xf32, #tpu.memory_space<vmem>>, vector<128x128xf32>
    %cst_127 = arith.constant dense<0.000000e+00> : vector<8x128xf32>
    %308 = tpu.matmul %265, %307, %cst_127 {dimension_numbers = #tpu.dot_dimension_numbers<[1], [0], [0], [1], [0, 0, 1, 1], [], []>} : vector<8x128xf32>, vector<128x128xf32>, vector<8x128xf32> -> vector<8x128xf32>
    %309 = vector.extract_strided_slice %304 {offsets = [0, 0], sizes = [8, 128], strides = [1, 1]} : vector<8x384xf32> to vector<8x128xf32>
    %310 = vector.extract_strided_slice %306 {offsets = [0, 0], sizes = [8, 128], strides = [1, 1]} : vector<8x256xf32> to vector<8x128xf32>
    %311 = arith.addf %309, %310 : vector<8x128xf32>
    %312 = arith.negf %311 : vector<8x128xf32>
    %313 = math.exp %312 : vector<8x128xf32>
    %cst_128 = arith.constant 1.000000e+00 : f32
    %314 = vector.broadcast %cst_128 : f32 to vector<8x128xf32>
    %315 = arith.addf %314, %313 : vector<8x128xf32>
    %316 = arith.divf %314, %315 : vector<8x128xf32>
    %317 = vector.extract_strided_slice %304 {offsets = [0, 128], sizes = [8, 128], strides = [1, 1]} : vector<8x384xf32> to vector<8x128xf32>
    %318 = vector.extract_strided_slice %306 {offsets = [0, 128], sizes = [8, 128], strides = [1, 1]} : vector<8x256xf32> to vector<8x128xf32>
    %319 = arith.addf %317, %318 : vector<8x128xf32>
    %320 = arith.negf %319 : vector<8x128xf32>
    %321 = math.exp %320 : vector<8x128xf32>
    %cst_129 = arith.constant 1.000000e+00 : f32
    %322 = vector.broadcast %cst_129 : f32 to vector<8x128xf32>
    %323 = arith.addf %322, %321 : vector<8x128xf32>
    %324 = arith.divf %322, %323 : vector<8x128xf32>
    %325 = vector.extract_strided_slice %304 {offsets = [0, 256], sizes = [8, 128], strides = [1, 1]} : vector<8x384xf32> to vector<8x128xf32>
    %326 = arith.addf %308, %9 : vector<8x128xf32>
    %327 = arith.mulf %316, %326 : vector<8x128xf32>
    %328 = arith.addf %325, %327 : vector<8x128xf32>
    %329 = math.tanh %328 : vector<8x128xf32>
    %cst_130 = arith.constant 1.000000e+00 : f32
    %330 = vector.broadcast %cst_130 : f32 to vector<8x128xf32>
    %331 = arith.subf %330, %324 : vector<8x128xf32>
    %332 = arith.mulf %331, %329 : vector<8x128xf32>
    %333 = arith.mulf %324, %265 : vector<8x128xf32>
    %334 = arith.addf %332, %333 : vector<8x128xf32>
    %c0_131 = arith.constant 0 : index
    %c0_132 = arith.constant 0 : index
    %335 = vector.load %arg6[%c0_131, %c0_132] : memref<128x384xf32, #tpu.memory_space<vmem>>, vector<128x384xf32>
    %cst_133 = arith.constant dense<0.000000e+00> : vector<8x384xf32>
    %336 = tpu.matmul %334, %335, %cst_133 {dimension_numbers = #tpu.dot_dimension_numbers<[1], [0], [0], [1], [0, 0, 1, 1], [], []>} : vector<8x128xf32>, vector<128x384xf32>, vector<8x384xf32> -> vector<8x384xf32>
    %c0_134 = arith.constant 0 : index
    %c0_135 = arith.constant 0 : index
    %337 = vector.load %arg9[%c0_134, %c0_135] : memref<1x384xf32, #tpu.memory_space<vmem>>, vector<1x384xf32>
    %338 = vector.broadcast %337 : vector<1x384xf32> to vector<8x384xf32>
    %339 = arith.addf %336, %338 : vector<8x384xf32>
    %c0_136 = arith.constant 0 : index
    %c0_137 = arith.constant 0 : index
    %340 = vector.load %arg7[%c0_136, %c0_137] : memref<128x256xf32, #tpu.memory_space<vmem>>, vector<128x256xf32>
    %cst_138 = arith.constant dense<0.000000e+00> : vector<8x256xf32>
    %341 = tpu.matmul %300, %340, %cst_138 {dimension_numbers = #tpu.dot_dimension_numbers<[1], [0], [0], [1], [0, 0, 1, 1], [], []>} : vector<8x128xf32>, vector<128x256xf32>, vector<8x256xf32> -> vector<8x256xf32>
    %c0_139 = arith.constant 0 : index
    %c0_140 = arith.constant 0 : index
    %342 = vector.load %arg8[%c0_139, %c0_140] : memref<128x128xf32, #tpu.memory_space<vmem>>, vector<128x128xf32>
    %cst_141 = arith.constant dense<0.000000e+00> : vector<8x128xf32>
    %343 = tpu.matmul %300, %342, %cst_141 {dimension_numbers = #tpu.dot_dimension_numbers<[1], [0], [0], [1], [0, 0, 1, 1], [], []>} : vector<8x128xf32>, vector<128x128xf32>, vector<8x128xf32> -> vector<8x128xf32>
    %344 = vector.extract_strided_slice %270 {offsets = [0, 0], sizes = [8, 128], strides = [1, 1]} : vector<8x384xf32> to vector<8x128xf32>
    %345 = vector.extract_strided_slice %341 {offsets = [0, 0], sizes = [8, 128], strides = [1, 1]} : vector<8x256xf32> to vector<8x128xf32>
    %346 = arith.addf %344, %345 : vector<8x128xf32>
    %347 = arith.negf %346 : vector<8x128xf32>
    %348 = math.exp %347 : vector<8x128xf32>
    %cst_142 = arith.constant 1.000000e+00 : f32
    %349 = vector.broadcast %cst_142 : f32 to vector<8x128xf32>
    %350 = arith.addf %349, %348 : vector<8x128xf32>
    %351 = arith.divf %349, %350 : vector<8x128xf32>
    %352 = vector.extract_strided_slice %270 {offsets = [0, 128], sizes = [8, 128], strides = [1, 1]} : vector<8x384xf32> to vector<8x128xf32>
    %353 = vector.extract_strided_slice %341 {offsets = [0, 128], sizes = [8, 128], strides = [1, 1]} : vector<8x256xf32> to vector<8x128xf32>
    %354 = arith.addf %352, %353 : vector<8x128xf32>
    %355 = arith.negf %354 : vector<8x128xf32>
    %356 = math.exp %355 : vector<8x128xf32>
    %cst_143 = arith.constant 1.000000e+00 : f32
    %357 = vector.broadcast %cst_143 : f32 to vector<8x128xf32>
    %358 = arith.addf %357, %356 : vector<8x128xf32>
    %359 = arith.divf %357, %358 : vector<8x128xf32>
    %360 = vector.extract_strided_slice %270 {offsets = [0, 256], sizes = [8, 128], strides = [1, 1]} : vector<8x384xf32> to vector<8x128xf32>
    %361 = arith.addf %343, %12 : vector<8x128xf32>
    %362 = arith.mulf %351, %361 : vector<8x128xf32>
    %363 = arith.addf %360, %362 : vector<8x128xf32>
    %364 = math.tanh %363 : vector<8x128xf32>
    %cst_144 = arith.constant 1.000000e+00 : f32
    %365 = vector.broadcast %cst_144 : f32 to vector<8x128xf32>
    %366 = arith.subf %365, %359 : vector<8x128xf32>
    %367 = arith.mulf %366, %364 : vector<8x128xf32>
    %368 = arith.mulf %359, %300 : vector<8x128xf32>
    %369 = arith.addf %367, %368 : vector<8x128xf32>
    %c512 = arith.constant 512 : index
    %c0_145 = arith.constant 0 : index
    %370 = vector.load %arg11[%c512, %c0_145] : memref<1024x128xf32, #tpu.memory_space<vmem>>, vector<128x128xf32>
    %cst_146 = arith.constant dense<0.000000e+00> : vector<8x128xf32>
    %371 = tpu.matmul %369, %370, %cst_146 {dimension_numbers = #tpu.dot_dimension_numbers<[1], [0], [0], [1], [0, 0, 1, 1], [], []>} : vector<8x128xf32>, vector<128x128xf32>, vector<8x128xf32> -> vector<8x128xf32>
    %372 = arith.addf %303, %371 : vector<8x128xf32>
    %c48 = arith.constant 48 : index
    %c0_147 = arith.constant 0 : index
    %373 = vector.load %arg18[%c48, %c0_147] : memref<64x384xf32, #tpu.memory_space<vmem>>, vector<8x384xf32>
    %c0_148 = arith.constant 0 : index
    %c0_149 = arith.constant 0 : index
    %374 = vector.load %arg2[%c0_148, %c0_149] : memref<128x256xf32, #tpu.memory_space<vmem>>, vector<128x256xf32>
    %cst_150 = arith.constant dense<0.000000e+00> : vector<8x256xf32>
    %375 = tpu.matmul %334, %374, %cst_150 {dimension_numbers = #tpu.dot_dimension_numbers<[1], [0], [0], [1], [0, 0, 1, 1], [], []>} : vector<8x128xf32>, vector<128x256xf32>, vector<8x256xf32> -> vector<8x256xf32>
    %c0_151 = arith.constant 0 : index
    %c0_152 = arith.constant 0 : index
    %376 = vector.load %arg3[%c0_151, %c0_152] : memref<128x128xf32, #tpu.memory_space<vmem>>, vector<128x128xf32>
    %cst_153 = arith.constant dense<0.000000e+00> : vector<8x128xf32>
    %377 = tpu.matmul %334, %376, %cst_153 {dimension_numbers = #tpu.dot_dimension_numbers<[1], [0], [0], [1], [0, 0, 1, 1], [], []>} : vector<8x128xf32>, vector<128x128xf32>, vector<8x128xf32> -> vector<8x128xf32>
    %378 = vector.extract_strided_slice %373 {offsets = [0, 0], sizes = [8, 128], strides = [1, 1]} : vector<8x384xf32> to vector<8x128xf32>
    %379 = vector.extract_strided_slice %375 {offsets = [0, 0], sizes = [8, 128], strides = [1, 1]} : vector<8x256xf32> to vector<8x128xf32>
    %380 = arith.addf %378, %379 : vector<8x128xf32>
    %381 = arith.negf %380 : vector<8x128xf32>
    %382 = math.exp %381 : vector<8x128xf32>
    %cst_154 = arith.constant 1.000000e+00 : f32
    %383 = vector.broadcast %cst_154 : f32 to vector<8x128xf32>
    %384 = arith.addf %383, %382 : vector<8x128xf32>
    %385 = arith.divf %383, %384 : vector<8x128xf32>
    %386 = vector.extract_strided_slice %373 {offsets = [0, 128], sizes = [8, 128], strides = [1, 1]} : vector<8x384xf32> to vector<8x128xf32>
    %387 = vector.extract_strided_slice %375 {offsets = [0, 128], sizes = [8, 128], strides = [1, 1]} : vector<8x256xf32> to vector<8x128xf32>
    %388 = arith.addf %386, %387 : vector<8x128xf32>
    %389 = arith.negf %388 : vector<8x128xf32>
    %390 = math.exp %389 : vector<8x128xf32>
    %cst_155 = arith.constant 1.000000e+00 : f32
    %391 = vector.broadcast %cst_155 : f32 to vector<8x128xf32>
    %392 = arith.addf %391, %390 : vector<8x128xf32>
    %393 = arith.divf %391, %392 : vector<8x128xf32>
    %394 = vector.extract_strided_slice %373 {offsets = [0, 256], sizes = [8, 128], strides = [1, 1]} : vector<8x384xf32> to vector<8x128xf32>
    %395 = arith.addf %377, %9 : vector<8x128xf32>
    %396 = arith.mulf %385, %395 : vector<8x128xf32>
    %397 = arith.addf %394, %396 : vector<8x128xf32>
    %398 = math.tanh %397 : vector<8x128xf32>
    %cst_156 = arith.constant 1.000000e+00 : f32
    %399 = vector.broadcast %cst_156 : f32 to vector<8x128xf32>
    %400 = arith.subf %399, %393 : vector<8x128xf32>
    %401 = arith.mulf %400, %398 : vector<8x128xf32>
    %402 = arith.mulf %393, %334 : vector<8x128xf32>
    %403 = arith.addf %401, %402 : vector<8x128xf32>
    %c0_157 = arith.constant 0 : index
    %c0_158 = arith.constant 0 : index
    %404 = vector.load %arg6[%c0_157, %c0_158] : memref<128x384xf32, #tpu.memory_space<vmem>>, vector<128x384xf32>
    %cst_159 = arith.constant dense<0.000000e+00> : vector<8x384xf32>
    %405 = tpu.matmul %403, %404, %cst_159 {dimension_numbers = #tpu.dot_dimension_numbers<[1], [0], [0], [1], [0, 0, 1, 1], [], []>} : vector<8x128xf32>, vector<128x384xf32>, vector<8x384xf32> -> vector<8x384xf32>
    %c0_160 = arith.constant 0 : index
    %c0_161 = arith.constant 0 : index
    %406 = vector.load %arg9[%c0_160, %c0_161] : memref<1x384xf32, #tpu.memory_space<vmem>>, vector<1x384xf32>
    %407 = vector.broadcast %406 : vector<1x384xf32> to vector<8x384xf32>
    %408 = arith.addf %405, %407 : vector<8x384xf32>
    %c0_162 = arith.constant 0 : index
    %c0_163 = arith.constant 0 : index
    %409 = vector.load %arg7[%c0_162, %c0_163] : memref<128x256xf32, #tpu.memory_space<vmem>>, vector<128x256xf32>
    %cst_164 = arith.constant dense<0.000000e+00> : vector<8x256xf32>
    %410 = tpu.matmul %369, %409, %cst_164 {dimension_numbers = #tpu.dot_dimension_numbers<[1], [0], [0], [1], [0, 0, 1, 1], [], []>} : vector<8x128xf32>, vector<128x256xf32>, vector<8x256xf32> -> vector<8x256xf32>
    %c0_165 = arith.constant 0 : index
    %c0_166 = arith.constant 0 : index
    %411 = vector.load %arg8[%c0_165, %c0_166] : memref<128x128xf32, #tpu.memory_space<vmem>>, vector<128x128xf32>
    %cst_167 = arith.constant dense<0.000000e+00> : vector<8x128xf32>
    %412 = tpu.matmul %369, %411, %cst_167 {dimension_numbers = #tpu.dot_dimension_numbers<[1], [0], [0], [1], [0, 0, 1, 1], [], []>} : vector<8x128xf32>, vector<128x128xf32>, vector<8x128xf32> -> vector<8x128xf32>
    %413 = vector.extract_strided_slice %339 {offsets = [0, 0], sizes = [8, 128], strides = [1, 1]} : vector<8x384xf32> to vector<8x128xf32>
    %414 = vector.extract_strided_slice %410 {offsets = [0, 0], sizes = [8, 128], strides = [1, 1]} : vector<8x256xf32> to vector<8x128xf32>
    %415 = arith.addf %413, %414 : vector<8x128xf32>
    %416 = arith.negf %415 : vector<8x128xf32>
    %417 = math.exp %416 : vector<8x128xf32>
    %cst_168 = arith.constant 1.000000e+00 : f32
    %418 = vector.broadcast %cst_168 : f32 to vector<8x128xf32>
    %419 = arith.addf %418, %417 : vector<8x128xf32>
    %420 = arith.divf %418, %419 : vector<8x128xf32>
    %421 = vector.extract_strided_slice %339 {offsets = [0, 128], sizes = [8, 128], strides = [1, 1]} : vector<8x384xf32> to vector<8x128xf32>
    %422 = vector.extract_strided_slice %410 {offsets = [0, 128], sizes = [8, 128], strides = [1, 1]} : vector<8x256xf32> to vector<8x128xf32>
    %423 = arith.addf %421, %422 : vector<8x128xf32>
    %424 = arith.negf %423 : vector<8x128xf32>
    %425 = math.exp %424 : vector<8x128xf32>
    %cst_169 = arith.constant 1.000000e+00 : f32
    %426 = vector.broadcast %cst_169 : f32 to vector<8x128xf32>
    %427 = arith.addf %426, %425 : vector<8x128xf32>
    %428 = arith.divf %426, %427 : vector<8x128xf32>
    %429 = vector.extract_strided_slice %339 {offsets = [0, 256], sizes = [8, 128], strides = [1, 1]} : vector<8x384xf32> to vector<8x128xf32>
    %430 = arith.addf %412, %12 : vector<8x128xf32>
    %431 = arith.mulf %420, %430 : vector<8x128xf32>
    %432 = arith.addf %429, %431 : vector<8x128xf32>
    %433 = math.tanh %432 : vector<8x128xf32>
    %cst_170 = arith.constant 1.000000e+00 : f32
    %434 = vector.broadcast %cst_170 : f32 to vector<8x128xf32>
    %435 = arith.subf %434, %428 : vector<8x128xf32>
    %436 = arith.mulf %435, %433 : vector<8x128xf32>
    %437 = arith.mulf %428, %369 : vector<8x128xf32>
    %438 = arith.addf %436, %437 : vector<8x128xf32>
    %c640 = arith.constant 640 : index
    %c0_171 = arith.constant 0 : index
    %439 = vector.load %arg11[%c640, %c0_171] : memref<1024x128xf32, #tpu.memory_space<vmem>>, vector<128x128xf32>
    %cst_172 = arith.constant dense<0.000000e+00> : vector<8x128xf32>
    %440 = tpu.matmul %438, %439, %cst_172 {dimension_numbers = #tpu.dot_dimension_numbers<[1], [0], [0], [1], [0, 0, 1, 1], [], []>} : vector<8x128xf32>, vector<128x128xf32>, vector<8x128xf32> -> vector<8x128xf32>
    %441 = arith.addf %372, %440 : vector<8x128xf32>
    %c56 = arith.constant 56 : index
    %c0_173 = arith.constant 0 : index
    %442 = vector.load %arg18[%c56, %c0_173] : memref<64x384xf32, #tpu.memory_space<vmem>>, vector<8x384xf32>
    %c0_174 = arith.constant 0 : index
    %c0_175 = arith.constant 0 : index
    %443 = vector.load %arg2[%c0_174, %c0_175] : memref<128x256xf32, #tpu.memory_space<vmem>>, vector<128x256xf32>
    %cst_176 = arith.constant dense<0.000000e+00> : vector<8x256xf32>
    %444 = tpu.matmul %403, %443, %cst_176 {dimension_numbers = #tpu.dot_dimension_numbers<[1], [0], [0], [1], [0, 0, 1, 1], [], []>} : vector<8x128xf32>, vector<128x256xf32>, vector<8x256xf32> -> vector<8x256xf32>
    %c0_177 = arith.constant 0 : index
    %c0_178 = arith.constant 0 : index
    %445 = vector.load %arg3[%c0_177, %c0_178] : memref<128x128xf32, #tpu.memory_space<vmem>>, vector<128x128xf32>
    %cst_179 = arith.constant dense<0.000000e+00> : vector<8x128xf32>
    %446 = tpu.matmul %403, %445, %cst_179 {dimension_numbers = #tpu.dot_dimension_numbers<[1], [0], [0], [1], [0, 0, 1, 1], [], []>} : vector<8x128xf32>, vector<128x128xf32>, vector<8x128xf32> -> vector<8x128xf32>
    %447 = vector.extract_strided_slice %442 {offsets = [0, 0], sizes = [8, 128], strides = [1, 1]} : vector<8x384xf32> to vector<8x128xf32>
    %448 = vector.extract_strided_slice %444 {offsets = [0, 0], sizes = [8, 128], strides = [1, 1]} : vector<8x256xf32> to vector<8x128xf32>
    %449 = arith.addf %447, %448 : vector<8x128xf32>
    %450 = arith.negf %449 : vector<8x128xf32>
    %451 = math.exp %450 : vector<8x128xf32>
    %cst_180 = arith.constant 1.000000e+00 : f32
    %452 = vector.broadcast %cst_180 : f32 to vector<8x128xf32>
    %453 = arith.addf %452, %451 : vector<8x128xf32>
    %454 = arith.divf %452, %453 : vector<8x128xf32>
    %455 = vector.extract_strided_slice %442 {offsets = [0, 128], sizes = [8, 128], strides = [1, 1]} : vector<8x384xf32> to vector<8x128xf32>
    %456 = vector.extract_strided_slice %444 {offsets = [0, 128], sizes = [8, 128], strides = [1, 1]} : vector<8x256xf32> to vector<8x128xf32>
    %457 = arith.addf %455, %456 : vector<8x128xf32>
    %458 = arith.negf %457 : vector<8x128xf32>
    %459 = math.exp %458 : vector<8x128xf32>
    %cst_181 = arith.constant 1.000000e+00 : f32
    %460 = vector.broadcast %cst_181 : f32 to vector<8x128xf32>
    %461 = arith.addf %460, %459 : vector<8x128xf32>
    %462 = arith.divf %460, %461 : vector<8x128xf32>
    %463 = vector.extract_strided_slice %442 {offsets = [0, 256], sizes = [8, 128], strides = [1, 1]} : vector<8x384xf32> to vector<8x128xf32>
    %464 = arith.addf %446, %9 : vector<8x128xf32>
    %465 = arith.mulf %454, %464 : vector<8x128xf32>
    %466 = arith.addf %463, %465 : vector<8x128xf32>
    %467 = math.tanh %466 : vector<8x128xf32>
    %cst_182 = arith.constant 1.000000e+00 : f32
    %468 = vector.broadcast %cst_182 : f32 to vector<8x128xf32>
    %469 = arith.subf %468, %462 : vector<8x128xf32>
    %470 = arith.mulf %469, %467 : vector<8x128xf32>
    %471 = arith.mulf %462, %403 : vector<8x128xf32>
    %472 = arith.addf %470, %471 : vector<8x128xf32>
    %c0_183 = arith.constant 0 : index
    %c0_184 = arith.constant 0 : index
    %473 = vector.load %arg6[%c0_183, %c0_184] : memref<128x384xf32, #tpu.memory_space<vmem>>, vector<128x384xf32>
    %cst_185 = arith.constant dense<0.000000e+00> : vector<8x384xf32>
    %474 = tpu.matmul %472, %473, %cst_185 {dimension_numbers = #tpu.dot_dimension_numbers<[1], [0], [0], [1], [0, 0, 1, 1], [], []>} : vector<8x128xf32>, vector<128x384xf32>, vector<8x384xf32> -> vector<8x384xf32>
    %c0_186 = arith.constant 0 : index
    %c0_187 = arith.constant 0 : index
    %475 = vector.load %arg9[%c0_186, %c0_187] : memref<1x384xf32, #tpu.memory_space<vmem>>, vector<1x384xf32>
    %476 = vector.broadcast %475 : vector<1x384xf32> to vector<8x384xf32>
    %477 = arith.addf %474, %476 : vector<8x384xf32>
    %c0_188 = arith.constant 0 : index
    %c0_189 = arith.constant 0 : index
    %478 = vector.load %arg7[%c0_188, %c0_189] : memref<128x256xf32, #tpu.memory_space<vmem>>, vector<128x256xf32>
    %cst_190 = arith.constant dense<0.000000e+00> : vector<8x256xf32>
    %479 = tpu.matmul %438, %478, %cst_190 {dimension_numbers = #tpu.dot_dimension_numbers<[1], [0], [0], [1], [0, 0, 1, 1], [], []>} : vector<8x128xf32>, vector<128x256xf32>, vector<8x256xf32> -> vector<8x256xf32>
    %c0_191 = arith.constant 0 : index
    %c0_192 = arith.constant 0 : index
    %480 = vector.load %arg8[%c0_191, %c0_192] : memref<128x128xf32, #tpu.memory_space<vmem>>, vector<128x128xf32>
    %cst_193 = arith.constant dense<0.000000e+00> : vector<8x128xf32>
    %481 = tpu.matmul %438, %480, %cst_193 {dimension_numbers = #tpu.dot_dimension_numbers<[1], [0], [0], [1], [0, 0, 1, 1], [], []>} : vector<8x128xf32>, vector<128x128xf32>, vector<8x128xf32> -> vector<8x128xf32>
    %482 = vector.extract_strided_slice %408 {offsets = [0, 0], sizes = [8, 128], strides = [1, 1]} : vector<8x384xf32> to vector<8x128xf32>
    %483 = vector.extract_strided_slice %479 {offsets = [0, 0], sizes = [8, 128], strides = [1, 1]} : vector<8x256xf32> to vector<8x128xf32>
    %484 = arith.addf %482, %483 : vector<8x128xf32>
    %485 = arith.negf %484 : vector<8x128xf32>
    %486 = math.exp %485 : vector<8x128xf32>
    %cst_194 = arith.constant 1.000000e+00 : f32
    %487 = vector.broadcast %cst_194 : f32 to vector<8x128xf32>
    %488 = arith.addf %487, %486 : vector<8x128xf32>
    %489 = arith.divf %487, %488 : vector<8x128xf32>
    %490 = vector.extract_strided_slice %408 {offsets = [0, 128], sizes = [8, 128], strides = [1, 1]} : vector<8x384xf32> to vector<8x128xf32>
    %491 = vector.extract_strided_slice %479 {offsets = [0, 128], sizes = [8, 128], strides = [1, 1]} : vector<8x256xf32> to vector<8x128xf32>
    %492 = arith.addf %490, %491 : vector<8x128xf32>
    %493 = arith.negf %492 : vector<8x128xf32>
    %494 = math.exp %493 : vector<8x128xf32>
    %cst_195 = arith.constant 1.000000e+00 : f32
    %495 = vector.broadcast %cst_195 : f32 to vector<8x128xf32>
    %496 = arith.addf %495, %494 : vector<8x128xf32>
    %497 = arith.divf %495, %496 : vector<8x128xf32>
    %498 = vector.extract_strided_slice %408 {offsets = [0, 256], sizes = [8, 128], strides = [1, 1]} : vector<8x384xf32> to vector<8x128xf32>
    %499 = arith.addf %481, %12 : vector<8x128xf32>
    %500 = arith.mulf %489, %499 : vector<8x128xf32>
    %501 = arith.addf %498, %500 : vector<8x128xf32>
    %502 = math.tanh %501 : vector<8x128xf32>
    %cst_196 = arith.constant 1.000000e+00 : f32
    %503 = vector.broadcast %cst_196 : f32 to vector<8x128xf32>
    %504 = arith.subf %503, %497 : vector<8x128xf32>
    %505 = arith.mulf %504, %502 : vector<8x128xf32>
    %506 = arith.mulf %497, %438 : vector<8x128xf32>
    %507 = arith.addf %505, %506 : vector<8x128xf32>
    %c768 = arith.constant 768 : index
    %c0_197 = arith.constant 0 : index
    %508 = vector.load %arg11[%c768, %c0_197] : memref<1024x128xf32, #tpu.memory_space<vmem>>, vector<128x128xf32>
    %cst_198 = arith.constant dense<0.000000e+00> : vector<8x128xf32>
    %509 = tpu.matmul %507, %508, %cst_198 {dimension_numbers = #tpu.dot_dimension_numbers<[1], [0], [0], [1], [0, 0, 1, 1], [], []>} : vector<8x128xf32>, vector<128x128xf32>, vector<8x128xf32> -> vector<8x128xf32>
    %510 = arith.addf %441, %509 : vector<8x128xf32>
    %c0_199 = arith.constant 0 : index
    %c0_200 = arith.constant 0 : index
    %511 = vector.load %arg7[%c0_199, %c0_200] : memref<128x256xf32, #tpu.memory_space<vmem>>, vector<128x256xf32>
    %cst_201 = arith.constant dense<0.000000e+00> : vector<8x256xf32>
    %512 = tpu.matmul %507, %511, %cst_201 {dimension_numbers = #tpu.dot_dimension_numbers<[1], [0], [0], [1], [0, 0, 1, 1], [], []>} : vector<8x128xf32>, vector<128x256xf32>, vector<8x256xf32> -> vector<8x256xf32>
    %c0_202 = arith.constant 0 : index
    %c0_203 = arith.constant 0 : index
    %513 = vector.load %arg8[%c0_202, %c0_203] : memref<128x128xf32, #tpu.memory_space<vmem>>, vector<128x128xf32>
    %cst_204 = arith.constant dense<0.000000e+00> : vector<8x128xf32>
    %514 = tpu.matmul %507, %513, %cst_204 {dimension_numbers = #tpu.dot_dimension_numbers<[1], [0], [0], [1], [0, 0, 1, 1], [], []>} : vector<8x128xf32>, vector<128x128xf32>, vector<8x128xf32> -> vector<8x128xf32>
    %515 = vector.extract_strided_slice %477 {offsets = [0, 0], sizes = [8, 128], strides = [1, 1]} : vector<8x384xf32> to vector<8x128xf32>
    %516 = vector.extract_strided_slice %512 {offsets = [0, 0], sizes = [8, 128], strides = [1, 1]} : vector<8x256xf32> to vector<8x128xf32>
    %517 = arith.addf %515, %516 : vector<8x128xf32>
    %518 = arith.negf %517 : vector<8x128xf32>
    %519 = math.exp %518 : vector<8x128xf32>
    %cst_205 = arith.constant 1.000000e+00 : f32
    %520 = vector.broadcast %cst_205 : f32 to vector<8x128xf32>
    %521 = arith.addf %520, %519 : vector<8x128xf32>
    %522 = arith.divf %520, %521 : vector<8x128xf32>
    %523 = vector.extract_strided_slice %477 {offsets = [0, 128], sizes = [8, 128], strides = [1, 1]} : vector<8x384xf32> to vector<8x128xf32>
    %524 = vector.extract_strided_slice %512 {offsets = [0, 128], sizes = [8, 128], strides = [1, 1]} : vector<8x256xf32> to vector<8x128xf32>
    %525 = arith.addf %523, %524 : vector<8x128xf32>
    %526 = arith.negf %525 : vector<8x128xf32>
    %527 = math.exp %526 : vector<8x128xf32>
    %cst_206 = arith.constant 1.000000e+00 : f32
    %528 = vector.broadcast %cst_206 : f32 to vector<8x128xf32>
    %529 = arith.addf %528, %527 : vector<8x128xf32>
    %530 = arith.divf %528, %529 : vector<8x128xf32>
    %531 = vector.extract_strided_slice %477 {offsets = [0, 256], sizes = [8, 128], strides = [1, 1]} : vector<8x384xf32> to vector<8x128xf32>
    %532 = arith.addf %514, %12 : vector<8x128xf32>
    %533 = arith.mulf %522, %532 : vector<8x128xf32>
    %534 = arith.addf %531, %533 : vector<8x128xf32>
    %535 = math.tanh %534 : vector<8x128xf32>
    %cst_207 = arith.constant 1.000000e+00 : f32
    %536 = vector.broadcast %cst_207 : f32 to vector<8x128xf32>
    %537 = arith.subf %536, %530 : vector<8x128xf32>
    %538 = arith.mulf %537, %535 : vector<8x128xf32>
    %539 = arith.mulf %530, %507 : vector<8x128xf32>
    %540 = arith.addf %538, %539 : vector<8x128xf32>
    %c896 = arith.constant 896 : index
    %c0_208 = arith.constant 0 : index
    %541 = vector.load %arg11[%c896, %c0_208] : memref<1024x128xf32, #tpu.memory_space<vmem>>, vector<128x128xf32>
    %cst_209 = arith.constant dense<0.000000e+00> : vector<8x128xf32>
    %542 = tpu.matmul %540, %541, %cst_209 {dimension_numbers = #tpu.dot_dimension_numbers<[1], [0], [0], [1], [0, 0, 1, 1], [], []>} : vector<8x128xf32>, vector<128x128xf32>, vector<8x128xf32> -> vector<8x128xf32>
    %543 = arith.addf %510, %542 : vector<8x128xf32>
    %544 = vector.extract_strided_slice %543 {offsets = [0, 0], sizes = [2, 128], strides = [1, 1]} : vector<8x128xf32> to vector<2x128xf32>
    %c0_210 = arith.constant 0 : index
    %c0_211 = arith.constant 0 : index
    %545 = vector.load %arg12[%c0_210, %c0_211] : memref<1x128xf32, #tpu.memory_space<vmem>>, vector<1x128xf32>
    %546 = vector.broadcast %545 : vector<1x128xf32> to vector<2x128xf32>
    %547 = arith.addf %544, %546 : vector<2x128xf32>
    %cst_212 = arith.constant dense<0.000000e+00> : vector<128xf32>
    %548 = vector.multi_reduction <add>, %547, %cst_212 [0] : vector<2x128xf32> to vector<128xf32>
    %549 = vector.shape_cast %548 : vector<128xf32> to vector<1x128xf32>
    %cst_213 = arith.constant 2.000000e+00 : f32
    %550 = vector.broadcast %cst_213 : f32 to vector<1x128xf32>
    %551 = arith.divf %549, %550 : vector<1x128xf32>
    %552 = vector.broadcast %551 : vector<1x128xf32> to vector<2x128xf32>
    %553 = arith.subf %547, %552 : vector<2x128xf32>
    %554 = arith.mulf %553, %553 : vector<2x128xf32>
    %cst_214 = arith.constant dense<0.000000e+00> : vector<128xf32>
    %555 = vector.multi_reduction <add>, %554, %cst_214 [0] : vector<2x128xf32> to vector<128xf32>
    %556 = vector.shape_cast %555 : vector<128xf32> to vector<1x128xf32>
    %cst_215 = arith.constant 2.000000e+00 : f32
    %557 = vector.broadcast %cst_215 : f32 to vector<1x128xf32>
    %558 = arith.divf %556, %557 : vector<1x128xf32>
    %559 = vector.broadcast %551 : vector<1x128xf32> to vector<2x128xf32>
    %560 = arith.subf %547, %559 : vector<2x128xf32>
    %cst_216 = arith.constant 9.99999974E-6 : f32
    %561 = vector.broadcast %cst_216 : f32 to vector<1x128xf32>
    %562 = arith.addf %558, %561 : vector<1x128xf32>
    %563 = math.rsqrt %562 : vector<1x128xf32>
    %564 = vector.broadcast %563 : vector<1x128xf32> to vector<2x128xf32>
    %565 = arith.mulf %560, %564 : vector<2x128xf32>
    %c0_217 = arith.constant 0 : index
    %c0_218 = arith.constant 0 : index
    %566 = vector.load %arg13[%c0_217, %c0_218] : memref<1x128xf32, #tpu.memory_space<vmem>>, vector<1x128xf32>
    %567 = vector.broadcast %566 : vector<1x128xf32> to vector<2x128xf32>
    %568 = arith.mulf %565, %567 : vector<2x128xf32>
    %c0_219 = arith.constant 0 : index
    %c0_220 = arith.constant 0 : index
    %569 = vector.load %arg14[%c0_219, %c0_220] : memref<1x128xf32, #tpu.memory_space<vmem>>, vector<1x128xf32>
    %570 = vector.broadcast %569 : vector<1x128xf32> to vector<2x128xf32>
    %571 = arith.addf %568, %570 : vector<2x128xf32>
    %c0_221 = arith.constant 0 : index
    %c0_222 = arith.constant 0 : index
    %572 = vector.load %arg15[%c0_221, %c0_222] : memref<128x2xf32, #tpu.memory_space<vmem>>, vector<128x2xf32>
    %cst_223 = arith.constant dense<0.000000e+00> : vector<2x2xf32>
    %573 = tpu.matmul %571, %572, %cst_223 {dimension_numbers = #tpu.dot_dimension_numbers<[1], [0], [0], [1], [0, 0, 1, 1], [], []>} : vector<2x128xf32>, vector<128x2xf32>, vector<2x2xf32> -> vector<2x2xf32>
    %c0_224 = arith.constant 0 : index
    %c0_225 = arith.constant 0 : index
    %574 = vector.load %arg16[%c0_224, %c0_225] : memref<1x2xf32, #tpu.memory_space<vmem>>, vector<1x2xf32>
    %575 = vector.broadcast %574 : vector<1x2xf32> to vector<2x2xf32>
    %576 = arith.addf %573, %575 : vector<2x2xf32>
    %577 = math.tanh %576 : vector<2x2xf32>
    %c0_226 = arith.constant 0 : index
    %c0_227 = arith.constant 0 : index
    %578 = vector.load %arg17[%c0_226, %c0_227] : memref<2x2xf32, #tpu.memory_space<vmem>>, vector<2x2xf32>
    tpu.vector_store %arg17[%c0_226, %c0_227], %577 {strides = array<i32>} : memref<2x2xf32, #tpu.memory_space<vmem>>, vector<2x2xf32>,
    return
  }
}

</mosaic_0001>

<bundles_post_ra>
// kernel: tpu_custom_call.1
= control target key start
LH: loop header
LB: loop body
LE: loop exit
PB: predicated region body
PF: predicated region fallthrough
CT: control target
= control target key end

     0   :  { %s6577_s0 = inlined_call_operand.vmem [shape: f32[64,256], index: 0, kind: input, shape index: {}]   ;;  %s6578_s1 = inlined_call_operand.hbm [shape: f32[256,384], index: 1, kind: input, shape index: {}]   ;;  %s6579_s2 = inlined_call_operand.hbm [shape: f32[128,256], index: 2, kind: input, shape index: {}]   ;;  %s6580_s3 = inlined_call_operand.hbm [shape: f32[128,128], index: 3, kind: input, shape index: {}]   ;;  %s6581_s4 = inlined_call_operand.vmem [shape: f32[1,384], index: 4, kind: input, shape index: {}]   ;;  %s6582_s5 = inlined_call_operand.hbm [shape: f32[1,128], index: 5, kind: input, shape index: {}]   ;;  %s6583_s6 = inlined_call_operand.hbm [shape: f32[128,384], index: 6, kind: input, shape index: {}]   ;;  %s6584_s7 = inlined_call_operand.hbm [shape: f32[128,256], index: 7, kind: input, shape index: {}]   ;;  %s6585_s8 = inlined_call_operand.hbm [shape: f32[128,128], index: 8, kind: input, shape index: {}]   ;;  %s6586_s9 = inlined_call_operand.vmem [shape: f32[1,384], index: 9, kind: input, shape index: {}]   ;;  %s6587_s10 = inlined_call_operand.vmem [shape: f32[1,128], index: 10, kind: input, shape index: {}]   ;;  %s6588_s11 = inlined_call_operand.hbm [shape: f32[1024,128], index: 11, kind: input, shape index: {}]   ;;  %s6589_s12 = inlined_call_operand.vmem [shape: f32[1,128], index: 12, kind: input, shape index: {}]   ;;  %s6590_s13 = inlined_call_operand.vmem [shape: f32[1,128], index: 13, kind: input, shape index: {}]   ;;  %s6591_s14 = inlined_call_operand.vmem [shape: f32[1,128], index: 14, kind: input, shape index: {}]   ;;  %s6592_s15 = inlined_call_operand.vmem [shape: f32[128,2], index: 15, kind: input, shape index: {}]   ;;  %s6593_s16 = inlined_call_operand.vmem [shape: f32[1,2], index: 16, kind: input, shape index: {}]   ;;  %s6594_s17 = inlined_call_operand.hbm [shape: f32[2,2], index: 17, kind: output, shape index: {}]  }
   0x1   :  { %6865 = sst [smem:[#allocation129_spill]] %s6577_s0 }
   0x2   :  { %6866 = sst [smem:[#allocation130_spill]] %s6578_s1 }
   0x3   :  { %6867 = sst [smem:[#allocation131_spill]] %s6594_s17 }
   0x4   :  { %22 = vsyncpa [#allocation4], 0 }
   0x5   :  { %23 = vsyncpa [#allocation7], 0 }
   0x6   :  { %24 = vsyncpa [#allocation10], 0 }
   0x7   :  { %25 = vsyncpa [#allocation13], 0 }
   0x8   :  { %26 = vsyncpa [#allocation16], 0  ;;  %s47_s26 = sshll.u32 %s6579_s2, 4  ;;  %s48_s26 = int_to_ptr.hbm [resolvable:$true] %s47_s26 }
   0x9   :  { %27 = vsyncpa [#allocation5], 0  ;;  %s4024_s27 = smov [#allocation6]   ;;  %s76_s30 = sshll.u32 %s6582_s5, 4  ;;  %s77_s30 = int_to_ptr.hbm [resolvable:$true] %s76_s30 }
   0xa   :  { %s49_s28 = sshll.u32 %s4024_s27, 4  ;;  %s4025_s18 = smov 256   ;;  %s50_s28 = int_to_ptr.vmem [resolvable:$true] %s49_s28 }
   0xb   :  { %s4026_s19 = smov 16   ;;  %s4027_s1 = smov [#allocation9]  }
   0xc   :  { %55 = dma.hbm_to_vmem [thread:$0]  %s48_s26, 4096, %s50_s28, [#allocation7], %s4025_s18, %s4025_s18, %s4026_s19  }
   0xd   :  { %s78_s20 = sshll.u32 %s4027_s1, 4  ;;  %s99_s23 = sshll.u32 %s6584_s7, 4  ;;  %s79_s20 = int_to_ptr.vmem [resolvable:$true] %s78_s20  ;;  %s100_s23 = int_to_ptr.hbm [resolvable:$true] %s99_s23 }
   0xe   :  { %81 = dma.hbm_to_vmem [thread:$0]  %s77_s30, 16, %s79_s20, [#allocation10]  }
   0xf   :  { %s6868_s25 = sld [smem:[#allocation130_spill]]  ;;  %s4028_s17 = smov [#allocation12]  }
  0x10   :  { %s101_s29 = sshll.u32 %s4028_s17, 4  ;;  %s4029_s5 = smov [#allocation3]   ;;  %s102_s29 = int_to_ptr.vmem [resolvable:$true] %s101_s29 }
  0x11   :  { %107 = dma.hbm_to_vmem [thread:$0]  %s100_s23, 4096, %s102_s29, [#allocation13], %s4025_s18, %s4025_s18, %s4026_s19  }
  0x12   :  { %s36_s26 = sshll.u32 %s4029_s5, 4  ;;  %s4030_s28 = smov 384   ;;  %s37_s26 = int_to_ptr.vmem [resolvable:$true] %s36_s26 }
  0x13   :  { %s4031_s0 = smov 24   ;;  %s60_s21 = sshll.u32 %s6580_s3, 4  ;;  %s61_s21 = int_to_ptr.hbm [resolvable:$true] %s60_s21 }
  0x14   :  { %s4032_s30 = smov [#allocation8]   ;;  %s86_s17 = sshll.u32 %s6583_s6, 4  ;;  %s87_s17 = int_to_ptr.hbm [resolvable:$true] %s86_s17 }
  0x15   :  { %s34_s27 = sshll.u32 %s6868_s25, 4  ;;  %s62_s20 = sshll.u32 %s4032_s30, 4  ;;  %s35_s27 = int_to_ptr.hbm [resolvable:$true] %s34_s27  ;;  %s63_s20 = int_to_ptr.vmem [resolvable:$true] %s62_s20 }
  0x16   :  { %42 = dma.hbm_to_vmem [thread:$0]  %s35_s27, 12288, %s37_s26, [#allocation4], %s4030_s28, %s4030_s28, %s4031_s0  }
  0x17   :  { %s4033_s24 = smov 128   ;;  %s4034_s18 = smov 8  }
  0x18   :  { %68 = dma.hbm_to_vmem [thread:$0]  %s61_s21, 2048, %s63_s20, [#allocation7], %s4033_s24, %s4033_s24, %s4034_s18  }
  0x19   :  { %s4035_s19 = smov [#allocation11]   ;;  %s112_s29 = sshll.u32 %s6585_s8, 4  ;;  %s113_s29 = int_to_ptr.hbm [resolvable:$true] %s112_s29 }
  0x1a   :  { %s88_s23 = sshll.u32 %s4035_s19, 4  ;;  %s129_s26 = sshll.u32 %s6588_s11, 4  ;;  %s89_s23 = int_to_ptr.vmem [resolvable:$true] %s88_s23  ;;  %s130_s26 = int_to_ptr.hbm [resolvable:$true] %s129_s26 }
  0x1b   :  { %94 = dma.hbm_to_vmem [thread:$0]  %s87_s17, 6144, %s89_s23, [#allocation10], %s4030_s28, %s4030_s28, %s4031_s0  }
  0x1c   :  { %s4036_s1 = smov [#allocation14]   ;;  %s4037_s6 = smov [#allocation15]  }
  0x1d   :  { %s114_s7 = sshll.u32 %s4036_s1, 4  ;;  %s131_s21 = sshll.u32 %s4037_s6, 4  ;;  %s115_s7 = int_to_ptr.vmem [resolvable:$true] %s114_s7  ;;  %s132_s21 = int_to_ptr.vmem [resolvable:$true] %s131_s21 }
  0x1e   :  { %120 = dma.hbm_to_vmem [thread:$0]  %s113_s29, 2048, %s115_s7, [#allocation13], %s4033_s24, %s4033_s24, %s4034_s18  }
  0x1f   :  { %137 = dma.hbm_to_vmem [thread:$0]  %s130_s26, 16384, %s132_s21, [#allocation16], %s4033_s24, %s4033_s24, %s4034_s18  }
  0x20   :  { %4012 = dma.done.wait [#allocation4], 12288  }
  0x21   :  { %4013 = vsyncadd [#allocation4], 4294955008 }
  0x22   :  { %4014 = dma.done.wait [#allocation7], 6144  }
  0x23   :  { %4015 = vsyncadd [#allocation7], 4294961152 }
  0x24   :  { %4016 = dma.done.wait [#allocation10], 6160  }
  0x25   :  { %4017 = vsyncadd [#allocation10], 4294961136 }
  0x26   :  { %4018 = dma.done.wait [#allocation13], 6144  }
  0x27   :  { %4019 = vsyncadd [#allocation13], 4294961152 }
  0x28   :  { %4020 = dma.done.wait [#allocation16], 16384  }
  0x29   :  { %4021 = vsyncadd [#allocation16], 4294950912  ;;  %v241_v0 = vld [vmem:[#allocation3 + $0x168] sm:$0xff]  ;;  %v238_v1 = vld [vmem:[#allocation3 + $0x150] sm:$0xff]  ;;  %s6869_s28 = sld [smem:[#allocation129_spill]]  ;;  %s4039_s17 = smov [#allocation17]  }
  0x2a   :  { %v289_v2 = vld [vmem:[#allocation3 + $0x2e8] sm:$0xff]  ;;  %300 = vmatpush.msra.mxu0 %v241_v0  ;;  %v286_v3 = vld [vmem:[#allocation3 + $0x2d0] sm:$0xff]  ;;  %v235_v4 = vld [vmem:[#allocation3 + $0x138] sm:$0xff]  ;;  %s3213_s24 = sshll.u32 %s4039_s17, 4  ;;  %s3214_s24 = int_to_ptr.vmem [resolvable:$true] %s3213_s24 }
  0x2b   :  { %341 = vmatpush.msra.mxu1 %v289_v2  ;;  %v283_v5 = vld [vmem:[#allocation3 + $0x2b8] sm:$0xff]  ;;  %v232_v6 = vld [vmem:[#allocation3 + $0x120] sm:$0xff]  ;;  %v229_v8 = vld [vmem:[#allocation3 + $0x108] sm:$0xff] }
  0x2c   :  { %301 = vmatpush.msra.mxu0 %v238_v1  ;;  %v280_v7 = vld [vmem:[#allocation3 + $0x2a0] sm:$0xff]  ;;  %v277_v9 = vld [vmem:[#allocation3 + $0x288] sm:$0xff]  ;;  %v226_v10 = vld [vmem:[#allocation3 + $0xf0] sm:$0xff] }
  0x2d   :  { %342 = vmatpush.msra.mxu1 %v286_v3  ;;  %v274_v11 = vld [vmem:[#allocation3 + $0x270] sm:$0xff]  ;;  %v239_v13 = vld [vmem:[#allocation3 + $0x158] sm:$0xff]  ;;  %v236_v17 = vld [vmem:[#allocation3 + $0x140] sm:$0xff] }
  0x2e   :  { %302 = vmatpush.msra.mxu0 %v235_v4  ;;  %v242_v12 = vld [vmem:[#allocation3 + $0x170] sm:$0xff]  ;;  %v223_v15 = vld [vmem:[#allocation3 + $0xd8] sm:$0xff]  ;;  %v220_v19 = vld [vmem:[#allocation3 + $0xc0] sm:$0xff] }
  0x2f   :  { %343 = vmatpush.msra.mxu1 %v283_v5  ;;  %v290_v14 = vld [vmem:[#allocation3 + $0x2f0] sm:$0xff]  ;;  %v271_v16 = vld [vmem:[#allocation3 + $0x258] sm:$0xff]  ;;  %382 = vmatpush.msra.mxu2 %v242_v12  ;;  %v268_v20 = vld [vmem:[#allocation3 + $0x240] sm:$0xff] }
  0x30   :  { %303 = vmatpush.msra.mxu0 %v232_v6  ;;  %423 = vmatpush.msra.mxu3 %v290_v14  ;;  %v287_v18 = vld [vmem:[#allocation3 + $0x2d8] sm:$0xff]  ;;  %v284_v21 = vld [vmem:[#allocation3 + $0x2c0] sm:$0xff]  ;;  %v233_v22 = vld [vmem:[#allocation3 + $0x128] sm:$0xff] }
  0x31   :  { %344 = vmatpush.msra.mxu1 %v280_v7  ;;  %383 = vmatpush.msra.mxu2 %v239_v13  ;;  %v281_v23 = vld [vmem:[#allocation3 + $0x2a8] sm:$0xff]  ;;  %v230_v26 = vld [vmem:[#allocation3 + $0x110] sm:$0xff]  ;;  %v227_v30 = vld [vmem:[#allocation3 + $0xf8] sm:$0xff] }
  0x32   :  { %304 = vmatpush.msra.mxu0 %v229_v8  ;;  %424 = vmatpush.msra.mxu3 %v287_v18  ;;  %v217_v24 = vld [vmem:[#allocation3 + $0xa8] sm:$0xff]  ;;  %v278_v27 = vld [vmem:[#allocation3 + $0x290] sm:$0xff]  ;;  %v275_v31 = vld [vmem:[#allocation3 + $0x278] sm:$0xff] }
  0x33   :  { %345 = vmatpush.msra.mxu1 %v277_v9  ;;  %v265_v25 = vld [vmem:[#allocation3 + $0x228] sm:$0xff]  ;;  %384 = vmatpush.msra.mxu2 %v236_v17  ;;  %v214_v28 = vld [vmem:[#allocation3 + $0x90] sm:$0xff]  ;;  %v211_v32 = vld [vmem:[#allocation3 + $0x78] sm:$0xff] }
  0x34   :  { %305 = vmatpush.msra.mxu0 %v226_v10  ;;  %425 = vmatpush.msra.mxu3 %v284_v21  ;;  %v262_v29 = vld [vmem:[#allocation3 + $0x210] sm:$0xff]  ;;  %v259_v33 = vld [vmem:[#allocation3 + $0x1f8] sm:$0xff]  ;;  %v224_v34 = vld [vmem:[#allocation3 + $0xe0] sm:$0xff] }
  0x35   :  { %346 = vmatpush.msra.mxu1 %v274_v11  ;;  %385 = vmatpush.msra.mxu2 %v233_v22  ;;  %v272_v35 = vld [vmem:[#allocation3 + $0x260] sm:$0xff]  ;;  %v221_v38 = vld [vmem:[#allocation3 + $0xc8] sm:$0xff]  ;;  %v218_v42 = vld [vmem:[#allocation3 + $0xb0] sm:$0xff] }
  0x36   :  { %306 = vmatpush.msra.mxu0 %v223_v15  ;;  %426 = vmatpush.msra.mxu3 %v281_v23  ;;  %v208_v36 = vld [vmem:[#allocation3 + $0x60] sm:$0xff]  ;;  %v269_v39 = vld [vmem:[#allocation3 + $0x248] sm:$0xff]  ;;  %v266_v43 = vld [vmem:[#allocation3 + $0x230] sm:$0xff] }
  0x37   :  { %347 = vmatpush.msra.mxu1 %v271_v16  ;;  %386 = vmatpush.msra.mxu2 %v230_v26  ;;  %v256_v37 = vld [vmem:[#allocation3 + $0x1e0] sm:$0xff]  ;;  %v205_v40 = vld [vmem:[#allocation3 + $0x48] sm:$0xff]  ;;  %v202_v44 = vld [vmem:[#allocation3 + $0x30] sm:$0xff] }
  0x38   :  { %307 = vmatpush.msra.mxu0 %v220_v19  ;;  %427 = vmatpush.msra.mxu3 %v278_v27  ;;  %v253_v41 = vld [vmem:[#allocation3 + $0x1c8] sm:$0xff]  ;;  %v199_v45 = vld [vmem:[#allocation3 + $0x18] sm:$0xff]  ;;  %v250_v46 = vld [vmem:[#allocation3 + $0x1b0] sm:$0xff] }
  0x39   :  { %348 = vmatpush.msra.mxu1 %v268_v20  ;;  %387 = vmatpush.msra.mxu2 %v227_v30  ;;  %v247_v47 = vld [vmem:[#allocation3 + $0x198] sm:$0xff]  ;;  %v196_v50 = vld [vmem:[#allocation3] sm:$0xff]  ;;  %v4162_v55 = vld [vmem:[%s6869_s28 + $0x8] sm:$0xff] }
  0x3a   :  { %308 = vmatpush.msra.mxu0 %v217_v24  ;;  %428 = vmatpush.msra.mxu3 %v275_v31  ;;  %v215_v48 = vld [vmem:[#allocation3 + $0x98] sm:$0xff]  ;;  %v244_v51 = vld [vmem:[#allocation3 + $0x180] sm:$0xff]  ;;  %v209_v56 = vld [vmem:[#allocation3 + $0x68] sm:$0xff] }
  0x3b   :  { %349 = vmatpush.msra.mxu1 %v265_v25  ;;  %388 = vmatpush.msra.mxu2 %v224_v34  ;;  %v263_v49 = vld [vmem:[#allocation3 + $0x218] sm:$0xff]  ;;  %v212_v52 = vld [vmem:[#allocation3 + $0x80] sm:$0xff]  ;;  %v257_v58 = vld [vmem:[#allocation3 + $0x1e8] sm:$0xff] }
  0x3c   :  { %309 = vmatpush.msra.mxu0 %v214_v28  ;;  %429 = vmatpush.msra.mxu3 %v272_v35  ;;  %v260_v53 = vld [vmem:[#allocation3 + $0x200] sm:$0xff]  ;;  %v243_v57 = vld [vmem:[#allocation3 + $0x178] sm:$0xff]  ;;  %v206_v60 = vld [vmem:[#allocation3 + $0x50] sm:$0xff] }
  0x3d   :  { %350 = vmatpush.msra.mxu1 %v262_v29  ;;  %389 = vmatpush.msra.mxu2 %v221_v38  ;;  %v4157_v54 = vld [vmem:[%s6869_s28] sm:$0xff]  ;;  %v291_v59 = vld [vmem:[#allocation3 + $0x2f8] sm:$0xff]  ;;  %v254_v62 = vld [vmem:[#allocation3 + $0x1d0] sm:$0xff] }
  0x3e   :  { %310 = vmatpush.msra.mxu0 %v211_v32  ;;  %430 = vmatpush.msra.mxu3 %v269_v39  ;;  %v240_v61 = vld [vmem:[#allocation3 + $0x160] sm:$0xff]  ;;  %v203_v0 = vld [vmem:[#allocation3 + $0x38] sm:$0xff]  ;;  %v237_v1 = vld [vmem:[#allocation3 + $0x148] sm:$0xff] }
  0x3f   :  { %351 = vmatpush.msra.mxu1 %v259_v33  ;;  %390 = vmatpush.msra.mxu2 %v218_v42  ;;  %v288_v63 = vld [vmem:[#allocation3 + $0x2e0] sm:$0xff]  ;;  %v251_v2 = vld [vmem:[#allocation3 + $0x1b8] sm:$0xff]  ;;  %v285_v3 = vld [vmem:[#allocation3 + $0x2c8] sm:$0xff] }
  0x40   :  { %311 = vmatpush.msra.mxu0 %v208_v36  ;;  %431 = vmatpush.msra.mxu3 %v266_v43  ;;  %v200_v4 = vld [vmem:[#allocation3 + $0x20] sm:$0xff]  ;;  %v234_v5 = vld [vmem:[#allocation3 + $0x130] sm:$0xff]  ;;  %v4174_v7 = vld [vmem:[%s6869_s28 + $0x18] sm:$0xff] }
  0x41   :  { %352 = vmatpush.msra.mxu1 %v256_v37  ;;  %391 = vmatpush.msra.mxu2 %v215_v48  ;;  %v4169_v6 = vld [vmem:[%s6869_s28 + $0x10] sm:$0xff]  ;;  %v197_v8 = vld [vmem:[#allocation3 + $0x8] sm:$0xff]  ;;  %v248_v9 = vld [vmem:[#allocation3 + $0x1a0] sm:$0xff] }
  0x42   :  { %312 = vmatpush.msra.mxu0 %v205_v40  ;;  %432 = vmatpush.msra.mxu3 %v263_v49  ;;  %v282_v10 = vld [vmem:[#allocation3 + $0x2b0] sm:$0xff]  ;;  %v245_v11 = vld [vmem:[#allocation3 + $0x188] sm:$0xff]  ;;  %v231_v12 = vld [vmem:[#allocation3 + $0x118] sm:$0xff] }
  0x43   :  { %353 = vmatpush.msra.mxu1 %v253_v41  ;;  %392 = vmatpush.msra.mxu2 %v212_v52  ;;  %v279_v13 = vld [vmem:[#allocation3 + $0x298] sm:$0xff]  ;;  %v228_v14 = vld [vmem:[#allocation3 + $0x100] sm:$0xff]  ;;  %v225_v16 = vld [vmem:[#allocation3 + $0xe8] sm:$0xff] }
  0x44   :  { %313 = vmatpush.msra.mxu0 %v202_v44  ;;  %433 = vmatpush.msra.mxu3 %v260_v53  ;;  %v276_v15 = vld [vmem:[#allocation3 + $0x280] sm:$0xff]  ;;  %v4188_v18 = vld [vmem:[%s6869_s28 + $0x28] sm:$0xff]  ;;  %v222_v20 = vld [vmem:[#allocation3 + $0xd0] sm:$0xff] }
  0x45   :  { %354 = vmatpush.msra.mxu1 %v250_v46  ;;  %393 = vmatpush.msra.mxu2 %v209_v56  ;;  %v4183_v17 = vld [vmem:[%s6869_s28 + $0x20] sm:$0xff]  ;;  %v273_v19 = vld [vmem:[#allocation3 + $0x268] sm:$0xff]  ;;  %v270_v21 = vld [vmem:[#allocation3 + $0x250] sm:$0xff] }
  0x46   :  { %314 = vmatpush.msra.mxu0 %v199_v45  ;;  %434 = vmatpush.msra.mxu3 %v257_v58  ;;  %v219_v22 = vld [vmem:[#allocation3 + $0xb8] sm:$0xff]  ;;  %v216_v24 = vld [vmem:[#allocation3 + $0xa0] sm:$0xff]  ;;  %v213_v25 = vld [vmem:[#allocation3 + $0x88] sm:$0xff] }
  0x47   :  { %355 = vmatpush.msra.mxu1 %v247_v47  ;;  %394 = vmatpush.msra.mxu2 %v206_v60  ;;  %v267_v23 = vld [vmem:[#allocation3 + $0x238] sm:$0xff]  ;;  %v264_v26 = vld [vmem:[#allocation3 + $0x220] sm:$0xff]  ;;  %v4197_v27 = vld [vmem:[%s6869_s28 + $0x30] sm:$0xff] }
  0x48   :  { %315 = vmatpush.msra.mxu0 %v196_v50  ;;  %435 = vmatpush.msra.mxu3 %v254_v62  ;;  %v4202_v28 = vld [vmem:[%s6869_s28 + $0x38] sm:$0xff]  ;;  %v210_v29 = vld [vmem:[#allocation3 + $0x70] sm:$0xff]  ;;  %v261_v30 = vld [vmem:[#allocation3 + $0x208] sm:$0xff] }
  0x49   :  { %356 = vmatpush.msra.mxu1 %v244_v51  ;;  %316 = vmatmul.f32.vlgmr.msra.gmra.mxu0 %v4157_v54  ;;  %v207_v31 = vld [vmem:[#allocation3 + $0x58] sm:$0xff]  ;;  %v258_v32 = vld [vmem:[#allocation3 + $0x1f0] sm:$0xff]  ;;  %v204_v33 = vld [vmem:[#allocation3 + $0x40] sm:$0xff] }
  0x4a   :  { %357 = vmatmul.f32.vlgmr.msra.gmra.mxu1 %v4162_v55  ;;  %464 = vmatpush.msrb.mxu0 %v243_v57  ;;  %v255_v34 = vld [vmem:[#allocation3 + $0x1d8] sm:$0xff]  ;;  %v201_v35 = vld [vmem:[#allocation3 + $0x28] sm:$0xff]  ;;  %v252_v36 = vld [vmem:[#allocation3 + $0x1c0] sm:$0xff] }
  0x4b   :  { %505 = vmatpush.msrb.mxu1 %v291_v59  ;;  %395 = vmatpush.msra.mxu2 %v203_v0  ;;  %v188_v37 = vld [vmem:[%s6869_s28 + $0x40] sm:$0xff]  ;;  %v189_v38 = vld [vmem:[%s6869_s28 + $0x48] sm:$0xff]  ;;  %v198_v39 = vld [vmem:[#allocation3 + $0x10] sm:$0xff] }
  0x4c   :  { %465 = vmatpush.msrb.mxu0 %v240_v61  ;;  %436 = vmatpush.msra.mxu3 %v251_v2  ;;  %v249_v40 = vld [vmem:[#allocation3 + $0x1a8] sm:$0xff]  ;;  %v246_v41 = vld [vmem:[#allocation3 + $0x190] sm:$0xff]  ;;  %v191_v43 = vld [vmem:[%s6869_s28 + $0x58] sm:$0xff] }
  0x4d   :  { %506 = vmatpush.msrb.mxu1 %v288_v63  ;;  %396 = vmatpush.msra.mxu2 %v200_v4  ;;  %v190_v42 = vld [vmem:[%s6869_s28 + $0x50] sm:$0xff]  ;;  %v192_v44 = vld [vmem:[%s6869_s28 + $0x60] sm:$0xff]  ;;  %v193_v45 = vld [vmem:[%s6869_s28 + $0x68] sm:$0xff] }
  0x4e   :  { %466 = vmatpush.msrb.mxu0 %v237_v1  ;;  %437 = vmatpush.msra.mxu3 %v248_v9  ;;  %v194_v46 = vld [vmem:[%s6869_s28 + $0x70] sm:$0xff]  ;;  %v195_v47 = vld [vmem:[%s6869_s28 + $0x78] sm:$0xff]  ;;  %v4256_v53 = vld [vmem:[#allocation11 + $0x140] sm:$0xff]  ;;  %s7413_s28 = sld [smem:[#allocation131_spill]] }
  0x4f   :  { %507 = vmatpush.msrb.mxu1 %v285_v3  ;;  %397 = vmatpush.msra.mxu2 %v197_v8  ;;  %v4242_v48 = vld [vmem:[#allocation11 + $0x168] sm:$0xff]  ;;  %v4244_v49 = vld [vmem:[#allocation11 + $0x170] sm:$0xff]  ;;  %v4250_v51 = vld [vmem:[#allocation11 + $0x158] sm:$0xff] }
  0x50   :  { %467 = vmatpush.msrb.mxu0 %v234_v5  ;;  %398 = vmatmul.f32.vlgmr.msra.gmra.mxu2 %v4157_v54  ;;  %v4248_v50 = vld [vmem:[#allocation11 + $0x150] sm:$0xff]  ;;  %v4252_v52 = vld [vmem:[#allocation11 + $0x138] sm:$0xff]  ;;  %v4266_v58 = vld [vmem:[#allocation11 + $0x108] sm:$0xff] }
  0x51   :  { %319 = vmatmul.f32.gmra.mxu0 %v4169_v6  ;;  %508 = vmatpush.msrb.mxu1 %v282_v10  ;;  %v4268_v59 = vld [vmem:[#allocation11 + $0x110] sm:$0xff]  ;;  %v4274_v61 = vld [vmem:[#allocation11 + $0xf8] sm:$0xff]  ;;  %v4285_v0 = vld [vmem:[#allocation11 + $0xe0] sm:$0xff] }
  0x52   :  { %360 = vmatmul.f32.gmra.mxu1 %v4174_v7  ;;  %438 = vmatpush.msra.mxu3 %v245_v11  ;;  %v4272_v60 = vld [vmem:[#allocation11 + $0xf0] sm:$0xff]  ;;  %v4279_v62 = vld [vmem:[%s6581_s4] sm:$0x7]  ;;  %v4294_v3 = vld [vmem:[#allocation11 + $0xc8] sm:$0xff] }
  0x53   :  { %468 = vmatpush.msrb.mxu0 %v231_v12  ;;  %439 = vmatmul.f32.vlgmr.msra.gmra.mxu3 %v4162_v55  ;;  %v4283_v63 = vld [vmem:[#allocation11 + $0xd8] sm:$0xff]  ;;  %v4290_v1 = vperm.slane %v4279_v62, 0  ;;  %v4292_v2 = vld [vmem:[#allocation11 + $0xc0] sm:$0xff]  ;;  %v4309_v9 = vld [vmem:[#allocation11 + $0x90] sm:$0xff] }
  0x54   :  { %509 = vmatpush.msrb.mxu1 %v279_v13  ;;  %680 = vmatpush.msrb.mxu2 %v4242_v48  ;;  %v4311_v10 = vld [vmem:[#allocation11 + $0x98] sm:$0xff]  ;;  %v4317_v12 = vld [vmem:[#allocation11 + $0x80] sm:$0xff]  ;;  %s3215_s19 = sshll.u32 %s7413_s28, 4  ;;  %s3216_s19 = int_to_ptr.hbm [resolvable:$true] %s3215_s19 }
  0x55   :  { %469 = vmatpush.msrb.mxu0 %v228_v14  ;;  %700 = vmatpush.msrb.mxu3 %v4244_v49  ;;  %6870 = vst [vmem:[#allocation24_spill] sm:$0xff] %v4290_v1  ;;  %v4315_v11 = vld [vmem:[#allocation11 + $0x78] sm:$0xff]  ;;  %v4321_v14 = vld [vmem:[#allocation11 + $0x60] sm:$0xff] }
  0x56   :  { %510 = vmatpush.msrb.mxu1 %v276_v15  ;;  %681 = vmatpush.msrb.mxu2 %v4248_v50  ;;  %6873 = vst [vmem:[#allocation27_spill] sm:$0xff] %v4321_v14  ;;  %v4323_v15 = vld [vmem:[#allocation11 + $0x68] sm:$0xff] }
  0x57   :  { %470 = vmatpush.msrb.mxu0 %v225_v16  ;;  %701 = vmatpush.msrb.mxu3 %v4250_v51 }
  0x58   :  { %511 = vmatpush.msrb.mxu1 %v273_v19  ;;  %401 = vmatmul.f32.gmra.mxu2 %v4169_v6  ;;  %v4334_v19 = vld [vmem:[#allocation6 + $0xf8] sm:$0xff] }
  0x59   :  { %322 = vmatmul.f32.gmra.mxu0 %v4183_v17  ;;  %682 = vmatpush.msrb.mxu2 %v4252_v52  ;;  %6877 = vst [vmem:[#allocation31_spill] sm:$0xff] %v4334_v19 }
  0x5a   :  { %363 = vmatmul.f32.gmra.mxu1 %v4188_v18  ;;  %471 = vmatpush.msrb.mxu0 %v222_v20  ;;  %v4336_v20 = vld [vmem:[#allocation8 + $0x78] sm:$0xff] }
  0x5b   :  { %512 = vmatpush.msrb.mxu1 %v270_v21  ;;  %442 = vmatmul.f32.gmra.mxu3 %v4174_v7  ;;  %6878 = vst [vmem:[#allocation32_spill] sm:$0xff] %v4336_v20 }
  0x5c   :  { %472 = vmatpush.msrb.mxu0 %v219_v22  ;;  %702 = vmatpush.msrb.mxu3 %v4256_v53  ;;  %v4340_v22 = vld [vmem:[#allocation11 + $0x48] sm:$0xff] }
  0x5d   :  { %513 = vmatpush.msrb.mxu1 %v267_v23  ;;  %6879 = vst [vmem:[#allocation33_spill] sm:$0xff] %v4340_v22  ;;  %v4342_v23 = vld [vmem:[#allocation11 + $0x50] sm:$0xff] }
  0x5e   :  { %473 = vmatpush.msrb.mxu0 %v216_v24  ;;  %6880 = vst [vmem:[#allocation34_spill] sm:$0xff] %v4342_v23  ;;  %v4346_v24 = vld [vmem:[#allocation6 + $0xe8] sm:$0xff] }
  0x5f   :  { %514 = vmatpush.msrb.mxu1 %v264_v26  ;;  %6881 = vst [vmem:[#allocation35_spill] sm:$0xff] %v4346_v24 }
  0x60   :  { %474 = vmatpush.msrb.mxu0 %v213_v25  ;;  %404 = vmatmul.f32.gmra.mxu2 %v4183_v17  ;;  %v4348_v25 = vld [vmem:[#allocation8 + $0x70] sm:$0xff] }
  0x61   :  { %325 = vmatmul.f32.gmra.mxu0 %v4197_v27  ;;  %515 = vmatpush.msrb.mxu1 %v261_v30  ;;  %6882 = vst [vmem:[#allocation36_spill] sm:$0xff] %v4348_v25 }
  0x62   :  { %366 = vmatmul.f32.gmra.mxu1 %v4202_v28  ;;  %475 = vmatpush.msrb.mxu0 %v210_v29  ;;  %v4356_v29 = vld [vmem:[#allocation6 + $0xd8] sm:$0xff] }
  0x63   :  { %516 = vmatpush.msrb.mxu1 %v258_v32  ;;  %445 = vmatmul.f32.gmra.mxu3 %v4188_v18  ;;  %6885 = vst [vmem:[#allocation39_spill] sm:$0xff] %v4356_v29  ;;  %v4363_v32 = vld [vmem:[#allocation11 + $0x18] sm:$0xff] }
  0x64   :  { %476 = vmatpush.msrb.mxu0 %v207_v31  ;;  %v4361_v31 = vld [vmem:[#allocation8 + $0x68] sm:$0xff]  ;;  %6887 = vst [vmem:[#allocation41_spill] sm:$0xff] %v4363_v32 }
  0x65   :  { %517 = vmatpush.msrb.mxu1 %v255_v34  ;;  %6886 = vst [vmem:[#allocation40_spill] sm:$0xff] %v4361_v31 }
  0x66   :  { %477 = vmatpush.msrb.mxu0 %v204_v33  ;;  %v4365_v33 = vld [vmem:[#allocation11 + $0x20] sm:$0xff] }
  0x67   :  { %518 = vmatpush.msrb.mxu1 %v252_v36  ;;  %6888 = vst [vmem:[#allocation42_spill] sm:$0xff] %v4365_v33  ;;  %v4371_v36 = vld [vmem:[#allocation8 + $0x60] sm:$0xff] }
  0x68   :  { %478 = vmatpush.msrb.mxu0 %v201_v35  ;;  %407 = vmatmul.f32.gmra.mxu2 %v4197_v27  ;;  %v4369_v35 = vld [vmem:[#allocation6 + $0xc8] sm:$0xff]  ;;  %6890 = vst [vmem:[#allocation44_spill] sm:$0xff] %v4371_v36 }
  0x69   :  { %328 = vmatmul.f32.gmra.mxu0 %v188_v37  ;;  %519 = vmatpush.msrb.mxu1 %v249_v40  ;;  %6889 = vst [vmem:[#allocation43_spill] sm:$0xff] %v4369_v35 }
  0x6a   :  { %369 = vmatmul.f32.gmra.mxu1 %v189_v38  ;;  %479 = vmatpush.msrb.mxu0 %v198_v39 }
  0x6b   :  { %520 = vmatpush.msrb.mxu1 %v246_v41  ;;  %448 = vmatmul.f32.gmra.mxu3 %v4202_v28 }
  0x6c   :  { %795 = vmatpush.msra.mxu0 %v4334_v19  ;;  %v4529_v19 = vld [vmem:[#allocation6 + $0x18] sm:$0xff] }
  0x6d   :  { %871 = vmatpush.msra.mxu1 %v4336_v20  ;;  %6923 = vst [vmem:[#allocation77_spill] sm:$0xff] %v4529_v19  ;;  %v4533_v20 = vld [vmem:[#allocation8 + $0x8] sm:$0xff] }
  0x6e   :  { %796 = vmatpush.msra.mxu0 %v4346_v24  ;;  %v4518_v24 = vld [vmem:[#allocation8 + $0x10] sm:$0xff]  ;;  %6924 = vst [vmem:[#allocation78_spill] sm:$0xff] %v4533_v20 }
  0x6f   :  { %872 = vmatpush.msra.mxu1 %v4348_v25  ;;  %6922 = vst [vmem:[#allocation76_spill] sm:$0xff] %v4518_v24 }
  0x70   :  { %410 = vmatmul.f32.gmra.mxu2 %v188_v37  ;;  %797 = vmatpush.msra.mxu0 %v4356_v29 }
  0x71   :  { %331 = vmatmul.f32.gmra.mxu0 %v190_v42  ;;  %873 = vmatpush.msra.mxu1 %v4361_v31 }
  0x72   :  { %372 = vmatmul.f32.gmra.mxu1 %v191_v43  ;;  %798 = vmatpush.msra.mxu0 %v4369_v35 }
  0x73   :  { %451 = vmatmul.f32.gmra.mxu3 %v189_v38  ;;  %874 = vmatpush.msra.mxu1 %v4371_v36  ;;  %v4490_v36 = vld [vmem:[#allocation8 + $0x20] sm:$0xff] }
  0x74   :  { %6918 = vst [vmem:[#allocation72_spill] sm:$0xff] %v4490_v36 }
  0x78   :  { %413 = vmatmul.f32.gmra.mxu2 %v190_v42 }
  0x79   :  { %334 = vmatmul.f32.gmra.mxu0 %v192_v44 }
  0x7a   :  { %375 = vmatmul.f32.gmra.mxu1 %v193_v45 }
  0x7b   :  { %454 = vmatmul.f32.gmra.mxu3 %v191_v43 }
  0x80   :  { %416 = vmatmul.f32.gmra.mxu2 %v192_v44 }
  0x81   :  { %337 = vmatmul.f32.gmra.mxu0 %v194_v46 }
  0x82   :  { %378 = vmatmul.f32.gmra.mxu1 %v195_v47 }
  0x83   :  { %457 = vmatmul.f32.gmra.mxu3 %v193_v45 }
  0x88   :  { %419 = vmatmul.f32.gmra.mxu2 %v194_v46 }
  0x89   :  { %480 = vmatmul.f32.vlgmr.msrb.gmra.mxu0 %v4157_v54  ;;  %v4260_v54 = vld [vmem:[#allocation11 + $0x120] sm:$0xff] }
  0x8a   :  { %521 = vmatmul.f32.vlgmr.msrb.gmra.mxu1 %v4162_v55  ;;  %v4262_v55 = vld [vmem:[#allocation11 + $0x128] sm:$0xff]  ;;  %683 = vmatpush.msrb.mxu2 %v4260_v54 }
  0x8b   :  { %460 = vmatmul.f32.gmra.mxu3 %v195_v47 }
  0x8c   :  { %703 = vmatpush.msrb.mxu3 %v4262_v55  ;;  %684 = vmatpush.msrb.mxu2 %v4266_v58 }
  0x8e   :  { %704 = vmatpush.msrb.mxu3 %v4268_v59  ;;  %685 = vmatpush.msrb.mxu2 %v4272_v60 }
  0x90   :  { %705 = vmatpush.msrb.mxu3 %v4274_v61  ;;  %686 = vmatpush.msrb.mxu2 %v4283_v63 }
  0x91   :  { %483 = vmatmul.f32.gmra.mxu0 %v4169_v6  ;;  %v4302_v6 = vld [vmem:[#allocation11 + $0xa8] sm:$0xff] }
  0x92   :  { %524 = vmatmul.f32.gmra.mxu1 %v4174_v7  ;;  %706 = vmatpush.msrb.mxu3 %v4285_v0  ;;  %v4304_v7 = vld [vmem:[#allocation11 + $0xb0] sm:$0xff] }
  0x93   :  { %687 = vmatpush.msrb.mxu2 %v4292_v2 }
  0x94   :  { %707 = vmatpush.msrb.mxu3 %v4294_v3 }
  0x95   :  { %688 = vmatpush.msrb.mxu2 %v4302_v6 }
  0x96   :  { %708 = vmatpush.msrb.mxu3 %v4304_v7 }
  0x97   :  { %689 = vmatpush.msrb.mxu2 %v4309_v9 }
  0x98   :  { %709 = vmatpush.msrb.mxu3 %v4311_v10 }
  0x99   :  { %486 = vmatmul.f32.gmra.mxu0 %v4183_v17  ;;  %690 = vmatpush.msrb.mxu2 %v4315_v11 }
  0x9a   :  { %527 = vmatmul.f32.gmra.mxu1 %v4188_v18  ;;  %710 = vmatpush.msrb.mxu3 %v4317_v12  ;;  %v4330_v18 = vperm.slane %v4279_v62, 1 }
  0x9b   :  { %691 = vmatpush.msrb.mxu2 %v4321_v14 }
  0x9c   :  { %6876 = vst [vmem:[#allocation30_spill] sm:$0xff] %v4330_v18  ;;  %711 = vmatpush.msrb.mxu3 %v4323_v15 }
  0x9d   :  { %692 = vmatpush.msrb.mxu2 %v4340_v22  ;;  %v4565_v22 = vld [vmem:[#allocation11 + $0x28] sm:$0xff] }
  0x9e   :  { %712 = vmatpush.msrb.mxu3 %v4342_v23  ;;  %v4576_v23 = vld [vmem:[#allocation6] sm:$0xff] }
  0xa1   :  { %489 = vmatmul.f32.gmra.mxu0 %v4197_v27  ;;  %v4352_v27 = vld [vmem:[#allocation11 + $0x30] sm:$0xff] }
  0xa2   :  { %530 = vmatmul.f32.gmra.mxu1 %v4202_v28  ;;  %6883 = vst [vmem:[#allocation37_spill] sm:$0xff] %v4352_v27  ;;  %v4354_v28 = vld [vmem:[#allocation11 + $0x38] sm:$0xff]  ;;  %693 = vmatpush.msrb.mxu2 %v4352_v27 }
  0xa3   :  { %6884 = vst [vmem:[#allocation38_spill] sm:$0xff] %v4354_v28  ;;  %713 = vmatpush.msrb.mxu3 %v4354_v28  ;;  %v4557_v28 = vld [vmem:[#allocation11 + $0x40] sm:$0xff] }
  0xa4   :  { %694 = vmatpush.msrb.mxu2 %v4363_v32 }
  0xa5   :  { %714 = vmatpush.msrb.mxu3 %v4365_v33 }
  0xa9   :  { %492 = vmatmul.f32.gmra.mxu0 %v188_v37  ;;  %v4377_v37 = vld [vmem:[#allocation11] sm:$0xff] }
  0xaa   :  { %533 = vmatmul.f32.gmra.mxu1 %v189_v38  ;;  %6891 = vst [vmem:[#allocation45_spill] sm:$0xff] %v4377_v37  ;;  %v4379_v38 = vld [vmem:[#allocation11 + $0x8] sm:$0xff]  ;;  %695 = vmatpush.msrb.mxu2 %v4377_v37  ;;  %v4535_v37 = vld [vmem:[#allocation11 + $0x70] sm:$0xff] }
  0xab   :  { %6892 = vst [vmem:[#allocation46_spill] sm:$0xff] %v4379_v38  ;;  %715 = vmatpush.msrb.mxu3 %v4379_v38  ;;  %v4537_v38 = vld [vmem:[#allocation6 + $0x40] sm:$0xff] }
  0xb1   :  { %495 = vmatmul.f32.gmra.mxu0 %v190_v42  ;;  %v4387_v42 = vld [vmem:[#allocation11 + $0x178] sm:$0xff] }
  0xb2   :  { %536 = vmatmul.f32.gmra.mxu1 %v191_v43  ;;  %6895 = vst [vmem:[#allocation49_spill] sm:$0xff] %v4387_v42  ;;  %v4389_v43 = vld [vmem:[#allocation6 + $0xf0] sm:$0xff]  ;;  %720 = vmatpush.msra.mxu2 %v4387_v42 }
  0xb3   :  { %775 = vmatpush.msra.mxu3 %v4389_v43 }
  0xb9   :  { %498 = vmatmul.f32.gmra.mxu0 %v192_v44  ;;  %v4391_v44 = vld [vmem:[#allocation6 + $0xb8] sm:$0xff] }
  0xba   :  { %539 = vmatmul.f32.gmra.mxu1 %v193_v45  ;;  %6896 = vst [vmem:[#allocation50_spill] sm:$0xff] %v4391_v44  ;;  %v4395_v45 = vld [vmem:[#allocation8 + $0x58] sm:$0xff]  ;;  %799 = vmatpush.msra.mxu0 %v4391_v44  ;;  %v4482_v44 = vld [vmem:[#allocation6 + $0x48] sm:$0xff] }
  0xbb   :  { %6897 = vst [vmem:[#allocation51_spill] sm:$0xff] %v4395_v45  ;;  %875 = vmatpush.msra.mxu1 %v4395_v45 }
  0xbc   :  { %6915 = vst [vmem:[#allocation69_spill] sm:$0xff] %v4482_v44 }
  0xc1   :  { %501 = vmatmul.f32.gmra.mxu0 %v194_v46  ;;  %v4399_v46 = vld [vmem:[#allocation11 + $0x160] sm:$0xff] }
  0xc2   :  { %542 = vmatmul.f32.gmra.mxu1 %v195_v47  ;;  %6898 = vst [vmem:[#allocation52_spill] sm:$0xff] %v4399_v46  ;;  %v4401_v47 = vld [vmem:[#allocation6 + $0xe0] sm:$0xff]  ;;  %721 = vmatpush.msra.mxu2 %v4399_v46 }
  0xc3   :  { %776 = vmatpush.msra.mxu3 %v4401_v47 }
  0xc6   :  { %v317_v56 = vpop.f32.mrf.mxu0 }
  0xc7   :  { %v358_v57 = vpop.f32.mrf.mxu1  ;;  %v318_v8 = vadd.f32 %v317_v56, %v4290_v1  ;;  %v4403_v56 = vld [vmem:[#allocation6 + $0xa8] sm:$0xff]  ;;  %v4441_v1 = vld [vmem:[#allocation11 + $0x118] sm:$0xff] }
  0xc8   :  { %6899 = vst [vmem:[#allocation53_spill] sm:$0xff] %v4403_v56  ;;  %800 = vmatpush.msra.mxu0 %v4403_v56 }
  0xc9   :  { %v359_v13 = vadd.f32 %v358_v57, %v318_v8  ;;  %v4407_v57 = vld [vmem:[#allocation8 + $0x50] sm:$0xff] }
  0xca   :  { %6900 = vst [vmem:[#allocation54_spill] sm:$0xff] %v4407_v57  ;;  %v4409_v8 = vld [vmem:[#allocation11 + $0x148] sm:$0xff]  ;;  %876 = vmatpush.msra.mxu1 %v4407_v57 }
  0xcb   :  { %v3229_v26 = vmul.f32 -1.442695, %v359_v13  ;;  %6901 = vst [vmem:[#allocation55_spill] sm:$0xff] %v4409_v8  ;;  %v4411_v13 = vld [vmem:[#allocation6 + $0xd0] sm:$0xff]  ;;  %722 = vmatpush.msra.mxu2 %v4409_v8  ;;  %v4474_v57 = vld [vmem:[#allocation8 + $0x28] sm:$0xff] }
  0xcc   :  { %777 = vmatpush.msra.mxu3 %v4411_v13  ;;  %6914 = vst [vmem:[#allocation68_spill] sm:$0xff] %v4474_v57 }
  0xcd   :  { %3283 = vpow2.f32 %v3229_v26  ;;  %v4415_v26 = vld [vmem:[#allocation6 + $0x98] sm:$0xff] }
  0xce   :  { %v4296_v4 = vpop.f32.mrf.mxu0  ;;  %6902 = vst [vmem:[#allocation56_spill] sm:$0xff] %v4415_v26  ;;  %801 = vmatpush.msra.mxu0 %v4415_v26  ;;  %v4443_v26 = vld [vmem:[#allocation6 + $0xb0] sm:$0xff] }
  0xcf   :  { %6871 = vst [vmem:[#allocation25_spill] sm:$0xff] %v4296_v4  ;;  %v4298_v5 = vpop.f32.mrf.mxu1 }
  0xd0   :  { %6872 = vst [vmem:[#allocation26_spill] sm:$0xff] %v4298_v5 }
  0xd3   :  { %v399_v21 = vpop.f32.mrf.mxu2 }
  0xd4   :  { %v400_v30 = vadd.f32 %v399_v21, %v4330_v18 }
  0xd6   :  { %v4325_v16 = vpop.f32.mrf.mxu0  ;;  %v440_v34 = vpop.f32.mrf.mxu3 }
  0xd7   :  { %6874 = vst [vmem:[#allocation28_spill] sm:$0xff] %v4325_v16  ;;  %v4327_v17 = vpop.f32.mrf.mxu1  ;;  %v441_v41 = vadd.f32 %v440_v34, %v400_v30  ;;  %v4417_v30 = vld [vmem:[#allocation8 + $0x48] sm:$0xff]  ;;  %v4419_v34 = vld [vmem:[#allocation11 + $0x130] sm:$0xff] }
  0xd8   :  { %6875 = vst [vmem:[#allocation29_spill] sm:$0xff] %v4327_v17  ;;  %v4425_v17 = vld [vmem:[#allocation6 + $0x88] sm:$0xff]  ;;  %877 = vmatpush.msra.mxu1 %v4417_v30  ;;  %723 = vmatpush.msra.mxu2 %v4419_v34 }
  0xd9   :  { %v3230_v21 = vmul.f32 -1.442695, %v441_v41  ;;  %6903 = vst [vmem:[#allocation57_spill] sm:$0xff] %v4417_v30  ;;  %v4427_v41 = vld [vmem:[#allocation8 + $0x40] sm:$0xff]  ;;  %802 = vmatpush.msra.mxu0 %v4425_v17  ;;  %v4445_v30 = vld [vmem:[#allocation6 + $0x78] sm:$0xff] }
  0xda   :  { %6904 = vst [vmem:[#allocation58_spill] sm:$0xff] %v4419_v34  ;;  %878 = vmatpush.msra.mxu1 %v4427_v41  ;;  %724 = vmatpush.msra.mxu2 %v4441_v1 }
  0xdb   :  { %6905 = vst [vmem:[#allocation59_spill] sm:$0xff] %v4425_v17  ;;  %3285 = vpow2.f32 %v3230_v21  ;;  %803 = vmatpush.msra.mxu0 %v4445_v30  ;;  %v4453_v21 = vld [vmem:[#allocation11 + $0x100] sm:$0xff]  ;;  %v4462_v17 = vld [vmem:[#allocation8 + $0x30] sm:$0xff] }
  0xdc   :  { %6906 = vst [vmem:[#allocation60_spill] sm:$0xff] %v4427_v41  ;;  %725 = vmatpush.msra.mxu2 %v4453_v21  ;;  %v4470_v41 = vld [vmem:[#allocation6 + $0x58] sm:$0xff] }
  0xdd   :  { %6909 = vst [vmem:[#allocation63_spill] sm:$0xff] %v4445_v30  ;;  %v4466_v30 = vld [vmem:[#allocation11 + $0xe8] sm:$0xff] }
  0xde   :  { %v4381_v39 = vpop.f32.mrf.mxu0  ;;  %6912 = vst [vmem:[#allocation66_spill] sm:$0xff] %v4462_v17  ;;  %726 = vmatpush.msra.mxu2 %v4466_v30 }
  0xdf   :  { %6893 = vst [vmem:[#allocation47_spill] sm:$0xff] %v4381_v39  ;;  %v4383_v40 = vpop.f32.mrf.mxu1  ;;  %v4423_v39 = vld [vmem:[#allocation6 + $0xc0] sm:$0xff] }
  0xe0   :  { %6894 = vst [vmem:[#allocation48_spill] sm:$0xff] %v4383_v40  ;;  %v3284_v40 = vpop.eup %3283  ;;  %778 = vmatpush.msra.mxu3 %v4423_v39 }
  0xe1   :  { %v4433_v16 = vadd.f32 1.0, %v3284_v40  ;;  %v4449_v40 = vld [vmem:[#allocation8 + $0x38] sm:$0xff]  ;;  %6913 = vst [vmem:[#allocation67_spill] sm:$0xff] %v4470_v41  ;;  %v3286_v56 = vpop.eup %3285 }
  0xe2   :  { %779 = vmatpush.msra.mxu3 %v4443_v26  ;;  %6910 = vst [vmem:[#allocation64_spill] sm:$0xff] %v4449_v40  ;;  %879 = vmatpush.msra.mxu1 %v4449_v40  ;;  %v4468_v40 = vld [vmem:[#allocation6 + $0x90] sm:$0xff]  ;;  %v4492_v29 = vadd.f32 1.0, %v3286_v56  ;;  %v4510_v56 = vld [vmem:[#allocation11 + $0xa0] sm:$0xff] }
  0xe3   :  { %3287 = vrcp.f32 %v4433_v16  ;;  %vm590_vm1 = vweird.f32 %v4433_v16 }
  0xe4   :  { %880 = vmatpush.msra.mxu1 %v4462_v17  ;;  %v4480_v17 = vld [vmem:[#allocation6 + $0x80] sm:$0xff]  ;;  %3289 = vrcp.f32 %v4492_v29  ;;  %vm609_vm4 = vweird.f32 %v4492_v29 }
  0xe6   :  { %v4435_v5 = vpop.f32.mrf.mxu0  ;;  %881 = vmatpush.msra.mxu1 %v4474_v57  ;;  %v4498_v57 = vld [vmem:[#allocation6 + $0x70] sm:$0xff] }
  0xe7   :  { %6907 = vst [vmem:[#allocation61_spill] sm:$0xff] %v4435_v5  ;;  %v4437_v4 = vpop.f32.mrf.mxu1  ;;  %v4457_v5 = vld [vmem:[#allocation6 + $0x68] sm:$0xff] }
  0xe8   :  { %6908 = vst [vmem:[#allocation62_spill] sm:$0xff] %v4437_v4  ;;  %v4455_v4 = vld [vmem:[#allocation6 + $0xa0] sm:$0xff]  ;;  %804 = vmatpush.msra.mxu0 %v4457_v5  ;;  %882 = vmatpush.msra.mxu1 %v4490_v36  ;;  %v4514_v36 = vld [vmem:[#allocation6 + $0x28] sm:$0xff] }
  0xe9   :  { %6911 = vst [vmem:[#allocation65_spill] sm:$0xff] %v4457_v5  ;;  %780 = vmatpush.msra.mxu3 %v4455_v4  ;;  %v4478_v5 = vld [vmem:[#allocation11 + $0xd0] sm:$0xff]  ;;  %v4500_v31 = vpop.eup %3287 }
  0xea   :  { %805 = vmatpush.msra.mxu0 %v4470_v41  ;;  %727 = vmatpush.msra.mxu2 %v4478_v5  ;;  %v4496_v41 = vld [vmem:[#allocation11 + $0xb8] sm:$0xff]  ;;  %6921 = vst [vmem:[#allocation75_spill] sm:$0xff] %v4514_v36  ;;  %v586_v25 = vmul.f32 %v4500_v31, %v4433_v16  ;;  %vm591_vm0 = vweird.f32 %v4500_v31 }
  0xeb   :  { %781 = vmatpush.msra.mxu3 %v4468_v40  ;;  %vm592_vm2 = vmor %vm590_vm1, %vm591_vm0 }
  0xec   :  { %806 = vmatpush.msra.mxu0 %v4482_v44  ;;  %728 = vmatpush.msra.mxu2 %v4496_v41  ;;  %v4512_v44 = vld [vmem:[#allocation6 + $0x60] sm:$0xff]  ;;  %v587_v27 = vsub.f32 1.0, %v586_v25  ;;  %v4567_v25 = vld [vmem:[#allocation6 + $0x10] sm:$0xff] }
  0xed   :  { %782 = vmatpush.msra.mxu3 %v4480_v17 }
  0xee   :  { %v4484_v45 = vpop.f32.mrf.mxu0  ;;  %729 = vmatpush.msra.mxu2 %v4510_v56 }
  0xef   :  { %6916 = vst [vmem:[#allocation70_spill] sm:$0xff] %v4484_v45  ;;  %v4486_v35 = vpop.f32.mrf.mxu1  ;;  %783 = vmatpush.msra.mxu3 %v4498_v57  ;;  %v4506_v45 = vld [vmem:[#allocation8 + $0x18] sm:$0xff] }
  0xf0   :  { %6917 = vst [vmem:[#allocation71_spill] sm:$0xff] %v4486_v35  ;;  %v4504_v35 = vld [vmem:[#allocation6 + $0x38] sm:$0xff]  ;;  %883 = vmatpush.msra.mxu1 %v4506_v45 }
  0xf1   :  { %6919 = vst [vmem:[#allocation73_spill] sm:$0xff] %v4504_v35  ;;  %807 = vmatpush.msra.mxu0 %v4504_v35  ;;  %784 = vmatpush.msra.mxu3 %v4512_v44  ;;  %v4525_v35 = vld [vmem:[#allocation11 + $0x88] sm:$0xff] }
  0xf2   :  { %6920 = vst [vmem:[#allocation74_spill] sm:$0xff] %v4506_v45  ;;  %884 = vmatpush.msra.mxu1 %v4518_v24  ;;  %v4527_v45 = vld [vmem:[#allocation6 + $0x50] sm:$0xff]  ;;  %730 = vmatpush.msra.mxu2 %v4525_v35  ;;  %v4543_v24 = vld [vmem:[#allocation8] sm:$0xff] }
  0xf3   :  { %808 = vmatpush.msra.mxu0 %v4514_v36  ;;  %785 = vmatpush.msra.mxu3 %v4527_v45  ;;  %v4541_v36 = vld [vmem:[#allocation6 + $0x8] sm:$0xff]  ;;  %6926 = vst [vmem:[#allocation80_spill] sm:$0xff] %v4543_v24 }
  0xf4   :  { %885 = vmatpush.msra.mxu1 %v4533_v20  ;;  %6925 = vst [vmem:[#allocation79_spill] sm:$0xff] %v4541_v36  ;;  %731 = vmatpush.msra.mxu2 %v4535_v37  ;;  %v4555_v20 = vld [vmem:[#allocation6 + $0x30] sm:$0xff] }
  0xf5   :  { %809 = vmatpush.msra.mxu0 %v4529_v19  ;;  %786 = vmatpush.msra.mxu3 %v4537_v38  ;;  %v4553_v19 = vld [vmem:[#allocation11 + $0x58] sm:$0xff] }
  0xf6   :  { %v4545_v32 = vpop.f32.mrf.mxu0  ;;  %886 = vmatpush.msra.mxu1 %v4543_v24  ;;  %732 = vmatpush.msra.mxu2 %v4553_v19  ;;  %v4574_v24 = vld [vmem:[#allocation11 + $0x10] sm:$0xff] }
  0xf7   :  { %6927 = vst [vmem:[#allocation81_spill] sm:$0xff] %v4545_v32  ;;  %v4547_v33 = vpop.f32.mrf.mxu1  ;;  %810 = vmatpush.msra.mxu0 %v4541_v36  ;;  %787 = vmatpush.msra.mxu3 %v4555_v20  ;;  %v4563_v32 = vpop.eup %3289  ;;  %v588_v36 = vmul.f32 %v4500_v31, %v587_v27 }
  0xf8   :  { %6928 = vst [vmem:[#allocation82_spill] sm:$0xff] %v4547_v33  ;;  %v4561_v33 = vld [vmem:[#allocation6 + $0x20] sm:$0xff]  ;;  %1020 = vmatpush.msrb.mxu1 %v4389_v43  ;;  %733 = vmatpush.msra.mxu2 %v4557_v28  ;;  %v605_v14 = vmul.f32 %v4563_v32, %v4492_v29  ;;  %vm610_vm5 = vweird.f32 %v4563_v32 }
  0xf9   :  { %938 = vmatpush.msrb.mxu0 %v4387_v42  ;;  %788 = vmatpush.msra.mxu3 %v4561_v33  ;;  %v4596_v42 = vpop.f32.mrf.mxu3  ;;  %vm4628_vm6 = vmor %vm609_vm4, %vm610_vm5 }
  0xfa   :  { %1021 = vmatpush.msrb.mxu1 %v4401_v47  ;;  %734 = vmatpush.msra.mxu2 %v4565_v22  ;;  %v589_v47 = vadd.f32 %v4500_v31, %v588_v36  ;;  %v4606_v36 = vperm.slane %v4279_v62, 2 }
  0xfb   :  { %939 = vmatpush.msrb.mxu0 %v4399_v46  ;;  %789 = vmatpush.msra.mxu3 %v4567_v25  ;;  %v4594_v46 = vpop.f32.mrf.mxu2 }
  0xfc   :  { %1022 = vmatpush.msrb.mxu1 %v4411_v13  ;;  %735 = vmatpush.msra.mxu2 %v4574_v24  ;;  %v606_v13 = vsub.f32 1.0, %v605_v14  ;;  %6931 = vst [vmem:[#allocation85_spill] sm:$0xff] %v4606_v36 }
  0xfd   :  { %940 = vmatpush.msrb.mxu0 %v4409_v8  ;;  %790 = vmatpush.msra.mxu3 %v4576_v23  ;;  %v593_v8 = vsel %vm592_vm2, %v4500_v31, %v589_v47  ;;  %v615_v31 = vand.u32 2147483648, %v4492_v29 }
  0xfe   :  { %v4586_v27 = vpop.f32.mrf.mxu0  ;;  %1023 = vmatpush.msrb.mxu1 %v4423_v39  ;;  %v607_v14 = vmul.f32 %v4563_v32, %v606_v13 }
  0xff   :  { %6929 = vst [vmem:[#allocation83_spill] sm:$0xff] %v4586_v27  ;;  %v4588_v43 = vpop.f32.mrf.mxu1  ;;  %941 = vmatpush.msrb.mxu0 %v4419_v34  ;;  %v596_v27 = vand.u32 2147483648, %v4433_v16  ;;  %v4612_v34 = vld [vmem:[#allocation9] ss:$0 sm:$0xff] }
 0x100   :  { %6930 = vst [vmem:[#allocation84_spill] sm:$0xff] %v4588_v43  ;;  %v594_v43 = vand.u32 2147483647, %v4433_v16  ;;  %1024 = vmatpush.msrb.mxu1 %v4443_v26 }
 0x101   :  { %942 = vmatpush.msrb.mxu0 %v4441_v1  ;;  %v597_v39 = vor.u32 1.1754944e-38, %v596_v27  ;;  %v4622_v27 = vpop.f32.mrf.mxu3 }
 0x102   :  { %1025 = vmatpush.msrb.mxu1 %v4455_v4  ;;  %vm595_vm3 = vcmp.eq.f32.partialorder %v594_v43, 8.507059e+37  ;;  %6932 = vst [vmem:[#allocation86_spill] sm:$0xff] %v4622_v27  ;;  %v613_v43 = vand.u32 2147483647, %v4492_v29 }
 0x103   :  { %943 = vmatpush.msrb.mxu0 %v4453_v21  ;;  %v598_v26 = vsel %vm595_vm3, %v597_v39, %v593_v8  ;;  %v4620_v47 = vpop.f32.mrf.mxu2 }
 0x104   :  { %1026 = vmatpush.msrb.mxu1 %v4468_v40  ;;  %v608_v40 = vadd.f32 %v4563_v32, %v607_v14  ;;  %v619_v39 = vmul.f32 %v4612_v34, %v598_v26  ;;  %vm614_vm7 = vcmp.eq.f32.partialorder %v613_v43, 8.507059e+37 }
 0x105   :  { %944 = vmatpush.msrb.mxu0 %v4466_v30 }
 0x106   :  { %v481_v62 = vpop.f32.mrf.mxu0  ;;  %1027 = vmatpush.msrb.mxu1 %v4480_v17  ;;  %v612_v17 = vsel %vm4628_vm6, %v4563_v32, %v608_v40 }
 0x107   :  { %v522_v16 = vpop.f32.mrf.mxu1  ;;  %v482_v4 = vadd.f32 %v481_v62, %v4606_v36  ;;  %945 = vmatpush.msrb.mxu0 %v4478_v5  ;;  %v616_v62 = vor.u32 1.1754944e-38, %v615_v31 }
 0x108   :  { %1028 = vmatpush.msrb.mxu1 %v4498_v57 }
 0x109   :  { %v523_v13 = vadd.f32 %v522_v16, %v482_v4  ;;  %946 = vmatpush.msrb.mxu0 %v4496_v41  ;;  %v617_v57 = vsel %vm614_vm7, %v616_v62, %v612_v17  ;;  %v4648_v26 = vpop.f32.mrf.mxu3 }
 0x10a   :  { %1029 = vmatpush.msrb.mxu1 %v4512_v44  ;;  %6936 = vst [vmem:[#allocation88_spill] sm:$0xff] %v4648_v26  ;;  %v622_v32 = vsub.f32 1.0, %v617_v57  ;;  %v6951_v57 = vld [vmem:[#allocation45_spill] sm:$0xff] }
 0x10b   :  { %v620_v27 = vadd.f32 %v619_v39, %v523_v13  ;;  %947 = vmatpush.msrb.mxu0 %v4510_v56  ;;  %v4646_v16 = vpop.f32.mrf.mxu2 }
 0x10c   :  { %1030 = vmatpush.msrb.mxu1 %v4527_v45  ;;  %6935 = vst [vmem:[#allocation87_spill] sm:$0xff] %v4646_v16  ;;  %v5110_v16 = vld [vmem:[#allocation11 + $0x148] sm:$0xff] }
 0x10d   :  { %3291 = vtanh.f32 %v620_v27  ;;  %948 = vmatpush.msrb.mxu0 %v4525_v35 }
 0x10e   :  { %v4642_v29 = vpop.f32.mrf.mxu0  ;;  %1031 = vmatpush.msrb.mxu1 %v4537_v38 }
 0x10f   :  { %v4644_v14 = vpop.f32.mrf.mxu1  ;;  %949 = vmatpush.msrb.mxu0 %v4535_v37 }
 0x110   :  { %1032 = vmatpush.msrb.mxu1 %v4555_v20 }
 0x111   :  { %950 = vmatpush.msrb.mxu0 %v4553_v19 }
 0x112   :  { %1033 = vmatpush.msrb.mxu1 %v4561_v33  ;;  %v452_v33 = vpop.f32.mrf.mxu3 }
 0x113   :  { %v3292_v44 = vpop.eup %3291  ;;  %951 = vmatpush.msrb.mxu0 %v4557_v28  ;;  %v411_v4 = vpop.f32.mrf.mxu2 }
 0x114   :  { %v4656_v45 = vmul.f32 %v3292_v44, %v622_v32  ;;  %1034 = vmatpush.msrb.mxu1 %v4567_v25  ;;  %v412_v27 = vadd.f32 %v411_v4, %v4330_v18  ;;  %v6952_v44 = vld [vmem:[#allocation32_spill] sm:$0xff]  ;;  %v6956_v4 = vld [vmem:[#allocation35_spill] sm:$0xff] }
 0x115   :  { %952 = vmatpush.msrb.mxu0 %v4565_v22 }
 0x116   :  { %696 = vmatmul.f32.vlgmr.msrb.gmra.mxu2 %v4656_v45  ;;  %716 = vmatmul.f32.vlgmr.msrb.gmra.mxu3 %v4656_v45  ;;  %v487_v38 = vpop.f32.mrf.mxu0  ;;  %v4672_v40 = vadd.f32 %v452_v33, %v412_v27  ;;  %v6957_v33 = vld [vmem:[#allocation40_spill] sm:$0xff]  ;;  %v6958_v27 = vld [vmem:[#allocation39_spill] sm:$0xff] }
 0x117   :  { %v528_v31 = vpop.f32.mrf.mxu1  ;;  %811 = vmatmul.f32.vlgmr.msra.gmra.mxu0 %v4656_v45  ;;  %887 = vmatmul.f32.vlgmr.msra.gmra.mxu1 %v4656_v45  ;;  %v488_v20 = vadd.f32 %v487_v38, %v4606_v36  ;;  %v6953_v38 = vld [vmem:[#allocation31_spill] sm:$0xff] }
 0x118   :  { %918 = vmatpush.msrb.mxu3 %v4244_v49  ;;  %898 = vmatpush.msrb.mxu2 %v4242_v48  ;;  %6937 = vst [vmem:[#allocation89_spill] sm:$0xff] %v4672_v40 }
 0x119   :  { %v4668_v25 = vadd.f32 %v528_v31, %v488_v20  ;;  %953 = vmatpush.msrb.mxu0 %v4574_v24  ;;  %1035 = vmatpush.msrb.mxu1 %v4576_v23  ;;  %v6955_v20 = vld [vmem:[#allocation36_spill] sm:$0xff] }
 0x11a   :  { %919 = vmatpush.msrb.mxu3 %v4250_v51  ;;  %899 = vmatpush.msrb.mxu2 %v4248_v50 }
 0x11b   :  { %1127 = vmatpush.msra.mxu0 %v4242_v48  ;;  %1147 = vmatpush.msra.mxu1 %v4244_v49  ;;  %v414_v8 = vpop.f32.mrf.mxu2  ;;  %v455_v48 = vpop.f32.mrf.mxu3 }
 0x11c   :  { %920 = vmatpush.msrb.mxu3 %v4256_v53  ;;  %900 = vmatpush.msrb.mxu2 %v4252_v52  ;;  %v415_v49 = vadd.f32 %v414_v8, %v4330_v18  ;;  %v6962_v8 = vld [vmem:[#allocation50_spill] sm:$0xff] }
 0x11d   :  { %1128 = vmatpush.msra.mxu0 %v4248_v50  ;;  %1148 = vmatpush.msra.mxu1 %v4250_v51 }
 0x11e   :  { %736 = vmatmul.f32.vlgmr.msra.gmra.mxu2 %v4656_v45  ;;  %791 = vmatmul.f32.vlgmr.msra.gmra.mxu3 %v4656_v45  ;;  %v490_v23 = vpop.f32.mrf.mxu0  ;;  %v4694_v51 = vadd.f32 %v455_v48, %v415_v49  ;;  %v6963_v48 = vld [vmem:[#allocation54_spill] sm:$0xff]  ;;  %v6964_v49 = vld [vmem:[#allocation53_spill] sm:$0xff] }
 0x11f   :  { %v531_v43 = vpop.f32.mrf.mxu1  ;;  %v491_v13 = vadd.f32 %v490_v23, %v4606_v36  ;;  %921 = vmatpush.msrb.mxu3 %v4262_v55  ;;  %901 = vmatpush.msrb.mxu2 %v4260_v54  ;;  %v6959_v23 = vld [vmem:[#allocation44_spill] sm:$0xff] }
 0x120   :  { %1129 = vmatpush.msra.mxu0 %v4252_v52  ;;  %1149 = vmatpush.msra.mxu1 %v4256_v53  ;;  %6939 = vst [vmem:[#allocation91_spill] sm:$0xff] %v4694_v51 }
 0x121   :  { %v4690_v50 = vadd.f32 %v531_v43, %v491_v13  ;;  %922 = vmatpush.msrb.mxu3 %v4268_v59  ;;  %902 = vmatpush.msrb.mxu2 %v4266_v58  ;;  %v6960_v43 = vld [vmem:[#allocation43_spill] sm:$0xff] }
 0x122   :  { %1130 = vmatpush.msra.mxu0 %v4260_v54  ;;  %1150 = vmatpush.msra.mxu1 %v4262_v55  ;;  %v6961_v13 = vld [vmem:[#allocation51_spill] sm:$0xff] }
 0x123   :  { %6938 = vst [vmem:[#allocation90_spill] sm:$0xff] %v4690_v50  ;;  %923 = vmatpush.msrb.mxu3 %v4274_v61  ;;  %903 = vmatpush.msrb.mxu2 %v4272_v60  ;;  %v417_v55 = vpop.f32.mrf.mxu2  ;;  %v458_v39 = vpop.f32.mrf.mxu3 }
 0x124   :  { %1131 = vmatpush.msra.mxu0 %v4266_v58  ;;  %1151 = vmatpush.msra.mxu1 %v4268_v59  ;;  %v418_v58 = vadd.f32 %v417_v55, %v4330_v18  ;;  %v6968_v55 = vld [vmem:[#allocation59_spill] sm:$0xff] }
 0x125   :  { %924 = vmatpush.msrb.mxu3 %v4285_v0  ;;  %904 = vmatpush.msrb.mxu2 %v4283_v63 }
 0x126   :  { %v493_v52 = vpop.f32.mrf.mxu0  ;;  %1132 = vmatpush.msra.mxu0 %v4272_v60  ;;  %1152 = vmatpush.msra.mxu1 %v4274_v61  ;;  %v4716_v60 = vadd.f32 %v458_v39, %v418_v58  ;;  %v6969_v39 = vld [vmem:[#allocation64_spill] sm:$0xff]  ;;  %v6970_v58 = vld [vmem:[#allocation63_spill] sm:$0xff] }
 0x127   :  { %v534_v53 = vpop.f32.mrf.mxu1  ;;  %v494_v54 = vadd.f32 %v493_v52, %v4606_v36  ;;  %925 = vmatpush.msrb.mxu3 %v4294_v3  ;;  %905 = vmatpush.msrb.mxu2 %v4292_v2  ;;  %v6965_v52 = vld [vmem:[#allocation57_spill] sm:$0xff] }
 0x128   :  { %1133 = vmatpush.msra.mxu0 %v4283_v63  ;;  %1153 = vmatpush.msra.mxu1 %v4285_v0  ;;  %6941 = vst [vmem:[#allocation93_spill] sm:$0xff] %v4716_v60 }
 0x129   :  { %v4712_v59 = vadd.f32 %v534_v53, %v494_v54  ;;  %926 = vmatpush.msrb.mxu3 %v4304_v7  ;;  %906 = vmatpush.msrb.mxu2 %v4302_v6  ;;  %v6966_v53 = vld [vmem:[#allocation56_spill] sm:$0xff] }
 0x12a   :  { %1134 = vmatpush.msra.mxu0 %v4292_v2  ;;  %1154 = vmatpush.msra.mxu1 %v4294_v3  ;;  %v6942_v2 = vld [vmem:[#allocation27_spill] sm:$0xff]  ;;  %v6967_v54 = vld [vmem:[#allocation60_spill] sm:$0xff] }
 0x12b   :  { %6940 = vst [vmem:[#allocation92_spill] sm:$0xff] %v4712_v59  ;;  %927 = vmatpush.msrb.mxu3 %v4311_v10  ;;  %907 = vmatpush.msrb.mxu2 %v4309_v9 }
 0x12c   :  { %1135 = vmatpush.msra.mxu0 %v4302_v6  ;;  %1155 = vmatpush.msra.mxu1 %v4304_v7  ;;  %v6944_v6 = vld [vmem:[#allocation34_spill] sm:$0xff]  ;;  %v6945_v7 = vld [vmem:[#allocation33_spill] sm:$0xff] }
 0x12d   :  { %928 = vmatpush.msrb.mxu3 %v4317_v12  ;;  %908 = vmatpush.msrb.mxu2 %v4315_v11 }
 0x12e   :  { %v496_v61 = vpop.f32.mrf.mxu0  ;;  %1136 = vmatpush.msra.mxu0 %v4309_v9  ;;  %1156 = vmatpush.msra.mxu1 %v4311_v10  ;;  %v6946_v9 = vld [vmem:[#allocation38_spill] sm:$0xff]  ;;  %v6947_v10 = vld [vmem:[#allocation37_spill] sm:$0xff] }
 0x12f   :  { %v537_v63 = vpop.f32.mrf.mxu1  ;;  %v497_v0 = vadd.f32 %v496_v61, %v4606_v36  ;;  %929 = vmatpush.msrb.mxu3 %v4323_v15  ;;  %909 = vmatpush.msrb.mxu2 %v6942_v2  ;;  %v6971_v61 = vld [vmem:[#allocation66_spill] sm:$0xff] }
 0x130   :  { %1137 = vmatpush.msra.mxu0 %v4315_v11  ;;  %1157 = vmatpush.msra.mxu1 %v4317_v12  ;;  %v6948_v11 = vld [vmem:[#allocation42_spill] sm:$0xff]  ;;  %v6949_v12 = vld [vmem:[#allocation41_spill] sm:$0xff] }
 0x131   :  { %v4733_v3 = vadd.f32 %v537_v63, %v497_v0  ;;  %930 = vmatpush.msrb.mxu3 %v6944_v6  ;;  %910 = vmatpush.msrb.mxu2 %v6945_v7  ;;  %v6972_v63 = vld [vmem:[#allocation65_spill] sm:$0xff]  ;;  %v6973_v0 = vld [vmem:[#allocation68_spill] sm:$0xff] }
 0x132   :  { %1138 = vmatpush.msra.mxu0 %v6942_v2  ;;  %1158 = vmatpush.msra.mxu1 %v4323_v15  ;;  %v6950_v15 = vld [vmem:[#allocation46_spill] sm:$0xff]  ;;  %v6974_v2 = vld [vmem:[#allocation67_spill] sm:$0xff] }
 0x133   :  { %6943 = vst [vmem:[#allocation27_spill] sm:$0xff] %v4733_v3  ;;  %931 = vmatpush.msrb.mxu3 %v6946_v9  ;;  %911 = vmatpush.msrb.mxu2 %v6947_v10  ;;  %v4985_v3 = vld [vmem:[#allocation9] ss:$0 sm:$0xff] }
 0x134   :  { %1139 = vmatpush.msra.mxu0 %v6945_v7  ;;  %1159 = vmatpush.msra.mxu1 %v6944_v6  ;;  %v6975_v6 = vld [vmem:[#allocation72_spill] sm:$0xff]  ;;  %v6976_v7 = vld [vmem:[#allocation69_spill] sm:$0xff]  ;;  %7017 = vst [vmem:[#allocation59_spill] sm:$0xff] %v4985_v3 }
 0x135   :  { %932 = vmatpush.msrb.mxu3 %v6948_v11  ;;  %912 = vmatpush.msrb.mxu2 %v6949_v12 }
 0x136   :  { %v499_v62 = vpop.f32.mrf.mxu0  ;;  %1140 = vmatpush.msra.mxu0 %v6947_v10  ;;  %1160 = vmatpush.msra.mxu1 %v6946_v9  ;;  %v6977_v9 = vld [vmem:[#allocation74_spill] sm:$0xff]  ;;  %v6978_v10 = vld [vmem:[#allocation73_spill] sm:$0xff] }
 0x137   :  { %v500_v17 = vadd.f32 %v499_v62, %v4606_v36  ;;  %933 = vmatpush.msrb.mxu3 %v6950_v15  ;;  %913 = vmatpush.msrb.mxu2 %v6951_v57  ;;  %v540_v32 = vpop.f32.mrf.mxu1  ;;  %v6981_v62 = vld [vmem:[#allocation78_spill] sm:$0xff] }
 0x138   :  { %1141 = vmatpush.msra.mxu0 %v6949_v12  ;;  %1161 = vmatpush.msra.mxu1 %v6948_v11  ;;  %v6979_v11 = vld [vmem:[#allocation76_spill] sm:$0xff]  ;;  %v6980_v12 = vld [vmem:[#allocation75_spill] sm:$0xff] }
 0x139   :  { %1100 = vmatpush.msra.mxu3 %v6952_v44  ;;  %1040 = vmatpush.msra.mxu2 %v6953_v38  ;;  %v4752_v31 = vadd.f32 %v540_v32, %v500_v17  ;;  %v6982_v17 = vld [vmem:[#allocation77_spill] sm:$0xff]  ;;  %v4790_v44 = vpop.f32.mrf.mxu3  ;;  %v403_v38 = vadd.f32 %v4594_v46, %v4330_v18  ;;  %v4803_v46 = vld [vmem:[%s6586_s9] sm:$0x7] }
 0x13a   :  { %1142 = vmatpush.msra.mxu0 %v6951_v57  ;;  %1162 = vmatpush.msra.mxu1 %v6950_v15  ;;  %v6983_v15 = vld [vmem:[#allocation80_spill] sm:$0xff]  ;;  %v6984_v57 = vld [vmem:[#allocation79_spill] sm:$0xff]  ;;  %6986 = vst [vmem:[#allocation38_spill] sm:$0xff] %v4790_v44 }
 0x13b   :  { %6954 = vst [vmem:[#allocation34_spill] sm:$0xff] %v4752_v31  ;;  %1101 = vmatpush.msra.mxu3 %v6955_v20  ;;  %1041 = vmatpush.msra.mxu2 %v6956_v4  ;;  %v444_v4 = vadd.f32 %v4596_v42, %v403_v38 }
 0x13d   :  { %1102 = vmatpush.msra.mxu3 %v6957_v33  ;;  %1042 = vmatpush.msra.mxu2 %v6958_v27 }
 0x13e   :  { %v4788_v32 = vpop.f32.mrf.mxu0 }
 0x13f   :  { %1103 = vmatpush.msra.mxu3 %v6959_v23  ;;  %1043 = vmatpush.msra.mxu2 %v6960_v43  ;;  %6985 = vst [vmem:[#allocation33_spill] sm:$0xff] %v4788_v32  ;;  %v6987_v23 = vld [vmem:[#allocation24_spill] sm:$0xff]  ;;  %v6988_v43 = vld [vmem:[#allocation25_spill] sm:$0xff] }
 0x141   :  { %1104 = vmatpush.msra.mxu3 %v6961_v13  ;;  %1044 = vmatpush.msra.mxu2 %v6962_v8  ;;  %v321_v13 = vadd.f32 %v6988_v43, %v6987_v23 }
 0x143   :  { %1105 = vmatpush.msra.mxu3 %v6963_v48  ;;  %1045 = vmatpush.msra.mxu2 %v6964_v49  ;;  %v6989_v48 = vld [vmem:[#allocation26_spill] sm:$0xff] }
 0x144   :  { %v362_v49 = vadd.f32 %v6989_v48, %v321_v13  ;;  %v485_v48 = vadd.f32 %v4642_v29, %v4606_v36 }
 0x145   :  { %1106 = vmatpush.msra.mxu3 %v6965_v52  ;;  %1046 = vmatpush.msra.mxu2 %v6966_v53  ;;  %v4798_v53 = vpop.f32.mrf.mxu2 }
 0x146   :  { %6990 = vst [vmem:[#allocation37_spill] sm:$0xff] %v4798_v53 }
 0x147   :  { %1107 = vmatpush.msra.mxu3 %v6967_v54  ;;  %1047 = vmatpush.msra.mxu2 %v6968_v55 }
 0x149   :  { %1108 = vmatpush.msra.mxu3 %v6969_v39  ;;  %1048 = vmatpush.msra.mxu2 %v6970_v58  ;;  %v4806_v39 = vperm.slane %v4803_v46, 0 }
 0x14b   :  { %1109 = vmatpush.msra.mxu3 %v6971_v61  ;;  %1049 = vmatpush.msra.mxu2 %v6972_v63  ;;  %6991 = vst [vmem:[#allocation42_spill] sm:$0xff] %v4806_v39 }
 0x14d   :  { %1110 = vmatpush.msra.mxu3 %v6973_v0  ;;  %1050 = vmatpush.msra.mxu2 %v6974_v2 }
 0x14f   :  { %1111 = vmatpush.msra.mxu3 %v6975_v6  ;;  %1051 = vmatpush.msra.mxu2 %v6976_v7 }
 0x151   :  { %1112 = vmatpush.msra.mxu3 %v6977_v9  ;;  %1052 = vmatpush.msra.mxu2 %v6978_v10  ;;  %v4809_v9 = vpop.f32.mrf.mxu1 }
 0x152   :  { %6992 = vst [vmem:[#allocation41_spill] sm:$0xff] %v4809_v9  ;;  %v4974_v9 = vld [vmem:[#allocation14 + $0x10] sm:$0xff] }
 0x153   :  { %1113 = vmatpush.msra.mxu3 %v6979_v11  ;;  %1053 = vmatpush.msra.mxu2 %v6980_v12  ;;  %v4812_v11 = vperm.slane %v4803_v46, 1  ;;  %7014 = vst [vmem:[#allocation57_spill] sm:$0xff] %v4974_v9 }
 0x155   :  { %1114 = vmatpush.msra.mxu3 %v6981_v62  ;;  %1054 = vmatpush.msra.mxu2 %v6982_v17  ;;  %6993 = vst [vmem:[#allocation46_spill] sm:$0xff] %v4812_v11 }
 0x157   :  { %1115 = vmatpush.msra.mxu3 %v6983_v15  ;;  %1055 = vmatpush.msra.mxu2 %v6984_v57 }
 0x194   :  { %v812_v20 = vpop.f32.mrf.mxu0 }
 0x195   :  { %v851_v33 = vadd.f32 %v812_v20, %v444_v4 }
 0x197   :  { %v3232_v8 = vmul.f32 -1.442695, %v851_v33 }
 0x199   :  { %v717_v27 = vpop.f32.mrf.mxu3  ;;  %3293 = vpow2.f32 %v3232_v8  ;;  %v697_v61 = vpop.f32.mrf.mxu2 }
 0x19a   :  { %v698_v63 = vadd.f32 %v697_v61, %v4806_v39  ;;  %v718_v57 = vadd.f32 %v717_v27, %v4812_v11  ;;  %v888_v8 = vpop.f32.mrf.mxu1 }
 0x19c   :  { %v3233_v2 = vmul.f32 -1.442695, %v698_v63  ;;  %v526_v63 = vadd.f32 %v4644_v14, %v485_v48  ;;  %v4839_v48 = vld [vmem:[#allocation12 + $0xd0] sm:$0xff] }
 0x19f   :  { %v3294_v42 = vpop.eup %3293 }
 0x1a0   :  { %v855_v58 = vadd.f32 1.0, %v3294_v42 }
 0x1a1   :  { %v792_v52 = vpop.f32.mrf.mxu3 }
 0x1a2   :  { %v831_v54 = vadd.f32 %v792_v52, %v362_v49  ;;  %v3234_v49 = vmul.f32 -1.442695, %v718_v57  ;;  %vm861_vm13 = vweird.f32 %v855_v58  ;;  %v865_v29 = vand.u32 2147483647, %v855_v58 }
 0x1a4   :  { %v3231_v55 = vmul.f32 -1.442695, %v831_v54  ;;  %vm866_vm15 = vcmp.eq.f32.partialorder %v865_v29, 8.507059e+37 }
 0x1a6   :  { %3295 = vpow2.f32 %v3231_v55  ;;  %v889_v55 = vadd.f32 %v4612_v34, %v888_v8  ;;  %v4835_v8 = vld [vmem:[#allocation12 + $0xe0] sm:$0xff] }
 0x1a7   :  { %3297 = vrcp.f32 %v855_v58 }
 0x1ac   :  { %v3296_v0 = vpop.eup %3295 }
 0x1ad   :  { %v835_v6 = vadd.f32 1.0, %v3296_v0  ;;  %v3298_v7 = vpop.eup %3297  ;;  %v867_v0 = vand.u32 2147483648, %v855_v58 }
 0x1ae   :  { %v857_v10 = vmul.f32 %v3298_v7, %v855_v58  ;;  %vm862_vm12 = vweird.f32 %v3298_v7 }
 0x1af   :  { %3299 = vrcp.f32 %v835_v6  ;;  %v847_v20 = vand.u32 2147483648, %v835_v6  ;;  %v845_v43 = vand.u32 2147483647, %v835_v6  ;;  %vm841_vm9 = vweird.f32 %v835_v6  ;;  %vm863_vm14 = vmor %vm861_vm13, %vm862_vm12 }
 0x1b0   :  { %3301 = vpow2.f32 %v3233_v2  ;;  %v858_v15 = vsub.f32 1.0, %v857_v10 }
 0x1b1   :  { %v848_v54 = vor.u32 1.1754944e-38, %v847_v20  ;;  %vm846_vm11 = vcmp.eq.f32.partialorder %v845_v43, 8.507059e+37 }
 0x1b2   :  { %v859_v13 = vmul.f32 %v3298_v7, %v858_v15 }
 0x1b4   :  { %v860_v42 = vadd.f32 %v3298_v7, %v859_v13 }
 0x1b5   :  { %v3300_v12 = vpop.eup %3299 }
 0x1b6   :  { %v837_v62 = vmul.f32 %v3300_v12, %v835_v6  ;;  %v3302_v17 = vpop.eup %3301  ;;  %vm842_vm8 = vweird.f32 %v3300_v12  ;;  %v864_v10 = vsel %vm863_vm14, %v3298_v7, %v860_v42  ;;  %v4829_v7 = vld [vmem:[#allocation12 + $0xf0] sm:$0xff] }
 0x1b7   :  { %v4815_v4 = vadd.f32 1.0, %v3302_v17  ;;  %vm843_vm10 = vmor %vm841_vm9, %vm842_vm8  ;;  %v868_v17 = vor.u32 1.1754944e-38, %v867_v0  ;;  %v4854_v0 = vld [vmem:[#allocation12 + $0xb0] sm:$0xff] }
 0x1b8   :  { %v838_v38 = vsub.f32 1.0, %v837_v62 }
 0x1b9   :  { %3303 = vrcp.f32 %v4815_v4  ;;  %vm967_vm1 = vweird.f32 %v4815_v4  ;;  %v971_v42 = vand.u32 2147483647, %v4815_v4 }
 0x1ba   :  { %v839_v33 = vmul.f32 %v3300_v12, %v838_v38  ;;  %3305 = vpow2.f32 %v3234_v49 }
 0x1bb   :  { %vm972_vm3 = vcmp.eq.f32.partialorder %v971_v42, 8.507059e+37 }
 0x1bc   :  { %v840_v52 = vadd.f32 %v3300_v12, %v839_v33 }
 0x1be   :  { %v844_v27 = vsel %vm843_vm10, %v3300_v12, %v840_v52  ;;  %v869_v12 = vsel %vm866_vm15, %v868_v17, %v864_v10  ;;  %v4865_v10 = vld [vmem:[%s6587_s10] ss:$0 sm:$0xff] }
 0x1bf   :  { %v849_v61 = vsel %vm846_vm11, %v848_v54, %v844_v27  ;;  %v3304_v62 = vpop.eup %3303  ;;  %v894_v57 = vsub.f32 1.0, %v869_v12  ;;  %v896_v20 = vmul.f32 %v869_v12, %v4656_v45  ;;  %v6994_v45 = vld [vmem:[#allocation49_spill] sm:$0xff]  ;;  %v6995_v54 = vld [vmem:[#allocation52_spill] sm:$0xff]  ;;  %v4872_v12 = vperm.slane %v4803_v46, 2 }
 0x1c0   :  { %v891_v2 = vmul.f32 %v889_v55, %v849_v61  ;;  %v3306_v34 = vpop.eup %3305  ;;  %v963_v15 = vmul.f32 %v3304_v62, %v4815_v4  ;;  %vm968_vm0 = vweird.f32 %v3304_v62  ;;  %v973_v55 = vand.u32 2147483648, %v4815_v4  ;;  %v4846_v27 = vld [vmem:[#allocation12 + $0xc0] sm:$0xff]  ;;  %v6997_v4 = vld [vmem:[#allocation58_spill] sm:$0xff]  ;;  %7037 = vst [vmem:[#allocation52_spill] sm:$0xff] %v5110_v16 }
 0x1c1   :  { %v4823_v38 = vadd.f32 1.0, %v3306_v34  ;;  %v6996_v61 = vld [vmem:[#allocation55_spill] sm:$0xff]  ;;  %vm969_vm2 = vmor %vm967_vm1, %vm968_vm0  ;;  %v4868_v34 = vld [vmem:[#allocation12 + $0x90] sm:$0xff]  ;;  %6998 = vst [vmem:[#allocation45_spill] sm:$0xff] %v4872_v12 }
 0x1c2   :  { %v892_v6 = vadd.f32 %v891_v2, %v526_v63  ;;  %v964_v33 = vsub.f32 1.0, %v963_v15  ;;  %v974_v29 = vor.u32 1.1754944e-38, %v973_v55  ;;  %v737_v15 = vpop.f32.mrf.mxu2  ;;  %v4886_v46 = vld [vmem:[#allocation12 + $0x60] sm:$0xff] }
 0x1c3   :  { %vm986_vm5 = vweird.f32 %v4823_v38  ;;  %v4908_v55 = vld [vmem:[#allocation12 + $0x20] sm:$0xff] }
 0x1c4   :  { %3307 = vtanh.f32 %v892_v6  ;;  %v965_v13 = vmul.f32 %v3304_v62, %v964_v33  ;;  %v4859_v6 = vld [vmem:[#allocation12 + $0xa0] sm:$0xff]  ;;  %v4881_v33 = vld [vmem:[#allocation12 + $0x70] sm:$0xff] }
 0x1c5   :  { %3309 = vrcp.f32 %v4823_v38 }
 0x1c6   :  { %v966_v52 = vadd.f32 %v3304_v62, %v965_v13  ;;  %v4892_v13 = vld [vmem:[#allocation12 + $0x50] sm:$0xff] }
 0x1c8   :  { %v970_v2 = vsel %vm969_vm2, %v3304_v62, %v966_v52 }
 0x1c9   :  { %v975_v17 = vsel %vm972_vm3, %v974_v29, %v970_v2  ;;  %v1013_v2 = vld [vmem:[#allocation15 + $0x60] sm:$0xff]  ;;  %v1011_v29 = vld [vmem:[#allocation15 + $0x50] sm:$0xff] }
 0x1ca   :  { %v3308_v14 = vpop.eup %3307 }
 0x1cb   :  { %v895_v43 = vmul.f32 %v3308_v14, %v894_v57  ;;  %v4841_v49 = vpop.eup %3309  ;;  %v4875_v57 = vld [vmem:[#allocation12 + $0x80] sm:$0xff]  ;;  %v996_v14 = vmul.f32 %v4865_v10, %v975_v17  ;;  %v1007_v17 = vld [vmem:[#allocation15 + $0x30] sm:$0xff] }
 0x1cc   :  { %v982_v63 = vmul.f32 %v4841_v49, %v4823_v38  ;;  %vm987_vm4 = vweird.f32 %v4841_v49 }
 0x1cd   :  { %v4827_v58 = vadd.f32 %v896_v20, %v895_v43  ;;  %vm988_vm6 = vmor %vm986_vm5, %vm987_vm4 }
 0x1ce   :  { %v983_v62 = vsub.f32 1.0, %v982_v63  ;;  %v1014_v63 = vld [vmem:[#allocation15 + $0x68] sm:$0xff] }
 0x1cf   :  { %914 = vmatmul.f32.vlgmr.msrb.gmra.mxu2 %v4827_v58  ;;  %934 = vmatmul.f32.vlgmr.msrb.gmra.mxu3 %v4827_v58 }
 0x1d0   :  { %954 = vmatmul.f32.vlgmr.msrb.gmra.mxu0 %v4827_v58  ;;  %1036 = vmatmul.f32.vlgmr.msrb.gmra.mxu1 %v4827_v58  ;;  %v984_v20 = vmul.f32 %v4841_v49, %v983_v62  ;;  %v1009_v62 = vld [vmem:[#allocation15 + $0x40] sm:$0xff] }
 0x1d1   :  { %1219 = vmatpush.msrb.mxu3 %v4829_v7  ;;  %1167 = vmatpush.msrb.mxu2 %v6994_v45  ;;  %v990_v45 = vand.u32 2147483647, %v4823_v38 }
 0x1d3   :  { %1220 = vmatpush.msrb.mxu3 %v4835_v8  ;;  %1168 = vmatpush.msrb.mxu2 %v6995_v54  ;;  %v4904_v54 = vld [vmem:[#allocation12 + $0x30] sm:$0xff]  ;;  %vm991_vm7 = vcmp.eq.f32.partialorder %v990_v45, 8.507059e+37  ;;  %v3451_v45 = vld [vmem:[#allocation11 + $0x138] sm:$0xff] }
 0x1d5   :  { %1221 = vmatpush.msrb.mxu3 %v4839_v48  ;;  %1169 = vmatpush.msrb.mxu2 %v6996_v61 }
 0x1d7   :  { %1222 = vmatpush.msrb.mxu3 %v4846_v27  ;;  %1056 = vmatmul.f32.vlgmr.msra.gmra.mxu2 %v4827_v58 }
 0x1d8   :  { %1116 = vmatmul.f32.vlgmr.msra.gmra.mxu3 %v4827_v58  ;;  %1170 = vmatpush.msrb.mxu2 %v6997_v4  ;;  %v1010_v4 = vld [vmem:[#allocation15 + $0x48] sm:$0xff] }
 0x1d9   :  { %1223 = vmatpush.msrb.mxu3 %v4854_v0 }
 0x1da   :  { %1171 = vmatpush.msrb.mxu2 %v4441_v1  ;;  %v738_v1 = vadd.f32 %v737_v15, %v4872_v12  ;;  %v1006_v15 = vld [vmem:[#allocation15 + $0x28] sm:$0xff] }
 0x1db   :  { %1224 = vmatpush.msrb.mxu3 %v4859_v6 }
 0x1dc   :  { %1172 = vmatpush.msrb.mxu2 %v4453_v21  ;;  %v997_v43 = vadd.f32 %v996_v14, %v738_v1  ;;  %v985_v21 = vadd.f32 %v4841_v49, %v984_v20  ;;  %v1004_v14 = vld [vmem:[#allocation15 + $0x18] sm:$0xff]  ;;  %v1003_v20 = vld [vmem:[#allocation15 + $0x10] sm:$0xff]  ;;  %v1002_v1 = vld [vmem:[#allocation15 + $0x8] sm:$0xff] }
 0x1dd   :  { %1225 = vmatpush.msrb.mxu3 %v4868_v34 }
 0x1de   :  { %1173 = vmatpush.msrb.mxu2 %v4466_v30  ;;  %v992_v30 = vand.u32 2147483648, %v4823_v38  ;;  %3311 = vtanh.f32 %v997_v43  ;;  %v989_v52 = vsel %vm988_vm6, %v4841_v49, %v985_v21  ;;  %v1001_v43 = vld [vmem:[#allocation15] sm:$0xff]  ;;  %v3449_v21 = vld [vmem:[#allocation11 + $0x168] sm:$0xff] }
 0x1df   :  { %1226 = vmatpush.msrb.mxu3 %v4875_v57 }
 0x1e0   :  { %1174 = vmatpush.msrb.mxu2 %v4478_v5  ;;  %v4899_v5 = vld [vmem:[#allocation12 + $0x40] sm:$0xff] }
 0x1e1   :  { %1227 = vmatpush.msrb.mxu3 %v4881_v33 }
 0x1e2   :  { %1175 = vmatpush.msrb.mxu2 %v4496_v41  ;;  %v993_v41 = vor.u32 1.1754944e-38, %v992_v30  ;;  %v3450_v30 = vld [vmem:[#allocation11 + $0x150] sm:$0xff] }
 0x1e3   :  { %1228 = vmatpush.msrb.mxu3 %v4886_v46 }
 0x1e4   :  { %1176 = vmatpush.msrb.mxu2 %v4510_v56  ;;  %v994_v38 = vsel %vm991_vm7, %v993_v41, %v989_v52  ;;  %v4912_v56 = vld [vmem:[#allocation12 + $0x10] sm:$0xff]  ;;  %v3312_v49 = vpop.eup %3311  ;;  %v3452_v52 = vld [vmem:[#allocation11 + $0x120] sm:$0xff]  ;;  %v3453_v41 = vld [vmem:[#allocation11 + $0x108] sm:$0xff] }
 0x1e5   :  { %1229 = vmatpush.msrb.mxu3 %v4892_v13  ;;  %v999_v42 = vsub.f32 1.0, %v994_v38  ;;  %v3454_v38 = vld [vmem:[#allocation11 + $0xf0] sm:$0xff] }
 0x1e6   :  { %1177 = vmatpush.msrb.mxu2 %v4525_v35  ;;  %v4916_v35 = vld [vmem:[#allocation12] sm:$0xff] }
 0x1e7   :  { %1230 = vmatpush.msrb.mxu3 %v4899_v5  ;;  %v4920_v61 = vmul.f32 %v3312_v49, %v999_v42  ;;  %v3455_v49 = vld [vmem:[#allocation11 + $0xd8] sm:$0xff]  ;;  %v3456_v42 = vld [vmem:[#allocation11 + $0xc0] sm:$0xff] }
 0x1e8   :  { %1178 = vmatpush.msrb.mxu2 %v4535_v37  ;;  %v1016_v37 = vld [vmem:[#allocation15 + $0x78] sm:$0xff] }
 0x1e9   :  { %1231 = vmatpush.msrb.mxu3 %v4904_v54 }
 0x1ea   :  { %1179 = vmatpush.msrb.mxu2 %v4553_v19  ;;  %v1015_v19 = vld [vmem:[#allocation15 + $0x70] sm:$0xff] }
 0x1eb   :  { %1232 = vmatpush.msrb.mxu3 %v4908_v55 }
 0x1ec   :  { %1180 = vmatpush.msrb.mxu2 %v4557_v28  ;;  %v1012_v28 = vld [vmem:[#allocation15 + $0x58] sm:$0xff] }
 0x1ed   :  { %1233 = vmatpush.msrb.mxu3 %v4912_v56 }
 0x1ee   :  { %1181 = vmatpush.msrb.mxu2 %v4565_v22  ;;  %v1008_v22 = vld [vmem:[#allocation15 + $0x38] sm:$0xff] }
 0x1ef   :  { %1234 = vmatpush.msrb.mxu3 %v4916_v35 }
 0x1f0   :  { %1235 = vmatmul.f32.vlgmr.msrb.gmra.mxu3 %v4920_v61  ;;  %1182 = vmatpush.msrb.mxu2 %v4574_v24  ;;  %v1005_v24 = vld [vmem:[#allocation15 + $0x20] sm:$0xff] }
 0x1f1   :  { %1378 = vmatpush.msra.mxu3 %v1016_v37  ;;  %v3457_v37 = vld [vmem:[#allocation11 + $0xa8] sm:$0xff] }
 0x1f3   :  { %1379 = vmatpush.msra.mxu3 %v1015_v19  ;;  %v3458_v19 = vld [vmem:[#allocation11 + $0x90] sm:$0xff] }
 0x1f5   :  { %1380 = vmatpush.msra.mxu3 %v1014_v63  ;;  %v3459_v63 = vld [vmem:[#allocation11 + $0x78] sm:$0xff] }
 0x1f7   :  { %1381 = vmatpush.msra.mxu3 %v1013_v2  ;;  %v3460_v2 = vld [vmem:[#allocation11 + $0x60] sm:$0xff] }
 0x1f9   :  { %1382 = vmatpush.msra.mxu3 %v1012_v28  ;;  %v3461_v28 = vld [vmem:[#allocation11 + $0x48] sm:$0xff] }
 0x1fb   :  { %1383 = vmatpush.msra.mxu3 %v1011_v29  ;;  %v3462_v29 = vld [vmem:[#allocation11 + $0x30] sm:$0xff] }
 0x1fd   :  { %1384 = vmatpush.msra.mxu3 %v1010_v4  ;;  %v3463_v4 = vld [vmem:[#allocation11 + $0x18] sm:$0xff] }
 0x1ff   :  { %1385 = vmatpush.msra.mxu3 %v1009_v62  ;;  %v3464_v62 = vld [vmem:[#allocation11] sm:$0xff] }
 0x201   :  { %1386 = vmatpush.msra.mxu3 %v1008_v22  ;;  %v1218_v22 = vld [vmem:[#allocation12 + $0xf8] sm:$0xff] }
 0x202   :  { %1239 = vmatpush.msrb.mxu0 %v1218_v22 }
 0x203   :  { %1387 = vmatpush.msra.mxu3 %v1007_v17  ;;  %v4927_v17 = vld [vmem:[#allocation14 + $0x78] sm:$0xff] }
 0x204   :  { %1315 = vmatpush.msrb.mxu1 %v4927_v17 }
 0x205   :  { %1388 = vmatpush.msra.mxu3 %v1006_v15  ;;  %v1216_v15 = vld [vmem:[#allocation12 + $0xe8] sm:$0xff] }
 0x206   :  { %1240 = vmatpush.msrb.mxu0 %v1216_v15 }
 0x207   :  { %1389 = vmatpush.msra.mxu3 %v1005_v24  ;;  %v4930_v24 = vld [vmem:[#allocation14 + $0x70] sm:$0xff] }
 0x208   :  { %6999 = vst [vmem:[#allocation32_spill] sm:$0xff] %v4930_v24  ;;  %1316 = vmatpush.msrb.mxu1 %v4930_v24 }
 0x209   :  { %1390 = vmatpush.msra.mxu3 %v1004_v14  ;;  %v1214_v14 = vld [vmem:[#allocation12 + $0xd8] sm:$0xff] }
 0x20a   :  { %1241 = vmatpush.msrb.mxu0 %v1214_v14 }
 0x20b   :  { %1391 = vmatpush.msra.mxu3 %v1003_v20  ;;  %v4933_v20 = vld [vmem:[#allocation14 + $0x68] sm:$0xff] }
 0x20c   :  { %7000 = vst [vmem:[#allocation31_spill] sm:$0xff] %v4933_v20  ;;  %1317 = vmatpush.msrb.mxu1 %v4933_v20 }
 0x20d   :  { %1392 = vmatpush.msra.mxu3 %v1002_v1  ;;  %v7001_v1 = vld [vmem:[#allocation28_spill] sm:$0xff] }
 0x20f   :  { %1393 = vmatpush.msra.mxu3 %v1001_v43  ;;  %v324_v43 = vadd.f32 %v7001_v1, %v6987_v23  ;;  %v4959_v1 = vld [vmem:[#allocation14 + $0x30] sm:$0xff] }
 0x210   :  { %1394 = vmatmul.f32.vlgmr.msra.gmra.mxu3 %v4920_v61  ;;  %7009 = vst [vmem:[#allocation51_spill] sm:$0xff] %v4959_v1  ;;  %v5119_v23 = vld [vmem:[#allocation11 + $0x110] sm:$0xff] }
 0x211   :  { %1508 = vmatpush.msrb.mxu3 %v3449_v21  ;;  %v1212_v21 = vld [vmem:[#allocation12 + $0xc8] sm:$0xff]  ;;  %7040 = vst [vmem:[#allocation28_spill] sm:$0xff] %v5119_v23 }
 0x212   :  { %1242 = vmatpush.msrb.mxu0 %v1212_v21 }
 0x213   :  { %1509 = vmatpush.msrb.mxu3 %v3450_v30  ;;  %v4938_v30 = vld [vmem:[#allocation14 + $0x60] sm:$0xff] }
 0x214   :  { %7002 = vst [vmem:[#allocation36_spill] sm:$0xff] %v4938_v30  ;;  %1318 = vmatpush.msrb.mxu1 %v4938_v30 }
 0x215   :  { %1510 = vmatpush.msrb.mxu3 %v3451_v45  ;;  %v1210_v45 = vld [vmem:[#allocation12 + $0xb8] sm:$0xff] }
 0x216   :  { %1243 = vmatpush.msrb.mxu0 %v1210_v45 }
 0x217   :  { %1511 = vmatpush.msrb.mxu3 %v3452_v52  ;;  %v4941_v52 = vld [vmem:[#allocation14 + $0x58] sm:$0xff] }
 0x218   :  { %7003 = vst [vmem:[#allocation35_spill] sm:$0xff] %v4941_v52  ;;  %1319 = vmatpush.msrb.mxu1 %v4941_v52 }
 0x219   :  { %1512 = vmatpush.msrb.mxu3 %v3453_v41  ;;  %v7004_v41 = vld [vmem:[#allocation29_spill] sm:$0xff] }
 0x21b   :  { %1513 = vmatpush.msrb.mxu3 %v3454_v38  ;;  %v365_v38 = vadd.f32 %v7004_v41, %v324_v43  ;;  %v406_v43 = vadd.f32 %v4620_v47, %v4330_v18  ;;  %v5113_v18 = vld [vmem:[#allocation11 + $0x128] sm:$0xff] }
 0x21c   :  { %7038 = vst [vmem:[#allocation55_spill] sm:$0xff] %v5113_v18 }
 0x21d   :  { %1514 = vmatpush.msrb.mxu3 %v3455_v49  ;;  %v1208_v49 = vld [vmem:[#allocation12 + $0xa8] sm:$0xff] }
 0x21e   :  { %1244 = vmatpush.msrb.mxu0 %v1208_v49 }
 0x21f   :  { %1515 = vmatpush.msrb.mxu3 %v3456_v42  ;;  %v4945_v42 = vld [vmem:[#allocation14 + $0x50] sm:$0xff] }
 0x220   :  { %7005 = vst [vmem:[#allocation40_spill] sm:$0xff] %v4945_v42  ;;  %1320 = vmatpush.msrb.mxu1 %v4945_v42 }
 0x221   :  { %1516 = vmatpush.msrb.mxu3 %v3457_v37 }
 0x223   :  { %1517 = vmatpush.msrb.mxu3 %v3458_v19 }
 0x225   :  { %1518 = vmatpush.msrb.mxu3 %v3459_v63  ;;  %v1206_v63 = vld [vmem:[#allocation12 + $0x98] sm:$0xff] }
 0x226   :  { %1245 = vmatpush.msrb.mxu0 %v1206_v63 }
 0x227   :  { %1519 = vmatpush.msrb.mxu3 %v3460_v2  ;;  %v4948_v2 = vld [vmem:[#allocation14 + $0x48] sm:$0xff] }
 0x228   :  { %7006 = vst [vmem:[#allocation39_spill] sm:$0xff] %v4948_v2  ;;  %1321 = vmatpush.msrb.mxu1 %v4948_v2 }
 0x229   :  { %1520 = vmatpush.msrb.mxu3 %v3461_v28 }
 0x22b   :  { %1521 = vmatpush.msrb.mxu3 %v3462_v29  ;;  %v1204_v29 = vld [vmem:[#allocation12 + $0x88] sm:$0xff] }
 0x22c   :  { %1246 = vmatpush.msrb.mxu0 %v1204_v29 }
 0x22d   :  { %1522 = vmatpush.msrb.mxu3 %v3463_v4  ;;  %v4951_v4 = vld [vmem:[#allocation14 + $0x40] sm:$0xff] }
 0x22e   :  { %7007 = vst [vmem:[#allocation44_spill] sm:$0xff] %v4951_v4  ;;  %1322 = vmatpush.msrb.mxu1 %v4951_v4 }
 0x22f   :  { %1523 = vmatpush.msrb.mxu3 %v3464_v62 }
 0x231   :  { %1588 = vmatpush.msra.mxu3 %v1218_v22  ;;  %v1202_v22 = vld [vmem:[#allocation12 + $0x78] sm:$0xff] }
 0x232   :  { %1247 = vmatpush.msrb.mxu0 %v1202_v22 }
 0x233   :  { %1589 = vmatpush.msra.mxu3 %v1216_v15  ;;  %v4956_v15 = vld [vmem:[#allocation14 + $0x38] sm:$0xff] }
 0x234   :  { %7008 = vst [vmem:[#allocation43_spill] sm:$0xff] %v4956_v15  ;;  %1323 = vmatpush.msrb.mxu1 %v4956_v15 }
 0x235   :  { %1590 = vmatpush.msra.mxu3 %v1214_v14  ;;  %v1200_v14 = vld [vmem:[#allocation12 + $0x68] sm:$0xff] }
 0x236   :  { %1248 = vmatpush.msrb.mxu0 %v1200_v14  ;;  %1324 = vmatpush.msrb.mxu1 %v4959_v1 }
 0x237   :  { %1591 = vmatpush.msra.mxu3 %v1212_v21  ;;  %v1198_v21 = vld [vmem:[#allocation12 + $0x58] sm:$0xff] }
 0x238   :  { %1249 = vmatpush.msrb.mxu0 %v1198_v21 }
 0x239   :  { %1592 = vmatpush.msra.mxu3 %v1210_v45  ;;  %v4964_v45 = vld [vmem:[#allocation14 + $0x28] sm:$0xff] }
 0x23a   :  { %7010 = vst [vmem:[#allocation50_spill] sm:$0xff] %v4964_v45  ;;  %1325 = vmatpush.msrb.mxu1 %v4964_v45 }
 0x23b   :  { %1593 = vmatpush.msra.mxu3 %v1208_v49  ;;  %v4967_v49 = vld [vmem:[#allocation14 + $0x20] sm:$0xff] }
 0x23c   :  { %7011 = vst [vmem:[#allocation54_spill] sm:$0xff] %v4967_v49  ;;  %1326 = vmatpush.msrb.mxu1 %v4967_v49 }
 0x23d   :  { %1594 = vmatpush.msra.mxu3 %v1206_v63 }
 0x23f   :  { %1595 = vmatpush.msra.mxu3 %v1204_v29  ;;  %v4971_v29 = vld [vmem:[#allocation14 + $0x18] sm:$0xff] }
 0x240   :  { %7013 = vst [vmem:[#allocation53_spill] sm:$0xff] %v4971_v29  ;;  %1327 = vmatpush.msrb.mxu1 %v4971_v29 }
 0x241   :  { %1596 = vmatpush.msra.mxu3 %v1202_v22 }
 0x242   :  { %1328 = vmatpush.msrb.mxu1 %v4974_v9 }
 0x243   :  { %1597 = vmatpush.msra.mxu3 %v1200_v14  ;;  %v1192_v14 = vld [vmem:[#allocation12 + $0x28] sm:$0xff] }
 0x245   :  { %1598 = vmatpush.msra.mxu3 %v1198_v21 }
 0x24d   :  { %v1037_v37 = vpop.f32.mrf.mxu1 }
 0x24e   :  { %v1060_v19 = vadd.f32 %v1037_v37, %v365_v38  ;;  %v1196_v38 = vld [vmem:[#allocation12 + $0x48] sm:$0xff]  ;;  %v7012_v37 = vld [vmem:[#allocation86_spill] sm:$0xff] }
 0x24f   :  { %1250 = vmatpush.msrb.mxu0 %v1196_v38  ;;  %1599 = vmatpush.msra.mxu3 %v1196_v38  ;;  %v1188_v38 = vld [vmem:[#allocation12 + $0x8] sm:$0xff] }
 0x250   :  { %v3235_v28 = vmul.f32 -1.442695, %v1060_v19  ;;  %v447_v19 = vadd.f32 %v7012_v37, %v406_v43  ;;  %v4979_v37 = vld [vmem:[#allocation14 + $0x8] sm:$0xff] }
 0x251   :  { %7015 = vst [vmem:[#allocation56_spill] sm:$0xff] %v4979_v37  ;;  %1329 = vmatpush.msrb.mxu1 %v4979_v37 }
 0x252   :  { %3313 = vpow2.f32 %v3235_v28  ;;  %v4954_v62 = vpop.f32.mrf.mxu2  ;;  %v1194_v28 = vld [vmem:[#allocation12 + $0x38] sm:$0xff]  ;;  %v4977_v43 = vpop.f32.mrf.mxu3 }
 0x253   :  { %1251 = vmatpush.msrb.mxu0 %v1194_v28  ;;  %1600 = vmatpush.msra.mxu3 %v1194_v28 }
 0x255   :  { %1252 = vmatpush.msrb.mxu0 %v1192_v14  ;;  %1601 = vmatpush.msra.mxu3 %v1192_v14 }
 0x258   :  { %v3314_v41 = vpop.eup %3313 }
 0x259   :  { %v1064_v63 = vadd.f32 1.0, %v3314_v41  ;;  %v1190_v41 = vld [vmem:[#allocation12 + $0x18] sm:$0xff] }
 0x25a   :  { %v1057_v47 = vpop.f32.mrf.mxu2  ;;  %1253 = vmatpush.msrb.mxu0 %v1190_v41  ;;  %1602 = vmatpush.msra.mxu3 %v1190_v41 }
 0x25b   :  { %3315 = vrcp.f32 %v1064_v63  ;;  %v1080_v22 = vadd.f32 %v1057_v47, %v447_v19  ;;  %v4982_v19 = vld [vmem:[#allocation14] sm:$0xff]  ;;  %v1076_v53 = vand.u32 2147483648, %v1064_v63  ;;  %v1074_v14 = vand.u32 2147483647, %v1064_v63 }
 0x25c   :  { %7016 = vst [vmem:[#allocation60_spill] sm:$0xff] %v4982_v19  ;;  %1254 = vmatpush.msrb.mxu0 %v1188_v38  ;;  %1330 = vmatpush.msrb.mxu1 %v4982_v19  ;;  %vm1070_vm9 = vweird.f32 %v1064_v63 }
 0x25d   :  { %v3236_v21 = vmul.f32 -1.442695, %v1080_v22  ;;  %1603 = vmatpush.msra.mxu3 %v1188_v38  ;;  %v1077_v31 = vor.u32 1.1754944e-38, %v1076_v53  ;;  %vm1075_vm11 = vcmp.eq.f32.partialorder %v1074_v14, 8.507059e+37 }
 0x25f   :  { %3317 = vpow2.f32 %v3236_v21  ;;  %v1117_v21 = vpop.f32.mrf.mxu3 }
 0x260   :  { %v1118_v51 = vadd.f32 %v4985_v3, %v1117_v21  ;;  %v5104_v3 = vld [vmem:[#allocation11 + $0x160] sm:$0xff] }
 0x261   :  { %v3316_v47 = vpop.eup %3315  ;;  %7035 = vst [vmem:[#allocation26_spill] sm:$0xff] %v5104_v3 }
 0x262   :  { %v1066_v28 = vmul.f32 %v3316_v47, %v1064_v63  ;;  %vm1071_vm8 = vweird.f32 %v3316_v47 }
 0x263   :  { %vm1072_vm10 = vmor %vm1070_vm9, %vm1071_vm8 }
 0x264   :  { %v1067_v22 = vsub.f32 1.0, %v1066_v28 }
 0x265   :  { %v3318_v44 = vpop.eup %3317 }
 0x266   :  { %v1084_v32 = vadd.f32 1.0, %v3318_v44  ;;  %v1068_v36 = vmul.f32 %v3316_v47, %v1067_v22 }
 0x268   :  { %3319 = vrcp.f32 %v1084_v32  ;;  %v1069_v60 = vadd.f32 %v3316_v47, %v1068_v36  ;;  %v1096_v50 = vand.u32 2147483648, %v1084_v32  ;;  %v1094_v36 = vand.u32 2147483647, %v1084_v32 }
 0x269   :  { %vm1090_vm13 = vweird.f32 %v1084_v32 }
 0x26a   :  { %v1073_v41 = vsel %vm1072_vm10, %v3316_v47, %v1069_v60  ;;  %v1097_v60 = vor.u32 1.1754944e-38, %v1096_v50  ;;  %vm1095_vm15 = vcmp.eq.f32.partialorder %v1094_v36, 8.507059e+37  ;;  %v4998_v50 = vld [vmem:[#allocation6 + $0xf8] sm:$0xff]  ;;  %v5016_v36 = vld [vmem:[#allocation6 + $0xc8] sm:$0xff] }
 0x26b   :  { %v1078_v38 = vsel %vm1075_vm11, %v1077_v31, %v1073_v41  ;;  %7018 = vst [vmem:[#allocation64_spill] sm:$0xff] %v4998_v50 }
 0x26c   :  { %v1120_v28 = vmul.f32 %v1118_v51, %v1078_v38  ;;  %v5007_v38 = vld [vmem:[#allocation6 + $0xd0] sm:$0xff]  ;;  %7021 = vst [vmem:[#allocation65_spill] sm:$0xff] %v5016_v36 }
 0x26e   :  { %v3320_v40 = vpop.eup %3319  ;;  %v1121_v22 = vadd.f32 %v1120_v28, %v4668_v25  ;;  %v1357_v25 = vld [vmem:[#allocation15 + $0xf8] sm:$0xff] }
 0x26f   :  { %v1086_v44 = vmul.f32 %v3320_v40, %v1084_v32  ;;  %vm1091_vm12 = vweird.f32 %v3320_v40  ;;  %1358 = vmatpush.msra.mxu2 %v1357_v25  ;;  %v1355_v32 = vld [vmem:[#allocation15 + $0xe8] sm:$0xff]  ;;  %v5010_v28 = vld [vmem:[#allocation6 + $0xd8] sm:$0xff] }
 0x270   :  { %3321 = vtanh.f32 %v1121_v22  ;;  %vm1092_vm14 = vmor %vm1090_vm13, %vm1091_vm12  ;;  %7020 = vst [vmem:[#allocation66_spill] sm:$0xff] %v5010_v28  ;;  %v1354_v22 = vld [vmem:[#allocation15 + $0xe0] sm:$0xff]  ;;  %v5036_v25 = vld [vmem:[#allocation6 + $0x98] sm:$0xff] }
 0x271   :  { %v1087_v59 = vsub.f32 1.0, %v1086_v44  ;;  %v5013_v44 = vld [vmem:[#allocation6 + $0xc0] sm:$0xff]  ;;  %7024 = vst [vmem:[#allocation72_spill] sm:$0xff] %v5036_v25 }
 0x273   :  { %v1088_v26 = vmul.f32 %v3320_v40, %v1087_v59  ;;  %v5001_v59 = vld [vmem:[#allocation6 + $0xe0] sm:$0xff] }
 0x275   :  { %v1089_v63 = vadd.f32 %v3320_v40, %v1088_v26  ;;  %v4995_v26 = vld [vmem:[#allocation6 + $0xf0] sm:$0xff] }
 0x276   :  { %v3322_v31 = vpop.eup %3321 }
 0x277   :  { %v1093_v53 = vsel %vm1092_vm14, %v3320_v40, %v1089_v63  ;;  %v1356_v40 = vld [vmem:[#allocation15 + $0xf0] sm:$0xff] }
 0x278   :  { %v1098_v47 = vsel %vm1095_vm15, %v1097_v60, %v1093_v53  ;;  %1359 = vmatpush.msra.mxu2 %v1356_v40  ;;  %v5021_v63 = vld [vmem:[#allocation6 + $0xb0] sm:$0xff]  ;;  %v1353_v60 = vld [vmem:[#allocation15 + $0xd8] sm:$0xff] }
 0x279   :  { %v1123_v14 = vsub.f32 1.0, %v1098_v47  ;;  %v1125_v21 = vmul.f32 %v1098_v47, %v4827_v58  ;;  %v5004_v58 = vld [vmem:[#allocation6 + $0xe8] sm:$0xff]  ;;  %v5024_v53 = vld [vmem:[#allocation6 + $0xb8] sm:$0xff]  ;;  %v5027_v47 = vld [vmem:[#allocation6 + $0xa0] sm:$0xff] }
 0x27a   :  { %7019 = vst [vmem:[#allocation63_spill] sm:$0xff] %v5004_v58  ;;  %1360 = vmatpush.msra.mxu2 %v1355_v32  ;;  %v5039_v40 = vld [vmem:[#allocation6 + $0x80] sm:$0xff] }
 0x27b   :  { %v1124_v51 = vmul.f32 %v3322_v31, %v1123_v14  ;;  %7022 = vst [vmem:[#allocation68_spill] sm:$0xff] %v5024_v53  ;;  %v1352_v14 = vld [vmem:[#allocation15 + $0xd0] sm:$0xff]  ;;  %v5030_v31 = vld [vmem:[#allocation6 + $0xa8] sm:$0xff] }
 0x27c   :  { %1361 = vmatpush.msra.mxu2 %v1354_v22  ;;  %7023 = vst [vmem:[#allocation67_spill] sm:$0xff] %v5030_v31  ;;  %v1350_v32 = vld [vmem:[#allocation15 + $0xc0] sm:$0xff] }
 0x27d   :  { %v4990_v41 = vadd.f32 %v1125_v21, %v1124_v51  ;;  %v5033_v51 = vld [vmem:[#allocation6 + $0x90] sm:$0xff]  ;;  %v5042_v22 = vld [vmem:[#allocation6 + $0x88] sm:$0xff] }
 0x27e   :  { %1362 = vmatpush.msra.mxu2 %v1353_v60  ;;  %v1351_v21 = vld [vmem:[#allocation15 + $0xc8] sm:$0xff]  ;;  %7025 = vst [vmem:[#allocation69_spill] sm:$0xff] %v5042_v22 }
 0x27f   :  { %1143 = vmatmul.f32.vlgmr.msra.gmra.mxu0 %v4990_v41  ;;  %1163 = vmatmul.f32.vlgmr.msra.gmra.mxu1 %v4990_v41  ;;  %v5045_v60 = vld [vmem:[#allocation6 + $0x70] sm:$0xff] }
 0x280   :  { %1183 = vmatmul.f32.vlgmr.msrb.gmra.mxu2 %v4990_v41  ;;  %1401 = vmatpush.msra.mxu0 %v4995_v26 }
 0x281   :  { %1421 = vmatpush.msra.mxu1 %v4998_v50  ;;  %1363 = vmatpush.msra.mxu2 %v1352_v14  ;;  %v5051_v14 = vld [vmem:[#allocation6 + $0x60] sm:$0xff] }
 0x282   :  { %1402 = vmatpush.msra.mxu0 %v5001_v59  ;;  %v5098_v50 = vld [vmem:[#allocation11 + $0x178] sm:$0xff] }
 0x283   :  { %1422 = vmatpush.msra.mxu1 %v5004_v58  ;;  %1364 = vmatpush.msra.mxu2 %v1351_v21  ;;  %v5057_v21 = vld [vmem:[#allocation6 + $0x50] sm:$0xff]  ;;  %v5087_v58 = vld [vmem:[#allocation6] sm:$0xff]  ;;  %7034 = vst [vmem:[#allocation25_spill] sm:$0xff] %v5098_v50 }
 0x284   :  { %1403 = vmatpush.msra.mxu0 %v5007_v38 }
 0x285   :  { %1423 = vmatpush.msra.mxu1 %v5010_v28  ;;  %1365 = vmatpush.msra.mxu2 %v1350_v32  ;;  %v5066_v32 = vld [vmem:[#allocation6 + $0x48] sm:$0xff]  ;;  %v5081_v28 = vld [vmem:[#allocation6 + $0x10] sm:$0xff] }
 0x286   :  { %1404 = vmatpush.msra.mxu0 %v5013_v44  ;;  %7029 = vst [vmem:[#allocation75_spill] sm:$0xff] %v5066_v32 }
 0x287   :  { %1424 = vmatpush.msra.mxu1 %v5016_v36  ;;  %1255 = vmatmul.f32.vlgmr.msrb.gmra.mxu0 %v4920_v61  ;;  %v5063_v36 = vld [vmem:[#allocation6 + $0x40] sm:$0xff] }
 0x288   :  { %1331 = vmatmul.f32.vlgmr.msrb.gmra.mxu1 %v4920_v61  ;;  %1405 = vmatpush.msra.mxu0 %v5021_v63 }
 0x289   :  { %1425 = vmatpush.msra.mxu1 %v5024_v53  ;;  %v5048_v53 = vld [vmem:[#allocation6 + $0x78] sm:$0xff] }
 0x28a   :  { %1406 = vmatpush.msra.mxu0 %v5027_v47  ;;  %7026 = vst [vmem:[#allocation74_spill] sm:$0xff] %v5048_v53 }
 0x28b   :  { %1426 = vmatpush.msra.mxu1 %v5030_v31  ;;  %v1349_v31 = vld [vmem:[#allocation15 + $0xb8] sm:$0xff] }
 0x28c   :  { %1407 = vmatpush.msra.mxu0 %v5033_v51  ;;  %1366 = vmatpush.msra.mxu2 %v1349_v31  ;;  %v5072_v31 = vld [vmem:[#allocation6 + $0x38] sm:$0xff] }
 0x28d   :  { %1427 = vmatpush.msra.mxu1 %v5036_v25  ;;  %v5054_v25 = vld [vmem:[#allocation6 + $0x68] sm:$0xff]  ;;  %7030 = vst [vmem:[#allocation78_spill] sm:$0xff] %v5072_v31 }
 0x28e   :  { %1408 = vmatpush.msra.mxu0 %v5039_v40  ;;  %7027 = vst [vmem:[#allocation73_spill] sm:$0xff] %v5054_v25 }
 0x28f   :  { %1428 = vmatpush.msra.mxu1 %v5042_v22  ;;  %v5060_v22 = vld [vmem:[#allocation6 + $0x58] sm:$0xff] }
 0x290   :  { %1409 = vmatpush.msra.mxu0 %v5045_v60  ;;  %7028 = vst [vmem:[#allocation76_spill] sm:$0xff] %v5060_v22 }
 0x291   :  { %1429 = vmatpush.msra.mxu1 %v5048_v53  ;;  %v5069_v53 = vld [vmem:[#allocation6 + $0x30] sm:$0xff] }
 0x292   :  { %1410 = vmatpush.msra.mxu0 %v5051_v14 }
 0x293   :  { %1430 = vmatpush.msra.mxu1 %v5054_v25  ;;  %v5075_v25 = vld [vmem:[#allocation6 + $0x20] sm:$0xff] }
 0x294   :  { %1411 = vmatpush.msra.mxu0 %v5057_v21 }
 0x295   :  { %1431 = vmatpush.msra.mxu1 %v5060_v22  ;;  %v5078_v22 = vld [vmem:[#allocation6 + $0x28] sm:$0xff] }
 0x296   :  { %1412 = vmatpush.msra.mxu0 %v5063_v36  ;;  %7031 = vst [vmem:[#allocation77_spill] sm:$0xff] %v5078_v22 }
 0x297   :  { %1432 = vmatpush.msra.mxu1 %v5066_v32  ;;  %v5084_v32 = vld [vmem:[#allocation6 + $0x18] sm:$0xff] }
 0x298   :  { %1413 = vmatpush.msra.mxu0 %v5069_v53  ;;  %7032 = vst [vmem:[#allocation80_spill] sm:$0xff] %v5084_v32 }
 0x299   :  { %1433 = vmatpush.msra.mxu1 %v5072_v31  ;;  %v5090_v31 = vld [vmem:[#allocation6 + $0x8] sm:$0xff] }
 0x29a   :  { %1414 = vmatpush.msra.mxu0 %v5075_v25  ;;  %7033 = vst [vmem:[#allocation79_spill] sm:$0xff] %v5090_v31 }
 0x29b   :  { %1434 = vmatpush.msra.mxu1 %v5078_v22  ;;  %v5095_v22 = vld [vmem:[#allocation11 + $0x170] sm:$0xff] }
 0x29c   :  { %1415 = vmatpush.msra.mxu0 %v5081_v28 }
 0x29d   :  { %1435 = vmatpush.msra.mxu1 %v5084_v32  ;;  %v5101_v32 = vld [vmem:[#allocation11 + $0x158] sm:$0xff] }
 0x29e   :  { %1416 = vmatpush.msra.mxu0 %v5087_v58 }
 0x29f   :  { %1436 = vmatpush.msra.mxu1 %v5090_v31  ;;  %1417 = vmatmul.f32.vlgmr.msra.gmra.mxu0 %v4990_v41  ;;  %v5107_v31 = vld [vmem:[#allocation11 + $0x140] sm:$0xff] }
 0x2a0   :  { %1437 = vmatmul.f32.vlgmr.msra.gmra.mxu1 %v4990_v41  ;;  %1528 = vmatpush.msrb.mxu0 %v5095_v22  ;;  %7036 = vst [vmem:[#allocation49_spill] sm:$0xff] %v5107_v31 }
 0x2a1   :  { %1548 = vmatpush.msrb.mxu1 %v5098_v50  ;;  %v5116_v50 = vld [vmem:[#allocation11 + $0x130] sm:$0xff] }
 0x2a2   :  { %1529 = vmatpush.msrb.mxu0 %v5101_v32  ;;  %7039 = vst [vmem:[#allocation58_spill] sm:$0xff] %v5116_v50 }
 0x2a3   :  { %1549 = vmatpush.msrb.mxu1 %v5104_v3  ;;  %v5122_v3 = vld [vmem:[#allocation11 + $0x118] sm:$0xff] }
 0x2a4   :  { %1530 = vmatpush.msrb.mxu0 %v5107_v31  ;;  %7041 = vst [vmem:[#allocation29_spill] sm:$0xff] %v5122_v3  ;;  %v5125_v31 = vld [vmem:[#allocation11 + $0xf8] sm:$0xff] }
 0x2a5   :  { %1550 = vmatpush.msrb.mxu1 %v5110_v16  ;;  %7042 = vst [vmem:[#allocation86_spill] sm:$0xff] %v5125_v31  ;;  %v5128_v16 = vld [vmem:[#allocation11 + $0x100] sm:$0xff] }
 0x2a6   :  { %1531 = vmatpush.msrb.mxu0 %v5113_v18  ;;  %7043 = vst [vmem:[#allocation94_spill] sm:$0xff] %v5128_v16  ;;  %v5131_v18 = vld [vmem:[#allocation11 + $0xe0] sm:$0xff] }
 0x2a7   :  { %1551 = vmatpush.msrb.mxu1 %v5116_v50  ;;  %7044 = vst [vmem:[#allocation95_spill] sm:$0xff] %v5131_v18  ;;  %v5134_v50 = vld [vmem:[#allocation11 + $0xe8] sm:$0xff] }
 0x2a8   :  { %1532 = vmatpush.msrb.mxu0 %v5119_v23  ;;  %7045 = vst [vmem:[#allocation96_spill] sm:$0xff] %v5134_v50  ;;  %v5137_v23 = vld [vmem:[#allocation11 + $0xc8] sm:$0xff] }
 0x2a9   :  { %1552 = vmatpush.msrb.mxu1 %v5122_v3  ;;  %7046 = vst [vmem:[#allocation97_spill] sm:$0xff] %v5137_v23  ;;  %v5140_v3 = vld [vmem:[#allocation11 + $0xd0] sm:$0xff] }
 0x2aa   :  { %1533 = vmatpush.msrb.mxu0 %v5125_v31  ;;  %7047 = vst [vmem:[#allocation98_spill] sm:$0xff] %v5140_v3  ;;  %v5143_v31 = vld [vmem:[#allocation11 + $0xb0] sm:$0xff] }
 0x2ab   :  { %1553 = vmatpush.msrb.mxu1 %v5128_v16  ;;  %7048 = vst [vmem:[#allocation99_spill] sm:$0xff] %v5143_v31  ;;  %v5146_v16 = vld [vmem:[#allocation11 + $0xb8] sm:$0xff] }
 0x2ac   :  { %1534 = vmatpush.msrb.mxu0 %v5131_v18  ;;  %7049 = vst [vmem:[#allocation100_spill] sm:$0xff] %v5146_v16  ;;  %v5149_v18 = vld [vmem:[#allocation11 + $0x98] sm:$0xff] }
 0x2ad   :  { %1554 = vmatpush.msrb.mxu1 %v5134_v50  ;;  %7050 = vst [vmem:[#allocation101_spill] sm:$0xff] %v5149_v18  ;;  %v5152_v50 = vld [vmem:[#allocation11 + $0xa0] sm:$0xff] }
 0x2ae   :  { %1535 = vmatpush.msrb.mxu0 %v5137_v23  ;;  %7051 = vst [vmem:[#allocation102_spill] sm:$0xff] %v5152_v50  ;;  %v5155_v23 = vld [vmem:[#allocation11 + $0x80] sm:$0xff] }
 0x2af   :  { %1555 = vmatpush.msrb.mxu1 %v5140_v3  ;;  %7052 = vst [vmem:[#allocation103_spill] sm:$0xff] %v5155_v23  ;;  %v5158_v3 = vld [vmem:[#allocation11 + $0x88] sm:$0xff] }
 0x2b0   :  { %1536 = vmatpush.msrb.mxu0 %v5143_v31  ;;  %7053 = vst [vmem:[#allocation104_spill] sm:$0xff] %v5158_v3  ;;  %v5161_v31 = vld [vmem:[#allocation11 + $0x68] sm:$0xff] }
 0x2b1   :  { %1556 = vmatpush.msrb.mxu1 %v5146_v16  ;;  %7054 = vst [vmem:[#allocation105_spill] sm:$0xff] %v5161_v31  ;;  %v5164_v16 = vld [vmem:[#allocation11 + $0x70] sm:$0xff] }
 0x2b2   :  { %1537 = vmatpush.msrb.mxu0 %v5149_v18  ;;  %7055 = vst [vmem:[#allocation106_spill] sm:$0xff] %v5164_v16  ;;  %v5167_v18 = vld [vmem:[#allocation11 + $0x50] sm:$0xff] }
 0x2b3   :  { %1557 = vmatpush.msrb.mxu1 %v5152_v50  ;;  %7056 = vst [vmem:[#allocation107_spill] sm:$0xff] %v5167_v18  ;;  %v5170_v50 = vld [vmem:[#allocation11 + $0x58] sm:$0xff] }
 0x2b4   :  { %1538 = vmatpush.msrb.mxu0 %v5155_v23  ;;  %7057 = vst [vmem:[#allocation108_spill] sm:$0xff] %v5170_v50  ;;  %v5173_v23 = vld [vmem:[#allocation11 + $0x38] sm:$0xff] }
 0x2b5   :  { %1558 = vmatpush.msrb.mxu1 %v5158_v3  ;;  %v5176_v3 = vld [vmem:[#allocation11 + $0x40] sm:$0xff] }
 0x2b6   :  { %1539 = vmatpush.msrb.mxu0 %v5161_v31  ;;  %7058 = vst [vmem:[#allocation109_spill] sm:$0xff] %v5176_v3  ;;  %v5179_v31 = vld [vmem:[#allocation11 + $0x20] sm:$0xff] }
 0x2b7   :  { %1559 = vmatpush.msrb.mxu1 %v5164_v16  ;;  %v5182_v16 = vld [vmem:[#allocation11 + $0x28] sm:$0xff] }
 0x2b8   :  { %1540 = vmatpush.msrb.mxu0 %v5167_v18  ;;  %7059 = vst [vmem:[#allocation110_spill] sm:$0xff] %v5182_v16  ;;  %v5185_v18 = vld [vmem:[#allocation11 + $0x8] sm:$0xff] }
 0x2b9   :  { %1560 = vmatpush.msrb.mxu1 %v5170_v50  ;;  %v5189_v50 = vld [vmem:[#allocation11 + $0x10] sm:$0xff] }
 0x2ba   :  { %1541 = vmatpush.msrb.mxu0 %v5173_v23  ;;  %7060 = vst [vmem:[#allocation111_spill] sm:$0xff] %v5189_v50 }
 0x2bb   :  { %1561 = vmatpush.msrb.mxu1 %v5176_v3  ;;  %v1346_v3 = vld [vmem:[#allocation15 + $0xa0] sm:$0xff] }
 0x2bc   :  { %1542 = vmatpush.msrb.mxu0 %v5179_v31 }
 0x2bd   :  { %1562 = vmatpush.msrb.mxu1 %v5182_v16  ;;  %v1347_v16 = vld [vmem:[#allocation15 + $0xa8] sm:$0xff] }
 0x2be   :  { %1543 = vmatpush.msrb.mxu0 %v5185_v18 }
 0x2bf   :  { %1563 = vmatpush.msrb.mxu1 %v5189_v50  ;;  %v1348_v50 = vld [vmem:[#allocation15 + $0xb0] sm:$0xff] }
 0x2c0   :  { %1648 = vmatpush.msra.mxu0 %v4927_v17  ;;  %1367 = vmatpush.msra.mxu2 %v1348_v50  ;;  %v5235_v50 = vld [vmem:[#allocation8 + $0x38] sm:$0xff] }
 0x2c1   :  { %7069 = vst [vmem:[#allocation120_spill] sm:$0xff] %v5235_v50 }
 0x2c2   :  { %1649 = vmatpush.msra.mxu0 %v4930_v24  ;;  %1368 = vmatpush.msra.mxu2 %v1347_v16  ;;  %v5212_v16 = vld [vmem:[#allocation8 + $0x70] sm:$0xff] }
 0x2c3   :  { %7061 = vst [vmem:[#allocation112_spill] sm:$0xff] %v5212_v16 }
 0x2c4   :  { %1650 = vmatpush.msra.mxu0 %v4933_v20  ;;  %1369 = vmatpush.msra.mxu2 %v1346_v3  ;;  %v5215_v3 = vld [vmem:[#allocation8 + $0x68] sm:$0xff] }
 0x2c5   :  { %7062 = vst [vmem:[#allocation113_spill] sm:$0xff] %v5215_v3 }
 0x2c6   :  { %1651 = vmatpush.msra.mxu0 %v4938_v30 }
 0x2c8   :  { %1652 = vmatpush.msra.mxu0 %v4941_v52 }
 0x2ca   :  { %1653 = vmatpush.msra.mxu0 %v4945_v42 }
 0x2cc   :  { %1654 = vmatpush.msra.mxu0 %v4948_v2  ;;  %v5241_v2 = vld [vmem:[#allocation8 + $0x28] sm:$0xff] }
 0x2cd   :  { %7071 = vst [vmem:[#allocation122_spill] sm:$0xff] %v5241_v2 }
 0x2ce   :  { %1655 = vmatpush.msra.mxu0 %v4951_v4 }
 0x2d0   :  { %1656 = vmatpush.msra.mxu0 %v4956_v15  ;;  %v1236_v15 = vpop.f32.mrf.mxu3 }
 0x2d2   :  { %1657 = vmatpush.msra.mxu0 %v4959_v1  ;;  %v916_v1 = vadd.f32 %v4954_v62, %v4806_v39  ;;  %v5238_v39 = vld [vmem:[#allocation8 + $0x30] sm:$0xff] }
 0x2d3   :  { %7070 = vst [vmem:[#allocation121_spill] sm:$0xff] %v5238_v39 }
 0x2d4   :  { %1658 = vmatpush.msra.mxu0 %v4964_v45  ;;  %v1275_v45 = vadd.f32 %v1236_v15, %v916_v1  ;;  %v5218_v15 = vld [vmem:[#allocation8 + $0x60] sm:$0xff]  ;;  %v5221_v1 = vld [vmem:[#allocation8 + $0x58] sm:$0xff] }
 0x2d5   :  { %7063 = vst [vmem:[#allocation114_spill] sm:$0xff] %v5218_v15 }
 0x2d6   :  { %1659 = vmatpush.msra.mxu0 %v4967_v49  ;;  %v1345_v49 = vld [vmem:[#allocation15 + $0x98] sm:$0xff]  ;;  %v3237_v4 = vmul.f32 -1.442695, %v1275_v45  ;;  %7064 = vst [vmem:[#allocation115_spill] sm:$0xff] %v5221_v1  ;;  %v5224_v45 = vld [vmem:[#allocation8 + $0x50] sm:$0xff] }
 0x2d7   :  { %1370 = vmatpush.msra.mxu2 %v1345_v49  ;;  %7065 = vst [vmem:[#allocation116_spill] sm:$0xff] %v5224_v45  ;;  %v5227_v49 = vld [vmem:[#allocation8 + $0x48] sm:$0xff] }
 0x2d8   :  { %1660 = vmatpush.msra.mxu0 %v4971_v29  ;;  %v1344_v29 = vld [vmem:[#allocation15 + $0x90] sm:$0xff]  ;;  %3323 = vpow2.f32 %v3237_v4  ;;  %7066 = vst [vmem:[#allocation117_spill] sm:$0xff] %v5227_v49 }
 0x2d9   :  { %1371 = vmatpush.msra.mxu2 %v1344_v29  ;;  %v5230_v29 = vld [vmem:[#allocation8 + $0x40] sm:$0xff] }
 0x2da   :  { %1661 = vmatpush.msra.mxu0 %v4974_v9  ;;  %v1343_v9 = vld [vmem:[#allocation15 + $0x88] sm:$0xff]  ;;  %7067 = vst [vmem:[#allocation118_spill] sm:$0xff] %v5230_v29 }
 0x2db   :  { %1372 = vmatpush.msra.mxu2 %v1343_v9  ;;  %v955_v9 = vpop.f32.mrf.mxu0 }
 0x2dc   :  { %1662 = vmatpush.msra.mxu0 %v4979_v37  ;;  %v1342_v37 = vld [vmem:[#allocation15 + $0x80] sm:$0xff] }
 0x2dd   :  { %1373 = vmatpush.msra.mxu2 %v1342_v37 }
 0x2de   :  { %1663 = vmatpush.msra.mxu0 %v4982_v19  ;;  %v5209_v19 = vld [vmem:[#allocation8 + $0x78] sm:$0xff]  ;;  %v3324_v62 = vpop.eup %3323 }
 0x2df   :  { %1481 = vmatpush.msrb.mxu2 %v5209_v19  ;;  %v1279_v4 = vadd.f32 1.0, %v3324_v62 }
 0x2e1   :  { %1482 = vmatpush.msrb.mxu2 %v5212_v16  ;;  %3325 = vrcp.f32 %v1279_v4  ;;  %vm1285_vm1 = vweird.f32 %v1279_v4 }
 0x2e3   :  { %1483 = vmatpush.msrb.mxu2 %v5215_v3 }
 0x2e5   :  { %1484 = vmatpush.msrb.mxu2 %v5218_v15 }
 0x2e7   :  { %1485 = vmatpush.msrb.mxu2 %v5221_v1  ;;  %v3326_v62 = vpop.eup %3325  ;;  %v5254_v1 = vld [vmem:[#allocation8 + $0x10] sm:$0xff] }
 0x2e8   :  { %v1281_v42 = vmul.f32 %v3326_v62, %v1279_v4  ;;  %7075 = vst [vmem:[#allocation126_spill] sm:$0xff] %v5254_v1  ;;  %vm1286_vm0 = vweird.f32 %v3326_v62 }
 0x2e9   :  { %1486 = vmatpush.msrb.mxu2 %v5224_v45  ;;  %v5251_v45 = vld [vmem:[#allocation8 + $0x18] sm:$0xff]  ;;  %vm1287_vm2 = vmor %vm1285_vm1, %vm1286_vm0 }
 0x2ea   :  { %7074 = vst [vmem:[#allocation125_spill] sm:$0xff] %v5251_v45 }
 0x2eb   :  { %1487 = vmatpush.msrb.mxu2 %v5227_v49  ;;  %v936_v49 = vadd.f32 %v4977_v43, %v4812_v11  ;;  %v5257_v43 = vld [vmem:[#allocation8 + $0x8] sm:$0xff] }
 0x2ec   :  { %7076 = vst [vmem:[#allocation127_spill] sm:$0xff] %v5257_v43 }
 0x2ed   :  { %1488 = vmatpush.msrb.mxu2 %v5230_v29  ;;  %v5246_v29 = vld [vmem:[#allocation8 + $0x20] sm:$0xff] }
 0x2ee   :  { %7072 = vst [vmem:[#allocation123_spill] sm:$0xff] %v5246_v29 }
 0x2ef   :  { %1489 = vmatpush.msrb.mxu2 %v5235_v50 }
 0x2f1   :  { %1490 = vmatpush.msrb.mxu2 %v5238_v39  ;;  %v1282_v39 = vsub.f32 1.0, %v1281_v42 }
 0x2f3   :  { %1491 = vmatpush.msrb.mxu2 %v5241_v2  ;;  %v1283_v11 = vmul.f32 %v3326_v62, %v1282_v39 }
 0x2f5   :  { %1492 = vmatpush.msrb.mxu2 %v5246_v29  ;;  %v5260_v29 = vld [vmem:[#allocation8] sm:$0xff] }
 0x2f6   :  { %7077 = vst [vmem:[#allocation128_spill] sm:$0xff] %v5260_v29 }
 0x2f7   :  { %1493 = vmatpush.msrb.mxu2 %v5251_v45  ;;  %v1289_v45 = vand.u32 2147483647, %v1279_v4 }
 0x2f9   :  { %1494 = vmatpush.msrb.mxu2 %v5254_v1  ;;  %vm1290_vm3 = vcmp.eq.f32.partialorder %v1289_v45, 8.507059e+37 }
 0x2fb   :  { %1495 = vmatpush.msrb.mxu2 %v5257_v43 }
 0x2fc   :  { %v5233_v37 = vpop.f32.mrf.mxu0  ;;  %v5249_v52 = vpop.f32.mrf.mxu1 }
 0x2fd   :  { %7068 = vst [vmem:[#allocation119_spill] sm:$0xff] %v5233_v37  ;;  %1496 = vmatpush.msrb.mxu2 %v5260_v29  ;;  %v956_v29 = vadd.f32 %v955_v9, %v4872_v12 }
 0x2fe   :  { %7073 = vst [vmem:[#allocation124_spill] sm:$0xff] %v5249_v52  ;;  %v1291_v52 = vand.u32 2147483648, %v1279_v4 }
 0x300   :  { %v1292_v2 = vor.u32 1.1754944e-38, %v1291_v52 }
 0x304   :  { %v1256_v37 = vpop.f32.mrf.mxu0 }
 0x305   :  { %v1295_v50 = vadd.f32 %v1256_v37, %v936_v49  ;;  %v1284_v49 = vadd.f32 %v3326_v62, %v1283_v11  ;;  %v1332_v42 = vpop.f32.mrf.mxu1 }
 0x306   :  { %v1333_v1 = vadd.f32 %v4865_v10, %v1332_v42 }
 0x307   :  { %v3238_v30 = vmul.f32 -1.442695, %v1295_v50 }
 0x309   :  { %3327 = vpow2.f32 %v3238_v30  ;;  %v1288_v30 = vsel %vm1287_vm2, %v3326_v62, %v1284_v49 }
 0x30a   :  { %v1293_v39 = vsel %vm1290_vm3, %v1292_v2, %v1288_v30 }
 0x30b   :  { %v1335_v43 = vmul.f32 %v1333_v1, %v1293_v39 }
 0x30d   :  { %v1336_v20 = vadd.f32 %v1335_v43, %v956_v29  ;;  %v7094_v43 = vld [vmem:[#allocation88_spill] sm:$0xff] }
 0x30f   :  { %v3328_v37 = vpop.eup %3327 }
 0x310   :  { %v1299_v50 = vadd.f32 1.0, %v3328_v37 }
 0x312   :  { %3329 = vrcp.f32 %v1299_v50  ;;  %v1311_v24 = vand.u32 2147483648, %v1299_v50  ;;  %v1309_v37 = vand.u32 2147483647, %v1299_v50  ;;  %vm1305_vm5 = vweird.f32 %v1299_v50 }
 0x313   :  { %3331 = vtanh.f32 %v1336_v20  ;;  %v7092_v20 = vld [vmem:[#allocation30_spill] sm:$0xff] }
 0x314   :  { %v1312_v62 = vor.u32 1.1754944e-38, %v1311_v24  ;;  %vm1310_vm7 = vcmp.eq.f32.partialorder %v1309_v37, 8.507059e+37 }
 0x318   :  { %v3330_v15 = vpop.eup %3329 }
 0x319   :  { %v1301_v11 = vmul.f32 %v3330_v15, %v1299_v50  ;;  %vm1306_vm4 = vweird.f32 %v3330_v15  ;;  %v3332_v1 = vpop.eup %3331 }
 0x31a   :  { %vm1307_vm6 = vmor %vm1305_vm5, %vm1306_vm4 }
 0x31b   :  { %v1302_v3 = vsub.f32 1.0, %v1301_v11 }
 0x31d   :  { %v1303_v16 = vmul.f32 %v3330_v15, %v1302_v3  ;;  %v1438_v29 = vpop.f32.mrf.mxu1 }
 0x31f   :  { %v1304_v4 = vadd.f32 %v3330_v15, %v1303_v16  ;;  %v7093_v16 = vld [vmem:[#allocation87_spill] sm:$0xff] }
 0x320   :  { %v409_v3 = vadd.f32 %v7093_v16, %v7092_v20  ;;  %v5430_v20 = vld [vmem:[#allocation12 + $0x50] sm:$0xff] }
 0x321   :  { %v1308_v10 = vsel %vm1307_vm6, %v3330_v15, %v1304_v4 }
 0x322   :  { %v1313_v52 = vsel %vm1310_vm7, %v1312_v62, %v1308_v10  ;;  %v450_v42 = vadd.f32 %v7094_v43, %v409_v3  ;;  %v5325_v62 = vpop.f32.mrf.mxu2 }
 0x323   :  { %v1338_v2 = vsub.f32 1.0, %v1313_v52  ;;  %v1340_v9 = vmul.f32 %v1313_v52, %v4920_v61 }
 0x324   :  { %v1461_v50 = vadd.f32 %v1438_v29, %v450_v42  ;;  %v7097_v42 = vld [vmem:[#allocation90_spill] sm:$0xff] }
 0x325   :  { %v1339_v45 = vmul.f32 %v3332_v1, %v1338_v2 }
 0x326   :  { %v3240_v30 = vmul.f32 -1.442695, %v1461_v50 }
 0x327   :  { %v5266_v49 = vadd.f32 %v1340_v9, %v1339_v45 }
 0x329   :  { %1374 = vmatmul.f32.vlgmr.msra.gmra.mxu2 %v5266_v49 }
 0x32a   :  { %1568 = vmatpush.msra.mxu2 %v4829_v7  ;;  %v7078_v7 = vld [vmem:[#allocation49_spill] sm:$0xff] }
 0x32c   :  { %1569 = vmatpush.msra.mxu2 %v4835_v8  ;;  %v7079_v8 = vld [vmem:[#allocation55_spill] sm:$0xff] }
 0x32e   :  { %1570 = vmatpush.msra.mxu2 %v4839_v48  ;;  %v7080_v48 = vld [vmem:[#allocation28_spill] sm:$0xff] }
 0x330   :  { %1571 = vmatpush.msra.mxu2 %v4846_v27  ;;  %v7081_v27 = vld [vmem:[#allocation86_spill] sm:$0xff] }
 0x331   :  { %1497 = vmatmul.f32.vlgmr.msrb.gmra.mxu2 %v4990_v41  ;;  %7156 = vst [vmem:[#allocation86_spill] sm:$0xff] %v5430_v20 }
 0x332   :  { %1572 = vmatpush.msra.mxu2 %v4854_v0  ;;  %v7082_v0 = vld [vmem:[#allocation95_spill] sm:$0xff] }
 0x334   :  { %1573 = vmatpush.msra.mxu2 %v4859_v6  ;;  %v7083_v6 = vld [vmem:[#allocation97_spill] sm:$0xff] }
 0x336   :  { %1574 = vmatpush.msra.mxu2 %v4868_v34  ;;  %v7084_v34 = vld [vmem:[#allocation99_spill] sm:$0xff] }
 0x338   :  { %1575 = vmatpush.msra.mxu2 %v4875_v57  ;;  %v7085_v57 = vld [vmem:[#allocation101_spill] sm:$0xff] }
 0x33a   :  { %1576 = vmatpush.msra.mxu2 %v4881_v33  ;;  %v7086_v33 = vld [vmem:[#allocation103_spill] sm:$0xff] }
 0x33c   :  { %1577 = vmatpush.msra.mxu2 %v4886_v46  ;;  %v7087_v46 = vld [vmem:[#allocation24_spill] sm:$0xff] }
 0x33e   :  { %1578 = vmatpush.msra.mxu2 %v4892_v13  ;;  %v7088_v13 = vld [vmem:[#allocation47_spill] sm:$0xff] }
 0x340   :  { %1579 = vmatpush.msra.mxu2 %v4899_v5  ;;  %v327_v5 = vadd.f32 %v7088_v13, %v7087_v46 }
 0x342   :  { %1580 = vmatpush.msra.mxu2 %v4904_v54  ;;  %v7089_v54 = vld [vmem:[#allocation105_spill] sm:$0xff] }
 0x344   :  { %1581 = vmatpush.msra.mxu2 %v4908_v55  ;;  %v7090_v55 = vld [vmem:[#allocation107_spill] sm:$0xff] }
 0x346   :  { %1582 = vmatpush.msra.mxu2 %v4912_v56  ;;  %v1418_v56 = vpop.f32.mrf.mxu0 }
 0x348   :  { %1583 = vmatpush.msra.mxu2 %v4916_v35  ;;  %v7091_v35 = vld [vmem:[#allocation48_spill] sm:$0xff] }
 0x349   :  { %1584 = vmatmul.f32.vlgmr.msra.gmra.mxu2 %v5266_v49  ;;  %v368_v61 = vadd.f32 %v7091_v35, %v327_v5 }
 0x34a   :  { %1715 = vmatpush.msrb.mxu2 %v4995_v26 }
 0x34b   :  { %v1441_v24 = vadd.f32 %v1418_v56, %v368_v61  ;;  %v7096_v61 = vld [vmem:[#allocation59_spill] sm:$0xff] }
 0x34c   :  { %1716 = vmatpush.msrb.mxu2 %v5001_v59 }
 0x34d   :  { %v3239_v15 = vmul.f32 -1.442695, %v1441_v24 }
 0x34e   :  { %1717 = vmatpush.msrb.mxu2 %v5007_v38 }
 0x34f   :  { %3333 = vpow2.f32 %v3239_v15 }
 0x350   :  { %1718 = vmatpush.msrb.mxu2 %v5013_v44  ;;  %3335 = vpow2.f32 %v3240_v30 }
 0x352   :  { %1719 = vmatpush.msrb.mxu2 %v5021_v63 }
 0x354   :  { %1720 = vmatpush.msrb.mxu2 %v5027_v47 }
 0x355   :  { %v3334_v39 = vpop.eup %3333 }
 0x356   :  { %1721 = vmatpush.msrb.mxu2 %v5033_v51  ;;  %v1445_v11 = vadd.f32 1.0, %v3334_v39  ;;  %v3336_v37 = vpop.eup %3335 }
 0x358   :  { %1722 = vmatpush.msrb.mxu2 %v5039_v40  ;;  %3337 = vrcp.f32 %v1445_v11  ;;  %v1457_v13 = vand.u32 2147483648, %v1445_v11  ;;  %vm1451_vm9 = vweird.f32 %v1445_v11  ;;  %v1455_v5 = vand.u32 2147483647, %v1445_v11 }
 0x35a   :  { %1723 = vmatpush.msrb.mxu2 %v5045_v60  ;;  %v1458_v56 = vor.u32 1.1754944e-38, %v1457_v13  ;;  %vm1456_vm11 = vcmp.eq.f32.partialorder %v1455_v5, 8.507059e+37  ;;  %v7101_v13 = vld [vmem:[#allocation32_spill] sm:$0xff]  ;;  %v7102_v5 = vld [vmem:[#allocation66_spill] sm:$0xff] }
 0x35c   :  { %1724 = vmatpush.msrb.mxu2 %v5051_v14 }
 0x35e   :  { %1725 = vmatpush.msrb.mxu2 %v5057_v21  ;;  %v3338_v4 = vpop.eup %3337 }
 0x35f   :  { %vm1452_vm8 = vweird.f32 %v3338_v4 }
 0x360   :  { %1726 = vmatpush.msrb.mxu2 %v5063_v36  ;;  %vm1453_vm10 = vmor %vm1451_vm9, %vm1452_vm8 }
 0x362   :  { %1727 = vmatpush.msrb.mxu2 %v5069_v53 }
 0x364   :  { %1728 = vmatpush.msrb.mxu2 %v5075_v25 }
 0x366   :  { %1729 = vmatpush.msrb.mxu2 %v5081_v28 }
 0x368   :  { %1730 = vmatpush.msrb.mxu2 %v5087_v58 }
 0x36a   :  { %1842 = vmatpush.msra.mxu2 %v5095_v22 }
 0x36c   :  { %1843 = vmatpush.msra.mxu2 %v5101_v32 }
 0x36e   :  { %1844 = vmatpush.msra.mxu2 %v7078_v7 }
 0x370   :  { %1845 = vmatpush.msra.mxu2 %v7079_v8 }
 0x372   :  { %1846 = vmatpush.msra.mxu2 %v7080_v48 }
 0x374   :  { %1847 = vmatpush.msra.mxu2 %v7081_v27 }
 0x376   :  { %1848 = vmatpush.msra.mxu2 %v7082_v0 }
 0x378   :  { %1849 = vmatpush.msra.mxu2 %v7083_v6 }
 0x37a   :  { %1850 = vmatpush.msra.mxu2 %v7084_v34 }
 0x37c   :  { %1851 = vmatpush.msra.mxu2 %v7085_v57 }
 0x37e   :  { %1852 = vmatpush.msra.mxu2 %v7086_v33 }
 0x380   :  { %1853 = vmatpush.msra.mxu2 %v7089_v54 }
 0x382   :  { %1854 = vmatpush.msra.mxu2 %v7090_v55 }
 0x384   :  { %1855 = vmatpush.msra.mxu2 %v5173_v23  ;;  %v1465_v23 = vadd.f32 1.0, %v3336_v37 }
 0x386   :  { %1856 = vmatpush.msra.mxu2 %v5179_v31  ;;  %3339 = vrcp.f32 %v1465_v23  ;;  %v1447_v31 = vmul.f32 %v3338_v4, %v1445_v11  ;;  %v1477_v15 = vand.u32 2147483648, %v1465_v23  ;;  %vm1471_vm13 = vweird.f32 %v1465_v23 }
 0x387   :  { %v1475_v43 = vand.u32 2147483647, %v1465_v23 }
 0x388   :  { %1857 = vmatpush.msra.mxu2 %v5185_v18  ;;  %v1448_v18 = vsub.f32 1.0, %v1447_v31  ;;  %v1478_v39 = vor.u32 1.1754944e-38, %v1477_v15  ;;  %v7110_v15 = vld [vmem:[#allocation67_spill] sm:$0xff] }
 0x389   :  { %vm1476_vm15 = vcmp.eq.f32.partialorder %v1475_v43, 8.507059e+37  ;;  %v1685_v43 = vld [vmem:[#allocation15 + $0x150] sm:$0xff] }
 0x38a   :  { %v1449_v2 = vmul.f32 %v3338_v4, %v1448_v18 }
 0x38c   :  { %v3340_v10 = vpop.eup %3339  ;;  %v1450_v9 = vadd.f32 %v3338_v4, %v1449_v2  ;;  %v1689_v2 = vld [vmem:[#allocation15 + $0x170] sm:$0xff] }
 0x38d   :  { %v1467_v52 = vmul.f32 %v3340_v10, %v1465_v23  ;;  %vm1472_vm12 = vweird.f32 %v3340_v10  ;;  %v1690_v23 = vld [vmem:[#allocation15 + $0x178] sm:$0xff] }
 0x38e   :  { %v1454_v55 = vsel %vm1453_vm10, %v3338_v4, %v1450_v9  ;;  %vm1473_vm14 = vmor %vm1471_vm13, %vm1472_vm12  ;;  %1691 = vmatpush.msra.mxu1 %v1690_v23  ;;  %v1688_v9 = vld [vmem:[#allocation15 + $0x168] sm:$0xff] }
 0x38f   :  { %v1468_v45 = vsub.f32 1.0, %v1467_v52  ;;  %v1459_v3 = vsel %vm1456_vm11, %v1458_v56, %v1454_v55  ;;  %v7104_v55 = vld [vmem:[#allocation31_spill] sm:$0xff]  ;;  %v7105_v56 = vld [vmem:[#allocation65_spill] sm:$0xff]  ;;  %v7121_v23 = vld [vmem:[#allocation44_spill] sm:$0xff] }
 0x390   :  { %1692 = vmatpush.msra.mxu1 %v1689_v2  ;;  %v7123_v2 = vld [vmem:[#allocation121_spill] sm:$0xff] }
 0x391   :  { %v1469_v54 = vmul.f32 %v3340_v10, %v1468_v45  ;;  %v7100_v45 = vld [vmem:[#allocation112_spill] sm:$0xff] }
 0x392   :  { %1693 = vmatpush.msra.mxu1 %v1688_v9  ;;  %v7125_v9 = vld [vmem:[#allocation76_spill] sm:$0xff] }
 0x393   :  { %v1470_v16 = vadd.f32 %v3340_v10, %v1469_v54  ;;  %v7103_v54 = vld [vmem:[#allocation113_spill] sm:$0xff] }
 0x395   :  { %v1474_v30 = vsel %vm1473_vm14, %v3340_v10, %v1470_v16  ;;  %v7098_v10 = vld [vmem:[#allocation64_spill] sm:$0xff]  ;;  %v1686_v16 = vld [vmem:[#allocation15 + $0x158] sm:$0xff] }
 0x396   :  { %v1479_v11 = vsel %vm1476_vm15, %v1478_v39, %v1474_v30  ;;  %v7114_v30 = vld [vmem:[#allocation117_spill] sm:$0xff]  ;;  %v7115_v39 = vld [vmem:[#allocation40_spill] sm:$0xff] }
 0x397   :  { %v1504_v37 = vsub.f32 1.0, %v1479_v11  ;;  %v1506_v18 = vmul.f32 %v1479_v11, %v4990_v41  ;;  %v7099_v41 = vld [vmem:[#allocation63_spill] sm:$0xff]  ;;  %v7116_v11 = vld [vmem:[#allocation69_spill] sm:$0xff] }
 0x3ac   :  { %v5327_v1 = vpop.f32.mrf.mxu2 }
 0x3ad   :  { %7095 = vst [vmem:[#allocation49_spill] sm:$0xff] %v5327_v1  ;;  %v5434_v1 = vld [vmem:[#allocation12 + $0x40] sm:$0xff] }
 0x3ae   :  { %7158 = vst [vmem:[#allocation95_spill] sm:$0xff] %v5434_v1 }
 0x3b4   :  { %v1498_v35 = vpop.f32.mrf.mxu2 }
 0x3b5   :  { %v1499_v24 = vadd.f32 %v7096_v61, %v1498_v35  ;;  %v7106_v35 = vld [vmem:[#allocation114_spill] sm:$0xff]  ;;  %v7107_v61 = vld [vmem:[#allocation68_spill] sm:$0xff] }
 0x3b7   :  { %v1501_v29 = vmul.f32 %v1499_v24, %v1459_v3  ;;  %v7108_v24 = vld [vmem:[#allocation115_spill] sm:$0xff]  ;;  %v7109_v3 = vld [vmem:[#allocation36_spill] sm:$0xff] }
 0x3b9   :  { %v1502_v50 = vadd.f32 %v1501_v29, %v7097_v42  ;;  %v7111_v29 = vld [vmem:[#allocation116_spill] sm:$0xff]  ;;  %v7112_v42 = vld [vmem:[#allocation35_spill] sm:$0xff] }
 0x3bb   :  { %3341 = vtanh.f32 %v1502_v50  ;;  %v7113_v50 = vld [vmem:[#allocation72_spill] sm:$0xff] }
 0x3c1   :  { %v3342_v4 = vpop.eup %3341 }
 0x3c2   :  { %v1505_v31 = vmul.f32 %v3342_v4, %v1504_v37  ;;  %v7117_v37 = vld [vmem:[#allocation118_spill] sm:$0xff]  ;;  %v7118_v4 = vld [vmem:[#allocation39_spill] sm:$0xff] }
 0x3c4   :  { %v5332_v52 = vadd.f32 %v1506_v18, %v1505_v31  ;;  %v7119_v31 = vld [vmem:[#allocation74_spill] sm:$0xff]  ;;  %v7120_v18 = vld [vmem:[#allocation120_spill] sm:$0xff] }
 0x3c6   :  { %1524 = vmatmul.f32.vlgmr.msrb.gmra.mxu3 %v5332_v52  ;;  %1544 = vmatmul.f32.vlgmr.msrb.gmra.mxu0 %v5332_v52 }
 0x3c7   :  { %1564 = vmatmul.f32.vlgmr.msrb.gmra.mxu1 %v5332_v52  ;;  %1731 = vmatmul.f32.vlgmr.msrb.gmra.mxu2 %v5332_v52 }
 0x3c8   :  { %1735 = vmatpush.msrb.mxu3 %v7098_v10  ;;  %1795 = vmatpush.msrb.mxu0 %v5209_v19  ;;  %v7122_v10 = vld [vmem:[#allocation73_spill] sm:$0xff] }
 0x3c9   :  { %1962 = vmatpush.msrb.mxu2 %v4927_v17  ;;  %v1687_v17 = vld [vmem:[#allocation15 + $0x160] sm:$0xff] }
 0x3ca   :  { %1736 = vmatpush.msrb.mxu3 %v7099_v41  ;;  %1796 = vmatpush.msrb.mxu0 %v7100_v45  ;;  %v7124_v41 = vld [vmem:[#allocation43_spill] sm:$0xff] }
 0x3cb   :  { %1963 = vmatpush.msrb.mxu2 %v7101_v13  ;;  %1694 = vmatpush.msra.mxu1 %v1687_v17  ;;  %v7126_v13 = vld [vmem:[#allocation122_spill] sm:$0xff] }
 0x3cc   :  { %1737 = vmatpush.msrb.mxu3 %v7102_v5  ;;  %1797 = vmatpush.msrb.mxu0 %v7103_v54  ;;  %v7127_v5 = vld [vmem:[#allocation51_spill] sm:$0xff]  ;;  %v7130_v17 = vld [vmem:[#allocation50_spill] sm:$0xff] }
 0x3cd   :  { %1964 = vmatpush.msrb.mxu2 %v7104_v55  ;;  %1695 = vmatpush.msra.mxu1 %v1686_v16  ;;  %v7128_v55 = vld [vmem:[#allocation75_spill] sm:$0xff]  ;;  %v7132_v16 = vld [vmem:[#allocation125_spill] sm:$0xff] }
 0x3ce   :  { %1738 = vmatpush.msrb.mxu3 %v7105_v56  ;;  %1798 = vmatpush.msrb.mxu0 %v7106_v35  ;;  %v7129_v56 = vld [vmem:[#allocation123_spill] sm:$0xff] }
 0x3cf   :  { %1604 = vmatmul.f32.vlgmr.msra.gmra.mxu3 %v5266_v49  ;;  %1664 = vmatmul.f32.vlgmr.msra.gmra.mxu0 %v5266_v49 }
 0x3d0   :  { %1739 = vmatpush.msrb.mxu3 %v7107_v61  ;;  %1799 = vmatpush.msrb.mxu0 %v7108_v24  ;;  %v7131_v61 = vld [vmem:[#allocation78_spill] sm:$0xff] }
 0x3d1   :  { %1965 = vmatpush.msrb.mxu2 %v7109_v3  ;;  %1696 = vmatpush.msra.mxu1 %v1685_v43  ;;  %v7133_v3 = vld [vmem:[#allocation54_spill] sm:$0xff] }
 0x3d2   :  { %1740 = vmatpush.msrb.mxu3 %v7110_v15  ;;  %1800 = vmatpush.msrb.mxu0 %v7111_v29  ;;  %v7134_v15 = vld [vmem:[#allocation77_spill] sm:$0xff]  ;;  %v7135_v43 = vld [vmem:[#allocation126_spill] sm:$0xff] }
 0x3d3   :  { %1966 = vmatpush.msrb.mxu2 %v7112_v42  ;;  %v7136_v42 = vld [vmem:[#allocation53_spill] sm:$0xff] }
 0x3d4   :  { %1741 = vmatpush.msrb.mxu3 %v7113_v50  ;;  %1801 = vmatpush.msrb.mxu0 %v7114_v30  ;;  %v7137_v50 = vld [vmem:[#allocation80_spill] sm:$0xff] }
 0x3d5   :  { %1967 = vmatpush.msrb.mxu2 %v7115_v39  ;;  %v7138_v39 = vld [vmem:[#allocation127_spill] sm:$0xff] }
 0x3d6   :  { %1742 = vmatpush.msrb.mxu3 %v7116_v11  ;;  %1802 = vmatpush.msrb.mxu0 %v7117_v37  ;;  %v7139_v11 = vld [vmem:[#allocation57_spill] sm:$0xff] }
 0x3d7   :  { %1968 = vmatpush.msrb.mxu2 %v7118_v4  ;;  %v7140_v4 = vld [vmem:[#allocation79_spill] sm:$0xff] }
 0x3d8   :  { %1743 = vmatpush.msrb.mxu3 %v7119_v31  ;;  %1803 = vmatpush.msrb.mxu0 %v7120_v18  ;;  %v7141_v31 = vld [vmem:[#allocation128_spill] sm:$0xff] }
 0x3d9   :  { %1969 = vmatpush.msrb.mxu2 %v7121_v23  ;;  %v5388_v23 = vld [vmem:[#allocation12 + $0xf0] sm:$0xff] }
 0x3da   :  { %1744 = vmatpush.msrb.mxu3 %v7122_v10  ;;  %1804 = vmatpush.msrb.mxu0 %v7123_v2  ;;  %v7142_v10 = vld [vmem:[#allocation25_spill] sm:$0xff] }
 0x3db   :  { %1970 = vmatpush.msrb.mxu2 %v7124_v41  ;;  %v7143_v41 = vld [vmem:[#allocation56_spill] sm:$0xff] }
 0x3dc   :  { %1745 = vmatpush.msrb.mxu3 %v7125_v9  ;;  %1805 = vmatpush.msrb.mxu0 %v7126_v13  ;;  %v5393_v9 = vld [vmem:[#allocation12 + $0xe0] sm:$0xff] }
 0x3dd   :  { %1971 = vmatpush.msrb.mxu2 %v7127_v5  ;;  %v7144_v5 = vld [vmem:[#allocation26_spill] sm:$0xff] }
 0x3de   :  { %1746 = vmatpush.msrb.mxu3 %v7128_v55  ;;  %1806 = vmatpush.msrb.mxu0 %v7129_v56  ;;  %v7145_v55 = vld [vmem:[#allocation60_spill] sm:$0xff] }
 0x3df   :  { %1972 = vmatpush.msrb.mxu2 %v7130_v17  ;;  %v5398_v17 = vld [vmem:[#allocation12 + $0xd0] sm:$0xff] }
 0x3e0   :  { %1747 = vmatpush.msrb.mxu3 %v7131_v61  ;;  %1807 = vmatpush.msrb.mxu0 %v7132_v16  ;;  %v7146_v61 = vld [vmem:[#allocation52_spill] sm:$0xff] }
 0x3e1   :  { %1973 = vmatpush.msrb.mxu2 %v7133_v3  ;;  %v5402_v3 = vld [vmem:[#allocation12 + $0xc0] sm:$0xff] }
 0x3e2   :  { %1748 = vmatpush.msrb.mxu3 %v7134_v15  ;;  %1808 = vmatpush.msrb.mxu0 %v7135_v43  ;;  %v7147_v15 = vld [vmem:[#allocation58_spill] sm:$0xff] }
 0x3e3   :  { %1974 = vmatpush.msrb.mxu2 %v7136_v42  ;;  %v5406_v42 = vld [vmem:[#allocation12 + $0xb0] sm:$0xff] }
 0x3e4   :  { %1749 = vmatpush.msrb.mxu3 %v7137_v50  ;;  %1809 = vmatpush.msrb.mxu0 %v7138_v39  ;;  %v7148_v50 = vld [vmem:[#allocation29_spill] sm:$0xff] }
 0x3e5   :  { %1975 = vmatpush.msrb.mxu2 %v7139_v11  ;;  %v5410_v11 = vld [vmem:[#allocation12 + $0xa0] sm:$0xff] }
 0x3e6   :  { %1750 = vmatpush.msrb.mxu3 %v7140_v4  ;;  %1810 = vmatpush.msrb.mxu0 %v7141_v31  ;;  %v7149_v4 = vld [vmem:[#allocation94_spill] sm:$0xff] }
 0x3e7   :  { %1751 = vmatmul.f32.vlgmr.msrb.gmra.mxu3 %v5332_v52  ;;  %1811 = vmatmul.f32.vlgmr.msrb.gmra.mxu0 %v5332_v52 }
 0x3e8   :  { %1882 = vmatpush.msra.mxu0 %v5388_v23  ;;  %1862 = vmatpush.msra.mxu3 %v7142_v10  ;;  %v5414_v10 = vld [vmem:[#allocation12 + $0x90] sm:$0xff] }
 0x3e9   :  { %1976 = vmatpush.msrb.mxu2 %v7143_v41  ;;  %v7150_v41 = vld [vmem:[#allocation96_spill] sm:$0xff] }
 0x3ea   :  { %1883 = vmatpush.msra.mxu0 %v5393_v9  ;;  %1863 = vmatpush.msra.mxu3 %v7144_v5  ;;  %v5418_v5 = vld [vmem:[#allocation12 + $0x80] sm:$0xff] }
 0x3eb   :  { %1977 = vmatpush.msrb.mxu2 %v7145_v55  ;;  %v7151_v55 = vld [vmem:[#allocation98_spill] sm:$0xff] }
 0x3ec   :  { %1884 = vmatpush.msra.mxu0 %v5398_v17  ;;  %1864 = vmatpush.msra.mxu3 %v7146_v61  ;;  %v5422_v61 = vld [vmem:[#allocation12 + $0x70] sm:$0xff] }
 0x3ed   :  { %7152 = vst [vmem:[#allocation55_spill] sm:$0xff] %v5422_v61 }
 0x3ee   :  { %1885 = vmatpush.msra.mxu0 %v5402_v3  ;;  %1865 = vmatpush.msra.mxu3 %v7147_v15  ;;  %v7153_v15 = vld [vmem:[#allocation100_spill] sm:$0xff] }
 0x3f0   :  { %1886 = vmatpush.msra.mxu0 %v5406_v42  ;;  %1866 = vmatpush.msra.mxu3 %v7148_v50  ;;  %v5426_v50 = vld [vmem:[#allocation12 + $0x60] sm:$0xff] }
 0x3f1   :  { %7154 = vst [vmem:[#allocation28_spill] sm:$0xff] %v5426_v50 }
 0x3f2   :  { %1887 = vmatpush.msra.mxu0 %v5410_v11  ;;  %1867 = vmatpush.msra.mxu3 %v7149_v4  ;;  %v7155_v4 = vld [vmem:[#allocation102_spill] sm:$0xff] }
 0x3f4   :  { %1888 = vmatpush.msra.mxu0 %v5414_v10  ;;  %1868 = vmatpush.msra.mxu3 %v7150_v41  ;;  %v7157_v41 = vld [vmem:[#allocation104_spill] sm:$0xff] }
 0x3f6   :  { %1889 = vmatpush.msra.mxu0 %v5418_v5  ;;  %1869 = vmatpush.msra.mxu3 %v7151_v55  ;;  %v7159_v55 = vld [vmem:[#allocation106_spill] sm:$0xff] }
 0x3f8   :  { %1890 = vmatpush.msra.mxu0 %v5422_v61  ;;  %1870 = vmatpush.msra.mxu3 %v7153_v15  ;;  %v5438_v61 = vld [vmem:[#allocation12 + $0x30] sm:$0xff]  ;;  %v7160_v15 = vld [vmem:[#allocation108_spill] sm:$0xff] }
 0x3fa   :  { %1891 = vmatpush.msra.mxu0 %v5426_v50  ;;  %1871 = vmatpush.msra.mxu3 %v7155_v4  ;;  %v5442_v50 = vld [vmem:[#allocation12 + $0x20] sm:$0xff]  ;;  %v7161_v4 = vld [vmem:[#allocation109_spill] sm:$0xff] }
 0x3fc   :  { %1892 = vmatpush.msra.mxu0 %v5430_v20  ;;  %1872 = vmatpush.msra.mxu3 %v7157_v41  ;;  %v5446_v20 = vld [vmem:[#allocation12 + $0x10] sm:$0xff] }
 0x3fd   :  { %7162 = vst [vmem:[#allocation97_spill] sm:$0xff] %v5446_v20  ;;  %v7163_v41 = vld [vmem:[#allocation110_spill] sm:$0xff] }
 0x3fe   :  { %1893 = vmatpush.msra.mxu0 %v5434_v1  ;;  %1873 = vmatpush.msra.mxu3 %v7159_v55  ;;  %v5450_v1 = vld [vmem:[#allocation12] sm:$0xff] }
 0x3ff   :  { %7164 = vst [vmem:[#allocation99_spill] sm:$0xff] %v5450_v1  ;;  %v7165_v55 = vld [vmem:[#allocation111_spill] sm:$0xff] }
 0x400   :  { %1894 = vmatpush.msra.mxu0 %v5438_v61  ;;  %1874 = vmatpush.msra.mxu3 %v7160_v15  ;;  %v5472_v15 = vld [vmem:[#allocation11 + $0x168] sm:$0xff] }
 0x401   :  { %7168 = vst [vmem:[#allocation101_spill] sm:$0xff] %v5472_v15 }
 0x402   :  { %1895 = vmatpush.msra.mxu0 %v5442_v50  ;;  %1875 = vmatpush.msra.mxu3 %v7161_v4  ;;  %v5475_v4 = vld [vmem:[#allocation11 + $0x150] sm:$0xff] }
 0x403   :  { %7169 = vst [vmem:[#allocation103_spill] sm:$0xff] %v5475_v4 }
 0x404   :  { %1896 = vmatpush.msra.mxu0 %v5446_v20  ;;  %1876 = vmatpush.msra.mxu3 %v7163_v41  ;;  %v5478_v41 = vld [vmem:[#allocation11 + $0x138] sm:$0xff]  ;;  %v7192_v20 = vld [vmem:[#allocation92_spill] sm:$0xff] }
 0x405   :  { %7170 = vst [vmem:[#allocation47_spill] sm:$0xff] %v5478_v41 }
 0x406   :  { %1897 = vmatpush.msra.mxu0 %v5450_v1  ;;  %1877 = vmatpush.msra.mxu3 %v7165_v55 }
 0x408   :  { %2029 = vmatpush.msrb.mxu0 %v4995_v26  ;;  %v1684_v26 = vld [vmem:[#allocation15 + $0x148] sm:$0xff] }
 0x409   :  { %1697 = vmatpush.msra.mxu1 %v1684_v26  ;;  %v5481_v26 = vld [vmem:[#allocation11 + $0x120] sm:$0xff] }
 0x40a   :  { %2030 = vmatpush.msrb.mxu0 %v5001_v59  ;;  %v1683_v59 = vld [vmem:[#allocation15 + $0x140] sm:$0xff]  ;;  %7171 = vst [vmem:[#allocation105_spill] sm:$0xff] %v5481_v26 }
 0x40b   :  { %1698 = vmatpush.msra.mxu1 %v1683_v59  ;;  %v5484_v59 = vpop.f32.mrf.mxu3 }
 0x40c   :  { %2031 = vmatpush.msrb.mxu0 %v5007_v38  ;;  %v1682_v38 = vld [vmem:[#allocation15 + $0x138] sm:$0xff]  ;;  %7172 = vst [vmem:[#allocation107_spill] sm:$0xff] %v5484_v59 }
 0x40d   :  { %1699 = vmatpush.msra.mxu1 %v1682_v38  ;;  %v5486_v38 = vld [vmem:[#allocation11 + $0x108] sm:$0xff] }
 0x40e   :  { %2032 = vmatpush.msrb.mxu0 %v5013_v44  ;;  %v1681_v44 = vld [vmem:[#allocation15 + $0x130] sm:$0xff]  ;;  %7173 = vst [vmem:[#allocation48_spill] sm:$0xff] %v5486_v38 }
 0x40f   :  { %1700 = vmatpush.msra.mxu1 %v1681_v44 }
 0x410   :  { %2033 = vmatpush.msrb.mxu0 %v5021_v63  ;;  %v1680_v63 = vld [vmem:[#allocation15 + $0x128] sm:$0xff] }
 0x411   :  { %1701 = vmatpush.msra.mxu1 %v1680_v63  ;;  %v5489_v63 = vld [vmem:[#allocation11 + $0xf0] sm:$0xff] }
 0x412   :  { %2034 = vmatpush.msrb.mxu0 %v5027_v47  ;;  %v1585_v47 = vpop.f32.mrf.mxu2  ;;  %7174 = vst [vmem:[#allocation87_spill] sm:$0xff] %v5489_v63 }
 0x414   :  { %2035 = vmatpush.msrb.mxu0 %v5033_v51  ;;  %v7167_v51 = vld [vmem:[#allocation119_spill] sm:$0xff] }
 0x416   :  { %2036 = vmatpush.msrb.mxu0 %v5039_v40  ;;  %v1679_v40 = vld [vmem:[#allocation15 + $0x120] sm:$0xff] }
 0x417   :  { %1702 = vmatpush.msra.mxu1 %v1679_v40  ;;  %v5497_v40 = vld [vmem:[#allocation11 + $0xc0] sm:$0xff] }
 0x418   :  { %2037 = vmatpush.msrb.mxu0 %v5045_v60  ;;  %v1677_v60 = vld [vmem:[#allocation15 + $0x110] sm:$0xff]  ;;  %7177 = vst [vmem:[#allocation59_spill] sm:$0xff] %v5497_v40 }
 0x41a   :  { %2038 = vmatpush.msrb.mxu0 %v5051_v14  ;;  %v1676_v14 = vld [vmem:[#allocation15 + $0x108] sm:$0xff] }
 0x41c   :  { %2039 = vmatpush.msrb.mxu0 %v5057_v21  ;;  %v1675_v21 = vld [vmem:[#allocation15 + $0x100] sm:$0xff] }
 0x41e   :  { %2040 = vmatpush.msrb.mxu0 %v5063_v36  ;;  %v7166_v36 = vld [vmem:[#allocation42_spill] sm:$0xff] }
 0x420   :  { %2041 = vmatpush.msrb.mxu0 %v5069_v53  ;;  %v1145_v53 = vadd.f32 %v7167_v51, %v7166_v36 }
 0x422   :  { %2042 = vmatpush.msrb.mxu0 %v5075_v25  ;;  %v1608_v25 = vadd.f32 %v1585_v47, %v1145_v53  ;;  %v7175_v47 = vld [vmem:[#allocation61_spill] sm:$0xff]  ;;  %v5494_v53 = vld [vmem:[#allocation11 + $0xd8] sm:$0xff] }
 0x423   :  { %v330_v51 = vadd.f32 %v7175_v47, %v7087_v46  ;;  %7176 = vst [vmem:[#allocation88_spill] sm:$0xff] %v5494_v53  ;;  %v5509_v46 = vld [vmem:[#allocation11 + $0x78] sm:$0xff] }
 0x424   :  { %2043 = vmatpush.msrb.mxu0 %v5081_v28  ;;  %v1678_v28 = vld [vmem:[#allocation15 + $0x118] sm:$0xff]  ;;  %7182 = vst [vmem:[#allocation112_spill] sm:$0xff] %v5509_v46 }
 0x425   :  { %1703 = vmatpush.msra.mxu1 %v1678_v28 }
 0x426   :  { %2044 = vmatpush.msrb.mxu0 %v5087_v58  ;;  %v3241_v58 = vmul.f32 -1.442695, %v1608_v25  ;;  %v7178_v25 = vld [vmem:[#allocation62_spill] sm:$0xff] }
 0x427   :  { %1704 = vmatpush.msra.mxu1 %v1677_v60  ;;  %v371_v28 = vadd.f32 %v7178_v25, %v330_v51  ;;  %v5512_v25 = vld [vmem:[#allocation11 + $0x60] sm:$0xff] }
 0x428   :  { %3343 = vpow2.f32 %v3241_v58  ;;  %7183 = vst [vmem:[#allocation32_spill] sm:$0xff] %v5512_v25 }
 0x429   :  { %1705 = vmatpush.msra.mxu1 %v1676_v14  ;;  %v5503_v14 = vld [vmem:[#allocation11 + $0xa8] sm:$0xff] }
 0x42a   :  { %7180 = vst [vmem:[#allocation64_spill] sm:$0xff] %v5503_v14 }
 0x42b   :  { %1706 = vmatpush.msra.mxu1 %v1675_v21 }
 0x42d   :  { %1822 = vmatpush.msrb.mxu1 %v5472_v15 }
 0x42e   :  { %v3344_v55 = vpop.eup %3343 }
 0x42f   :  { %1823 = vmatpush.msrb.mxu1 %v5475_v4  ;;  %v1612_v44 = vadd.f32 1.0, %v3344_v55  ;;  %v5506_v55 = vld [vmem:[#allocation11 + $0x90] sm:$0xff] }
 0x430   :  { %7181 = vst [vmem:[#allocation63_spill] sm:$0xff] %v5506_v55 }
 0x431   :  { %1824 = vmatpush.msrb.mxu1 %v5478_v41  ;;  %3345 = vrcp.f32 %v1612_v44  ;;  %vm1618_vm1 = vweird.f32 %v1612_v44 }
 0x433   :  { %1825 = vmatpush.msrb.mxu1 %v5481_v26  ;;  %v5522_v26 = vld [vmem:[#allocation11 + $0x30] sm:$0xff] }
 0x434   :  { %7188 = vst [vmem:[#allocation31_spill] sm:$0xff] %v5522_v26 }
 0x435   :  { %1826 = vmatpush.msrb.mxu1 %v5486_v38  ;;  %v5519_v38 = vld [vmem:[#allocation11 + $0x48] sm:$0xff] }
 0x436   :  { %7187 = vst [vmem:[#allocation113_spill] sm:$0xff] %v5519_v38 }
 0x437   :  { %1827 = vmatpush.msrb.mxu1 %v5489_v63  ;;  %v3346_v47 = vpop.eup %3345  ;;  %v7185_v63 = vld [vmem:[#allocation124_spill] sm:$0xff] }
 0x438   :  { %v1614_v51 = vmul.f32 %v3346_v47, %v1612_v44  ;;  %vm1619_vm0 = vweird.f32 %v3346_v47 }
 0x439   :  { %1828 = vmatpush.msrb.mxu1 %v5494_v53  ;;  %vm1620_vm2 = vmor %vm1618_vm1, %vm1619_vm0 }
 0x43b   :  { %1829 = vmatpush.msrb.mxu1 %v5497_v40  ;;  %v7184_v40 = vld [vmem:[#allocation46_spill] sm:$0xff] }
 0x43d   :  { %1830 = vmatpush.msrb.mxu1 %v5503_v14  ;;  %v1165_v14 = vadd.f32 %v7185_v63, %v7184_v40 }
 0x43f   :  { %1831 = vmatpush.msrb.mxu1 %v5506_v55  ;;  %v1615_v55 = vsub.f32 1.0, %v1614_v51 }
 0x441   :  { %1832 = vmatpush.msrb.mxu1 %v5509_v46  ;;  %v1616_v63 = vmul.f32 %v3346_v47, %v1615_v55 }
 0x443   :  { %1833 = vmatpush.msrb.mxu1 %v5512_v25  ;;  %v5525_v25 = vld [vmem:[#allocation11 + $0x18] sm:$0xff] }
 0x444   :  { %7189 = vst [vmem:[#allocation65_spill] sm:$0xff] %v5525_v25 }
 0x445   :  { %1834 = vmatpush.msrb.mxu1 %v5519_v38  ;;  %v1624_v38 = vand.u32 2147483648, %v1612_v44 }
 0x447   :  { %1835 = vmatpush.msrb.mxu1 %v5522_v26 }
 0x449   :  { %v5501_v60 = vpop.f32.mrf.mxu3  ;;  %1836 = vmatpush.msrb.mxu1 %v5525_v25 }
 0x44a   :  { %7179 = vst [vmem:[#allocation90_spill] sm:$0xff] %v5501_v60  ;;  %v1732_v58 = vpop.f32.mrf.mxu2 }
 0x44b   :  { %v1755_v21 = vadd.f32 %v1732_v58, %v371_v28  ;;  %v5517_v28 = vpop.f32.mrf.mxu0 }
 0x44c   :  { %7186 = vst [vmem:[#allocation66_spill] sm:$0xff] %v5517_v28  ;;  %v5528_v28 = vld [vmem:[#allocation11] sm:$0xff] }
 0x44d   :  { %v3243_v53 = vmul.f32 -1.442695, %v1755_v21  ;;  %7190 = vst [vmem:[#allocation114_spill] sm:$0xff] %v5528_v28  ;;  %1837 = vmatpush.msrb.mxu1 %v5528_v28 }
 0x44f   :  { %3347 = vpow2.f32 %v3243_v53 }
 0x452   :  { %v1605_v58 = vpop.f32.mrf.mxu3 }
 0x453   :  { %v1628_v21 = vadd.f32 %v1605_v58, %v1165_v14  ;;  %v1617_v14 = vadd.f32 %v3346_v47, %v1616_v63  ;;  %v1665_v51 = vpop.f32.mrf.mxu0  ;;  %v1625_v63 = vor.u32 1.1754944e-38, %v1624_v38  ;;  %v5539_v38 = vld [vmem:[#allocation9] ss:$0 sm:$0xff] }
 0x455   :  { %v3348_v53 = vpop.eup %3347  ;;  %v3242_v46 = vmul.f32 -1.442695, %v1628_v21  ;;  %v1622_v21 = vand.u32 2147483647, %v1612_v44  ;;  %v1621_v4 = vsel %vm1620_vm2, %v3346_v47, %v1617_v14  ;;  %v1185_v14 = vadd.f32 %v5325_v62, %v4872_v12  ;;  %v7193_v12 = vld [vmem:[#allocation89_spill] sm:$0xff] }
 0x456   :  { %v1759_v41 = vadd.f32 1.0, %v3348_v53 }
 0x457   :  { %3349 = vpow2.f32 %v3242_v46  ;;  %v5534_v46 = vld [vmem:[%s6587_s10] ss:$0 sm:$0xff]  ;;  %vm1623_vm3 = vcmp.eq.f32.partialorder %v1622_v21, 8.507059e+37 }
 0x458   :  { %3351 = vrcp.f32 %v1759_v41  ;;  %7191 = vst [vmem:[#allocation68_spill] sm:$0xff] %v5534_v46  ;;  %v1666_v55 = vadd.f32 %v5534_v46, %v1665_v51  ;;  %v1771_v25 = vand.u32 2147483648, %v1759_v41  ;;  %v1626_v15 = vsel %vm1623_vm3, %v1625_v63, %v1621_v4 }
 0x459   :  { %v1769_v44 = vand.u32 2147483647, %v1759_v41  ;;  %vm1765_vm5 = vweird.f32 %v1759_v41 }
 0x45a   :  { %v1772_v1 = vor.u32 1.1754944e-38, %v1771_v25 }
 0x45b   :  { %vm1770_vm7 = vcmp.eq.f32.partialorder %v1769_v44, 8.507059e+37 }
 0x45d   :  { %v3350_v58 = vpop.eup %3349 }
 0x45e   :  { %v3352_v26 = vpop.eup %3351  ;;  %v1632_v53 = vadd.f32 1.0, %v3350_v58  ;;  %v1668_v58 = vmul.f32 %v1666_v55, %v1626_v15 }
 0x45f   :  { %v1761_v40 = vmul.f32 %v3352_v26, %v1759_v41  ;;  %vm1766_vm4 = vweird.f32 %v3352_v26 }
 0x460   :  { %3353 = vrcp.f32 %v1632_v53  ;;  %vm1767_vm6 = vmor %vm1765_vm5, %vm1766_vm4  ;;  %v1642_v55 = vand.u32 2147483647, %v1632_v53  ;;  %vm1638_vm9 = vweird.f32 %v1632_v53 }
 0x461   :  { %v1762_v28 = vsub.f32 1.0, %v1761_v40  ;;  %v1669_v40 = vadd.f32 %v1668_v58, %v1185_v14 }
 0x462   :  { %vm1643_vm11 = vcmp.eq.f32.partialorder %v1642_v55, 8.507059e+37  ;;  %v5569_v55 = vld [vmem:[#allocation12 + $0xa8] sm:$0xff] }
 0x463   :  { %v1763_v60 = vmul.f32 %v3352_v26, %v1762_v28  ;;  %3355 = vtanh.f32 %v1669_v40  ;;  %v5561_v40 = vld [vmem:[#allocation12 + $0xc8] sm:$0xff] }
 0x464   :  { %v1812_v36 = vpop.f32.mrf.mxu0 }
 0x465   :  { %v1764_v59 = vadd.f32 %v3352_v26, %v1763_v60  ;;  %v1813_v4 = vadd.f32 %v5539_v38, %v1812_v36  ;;  %v1644_v60 = vand.u32 2147483648, %v1632_v53 }
 0x466   :  { %v3354_v47 = vpop.eup %3353 }
 0x467   :  { %v1634_v51 = vmul.f32 %v3354_v47, %v1632_v53  ;;  %v1768_v46 = vsel %vm1767_vm6, %v3352_v26, %v1764_v59  ;;  %vm1639_vm8 = vweird.f32 %v3354_v47  ;;  %v1645_v44 = vor.u32 1.1754944e-38, %v1644_v60  ;;  %v5553_v53 = vld [vmem:[#allocation12 + $0xe8] sm:$0xff] }
 0x468   :  { %v1773_v28 = vsel %vm1770_vm7, %v1772_v1, %v1768_v46  ;;  %vm1640_vm10 = vmor %vm1638_vm9, %vm1639_vm8 }
 0x469   :  { %v1635_v21 = vsub.f32 1.0, %v1634_v51  ;;  %v1815_v15 = vmul.f32 %v1813_v4, %v1773_v28  ;;  %v3356_v58 = vpop.eup %3355 }
 0x46a   :  { %v1752_v41 = vpop.f32.mrf.mxu3 }
 0x46b   :  { %v1636_v63 = vmul.f32 %v3354_v47, %v1635_v21  ;;  %v1816_v62 = vadd.f32 %v1815_v15, %v7192_v20  ;;  %v1775_v25 = vadd.f32 %v1752_v41, %v7193_v12  ;;  %v5549_v12 = vld [vmem:[#allocation12 + $0xf8] sm:$0xff] }
 0x46c   :  { %v5565_v21 = vld [vmem:[#allocation12 + $0xb8] sm:$0xff] }
 0x46d   :  { %v1637_v26 = vadd.f32 %v3354_v47, %v1636_v63  ;;  %v3244_v59 = vmul.f32 -1.442695, %v1775_v25  ;;  %v5577_v63 = vld [vmem:[#allocation12 + $0x88] sm:$0xff] }
 0x46f   :  { %3357 = vpow2.f32 %v3244_v59  ;;  %v1641_v1 = vsel %vm1640_vm10, %v3354_v47, %v1637_v26  ;;  %v5585_v59 = vld [vmem:[#allocation12 + $0x68] sm:$0xff] }
 0x470   :  { %v1646_v36 = vsel %vm1643_vm11, %v1645_v44, %v1641_v1  ;;  %v5590_v1 = vld [vmem:[#allocation12 + $0x58] sm:$0xff] }
 0x471   :  { %v1671_v46 = vsub.f32 1.0, %v1646_v36  ;;  %v1673_v51 = vmul.f32 %v1646_v36, %v5266_v49  ;;  %v5557_v49 = vld [vmem:[#allocation12 + $0xd8] sm:$0xff] }
 0x473   :  { %v1672_v14 = vmul.f32 %v3356_v58, %v1671_v46  ;;  %v5599_v46 = vld [vmem:[#allocation11 + $0x68] sm:$0xff]  ;;  %v5617_v58 = vld [vmem:[#allocation11 + $0x38] sm:$0xff] }
 0x475   :  { %v3358_v4 = vpop.eup %3357  ;;  %v5545_v28 = vadd.f32 %v1673_v51, %v1672_v14  ;;  %v5624_v14 = vld [vmem:[#allocation11 + $0x20] sm:$0xff]  ;;  %v5633_v51 = vld [vmem:[#allocation6 + $0xf8] sm:$0xff] }
 0x476   :  { %v1779_v20 = vadd.f32 1.0, %v3358_v4  ;;  %v5640_v4 = vld [vmem:[#allocation6 + $0xe8] sm:$0xff] }
 0x477   :  { %1707 = vmatmul.f32.vlgmr.msra.gmra.mxu1 %v5545_v28  ;;  %1898 = vmatmul.f32.vlgmr.msra.gmra.mxu0 %v5545_v28 }
 0x478   :  { %3359 = vrcp.f32 %v1779_v20  ;;  %1902 = vmatpush.msra.mxu1 %v5549_v12  ;;  %2156 = vmatpush.msra.mxu0 %v5095_v22  ;;  %v1791_v15 = vand.u32 2147483648, %v1779_v20  ;;  %v1789_v60 = vand.u32 2147483647, %v1779_v20  ;;  %vm1785_vm13 = vweird.f32 %v1779_v20 }
 0x479   :  { %3361 = vtanh.f32 %v1816_v62  ;;  %v5581_v62 = vld [vmem:[#allocation12 + $0x78] sm:$0xff] }
 0x47a   :  { %1903 = vmatpush.msra.mxu1 %v5553_v53  ;;  %2157 = vmatpush.msra.mxu0 %v5101_v32  ;;  %vm1790_vm15 = vcmp.eq.f32.partialorder %v1789_v60, 8.507059e+37  ;;  %v5689_v60 = vld [vmem:[#allocation6 + $0x78] sm:$0xff] }
 0x47b   :  { %7195 = vst [vmem:[#allocation36_spill] sm:$0xff] %v5689_v60 }
 0x47c   :  { %1904 = vmatpush.msra.mxu1 %v5557_v49  ;;  %2158 = vmatpush.msra.mxu0 %v7078_v7 }
 0x47e   :  { %v3360_v47 = vpop.eup %3359  ;;  %1905 = vmatpush.msra.mxu1 %v5561_v40  ;;  %2159 = vmatpush.msra.mxu0 %v7079_v8  ;;  %v5573_v8 = vld [vmem:[#allocation12 + $0x98] sm:$0xff] }
 0x47f   :  { %v1781_v22 = vmul.f32 %v3360_v47, %v1779_v20  ;;  %vm1786_vm12 = vweird.f32 %v3360_v47  ;;  %v3362_v26 = vpop.eup %3361  ;;  %v5647_v20 = vld [vmem:[#allocation6 + $0xd8] sm:$0xff] }
 0x480   :  { %1906 = vmatpush.msra.mxu1 %v5565_v21  ;;  %2160 = vmatpush.msra.mxu0 %v7080_v48  ;;  %vm1787_vm14 = vmor %vm1785_vm13, %vm1786_vm12  ;;  %v1792_v48 = vor.u32 1.1754944e-38, %v1791_v15  ;;  %v5675_v15 = vld [vmem:[#allocation6 + $0x98] sm:$0xff] }
 0x481   :  { %v1782_v32 = vsub.f32 1.0, %v1781_v22  ;;  %v5661_v22 = vld [vmem:[#allocation6 + $0xb8] sm:$0xff] }
 0x482   :  { %1907 = vmatpush.msra.mxu1 %v5569_v55  ;;  %2161 = vmatpush.msra.mxu0 %v7081_v27 }
 0x483   :  { %v1783_v7 = vmul.f32 %v3360_v47, %v1782_v32  ;;  %v5668_v32 = vld [vmem:[#allocation6 + $0xa8] sm:$0xff] }
 0x484   :  { %1908 = vmatpush.msra.mxu1 %v5573_v8  ;;  %2162 = vmatpush.msra.mxu0 %v7082_v0 }
 0x485   :  { %v1784_v41 = vadd.f32 %v3360_v47, %v1783_v7  ;;  %v5682_v7 = vld [vmem:[#allocation6 + $0x88] sm:$0xff] }
 0x486   :  { %1909 = vmatpush.msra.mxu1 %v5577_v63  ;;  %2163 = vmatpush.msra.mxu0 %v7083_v6 }
 0x487   :  { %v1788_v27 = vsel %vm1787_vm14, %v3360_v47, %v1784_v41  ;;  %v5654_v47 = vld [vmem:[#allocation6 + $0xc8] sm:$0xff] }
 0x488   :  { %v1793_v25 = vsel %vm1790_vm15, %v1792_v48, %v1788_v27  ;;  %1910 = vmatpush.msra.mxu1 %v5581_v62  ;;  %2164 = vmatpush.msra.mxu0 %v7084_v34  ;;  %v5596_v34 = vld [vmem:[#allocation12 + $0x48] sm:$0xff]  ;;  %v5703_v48 = vld [vmem:[#allocation6 + $0x58] sm:$0xff] }
 0x489   :  { %v1818_v0 = vsub.f32 1.0, %v1793_v25  ;;  %v1820_v6 = vmul.f32 %v1793_v25, %v5332_v52  ;;  %v5614_v52 = vld [vmem:[#allocation12 + $0x28] sm:$0xff]  ;;  %7199 = vst [vmem:[#allocation72_spill] sm:$0xff] %v5703_v48  ;;  %v5718_v25 = vld [vmem:[#allocation6 + $0x38] sm:$0xff] }
 0x48a   :  { %1911 = vmatpush.msra.mxu1 %v5585_v59  ;;  %2165 = vmatpush.msra.mxu0 %v7085_v57  ;;  %v5607_v57 = vld [vmem:[#allocation12 + $0x38] sm:$0xff]  ;;  %v5696_v41 = vld [vmem:[#allocation6 + $0x68] sm:$0xff]  ;;  %7203 = vst [vmem:[#allocation118_spill] sm:$0xff] %v5718_v25 }
 0x48b   :  { %v1819_v44 = vmul.f32 %v3362_v26, %v1818_v0  ;;  %7197 = vst [vmem:[#allocation116_spill] sm:$0xff] %v5696_v41  ;;  %v5710_v27 = vld [vmem:[#allocation6 + $0x48] sm:$0xff]  ;;  %v5732_v26 = vld [vmem:[#allocation6 + $0x18] sm:$0xff] }
 0x48c   :  { %1912 = vmatpush.msra.mxu1 %v5590_v1  ;;  %2166 = vmatpush.msra.mxu0 %v7086_v33  ;;  %v5610_v33 = vld [vmem:[#allocation11 + $0x50] sm:$0xff]  ;;  %7201 = vst [vmem:[#allocation40_spill] sm:$0xff] %v5710_v27  ;;  %v5725_v0 = vld [vmem:[#allocation6 + $0x28] sm:$0xff] }
 0x48d   :  { %v5594_v36 = vadd.f32 %v1820_v6, %v1819_v44  ;;  %7205 = vst [vmem:[#allocation74_spill] sm:$0xff] %v5725_v0  ;;  %v5739_v44 = vld [vmem:[#allocation6 + $0x8] sm:$0xff]  ;;  %v5748_v6 = vld [vmem:[#allocation11 + $0x178] sm:$0xff] }
 0x48e   :  { %1913 = vmatpush.msra.mxu1 %v5596_v34  ;;  %2167 = vmatpush.msra.mxu0 %v5599_v46  ;;  %7207 = vst [vmem:[#allocation44_spill] sm:$0xff] %v5732_v26 }
 0x48f   :  { %1838 = vmatmul.f32.vlgmr.msrb.gmra.mxu1 %v5594_v36  ;;  %1858 = vmatmul.f32.vlgmr.msra.gmra.mxu2 %v5594_v36  ;;  %7209 = vst [vmem:[#allocation121_spill] sm:$0xff] %v5739_v44 }
 0x490   :  { %1878 = vmatmul.f32.vlgmr.msra.gmra.mxu3 %v5594_v36  ;;  %2045 = vmatmul.f32.vlgmr.msrb.gmra.mxu0 %v5594_v36  ;;  %7211 = vst [vmem:[#allocation76_spill] sm:$0xff] %v5748_v6 }
 0x491   :  { %2109 = vmatpush.msra.mxu2 %v5209_v19  ;;  %1914 = vmatpush.msra.mxu1 %v5607_v57  ;;  %v5621_v19 = vld [vmem:[#allocation12 + $0x18] sm:$0xff] }
 0x492   :  { %2168 = vmatpush.msra.mxu0 %v5610_v33 }
 0x493   :  { %2110 = vmatpush.msra.mxu2 %v7100_v45  ;;  %1915 = vmatpush.msra.mxu1 %v5614_v52  ;;  %v5628_v45 = vld [vmem:[#allocation12 + $0x8] sm:$0xff] }
 0x494   :  { %2169 = vmatpush.msra.mxu0 %v5617_v58 }
 0x495   :  { %2111 = vmatpush.msra.mxu2 %v7103_v54  ;;  %1916 = vmatpush.msra.mxu1 %v5621_v19  ;;  %v5637_v54 = vld [vmem:[#allocation11 + $0x8] sm:$0xff] }
 0x496   :  { %2170 = vmatpush.msra.mxu0 %v5624_v14 }
 0x497   :  { %2112 = vmatpush.msra.mxu2 %v7106_v35  ;;  %1917 = vmatpush.msra.mxu1 %v5628_v45  ;;  %v5644_v35 = vld [vmem:[#allocation14 + $0x78] sm:$0xff] }
 0x498   :  { %1918 = vmatmul.f32.vlgmr.msra.gmra.mxu1 %v5545_v28  ;;  %1978 = vmatmul.f32.vlgmr.msrb.gmra.mxu2 %v5545_v28 }
 0x499   :  { %2049 = vmatpush.msrb.mxu1 %v5633_v51  ;;  %2113 = vmatpush.msra.mxu2 %v7108_v24  ;;  %v5651_v24 = vld [vmem:[#allocation14 + $0x70] sm:$0xff] }
 0x49a   :  { %2171 = vmatpush.msra.mxu0 %v5637_v54 }
 0x49b   :  { %2050 = vmatpush.msrb.mxu1 %v5640_v4  ;;  %2114 = vmatpush.msra.mxu2 %v7111_v29  ;;  %v5658_v29 = vld [vmem:[#allocation14 + $0x68] sm:$0xff] }
 0x49c   :  { %2276 = vmatpush.msrb.mxu0 %v5644_v35 }
 0x49d   :  { %2051 = vmatpush.msrb.mxu1 %v5647_v20  ;;  %2115 = vmatpush.msra.mxu2 %v7114_v30  ;;  %v5665_v30 = vld [vmem:[#allocation14 + $0x60] sm:$0xff] }
 0x49e   :  { %2277 = vmatpush.msrb.mxu0 %v5651_v24 }
 0x49f   :  { %2052 = vmatpush.msrb.mxu1 %v5654_v47  ;;  %2116 = vmatpush.msra.mxu2 %v7117_v37  ;;  %v5672_v37 = vld [vmem:[#allocation14 + $0x58] sm:$0xff] }
 0x4a0   :  { %2278 = vmatpush.msrb.mxu0 %v5658_v29 }
 0x4a1   :  { %2053 = vmatpush.msrb.mxu1 %v5661_v22  ;;  %2117 = vmatpush.msra.mxu2 %v7120_v18  ;;  %v5679_v18 = vld [vmem:[#allocation14 + $0x50] sm:$0xff] }
 0x4a2   :  { %2279 = vmatpush.msrb.mxu0 %v5665_v30 }
 0x4a3   :  { %2054 = vmatpush.msrb.mxu1 %v5668_v32  ;;  %2118 = vmatpush.msra.mxu2 %v7123_v2  ;;  %v5686_v2 = vld [vmem:[#allocation14 + $0x48] sm:$0xff] }
 0x4a4   :  { %2280 = vmatpush.msrb.mxu0 %v5672_v37  ;;  %7194 = vst [vmem:[#allocation115_spill] sm:$0xff] %v5686_v2 }
 0x4a5   :  { %2055 = vmatpush.msrb.mxu1 %v5675_v15  ;;  %2119 = vmatpush.msra.mxu2 %v7126_v13  ;;  %v5693_v13 = vld [vmem:[#allocation14 + $0x40] sm:$0xff] }
 0x4a6   :  { %2281 = vmatpush.msrb.mxu0 %v5679_v18  ;;  %7196 = vst [vmem:[#allocation67_spill] sm:$0xff] %v5693_v13 }
 0x4a7   :  { %2056 = vmatpush.msrb.mxu1 %v5682_v7  ;;  %2120 = vmatpush.msra.mxu2 %v7129_v56  ;;  %v5700_v56 = vld [vmem:[#allocation14 + $0x38] sm:$0xff] }
 0x4a8   :  { %2282 = vmatpush.msrb.mxu0 %v5686_v2  ;;  %7198 = vst [vmem:[#allocation35_spill] sm:$0xff] %v5700_v56 }
 0x4a9   :  { %2057 = vmatpush.msrb.mxu1 %v5689_v60  ;;  %2121 = vmatpush.msra.mxu2 %v7132_v16  ;;  %v5707_v16 = vld [vmem:[#allocation14 + $0x30] sm:$0xff] }
 0x4aa   :  { %2283 = vmatpush.msrb.mxu0 %v5693_v13  ;;  %7200 = vst [vmem:[#allocation117_spill] sm:$0xff] %v5707_v16 }
 0x4ab   :  { %2058 = vmatpush.msrb.mxu1 %v5696_v41  ;;  %2122 = vmatpush.msra.mxu2 %v7135_v43  ;;  %v5715_v43 = vld [vmem:[#allocation14 + $0x28] sm:$0xff] }
 0x4ac   :  { %2284 = vmatpush.msrb.mxu0 %v5700_v56  ;;  %7202 = vst [vmem:[#allocation69_spill] sm:$0xff] %v5715_v43 }
 0x4ad   :  { %2059 = vmatpush.msrb.mxu1 %v5703_v48  ;;  %2123 = vmatpush.msra.mxu2 %v7138_v39  ;;  %v5722_v39 = vld [vmem:[#allocation14 + $0x20] sm:$0xff]  ;;  %v7279_v48 = vld [vmem:[#allocation45_spill] sm:$0xff] }
 0x4ae   :  { %2285 = vmatpush.msrb.mxu0 %v5707_v16  ;;  %7204 = vst [vmem:[#allocation39_spill] sm:$0xff] %v5722_v39 }
 0x4af   :  { %2060 = vmatpush.msrb.mxu1 %v5710_v27  ;;  %2124 = vmatpush.msra.mxu2 %v7141_v31  ;;  %v5729_v31 = vld [vmem:[#allocation14 + $0x18] sm:$0xff]  ;;  %v7276_v27 = vld [vmem:[#allocation65_spill] sm:$0xff] }
 0x4b0   :  { %2125 = vmatmul.f32.vlgmr.msra.gmra.mxu2 %v5594_v36  ;;  %2286 = vmatpush.msrb.mxu0 %v5715_v43  ;;  %7206 = vst [vmem:[#allocation120_spill] sm:$0xff] %v5729_v31  ;;  %v7255_v43 = vld [vmem:[#allocation101_spill] sm:$0xff] }
 0x4b1   :  { %2061 = vmatpush.msrb.mxu1 %v5718_v25  ;;  %2196 = vmatpush.msrb.mxu2 %v5388_v23  ;;  %v5736_v23 = vld [vmem:[#allocation14 + $0x10] sm:$0xff] }
 0x4b2   :  { %2287 = vmatpush.msrb.mxu0 %v5722_v39  ;;  %7208 = vst [vmem:[#allocation73_spill] sm:$0xff] %v5736_v23  ;;  %v1991_v25 = vld [vmem:[#allocation15 + $0x190] sm:$0xff] }
 0x4b3   :  { %2062 = vmatpush.msrb.mxu1 %v5725_v0  ;;  %2197 = vmatpush.msrb.mxu2 %v5393_v9  ;;  %v5744_v9 = vld [vmem:[#allocation14 + $0x8] sm:$0xff] }
 0x4b4   :  { %2288 = vmatpush.msrb.mxu0 %v5729_v31  ;;  %7210 = vst [vmem:[#allocation43_spill] sm:$0xff] %v5744_v9 }
 0x4b5   :  { %2063 = vmatpush.msrb.mxu1 %v5732_v26  ;;  %2198 = vmatpush.msrb.mxu2 %v5398_v17  ;;  %v5751_v17 = vld [vmem:[#allocation14] sm:$0xff] }
 0x4b6   :  { %2289 = vmatpush.msrb.mxu0 %v5736_v23  ;;  %7212 = vst [vmem:[#allocation122_spill] sm:$0xff] %v5751_v17  ;;  %v7253_v23 = vld [vmem:[#allocation90_spill] sm:$0xff] }
 0x4b7   :  { %2064 = vmatpush.msrb.mxu1 %v5739_v44  ;;  %2199 = vmatpush.msrb.mxu2 %v5402_v3  ;;  %v5755_v44 = vld [vmem:[#allocation11 + $0x160] sm:$0xff]  ;;  %v5759_v3 = vld [vmem:[#allocation11 + $0x148] sm:$0xff] }
 0x4b8   :  { %2065 = vmatmul.f32.vlgmr.msrb.gmra.mxu1 %v5594_v36  ;;  %2290 = vmatpush.msrb.mxu0 %v5744_v9  ;;  %7213 = vst [vmem:[#allocation51_spill] sm:$0xff] %v5755_v44  ;;  %v7216_v9 = vld [vmem:[#allocation55_spill] sm:$0xff] }
 0x4b9   :  { %2200 = vmatpush.msrb.mxu2 %v5406_v42  ;;  %2176 = vmatpush.msra.mxu1 %v5748_v6  ;;  %7214 = vst [vmem:[#allocation75_spill] sm:$0xff] %v5759_v3  ;;  %v5763_v42 = vld [vmem:[#allocation11 + $0x130] sm:$0xff]  ;;  %v7251_v6 = vld [vmem:[#allocation107_spill] sm:$0xff] }
 0x4ba   :  { %2291 = vmatpush.msrb.mxu0 %v5751_v17  ;;  %7215 = vst [vmem:[#allocation123_spill] sm:$0xff] %v5763_v42  ;;  %v5767_v17 = vld [vmem:[#allocation11 + $0x118] sm:$0xff] }
 0x4bb   :  { %2201 = vmatpush.msrb.mxu2 %v5410_v11  ;;  %2177 = vmatpush.msra.mxu1 %v5755_v44  ;;  %7217 = vst [vmem:[#allocation50_spill] sm:$0xff] %v5767_v17  ;;  %v7218_v11 = vld [vmem:[#allocation28_spill] sm:$0xff] }
 0x4bc   :  { %v5771_v44 = vld [vmem:[#allocation11 + $0x100] sm:$0xff] }
 0x4bd   :  { %2202 = vmatpush.msrb.mxu2 %v5414_v10  ;;  %2178 = vmatpush.msra.mxu1 %v5759_v3  ;;  %7219 = vst [vmem:[#allocation78_spill] sm:$0xff] %v5771_v44  ;;  %v7220_v10 = vld [vmem:[#allocation86_spill] sm:$0xff]  ;;  %v5775_v3 = vld [vmem:[#allocation11 + $0xe8] sm:$0xff] }
 0x4be   :  { %7221 = vst [vmem:[#allocation125_spill] sm:$0xff] %v5775_v3 }
 0x4bf   :  { %2203 = vmatpush.msrb.mxu2 %v5418_v5  ;;  %2179 = vmatpush.msra.mxu1 %v5763_v42  ;;  %v7222_v5 = vld [vmem:[#allocation95_spill] sm:$0xff]  ;;  %v5779_v42 = vld [vmem:[#allocation11 + $0xd0] sm:$0xff] }
 0x4c0   :  { %7223 = vst [vmem:[#allocation54_spill] sm:$0xff] %v5779_v42 }
 0x4c1   :  { %2204 = vmatpush.msrb.mxu2 %v7216_v9  ;;  %2180 = vmatpush.msra.mxu1 %v5767_v17  ;;  %v5783_v9 = vld [vmem:[#allocation11 + $0xb8] sm:$0xff]  ;;  %v7250_v17 = vld [vmem:[#allocation49_spill] sm:$0xff] }
 0x4c2   :  { %7224 = vst [vmem:[#allocation77_spill] sm:$0xff] %v5783_v9 }
 0x4c3   :  { %2205 = vmatpush.msrb.mxu2 %v7218_v11  ;;  %2181 = vmatpush.msra.mxu1 %v5771_v44  ;;  %v5787_v11 = vld [vmem:[#allocation11 + $0xa0] sm:$0xff] }
 0x4c4   :  { %7225 = vst [vmem:[#allocation126_spill] sm:$0xff] %v5787_v11  ;;  %v5837_v44 = vld [vmem:[#allocation6 + $0x60] sm:$0xff] }
 0x4c5   :  { %2206 = vmatpush.msrb.mxu2 %v7220_v10  ;;  %2182 = vmatpush.msra.mxu1 %v5775_v3  ;;  %v7226_v10 = vld [vmem:[#allocation97_spill] sm:$0xff]  ;;  %7243 = vst [vmem:[#allocation98_spill] sm:$0xff] %v5837_v44 }
 0x4c6   :  { %v5791_v3 = vld [vmem:[#allocation11 + $0x88] sm:$0xff] }
 0x4c7   :  { %2207 = vmatpush.msrb.mxu2 %v7222_v5  ;;  %2183 = vmatpush.msra.mxu1 %v5779_v42  ;;  %7227 = vst [vmem:[#allocation53_spill] sm:$0xff] %v5791_v3  ;;  %v7228_v5 = vld [vmem:[#allocation99_spill] sm:$0xff]  ;;  %v5795_v42 = vld [vmem:[#allocation11 + $0x70] sm:$0xff] }
 0x4c8   :  { %7229 = vst [vmem:[#allocation80_spill] sm:$0xff] %v5795_v42 }
 0x4c9   :  { %2208 = vmatpush.msrb.mxu2 %v5438_v61  ;;  %2184 = vmatpush.msra.mxu1 %v5783_v9  ;;  %v5798_v61 = vld [vmem:[#allocation6 + $0xf0] sm:$0xff] }
 0x4ca   :  { %7230 = vst [vmem:[#allocation127_spill] sm:$0xff] %v5798_v61  ;;  %v5834_v9 = vld [vmem:[#allocation6 + $0x70] sm:$0xff] }
 0x4cb   :  { %2209 = vmatpush.msrb.mxu2 %v5442_v50  ;;  %2185 = vmatpush.msra.mxu1 %v5787_v11  ;;  %v5801_v50 = vld [vmem:[#allocation11 + $0x58] sm:$0xff]  ;;  %7242 = vst [vmem:[#allocation96_spill] sm:$0xff] %v5834_v9 }
 0x4cc   :  { %7231 = vst [vmem:[#allocation57_spill] sm:$0xff] %v5801_v50  ;;  %v5804_v11 = vld [vmem:[#allocation6 + $0xe0] sm:$0xff] }
 0x4cd   :  { %2210 = vmatpush.msrb.mxu2 %v7226_v10  ;;  %2186 = vmatpush.msra.mxu1 %v5791_v3  ;;  %7232 = vst [vmem:[#allocation79_spill] sm:$0xff] %v5804_v11  ;;  %v5807_v10 = vld [vmem:[#allocation11 + $0x40] sm:$0xff]  ;;  %v5828_v3 = vld [vmem:[#allocation6 + $0x90] sm:$0xff] }
 0x4ce   :  { %7233 = vst [vmem:[#allocation128_spill] sm:$0xff] %v5807_v10 }
 0x4cf   :  { %2211 = vmatpush.msrb.mxu2 %v7228_v5  ;;  %2187 = vmatpush.msra.mxu1 %v5795_v42  ;;  %v5810_v5 = vld [vmem:[#allocation6 + $0xd0] sm:$0xff]  ;;  %7240 = vst [vmem:[#allocation29_spill] sm:$0xff] %v5828_v3 }
 0x4d0   :  { %7234 = vst [vmem:[#allocation25_spill] sm:$0xff] %v5810_v5  ;;  %v5813_v42 = vld [vmem:[#allocation11 + $0x28] sm:$0xff] }
 0x4d1   :  { %2343 = vmatpush.msra.mxu2 %v5798_v61  ;;  %2188 = vmatpush.msra.mxu1 %v5801_v50  ;;  %7235 = vst [vmem:[#allocation56_spill] sm:$0xff] %v5813_v42  ;;  %v5816_v61 = vld [vmem:[#allocation6 + $0xc0] sm:$0xff]  ;;  %v5819_v50 = vld [vmem:[#allocation11 + $0x10] sm:$0xff] }
 0x4d2   :  { %7236 = vst [vmem:[#allocation26_spill] sm:$0xff] %v5816_v61 }
 0x4d3   :  { %2344 = vmatpush.msra.mxu2 %v5804_v11  ;;  %2189 = vmatpush.msra.mxu1 %v5807_v10  ;;  %7237 = vst [vmem:[#allocation60_spill] sm:$0xff] %v5819_v50  ;;  %v5822_v11 = vld [vmem:[#allocation6 + $0xb0] sm:$0xff]  ;;  %v5825_v10 = vld [vmem:[#allocation6 + $0xa0] sm:$0xff] }
 0x4d4   :  { %7238 = vst [vmem:[#allocation52_spill] sm:$0xff] %v5822_v11 }
 0x4d5   :  { %2345 = vmatpush.msra.mxu2 %v5810_v5  ;;  %2190 = vmatpush.msra.mxu1 %v5813_v42  ;;  %7239 = vst [vmem:[#allocation58_spill] sm:$0xff] %v5825_v10  ;;  %v2004_v5 = vld [vmem:[#allocation15 + $0x1f8] sm:$0xff]  ;;  %v2003_v42 = vld [vmem:[#allocation15 + $0x1f0] sm:$0xff] }
 0x4d6   :  { %2005 = vmatpush.msrb.mxu3 %v2004_v5  ;;  %v1999_v5 = vld [vmem:[#allocation15 + $0x1d0] sm:$0xff] }
 0x4d7   :  { %2346 = vmatpush.msra.mxu2 %v5816_v61  ;;  %2191 = vmatpush.msra.mxu1 %v5819_v50  ;;  %v5831_v61 = vld [vmem:[#allocation6 + $0x80] sm:$0xff]  ;;  %v2002_v50 = vld [vmem:[#allocation15 + $0x1e8] sm:$0xff] }
 0x4d8   :  { %7241 = vst [vmem:[#allocation94_spill] sm:$0xff] %v5831_v61  ;;  %2006 = vmatpush.msrb.mxu3 %v2003_v42  ;;  %v1998_v42 = vld [vmem:[#allocation15 + $0x1c8] sm:$0xff] }
 0x4d9   :  { %2347 = vmatpush.msra.mxu2 %v5822_v11  ;;  %v2001_v11 = vld [vmem:[#allocation15 + $0x1e0] sm:$0xff] }
 0x4da   :  { %2007 = vmatpush.msrb.mxu3 %v2002_v50  ;;  %v1997_v50 = vld [vmem:[#allocation15 + $0x1c0] sm:$0xff] }
 0x4db   :  { %2348 = vmatpush.msra.mxu2 %v5825_v10  ;;  %v2000_v10 = vld [vmem:[#allocation15 + $0x1d8] sm:$0xff] }
 0x4dc   :  { %2008 = vmatpush.msrb.mxu3 %v2001_v11  ;;  %v5849_v11 = vld [vmem:[#allocation6 + $0x20] sm:$0xff] }
 0x4dd   :  { %2349 = vmatpush.msra.mxu2 %v5828_v3  ;;  %v5840_v3 = vld [vmem:[#allocation6 + $0x50] sm:$0xff]  ;;  %7247 = vst [vmem:[#allocation106_spill] sm:$0xff] %v5849_v11 }
 0x4de   :  { %7244 = vst [vmem:[#allocation100_spill] sm:$0xff] %v5840_v3  ;;  %2009 = vmatpush.msrb.mxu3 %v2000_v10  ;;  %v5854_v10 = vld [vmem:[#allocation6 + $0x10] sm:$0xff] }
 0x4df   :  { %2350 = vmatpush.msra.mxu2 %v5831_v61  ;;  %v5843_v61 = vld [vmem:[#allocation6 + $0x40] sm:$0xff]  ;;  %7248 = vst [vmem:[#allocation108_spill] sm:$0xff] %v5854_v10 }
 0x4e0   :  { %7245 = vst [vmem:[#allocation102_spill] sm:$0xff] %v5843_v61  ;;  %2010 = vmatpush.msrb.mxu3 %v1999_v5  ;;  %v1995_v5 = vld [vmem:[#allocation15 + $0x1b0] sm:$0xff] }
 0x4e1   :  { %2351 = vmatpush.msra.mxu2 %v5834_v9  ;;  %v5846_v9 = vld [vmem:[#allocation6 + $0x30] sm:$0xff] }
 0x4e2   :  { %7246 = vst [vmem:[#allocation104_spill] sm:$0xff] %v5846_v9  ;;  %2011 = vmatpush.msrb.mxu3 %v1998_v42  ;;  %v1994_v42 = vld [vmem:[#allocation15 + $0x1a8] sm:$0xff] }
 0x4e3   :  { %2352 = vmatpush.msra.mxu2 %v5837_v44  ;;  %v1996_v44 = vld [vmem:[#allocation15 + $0x1b8] sm:$0xff] }
 0x4e4   :  { %2012 = vmatpush.msrb.mxu3 %v1997_v50  ;;  %v7252_v50 = vld [vmem:[#allocation42_spill] sm:$0xff] }
 0x4e5   :  { %2353 = vmatpush.msra.mxu2 %v5840_v3  ;;  %v5852_v3 = vpop.f32.mrf.mxu1  ;;  %v1526_v26 = vadd.f32 %v7253_v23, %v7252_v50  ;;  %v7257_v23 = vld [vmem:[#allocation47_spill] sm:$0xff]  ;;  %v7269_v50 = vld [vmem:[#allocation112_spill] sm:$0xff] }
 0x4e6   :  { %2013 = vmatpush.msrb.mxu3 %v1996_v44  ;;  %v1566_v56 = vadd.f32 %v5852_v3, %v7279_v48 }
 0x4e7   :  { %2354 = vmatpush.msra.mxu2 %v5843_v61  ;;  %v5857_v61 = vld [vmem:[#allocation6] sm:$0xff] }
 0x4e8   :  { %7249 = vst [vmem:[#allocation109_spill] sm:$0xff] %v5857_v61  ;;  %2014 = vmatpush.msrb.mxu3 %v1995_v5  ;;  %v1990_v5 = vld [vmem:[#allocation15 + $0x188] sm:$0xff] }
 0x4e9   :  { %2355 = vmatpush.msra.mxu2 %v5846_v9  ;;  %v1993_v9 = vld [vmem:[#allocation15 + $0x1a0] sm:$0xff] }
 0x4ea   :  { %2015 = vmatpush.msrb.mxu3 %v1994_v42  ;;  %v1989_v42 = vld [vmem:[#allocation15 + $0x180] sm:$0xff] }
 0x4eb   :  { %2356 = vmatpush.msra.mxu2 %v5849_v11  ;;  %v1396_v11 = vadd.f32 %v7251_v6, %v7250_v17  ;;  %v7256_v6 = vld [vmem:[#allocation103_spill] sm:$0xff]  ;;  %v7258_v17 = vld [vmem:[#allocation105_spill] sm:$0xff] }
 0x4ec   :  { %2016 = vmatpush.msrb.mxu3 %v1993_v9  ;;  %v7259_v9 = vld [vmem:[#allocation48_spill] sm:$0xff] }
 0x4ed   :  { %2357 = vmatpush.msra.mxu2 %v5854_v10  ;;  %v1992_v10 = vld [vmem:[#allocation15 + $0x198] sm:$0xff] }
 0x4ee   :  { %2017 = vmatpush.msrb.mxu3 %v1992_v10  ;;  %v7263_v10 = vld [vmem:[#allocation88_spill] sm:$0xff] }
 0x4ef   :  { %2358 = vmatpush.msra.mxu2 %v5857_v61 }
 0x4f0   :  { %2018 = vmatpush.msrb.mxu3 %v1991_v25  ;;  %v7261_v25 = vld [vmem:[#allocation24_spill] sm:$0xff] }
 0x4f2   :  { %2019 = vmatpush.msrb.mxu3 %v1990_v5 }
 0x4f4   :  { %v1708_v31 = vpop.f32.mrf.mxu1  ;;  %v1899_v0 = vpop.f32.mrf.mxu0  ;;  %2020 = vmatpush.msrb.mxu3 %v1989_v42 }
 0x4f5   :  { %v5864_v44 = vadd.f32 %v1708_v31, %v1396_v11  ;;  %v1922_v39 = vadd.f32 %v1899_v0, %v1526_v26  ;;  %v7260_v26 = vld [vmem:[#allocation87_spill] sm:$0xff] }
 0x4f6   :  { %2136 = vmatpush.msra.mxu3 %v7255_v43  ;;  %v7264_v43 = vld [vmem:[#allocation59_spill] sm:$0xff] }
 0x4f7   :  { %7254 = vst [vmem:[#allocation110_spill] sm:$0xff] %v5864_v44  ;;  %v3245_v61 = vmul.f32 -1.442695, %v1922_v39  ;;  %v7262_v39 = vld [vmem:[#allocation70_spill] sm:$0xff] }
 0x4f8   :  { %2137 = vmatpush.msra.mxu3 %v7256_v6  ;;  %v333_v11 = vadd.f32 %v7262_v39, %v7261_v25  ;;  %v7267_v6 = vld [vmem:[#allocation64_spill] sm:$0xff]  ;;  %v7271_v25 = vld [vmem:[#allocation46_spill] sm:$0xff] }
 0x4f9   :  { %3363 = vpow2.f32 %v3245_v61  ;;  %v7265_v61 = vld [vmem:[#allocation71_spill] sm:$0xff]  ;;  %v7270_v39 = vld [vmem:[#allocation32_spill] sm:$0xff] }
 0x4fa   :  { %2138 = vmatpush.msra.mxu3 %v7257_v23  ;;  %v374_v5 = vadd.f32 %v7265_v61, %v333_v11  ;;  %v7273_v11 = vld [vmem:[#allocation113_spill] sm:$0xff] }
 0x4fc   :  { %2139 = vmatpush.msra.mxu3 %v7258_v17 }
 0x4fe   :  { %2140 = vmatpush.msra.mxu3 %v7259_v9  ;;  %v7268_v9 = vld [vmem:[#allocation63_spill] sm:$0xff] }
 0x4ff   :  { %v3364_v31 = vpop.eup %3363 }
 0x500   :  { %v1926_v0 = vadd.f32 1.0, %v3364_v31  ;;  %2141 = vmatpush.msra.mxu3 %v7260_v26 }
 0x502   :  { %2142 = vmatpush.msra.mxu3 %v7263_v10  ;;  %3365 = vrcp.f32 %v1926_v0  ;;  %vm1932_vm1 = vweird.f32 %v1926_v0 }
 0x504   :  { %2143 = vmatpush.msra.mxu3 %v7264_v43  ;;  %v7272_v43 = vld [vmem:[#allocation66_spill] sm:$0xff] }
 0x505   :  { %v1546_v44 = vadd.f32 %v7272_v43, %v7271_v25  ;;  %v1938_v25 = vand.u32 2147483648, %v1926_v0 }
 0x506   :  { %2144 = vmatpush.msra.mxu3 %v7267_v6 }
 0x508   :  { %2145 = vmatpush.msra.mxu3 %v7268_v9  ;;  %v3366_v31 = vpop.eup %3365 }
 0x509   :  { %v1928_v10 = vmul.f32 %v3366_v31, %v1926_v0  ;;  %vm1933_vm0 = vweird.f32 %v3366_v31 }
 0x50a   :  { %2146 = vmatpush.msra.mxu3 %v7269_v50  ;;  %vm1934_vm2 = vmor %vm1932_vm1, %vm1933_vm0 }
 0x50c   :  { %v5877_v42 = vpop.f32.mrf.mxu1  ;;  %2147 = vmatpush.msra.mxu3 %v7270_v39 }
 0x50d   :  { %7266 = vst [vmem:[#allocation111_spill] sm:$0xff] %v5877_v42  ;;  %v2046_v23 = vpop.f32.mrf.mxu0 }
 0x50e   :  { %v2069_v17 = vadd.f32 %v2046_v23, %v374_v5  ;;  %2148 = vmatpush.msra.mxu3 %v7273_v11  ;;  %v7275_v5 = vld [vmem:[#allocation31_spill] sm:$0xff]  ;;  %v1929_v23 = vsub.f32 1.0, %v1928_v10 }
 0x510   :  { %v3247_v26 = vmul.f32 -1.442695, %v2069_v17  ;;  %2149 = vmatpush.msra.mxu3 %v7275_v5  ;;  %v1930_v39 = vmul.f32 %v3366_v31, %v1929_v23 }
 0x512   :  { %3367 = vpow2.f32 %v3247_v26  ;;  %v5886_v42 = vpop.f32.mrf.mxu2  ;;  %2150 = vmatpush.msra.mxu3 %v7276_v27  ;;  %v7277_v26 = vld [vmem:[#allocation114_spill] sm:$0xff]  ;;  %v1931_v43 = vadd.f32 %v3366_v31, %v1930_v39  ;;  %v7278_v27 = vld [vmem:[#allocation68_spill] sm:$0xff] }
 0x513   :  { %7274 = vst [vmem:[#allocation119_spill] sm:$0xff] %v5886_v42 }
 0x514   :  { %2151 = vmatpush.msra.mxu3 %v7277_v26 }
 0x515   :  { %v1919_v61 = vpop.f32.mrf.mxu1 }
 0x516   :  { %v1942_v6 = vadd.f32 %v1919_v61, %v1546_v44  ;;  %v1936_v61 = vand.u32 2147483647, %v1926_v0 }
 0x518   :  { %v3368_v9 = vpop.eup %3367  ;;  %v3246_v17 = vmul.f32 -1.442695, %v1942_v6  ;;  %v1935_v6 = vsel %vm1934_vm2, %v3366_v31, %v1931_v43  ;;  %vm1937_vm3 = vcmp.eq.f32.partialorder %v1936_v61, 8.507059e+37 }
 0x519   :  { %v2073_v50 = vadd.f32 1.0, %v3368_v9  ;;  %v1939_v9 = vor.u32 1.1754944e-38, %v1938_v25 }
 0x51a   :  { %3369 = vpow2.f32 %v3246_v17 }
 0x51b   :  { %3371 = vrcp.f32 %v2073_v50  ;;  %v1979_v16 = vpop.f32.mrf.mxu2  ;;  %v1940_v17 = vsel %vm1937_vm3, %v1939_v9, %v1935_v6  ;;  %vm2079_vm6 = vweird.f32 %v2073_v50  ;;  %v2083_v61 = vand.u32 2147483647, %v2073_v50 }
 0x51c   :  { %v1980_v5 = vadd.f32 %v7278_v27, %v1979_v16  ;;  %v2085_v16 = vand.u32 2147483648, %v2073_v50 }
 0x51d   :  { %vm2084_vm11 = vcmp.eq.f32.partialorder %v2083_v61, 8.507059e+37 }
 0x51e   :  { %v1982_v23 = vmul.f32 %v1980_v5, %v1940_v17 }
 0x520   :  { %v3370_v11 = vpop.eup %3369 }
 0x521   :  { %v3372_v42 = vpop.eup %3371  ;;  %v1946_v44 = vadd.f32 1.0, %v3370_v11  ;;  %v1983_v11 = vadd.f32 %v1982_v23, %v1566_v56 }
 0x522   :  { %v2075_v10 = vmul.f32 %v3372_v42, %v2073_v50  ;;  %vm2080_vm4 = vweird.f32 %v3372_v42 }
 0x523   :  { %3373 = vrcp.f32 %v1946_v44  ;;  %v1958_v0 = vand.u32 2147483648, %v1946_v44  ;;  %v1956_v31 = vand.u32 2147483647, %v1946_v44  ;;  %vm1952_vm7 = vweird.f32 %v1946_v44  ;;  %vm2081_vm8 = vmor %vm2079_vm6, %vm2080_vm4 }
 0x524   :  { %v2076_v26 = vsub.f32 1.0, %v2075_v10  ;;  %3375 = vtanh.f32 %v1983_v11  ;;  %v7281_v11 = vld [vmem:[#allocation27_spill] sm:$0xff] }
 0x525   :  { %v1959_v10 = vor.u32 1.1754944e-38, %v1958_v0  ;;  %vm1957_vm10 = vcmp.eq.f32.partialorder %v1956_v31, 8.507059e+37  ;;  %v5907_v31 = vld [vmem:[#allocation11 + $0x158] sm:$0xff] }
 0x526   :  { %v2077_v13 = vmul.f32 %v3372_v42, %v2076_v26 }
 0x528   :  { %v2078_v43 = vadd.f32 %v3372_v42, %v2077_v13 }
 0x529   :  { %v3374_v39 = vpop.eup %3373 }
 0x52a   :  { %v1948_v41 = vmul.f32 %v3374_v39, %v1946_v44  ;;  %vm1953_vm5 = vweird.f32 %v3374_v39  ;;  %v2082_v6 = vsel %vm2081_vm8, %v3372_v42, %v2078_v43  ;;  %v3376_v13 = vpop.eup %3375  ;;  %v7280_v44 = vld [vmem:[#allocation91_spill] sm:$0xff] }
 0x52b   :  { %vm1954_vm9 = vmor %vm1952_vm7, %vm1953_vm5 }
 0x52c   :  { %v1949_v60 = vsub.f32 1.0, %v1948_v41  ;;  %v2086_v41 = vor.u32 1.1754944e-38, %v2085_v16 }
 0x52e   :  { %v1950_v2 = vmul.f32 %v3374_v39, %v1949_v60  ;;  %v2087_v9 = vsel %vm2084_vm11, %v2086_v41, %v2082_v6 }
 0x530   :  { %v1951_v25 = vadd.f32 %v3374_v39, %v1950_v2 }
 0x532   :  { %v1955_v3 = vsel %vm1954_vm9, %v3374_v39, %v1951_v25 }
 0x533   :  { %v1960_v56 = vsel %vm1957_vm10, %v1959_v10, %v1955_v3  ;;  %v2126_v27 = vpop.f32.mrf.mxu2 }
 0x534   :  { %v1985_v5 = vsub.f32 1.0, %v1960_v56  ;;  %v2127_v60 = vadd.f32 %v5539_v38, %v2126_v27  ;;  %v1987_v50 = vmul.f32 %v1960_v56, %v5545_v28  ;;  %v5903_v38 = vld [vmem:[#allocation11 + $0x170] sm:$0xff]  ;;  %v5911_v28 = vld [vmem:[#allocation11 + $0x140] sm:$0xff] }
 0x535   :  { %v2066_v17 = vpop.f32.mrf.mxu1  ;;  %v5943_v56 = vld [vmem:[#allocation11 + $0x80] sm:$0xff] }
 0x536   :  { %v1986_v26 = vmul.f32 %v3376_v13, %v1985_v5  ;;  %v2129_v2 = vmul.f32 %v2127_v60, %v2087_v9  ;;  %v2089_v23 = vadd.f32 %v2066_v17, %v7280_v44  ;;  %v7292_v13 = vld [vmem:[#allocation39_spill] sm:$0xff]  ;;  %v7293_v9 = vld [vmem:[#allocation74_spill] sm:$0xff]  ;;  %v6035_v44 = vld [vmem:[#allocation8 + $0x8] sm:$0xff] }
 0x537   :  { %v6030_v17 = vld [vmem:[#allocation8 + $0x10] sm:$0xff] }
 0x538   :  { %v2130_v0 = vadd.f32 %v2129_v2, %v7281_v11  ;;  %v3248_v39 = vmul.f32 -1.442695, %v2089_v23  ;;  %v5898_v42 = vadd.f32 %v1987_v50, %v1986_v26  ;;  %v7294_v26 = vld [vmem:[#allocation120_spill] sm:$0xff]  ;;  %v7296_v23 = vld [vmem:[#allocation73_spill] sm:$0xff] }
 0x539   :  { %v7295_v2 = vld [vmem:[#allocation44_spill] sm:$0xff]  ;;  %v7297_v50 = vld [vmem:[#allocation121_spill] sm:$0xff] }
 0x53a   :  { %2021 = vmatmul.f32.vlgmr.msrb.gmra.mxu3 %v5898_v42  ;;  %2212 = vmatmul.f32.vlgmr.msrb.gmra.mxu2 %v5898_v42  ;;  %3377 = vpow2.f32 %v3248_v39  ;;  %v6040_v11 = vld [vmem:[#allocation8] sm:$0xff] }
 0x53b   :  { %2216 = vmatpush.msrb.mxu3 %v5549_v12  ;;  %2470 = vmatpush.msrb.mxu2 %v5903_v38  ;;  %v5915_v12 = vld [vmem:[#allocation11 + $0x128] sm:$0xff] }
 0x53c   :  { %v7298_v39 = vld [vmem:[#allocation76_spill] sm:$0xff] }
 0x53d   :  { %2217 = vmatpush.msrb.mxu3 %v5553_v53  ;;  %2471 = vmatpush.msrb.mxu2 %v5907_v31  ;;  %v5919_v53 = vld [vmem:[#allocation11 + $0x110] sm:$0xff] }
 0x53f   :  { %2218 = vmatpush.msrb.mxu3 %v5557_v49  ;;  %2472 = vmatpush.msrb.mxu2 %v5911_v28  ;;  %v5923_v49 = vld [vmem:[#allocation11 + $0xf8] sm:$0xff] }
 0x540   :  { %v3378_v43 = vpop.eup %3377 }
 0x541   :  { %2219 = vmatpush.msrb.mxu3 %v5561_v40  ;;  %2473 = vmatpush.msrb.mxu2 %v5915_v12  ;;  %v2093_v16 = vadd.f32 1.0, %v3378_v43  ;;  %v5927_v40 = vld [vmem:[#allocation11 + $0xe0] sm:$0xff] }
 0x542   :  { %v7299_v43 = vld [vmem:[#allocation43_spill] sm:$0xff] }
 0x543   :  { %2220 = vmatpush.msrb.mxu3 %v5565_v21  ;;  %2474 = vmatpush.msrb.mxu2 %v5919_v53  ;;  %3379 = vrcp.f32 %v2093_v16  ;;  %v5931_v21 = vld [vmem:[#allocation11 + $0xc8] sm:$0xff]  ;;  %v2103_v6 = vand.u32 2147483647, %v2093_v16  ;;  %vm2099_vm13 = vweird.f32 %v2093_v16 }
 0x544   :  { %3381 = vtanh.f32 %v2130_v0  ;;  %v6045_v0 = vld [vmem:[#allocation12 + $0xf0] sm:$0xff] }
 0x545   :  { %2221 = vmatpush.msrb.mxu3 %v5569_v55  ;;  %2475 = vmatpush.msrb.mxu2 %v5923_v49  ;;  %v5935_v55 = vld [vmem:[#allocation11 + $0xb0] sm:$0xff]  ;;  %vm2104_vm15 = vcmp.eq.f32.partialorder %v2103_v6, 8.507059e+37  ;;  %v7303_v6 = vld [vmem:[#allocation123_spill] sm:$0xff] }
 0x547   :  { %2222 = vmatpush.msrb.mxu3 %v5573_v8  ;;  %2476 = vmatpush.msrb.mxu2 %v5927_v40  ;;  %v5939_v8 = vld [vmem:[#allocation11 + $0x98] sm:$0xff] }
 0x549   :  { %2223 = vmatpush.msrb.mxu3 %v5577_v63  ;;  %2477 = vmatpush.msrb.mxu2 %v5931_v21  ;;  %v3380_v25 = vpop.eup %3379  ;;  %v2105_v63 = vand.u32 2147483648, %v2093_v16 }
 0x54a   :  { %v2095_v61 = vmul.f32 %v3380_v25, %v2093_v16  ;;  %vm2100_vm12 = vweird.f32 %v3380_v25  ;;  %v3382_v5 = vpop.eup %3381  ;;  %v6050_v16 = vld [vmem:[#allocation12 + $0xe0] sm:$0xff] }
 0x54b   :  { %2224 = vmatpush.msrb.mxu3 %v5581_v62  ;;  %2478 = vmatpush.msrb.mxu2 %v5935_v55  ;;  %vm2101_vm14 = vmor %vm2099_vm13, %vm2100_vm12 }
 0x54c   :  { %v2096_v10 = vsub.f32 1.0, %v2095_v61  ;;  %v7301_v61 = vld [vmem:[#allocation122_spill] sm:$0xff] }
 0x54d   :  { %2225 = vmatpush.msrb.mxu3 %v5585_v59  ;;  %2479 = vmatpush.msrb.mxu2 %v5939_v8  ;;  %v2106_v59 = vor.u32 1.1754944e-38, %v2105_v63  ;;  %v7302_v63 = vld [vmem:[#allocation75_spill] sm:$0xff] }
 0x54e   :  { %v2097_v3 = vmul.f32 %v3380_v25, %v2096_v10  ;;  %v6055_v10 = vld [vmem:[#allocation12 + $0xd0] sm:$0xff] }
 0x54f   :  { %2226 = vmatpush.msrb.mxu3 %v5590_v1  ;;  %2480 = vmatpush.msrb.mxu2 %v5943_v56 }
 0x550   :  { %v2098_v62 = vadd.f32 %v3380_v25, %v2097_v3  ;;  %v6059_v3 = vld [vmem:[#allocation12 + $0xc0] sm:$0xff] }
 0x551   :  { %2227 = vmatpush.msrb.mxu3 %v5596_v34  ;;  %2481 = vmatpush.msrb.mxu2 %v5599_v46 }
 0x552   :  { %v2102_v41 = vsel %vm2101_vm14, %v3380_v25, %v2098_v62  ;;  %v7300_v25 = vld [vmem:[#allocation51_spill] sm:$0xff]  ;;  %v6063_v62 = vld [vmem:[#allocation12 + $0xb0] sm:$0xff] }
 0x553   :  { %2228 = vmatpush.msrb.mxu3 %v5607_v57  ;;  %2482 = vmatpush.msrb.mxu2 %v5610_v33  ;;  %v2107_v1 = vsel %vm2104_vm15, %v2106_v59, %v2102_v41  ;;  %v5969_v57 = vld [vmem:[#allocation8 + $0x70] sm:$0xff]  ;;  %v5974_v33 = vld [vmem:[#allocation8 + $0x68] sm:$0xff] }
 0x554   :  { %v2132_v27 = vsub.f32 1.0, %v2107_v1  ;;  %v2134_v34 = vmul.f32 %v2107_v1, %v5594_v36  ;;  %v5964_v36 = vld [vmem:[#allocation8 + $0x78] sm:$0xff]  ;;  %v6067_v41 = vld [vmem:[#allocation12 + $0xa0] sm:$0xff] }
 0x555   :  { %2229 = vmatpush.msrb.mxu3 %v5614_v52  ;;  %2483 = vmatpush.msrb.mxu2 %v5617_v58  ;;  %v5979_v52 = vld [vmem:[#allocation8 + $0x60] sm:$0xff]  ;;  %v5985_v58 = vld [vmem:[#allocation8 + $0x58] sm:$0xff] }
 0x556   :  { %v2133_v60 = vmul.f32 %v3382_v5, %v2132_v27  ;;  %v7304_v59 = vld [vmem:[#allocation50_spill] sm:$0xff]  ;;  %v7306_v5 = vld [vmem:[#allocation125_spill] sm:$0xff] }
 0x557   :  { %2230 = vmatpush.msrb.mxu3 %v5621_v19  ;;  %2484 = vmatpush.msrb.mxu2 %v5624_v14  ;;  %v5990_v19 = vld [vmem:[#allocation8 + $0x50] sm:$0xff]  ;;  %v5995_v14 = vld [vmem:[#allocation8 + $0x48] sm:$0xff] }
 0x558   :  { %v5955_v46 = vadd.f32 %v2134_v34, %v2133_v60  ;;  %v7305_v1 = vld [vmem:[#allocation78_spill] sm:$0xff]  ;;  %v6075_v60 = vld [vmem:[#allocation12 + $0x80] sm:$0xff] }
 0x559   :  { %2231 = vmatpush.msrb.mxu3 %v5628_v45  ;;  %2485 = vmatpush.msrb.mxu2 %v5637_v54  ;;  %v6000_v45 = vld [vmem:[#allocation8 + $0x40] sm:$0xff]  ;;  %v6071_v27 = vld [vmem:[#allocation12 + $0x90] sm:$0xff] }
 0x55a   :  { %2152 = vmatmul.f32.vlgmr.msra.gmra.mxu3 %v5955_v46  ;;  %2172 = vmatmul.f32.vlgmr.msra.gmra.mxu0 %v5955_v46  ;;  %v7283_v54 = vld [vmem:[#allocation36_spill] sm:$0xff]  ;;  %v7307_v34 = vld [vmem:[#allocation54_spill] sm:$0xff] }
 0x55b   :  { %2192 = vmatmul.f32.vlgmr.msra.gmra.mxu1 %v5955_v46  ;;  %2359 = vmatmul.f32.vlgmr.msra.gmra.mxu2 %v5955_v46 }
 0x55c   :  { %2363 = vmatpush.msra.mxu3 %v5633_v51  ;;  %2423 = vmatpush.msra.mxu0 %v5964_v36  ;;  %v7282_v51 = vld [vmem:[#allocation115_spill] sm:$0xff] }
 0x55d   :  { %2590 = vmatpush.msra.mxu2 %v5644_v35  ;;  %v7284_v35 = vld [vmem:[#allocation67_spill] sm:$0xff] }
 0x55e   :  { %2364 = vmatpush.msra.mxu3 %v5640_v4  ;;  %2424 = vmatpush.msra.mxu0 %v5969_v57  ;;  %v6005_v4 = vld [vmem:[#allocation8 + $0x38] sm:$0xff] }
 0x55f   :  { %2591 = vmatpush.msra.mxu2 %v5651_v24  ;;  %v6010_v24 = vld [vmem:[#allocation8 + $0x30] sm:$0xff] }
 0x560   :  { %2365 = vmatpush.msra.mxu3 %v5647_v20  ;;  %2425 = vmatpush.msra.mxu0 %v5974_v33  ;;  %v7285_v20 = vld [vmem:[#allocation116_spill] sm:$0xff] }
 0x561   :  { %2592 = vmatpush.msra.mxu2 %v5658_v29  ;;  %v7287_v29 = vld [vmem:[#allocation72_spill] sm:$0xff] }
 0x562   :  { %2366 = vmatpush.msra.mxu3 %v5654_v47  ;;  %2426 = vmatpush.msra.mxu0 %v5979_v52  ;;  %v7286_v47 = vld [vmem:[#allocation35_spill] sm:$0xff] }
 0x563   :  { %2232 = vmatmul.f32.vlgmr.msrb.gmra.mxu3 %v5898_v42  ;;  %2292 = vmatmul.f32.vlgmr.msrb.gmra.mxu0 %v5898_v42 }
 0x564   :  { %2367 = vmatpush.msra.mxu3 %v5661_v22  ;;  %2427 = vmatpush.msra.mxu0 %v5985_v58  ;;  %v6015_v22 = vld [vmem:[#allocation8 + $0x28] sm:$0xff] }
 0x565   :  { %2593 = vmatpush.msra.mxu2 %v5665_v30  ;;  %v7288_v30 = vld [vmem:[#allocation117_spill] sm:$0xff] }
 0x566   :  { %2368 = vmatpush.msra.mxu3 %v5668_v32  ;;  %2428 = vmatpush.msra.mxu0 %v5990_v19  ;;  %v7289_v32 = vld [vmem:[#allocation40_spill] sm:$0xff] }
 0x567   :  { %2594 = vmatpush.msra.mxu2 %v5672_v37  ;;  %v6020_v37 = vld [vmem:[#allocation8 + $0x20] sm:$0xff] }
 0x568   :  { %2369 = vmatpush.msra.mxu3 %v5675_v15  ;;  %2429 = vmatpush.msra.mxu0 %v5995_v14  ;;  %v7290_v15 = vld [vmem:[#allocation69_spill] sm:$0xff] }
 0x569   :  { %2595 = vmatpush.msra.mxu2 %v5679_v18  ;;  %v7291_v18 = vld [vmem:[#allocation118_spill] sm:$0xff] }
 0x56a   :  { %2370 = vmatpush.msra.mxu3 %v5682_v7  ;;  %2430 = vmatpush.msra.mxu0 %v6000_v45  ;;  %v6025_v7 = vld [vmem:[#allocation8 + $0x18] sm:$0xff] }
 0x56b   :  { %2596 = vmatpush.msra.mxu2 %v7282_v51  ;;  %v6079_v51 = vld [vmem:[#allocation12 + $0x70] sm:$0xff] }
 0x56c   :  { %2371 = vmatpush.msra.mxu3 %v7283_v54  ;;  %2431 = vmatpush.msra.mxu0 %v6005_v4  ;;  %v7308_v54 = vld [vmem:[#allocation77_spill] sm:$0xff] }
 0x56d   :  { %2597 = vmatpush.msra.mxu2 %v7284_v35  ;;  %v6083_v35 = vld [vmem:[#allocation12 + $0x60] sm:$0xff] }
 0x56e   :  { %2372 = vmatpush.msra.mxu3 %v7285_v20  ;;  %2432 = vmatpush.msra.mxu0 %v6010_v24  ;;  %v7309_v20 = vld [vmem:[#allocation126_spill] sm:$0xff] }
 0x56f   :  { %2598 = vmatpush.msra.mxu2 %v7286_v47  ;;  %v6087_v47 = vld [vmem:[#allocation12 + $0x50] sm:$0xff] }
 0x570   :  { %2373 = vmatpush.msra.mxu3 %v7287_v29  ;;  %2433 = vmatpush.msra.mxu0 %v6015_v22  ;;  %7310 = vst [vmem:[#allocation61_spill] sm:$0xff] %v6087_v47  ;;  %v7311_v29 = vld [vmem:[#allocation53_spill] sm:$0xff] }
 0x571   :  { %2599 = vmatpush.msra.mxu2 %v7288_v30  ;;  %v6091_v30 = vld [vmem:[#allocation12 + $0x40] sm:$0xff] }
 0x572   :  { %2374 = vmatpush.msra.mxu3 %v7289_v32  ;;  %2434 = vmatpush.msra.mxu0 %v6020_v37  ;;  %7312 = vst [vmem:[#allocation62_spill] sm:$0xff] %v6091_v30  ;;  %v7313_v32 = vld [vmem:[#allocation80_spill] sm:$0xff] }
 0x573   :  { %2600 = vmatpush.msra.mxu2 %v7290_v15  ;;  %v6095_v15 = vld [vmem:[#allocation12 + $0x30] sm:$0xff] }
 0x574   :  { %2375 = vmatpush.msra.mxu3 %v7291_v18  ;;  %2435 = vmatpush.msra.mxu0 %v6025_v7  ;;  %7314 = vst [vmem:[#allocation124_spill] sm:$0xff] %v6095_v15  ;;  %v7315_v18 = vld [vmem:[#allocation57_spill] sm:$0xff] }
 0x575   :  { %2601 = vmatpush.msra.mxu2 %v7292_v13  ;;  %v6099_v13 = vld [vmem:[#allocation12 + $0x20] sm:$0xff] }
 0x576   :  { %2376 = vmatpush.msra.mxu3 %v7293_v9  ;;  %2436 = vmatpush.msra.mxu0 %v6030_v17  ;;  %7316 = vst [vmem:[#allocation92_spill] sm:$0xff] %v6099_v13  ;;  %v7317_v9 = vld [vmem:[#allocation128_spill] sm:$0xff] }
 0x577   :  { %2602 = vmatpush.msra.mxu2 %v7294_v26  ;;  %v6103_v26 = vld [vmem:[#allocation12 + $0x10] sm:$0xff] }
 0x578   :  { %2377 = vmatpush.msra.mxu3 %v7295_v2  ;;  %2437 = vmatpush.msra.mxu0 %v6035_v44  ;;  %7318 = vst [vmem:[#allocation89_spill] sm:$0xff] %v6103_v26  ;;  %v7319_v2 = vld [vmem:[#allocation56_spill] sm:$0xff] }
 0x579   :  { %2603 = vmatpush.msra.mxu2 %v7296_v23  ;;  %v6107_v23 = vld [vmem:[#allocation12] sm:$0xff] }
 0x57a   :  { %2378 = vmatpush.msra.mxu3 %v7297_v50  ;;  %2438 = vmatpush.msra.mxu0 %v6040_v11  ;;  %7320 = vst [vmem:[#allocation55_spill] sm:$0xff] %v6107_v23  ;;  %v7321_v50 = vld [vmem:[#allocation60_spill] sm:$0xff] }
 0x57b   :  { %2379 = vmatmul.f32.vlgmr.msra.gmra.mxu3 %v5955_v46  ;;  %2439 = vmatmul.f32.vlgmr.msra.gmra.mxu0 %v5955_v46 }
 0x57c   :  { %2510 = vmatpush.msrb.mxu0 %v6045_v0  ;;  %2490 = vmatpush.msrb.mxu3 %v7298_v39  ;;  %v7322_v39 = vld [vmem:[#allocation127_spill] sm:$0xff] }
 0x57d   :  { %2604 = vmatpush.msra.mxu2 %v7299_v43  ;;  %v7323_v43 = vld [vmem:[#allocation79_spill] sm:$0xff] }
 0x57e   :  { %2511 = vmatpush.msrb.mxu0 %v6050_v16  ;;  %2491 = vmatpush.msrb.mxu3 %v7300_v25  ;;  %v7324_v25 = vld [vmem:[#allocation25_spill] sm:$0xff] }
 0x57f   :  { %2605 = vmatpush.msra.mxu2 %v7301_v61  ;;  %v7325_v61 = vld [vmem:[#allocation26_spill] sm:$0xff] }
 0x580   :  { %2512 = vmatpush.msrb.mxu0 %v6055_v10  ;;  %2492 = vmatpush.msrb.mxu3 %v7302_v63  ;;  %v7326_v63 = vld [vmem:[#allocation52_spill] sm:$0xff] }
 0x582   :  { %2513 = vmatpush.msrb.mxu0 %v6059_v3  ;;  %2493 = vmatpush.msrb.mxu3 %v7303_v6  ;;  %v7327_v6 = vld [vmem:[#allocation58_spill] sm:$0xff] }
 0x584   :  { %2514 = vmatpush.msrb.mxu0 %v6063_v62  ;;  %2494 = vmatpush.msrb.mxu3 %v7304_v59  ;;  %v7328_v59 = vld [vmem:[#allocation29_spill] sm:$0xff] }
 0x586   :  { %2515 = vmatpush.msrb.mxu0 %v6067_v41  ;;  %2495 = vmatpush.msrb.mxu3 %v7305_v1  ;;  %v7329_v1 = vld [vmem:[#allocation94_spill] sm:$0xff] }
 0x588   :  { %2516 = vmatpush.msrb.mxu0 %v6071_v27  ;;  %2496 = vmatpush.msrb.mxu3 %v7306_v5  ;;  %v2318_v5 = vld [vmem:[#allocation15 + $0x278] sm:$0xff] }
 0x589   :  { %2319 = vmatpush.msrb.mxu1 %v2318_v5 }
 0x58a   :  { %2517 = vmatpush.msrb.mxu0 %v6075_v60  ;;  %2497 = vmatpush.msrb.mxu3 %v7307_v34  ;;  %v2317_v34 = vld [vmem:[#allocation15 + $0x270] sm:$0xff] }
 0x58b   :  { %2320 = vmatpush.msrb.mxu1 %v2317_v34  ;;  %v7338_v34 = vld [vmem:[#allocation110_spill] sm:$0xff] }
 0x58c   :  { %2518 = vmatpush.msrb.mxu0 %v6079_v51  ;;  %2498 = vmatpush.msrb.mxu3 %v7308_v54  ;;  %v7330_v54 = vld [vmem:[#allocation96_spill] sm:$0xff] }
 0x58e   :  { %2519 = vmatpush.msrb.mxu0 %v6083_v35  ;;  %2499 = vmatpush.msrb.mxu3 %v7309_v20  ;;  %v2316_v20 = vld [vmem:[#allocation15 + $0x268] sm:$0xff] }
 0x58f   :  { %2321 = vmatpush.msrb.mxu1 %v2316_v20  ;;  %v2309_v20 = vld [vmem:[#allocation15 + $0x230] sm:$0xff] }
 0x590   :  { %2520 = vmatpush.msrb.mxu0 %v6087_v47  ;;  %2500 = vmatpush.msrb.mxu3 %v7311_v29  ;;  %v7331_v29 = vld [vmem:[#allocation98_spill] sm:$0xff] }
 0x591   :  { %v7366_v47 = vld [vmem:[#allocation34_spill] sm:$0xff] }
 0x592   :  { %2521 = vmatpush.msrb.mxu0 %v6091_v30  ;;  %2501 = vmatpush.msrb.mxu3 %v7313_v32  ;;  %v2315_v32 = vld [vmem:[#allocation15 + $0x260] sm:$0xff] }
 0x593   :  { %2322 = vmatpush.msrb.mxu1 %v2315_v32 }
 0x594   :  { %2522 = vmatpush.msrb.mxu0 %v6095_v15  ;;  %2502 = vmatpush.msrb.mxu3 %v7315_v18  ;;  %v7332_v18 = vld [vmem:[#allocation100_spill] sm:$0xff] }
 0x596   :  { %2523 = vmatpush.msrb.mxu0 %v6099_v13  ;;  %2503 = vmatpush.msrb.mxu3 %v7317_v9  ;;  %v2314_v9 = vld [vmem:[#allocation15 + $0x258] sm:$0xff] }
 0x597   :  { %2323 = vmatpush.msrb.mxu1 %v2314_v9  ;;  %v7340_v9 = vld [vmem:[#allocation42_spill] sm:$0xff] }
 0x598   :  { %2524 = vmatpush.msrb.mxu0 %v6103_v26  ;;  %2504 = vmatpush.msrb.mxu3 %v7319_v2  ;;  %v7333_v2 = vld [vmem:[#allocation102_spill] sm:$0xff] }
 0x59a   :  { %2525 = vmatpush.msrb.mxu0 %v6107_v23  ;;  %2505 = vmatpush.msrb.mxu3 %v7321_v50  ;;  %v2313_v50 = vld [vmem:[#allocation15 + $0x250] sm:$0xff] }
 0x59b   :  { %2324 = vmatpush.msrb.mxu1 %v2313_v50 }
 0x59c   :  { %2657 = vmatpush.msra.mxu0 %v7322_v39  ;;  %v7334_v39 = vld [vmem:[#allocation104_spill] sm:$0xff] }
 0x59e   :  { %2658 = vmatpush.msra.mxu0 %v7323_v43  ;;  %v6124_v43 = vpop.f32.mrf.mxu3 }
 0x5a0   :  { %2659 = vmatpush.msra.mxu0 %v7324_v25  ;;  %v7335_v25 = vld [vmem:[#allocation106_spill] sm:$0xff] }
 0x5a2   :  { %2660 = vmatpush.msra.mxu0 %v7325_v61  ;;  %v7336_v61 = vld [vmem:[#allocation108_spill] sm:$0xff] }
 0x5a4   :  { %2661 = vmatpush.msra.mxu0 %v7326_v63  ;;  %v2312_v63 = vld [vmem:[#allocation15 + $0x248] sm:$0xff] }
 0x5a5   :  { %2325 = vmatpush.msrb.mxu1 %v2312_v63  ;;  %v2304_v63 = vld [vmem:[#allocation15 + $0x208] sm:$0xff] }
 0x5a6   :  { %2662 = vmatpush.msra.mxu0 %v7327_v6  ;;  %v2311_v6 = vld [vmem:[#allocation15 + $0x240] sm:$0xff] }
 0x5a7   :  { %2326 = vmatpush.msrb.mxu1 %v2311_v6 }
 0x5a8   :  { %2663 = vmatpush.msra.mxu0 %v7328_v59  ;;  %v7337_v59 = vld [vmem:[#allocation109_spill] sm:$0xff] }
 0x5aa   :  { %2664 = vmatpush.msra.mxu0 %v7329_v1  ;;  %v2310_v1 = vld [vmem:[#allocation15 + $0x238] sm:$0xff] }
 0x5ab   :  { %2327 = vmatpush.msrb.mxu1 %v2310_v1  ;;  %v6134_v1 = vld [vmem:[#allocation11 + $0x168] sm:$0xff] }
 0x5ac   :  { %2665 = vmatpush.msra.mxu0 %v7330_v54  ;;  %7342 = vst [vmem:[#allocation86_spill] sm:$0xff] %v6134_v1 }
 0x5ad   :  { %2328 = vmatpush.msrb.mxu1 %v2309_v20  ;;  %v6143_v20 = vld [vmem:[#allocation11 + $0x120] sm:$0xff] }
 0x5ae   :  { %2666 = vmatpush.msra.mxu0 %v7331_v29  ;;  %v2308_v29 = vld [vmem:[#allocation15 + $0x228] sm:$0xff]  ;;  %7345 = vst [vmem:[#allocation99_spill] sm:$0xff] %v6143_v20 }
 0x5af   :  { %2329 = vmatpush.msrb.mxu1 %v2308_v29 }
 0x5b0   :  { %2667 = vmatpush.msra.mxu0 %v7332_v18  ;;  %v2307_v18 = vld [vmem:[#allocation15 + $0x220] sm:$0xff] }
 0x5b1   :  { %2330 = vmatpush.msrb.mxu1 %v2307_v18 }
 0x5b2   :  { %2668 = vmatpush.msra.mxu0 %v7333_v2  ;;  %v7341_v2 = vld [vmem:[#allocation111_spill] sm:$0xff] }
 0x5b3   :  { %v1840_v50 = vadd.f32 %v7341_v2, %v7340_v9  ;;  %v6149_v2 = vld [vmem:[#allocation11 + $0xf0] sm:$0xff] }
 0x5b4   :  { %2669 = vmatpush.msra.mxu0 %v7334_v39  ;;  %v2306_v39 = vld [vmem:[#allocation15 + $0x218] sm:$0xff]  ;;  %7347 = vst [vmem:[#allocation107_spill] sm:$0xff] %v6149_v2 }
 0x5b5   :  { %2331 = vmatpush.msrb.mxu1 %v2306_v39  ;;  %v7349_v39 = vld [vmem:[#allocation81_spill] sm:$0xff] }
 0x5b6   :  { %2670 = vmatpush.msra.mxu0 %v7335_v25 }
 0x5b8   :  { %2671 = vmatpush.msra.mxu0 %v7336_v61  ;;  %v2305_v61 = vld [vmem:[#allocation15 + $0x210] sm:$0xff] }
 0x5b9   :  { %2332 = vmatpush.msrb.mxu1 %v2305_v61  ;;  %v6154_v61 = vld [vmem:[#allocation11 + $0xd8] sm:$0xff] }
 0x5ba   :  { %2672 = vmatpush.msra.mxu0 %v7337_v59  ;;  %v2303_v59 = vld [vmem:[#allocation15 + $0x200] sm:$0xff]  ;;  %7350 = vst [vmem:[#allocation90_spill] sm:$0xff] %v6154_v61 }
 0x5bb   :  { %2333 = vmatpush.msrb.mxu1 %v2304_v63  ;;  %v6157_v63 = vld [vmem:[#allocation11 + $0xc0] sm:$0xff] }
 0x5bc   :  { %7351 = vst [vmem:[#allocation101_spill] sm:$0xff] %v6157_v63 }
 0x5bd   :  { %v2022_v5 = vpop.f32.mrf.mxu3  ;;  %v2213_v32 = vpop.f32.mrf.mxu2  ;;  %2334 = vmatpush.msrb.mxu1 %v2303_v59 }
 0x5be   :  { %v6130_v54 = vadd.f32 %v2022_v5, %v7338_v34  ;;  %v2236_v25 = vadd.f32 %v2213_v32, %v1840_v50  ;;  %v6137_v5 = vld [vmem:[#allocation11 + $0x150] sm:$0xff]  ;;  %v6140_v34 = vld [vmem:[#allocation11 + $0x138] sm:$0xff]  ;;  %v6146_v32 = vld [vmem:[#allocation11 + $0x108] sm:$0xff] }
 0x5bf   :  { %2450 = vmatpush.msra.mxu1 %v6134_v1  ;;  %7343 = vst [vmem:[#allocation95_spill] sm:$0xff] %v6137_v5  ;;  %v7348_v50 = vld [vmem:[#allocation24_spill] sm:$0xff]  ;;  %v6182_v1 = vld [vmem:[#allocation11 + $0x30] sm:$0xff] }
 0x5c0   :  { %7339 = vst [vmem:[#allocation28_spill] sm:$0xff] %v6130_v54  ;;  %v3249_v6 = vmul.f32 -1.442695, %v2236_v25  ;;  %v336_v25 = vadd.f32 %v7349_v39, %v7348_v50  ;;  %v6166_v39 = vld [vmem:[#allocation11 + $0x90] sm:$0xff]  ;;  %v6169_v50 = vld [vmem:[#allocation11 + $0x78] sm:$0xff] }
 0x5c1   :  { %2451 = vmatpush.msra.mxu1 %v6137_v5  ;;  %7344 = vst [vmem:[#allocation97_spill] sm:$0xff] %v6140_v34 }
 0x5c2   :  { %3383 = vpow2.f32 %v3249_v6  ;;  %7346 = vst [vmem:[#allocation49_spill] sm:$0xff] %v6146_v32  ;;  %v7352_v6 = vld [vmem:[#allocation82_spill] sm:$0xff] }
 0x5c3   :  { %2452 = vmatpush.msra.mxu1 %v6140_v34  ;;  %v377_v59 = vadd.f32 %v7352_v6, %v336_v25  ;;  %7355 = vst [vmem:[#allocation105_spill] sm:$0xff] %v6166_v39  ;;  %v6172_v25 = vld [vmem:[#allocation11 + $0x60] sm:$0xff] }
 0x5c4   :  { %7356 = vst [vmem:[#allocation48_spill] sm:$0xff] %v6169_v50 }
 0x5c5   :  { %2453 = vmatpush.msra.mxu1 %v6143_v20  ;;  %7357 = vst [vmem:[#allocation87_spill] sm:$0xff] %v6172_v25 }
 0x5c6   :  { %7362 = vst [vmem:[#allocation59_spill] sm:$0xff] %v6182_v1 }
 0x5c7   :  { %2454 = vmatpush.msra.mxu1 %v6146_v32 }
 0x5c8   :  { %v3384_v29 = vpop.eup %3383 }
 0x5c9   :  { %v2240_v18 = vadd.f32 1.0, %v3384_v29  ;;  %2455 = vmatpush.msra.mxu1 %v6149_v2  ;;  %v6163_v29 = vld [vmem:[#allocation11 + $0xa8] sm:$0xff] }
 0x5ca   :  { %7354 = vst [vmem:[#allocation47_spill] sm:$0xff] %v6163_v29 }
 0x5cb   :  { %2456 = vmatpush.msra.mxu1 %v6154_v61  ;;  %3385 = vrcp.f32 %v2240_v18  ;;  %vm2246_vm1 = vweird.f32 %v2240_v18 }
 0x5cd   :  { %2457 = vmatpush.msra.mxu1 %v6157_v63  ;;  %v7358_v63 = vld [vmem:[#allocation46_spill] sm:$0xff] }
 0x5cf   :  { %2458 = vmatpush.msra.mxu1 %v6163_v29  ;;  %v7359_v29 = vld [vmem:[#allocation119_spill] sm:$0xff] }
 0x5d0   :  { %v1860_v5 = vadd.f32 %v7359_v29, %v7358_v63  ;;  %v6188_v63 = vld [vmem:[#allocation11] sm:$0xff] }
 0x5d1   :  { %2459 = vmatpush.msra.mxu1 %v6166_v39  ;;  %v3386_v61 = vpop.eup %3385  ;;  %7364 = vst [vmem:[#allocation64_spill] sm:$0xff] %v6188_v63 }
 0x5d2   :  { %v2242_v6 = vmul.f32 %v3386_v61, %v2240_v18  ;;  %vm2247_vm0 = vweird.f32 %v3386_v61 }
 0x5d3   :  { %2460 = vmatpush.msra.mxu1 %v6169_v50  ;;  %vm2248_vm2 = vmor %vm2246_vm1, %vm2247_vm0 }
 0x5d5   :  { %2461 = vmatpush.msra.mxu1 %v6172_v25  ;;  %v6185_v25 = vld [vmem:[#allocation11 + $0x18] sm:$0xff] }
 0x5d6   :  { %7363 = vst [vmem:[#allocation71_spill] sm:$0xff] %v6185_v25 }
 0x5dd   :  { %v6161_v32 = vpop.f32.mrf.mxu3 }
 0x5de   :  { %7353 = vst [vmem:[#allocation103_spill] sm:$0xff] %v6161_v32  ;;  %v2360_v2 = vpop.f32.mrf.mxu2 }
 0x5df   :  { %v2383_v20 = vadd.f32 %v2360_v2, %v377_v59  ;;  %v6177_v2 = vld [vmem:[#allocation11 + $0x48] sm:$0xff]  ;;  %v6180_v59 = vpop.f32.mrf.mxu0 }
 0x5e0   :  { %7360 = vst [vmem:[#allocation70_spill] sm:$0xff] %v6177_v2  ;;  %2462 = vmatpush.msra.mxu1 %v6177_v2 }
 0x5e1   :  { %v3251_v34 = vmul.f32 -1.442695, %v2383_v20  ;;  %7361 = vst [vmem:[#allocation88_spill] sm:$0xff] %v6180_v59 }
 0x5e2   :  { %2463 = vmatpush.msra.mxu1 %v6182_v1  ;;  %v2252_v1 = vand.u32 2147483648, %v2240_v18 }
 0x5e3   :  { %3387 = vpow2.f32 %v3251_v34  ;;  %v2243_v34 = vsub.f32 1.0, %v2242_v6 }
 0x5e4   :  { %2464 = vmatpush.msra.mxu1 %v6185_v25 }
 0x5e5   :  { %v2244_v2 = vmul.f32 %v3386_v61, %v2243_v34 }
 0x5e6   :  { %v2233_v20 = vpop.f32.mrf.mxu3  ;;  %2465 = vmatpush.msra.mxu1 %v6188_v63 }
 0x5e7   :  { %v2256_v39 = vadd.f32 %v2233_v20, %v1860_v5  ;;  %v2245_v5 = vadd.f32 %v3386_v61, %v2244_v2  ;;  %v2293_v20 = vpop.f32.mrf.mxu0  ;;  %v2253_v2 = vor.u32 1.1754944e-38, %v2252_v1 }
 0x5e9   :  { %v3388_v50 = vpop.eup %3387  ;;  %v3250_v54 = vmul.f32 -1.442695, %v2256_v39  ;;  %v2250_v39 = vand.u32 2147483647, %v2240_v18  ;;  %v2249_v25 = vsel %vm2248_vm2, %v3386_v61, %v2245_v5  ;;  %v1880_v5 = vadd.f32 %v6124_v43, %v7279_v48  ;;  %v7367_v48 = vld [vmem:[#allocation93_spill] sm:$0xff] }
 0x5ea   :  { %v2387_v29 = vadd.f32 1.0, %v3388_v50 }
 0x5eb   :  { %3389 = vpow2.f32 %v3250_v54  ;;  %v6194_v54 = vld [vmem:[%s6587_s10] ss:$0 sm:$0xff]  ;;  %vm2251_vm3 = vcmp.eq.f32.partialorder %v2250_v39, 8.507059e+37 }
 0x5ec   :  { %3391 = vrcp.f32 %v2387_v29  ;;  %7365 = vst [vmem:[#allocation63_spill] sm:$0xff] %v6194_v54  ;;  %v2294_v50 = vadd.f32 %v6194_v54, %v2293_v20  ;;  %v2399_v63 = vand.u32 2147483648, %v2387_v29  ;;  %v2254_v23 = vsel %vm2251_vm3, %v2253_v2, %v2249_v25 }
 0x5ed   :  { %v2397_v18 = vand.u32 2147483647, %v2387_v29  ;;  %vm2393_vm5 = vweird.f32 %v2387_v29 }
 0x5ee   :  { %v2400_v30 = vor.u32 1.1754944e-38, %v2399_v63 }
 0x5ef   :  { %vm2398_vm7 = vcmp.eq.f32.partialorder %v2397_v18, 8.507059e+37 }
 0x5f1   :  { %v3390_v59 = vpop.eup %3389 }
 0x5f2   :  { %v3392_v6 = vpop.eup %3391  ;;  %v2260_v32 = vadd.f32 1.0, %v3390_v59  ;;  %v2296_v59 = vmul.f32 %v2294_v50, %v2254_v23 }
 0x5f3   :  { %v2389_v9 = vmul.f32 %v3392_v6, %v2387_v29  ;;  %vm2394_vm4 = vweird.f32 %v3392_v6 }
 0x5f4   :  { %3393 = vrcp.f32 %v2260_v32  ;;  %vm2395_vm6 = vmor %vm2393_vm5, %vm2394_vm4  ;;  %v2297_v25 = vadd.f32 %v2296_v59, %v1880_v5  ;;  %v2270_v50 = vand.u32 2147483647, %v2260_v32  ;;  %vm2266_vm9 = vweird.f32 %v2260_v32 }
 0x5f5   :  { %v2390_v34 = vsub.f32 1.0, %v2389_v9  ;;  %v6199_v9 = vld [vmem:[#allocation9] ss:$0 sm:$0xff] }
 0x5f6   :  { %3395 = vtanh.f32 %v2297_v25  ;;  %vm2271_vm11 = vcmp.eq.f32.partialorder %v2270_v50, 8.507059e+37  ;;  %v6221_v25 = vld [vmem:[#allocation12 + $0xc8] sm:$0xff] }
 0x5f7   :  { %v2391_v26 = vmul.f32 %v3392_v6, %v2390_v34  ;;  %v6229_v50 = vld [vmem:[#allocation12 + $0xa8] sm:$0xff] }
 0x5f8   :  { %v2440_v13 = vpop.f32.mrf.mxu0 }
 0x5f9   :  { %v2392_v15 = vadd.f32 %v3392_v6, %v2391_v26  ;;  %v2441_v1 = vadd.f32 %v6199_v9, %v2440_v13  ;;  %v2272_v26 = vand.u32 2147483648, %v2260_v32 }
 0x5fa   :  { %v3394_v61 = vpop.eup %3393 }
 0x5fb   :  { %v2262_v20 = vmul.f32 %v3394_v61, %v2260_v32  ;;  %v2396_v54 = vsel %vm2395_vm6, %v3392_v6, %v2392_v15  ;;  %vm2267_vm8 = vweird.f32 %v3394_v61  ;;  %v2273_v18 = vor.u32 1.1754944e-38, %v2272_v26  ;;  %v6213_v32 = vld [vmem:[#allocation12 + $0xe8] sm:$0xff] }
 0x5fc   :  { %v2401_v39 = vsel %vm2398_vm7, %v2400_v30, %v2396_v54  ;;  %vm2268_vm10 = vmor %vm2266_vm9, %vm2267_vm8  ;;  %v3396_v59 = vpop.eup %3395 }
 0x5fd   :  { %v2263_v2 = vsub.f32 1.0, %v2262_v20  ;;  %v2443_v23 = vmul.f32 %v2441_v1, %v2401_v39 }
 0x5fe   :  { %v2380_v29 = vpop.f32.mrf.mxu3 }
 0x5ff   :  { %v2264_v34 = vmul.f32 %v3394_v61, %v2263_v2  ;;  %v2444_v43 = vadd.f32 %v2443_v23, %v7366_v47  ;;  %v2403_v63 = vadd.f32 %v2380_v29, %v7367_v48  ;;  %v6209_v48 = vld [vmem:[#allocation12 + $0xf8] sm:$0xff] }
 0x600   :  { %v6225_v2 = vld [vmem:[#allocation12 + $0xb8] sm:$0xff] }
 0x601   :  { %v2265_v15 = vadd.f32 %v3394_v61, %v2264_v34  ;;  %v3252_v6 = vmul.f32 -1.442695, %v2403_v63  ;;  %v6237_v34 = vld [vmem:[#allocation12 + $0x88] sm:$0xff] }
 0x603   :  { %3397 = vpow2.f32 %v3252_v6  ;;  %v2269_v30 = vsel %vm2268_vm10, %v3394_v61, %v2265_v15  ;;  %v6245_v6 = vld [vmem:[#allocation12 + $0x68] sm:$0xff] }
 0x604   :  { %v2274_v13 = vsel %vm2271_vm11, %v2273_v18, %v2269_v30  ;;  %v6250_v30 = vld [vmem:[#allocation12 + $0x58] sm:$0xff] }
 0x605   :  { %v2299_v54 = vsub.f32 1.0, %v2274_v13  ;;  %v2301_v20 = vmul.f32 %v2274_v13, %v5898_v42  ;;  %v6217_v42 = vld [vmem:[#allocation12 + $0xd8] sm:$0xff] }
 0x607   :  { %v2300_v5 = vmul.f32 %v3396_v59, %v2299_v54  ;;  %v3738_v54 = vld [vmem:[#allocation11 + $0x68] sm:$0xff]  ;;  %v3742_v59 = vld [vmem:[#allocation11 + $0x38] sm:$0xff] }
 0x609   :  { %v3398_v1 = vpop.eup %3397  ;;  %v6205_v39 = vadd.f32 %v2301_v20, %v2300_v5  ;;  %v6272_v5 = vld [vmem:[#allocation12 + $0x18] sm:$0xff]  ;;  %v6276_v20 = vld [vmem:[#allocation12 + $0x8] sm:$0xff] }
 0x60a   :  { %v2407_v47 = vadd.f32 1.0, %v3398_v1  ;;  %v3748_v1 = vld [vmem:[#allocation6 + $0xe8] sm:$0xff] }
 0x60b   :  { %2335 = vmatmul.f32.vlgmr.msrb.gmra.mxu1 %v6205_v39  ;;  %2526 = vmatmul.f32.vlgmr.msrb.gmra.mxu0 %v6205_v39 }
 0x60c   :  { %3399 = vrcp.f32 %v2407_v47  ;;  %2530 = vmatpush.msrb.mxu1 %v6209_v48  ;;  %2784 = vmatpush.msrb.mxu0 %v5903_v38  ;;  %v2419_v23 = vand.u32 2147483648, %v2407_v47  ;;  %v2417_v26 = vand.u32 2147483647, %v2407_v47  ;;  %vm2413_vm13 = vweird.f32 %v2407_v47 }
 0x60d   :  { %3401 = vtanh.f32 %v2444_v43  ;;  %v6241_v43 = vld [vmem:[#allocation12 + $0x78] sm:$0xff] }
 0x60e   :  { %2531 = vmatpush.msrb.mxu1 %v6213_v32  ;;  %2785 = vmatpush.msrb.mxu0 %v5907_v31  ;;  %vm2418_vm15 = vcmp.eq.f32.partialorder %v2417_v26, 8.507059e+37  ;;  %v6307_v26 = vld [vmem:[#allocation14 + $0x48] sm:$0xff] }
 0x610   :  { %2532 = vmatpush.msrb.mxu1 %v6217_v42  ;;  %2786 = vmatpush.msrb.mxu0 %v5911_v28 }
 0x612   :  { %v3400_v61 = vpop.eup %3399  ;;  %2533 = vmatpush.msrb.mxu1 %v6221_v25  ;;  %2787 = vmatpush.msrb.mxu0 %v5915_v12  ;;  %v6233_v12 = vld [vmem:[#allocation12 + $0x98] sm:$0xff] }
 0x613   :  { %v2409_v38 = vmul.f32 %v3400_v61, %v2407_v47  ;;  %vm2414_vm12 = vweird.f32 %v3400_v61  ;;  %v3402_v15 = vpop.eup %3401  ;;  %v6283_v47 = vld [vmem:[#allocation14 + $0x78] sm:$0xff] }
 0x614   :  { %2534 = vmatpush.msrb.mxu1 %v6225_v2  ;;  %2788 = vmatpush.msrb.mxu0 %v5919_v53  ;;  %vm2415_vm14 = vmor %vm2413_vm13, %vm2414_vm12  ;;  %v2420_v53 = vor.u32 1.1754944e-38, %v2419_v23  ;;  %v6299_v23 = vld [vmem:[#allocation14 + $0x58] sm:$0xff] }
 0x615   :  { %v2410_v31 = vsub.f32 1.0, %v2409_v38  ;;  %v3752_v38 = vld [vmem:[#allocation6 + $0xc8] sm:$0xff] }
 0x616   :  { %2535 = vmatpush.msrb.mxu1 %v6229_v50  ;;  %2789 = vmatpush.msrb.mxu0 %v5923_v49 }
 0x617   :  { %v2411_v28 = vmul.f32 %v3400_v61, %v2410_v31  ;;  %v6295_v31 = vld [vmem:[#allocation14 + $0x60] sm:$0xff] }
 0x618   :  { %2536 = vmatpush.msrb.mxu1 %v6233_v12  ;;  %2790 = vmatpush.msrb.mxu0 %v5927_v40 }
 0x619   :  { %v2412_v29 = vadd.f32 %v3400_v61, %v2411_v28  ;;  %v6303_v28 = vld [vmem:[#allocation14 + $0x50] sm:$0xff] }
 0x61a   :  { %2537 = vmatpush.msrb.mxu1 %v6237_v34  ;;  %2791 = vmatpush.msrb.mxu0 %v5931_v21 }
 0x61b   :  { %v2416_v49 = vsel %vm2415_vm14, %v3400_v61, %v2412_v29  ;;  %v6287_v61 = vld [vmem:[#allocation14 + $0x70] sm:$0xff]  ;;  %v6311_v29 = vld [vmem:[#allocation14 + $0x40] sm:$0xff] }
 0x61c   :  { %v2421_v63 = vsel %vm2418_vm15, %v2420_v53, %v2416_v49  ;;  %2538 = vmatpush.msrb.mxu1 %v6241_v43  ;;  %2792 = vmatpush.msrb.mxu0 %v5935_v55  ;;  %v6256_v55 = vld [vmem:[#allocation12 + $0x48] sm:$0xff]  ;;  %v6315_v53 = vld [vmem:[#allocation14 + $0x38] sm:$0xff]  ;;  %v6319_v49 = vld [vmem:[#allocation14 + $0x30] sm:$0xff] }
 0x61d   :  { %v2446_v40 = vsub.f32 1.0, %v2421_v63  ;;  %v2448_v21 = vmul.f32 %v2421_v63, %v5955_v46  ;;  %v6268_v46 = vld [vmem:[#allocation12 + $0x28] sm:$0xff] }
 0x61e   :  { %2539 = vmatpush.msrb.mxu1 %v6245_v6  ;;  %2793 = vmatpush.msrb.mxu0 %v5939_v8  ;;  %v6264_v8 = vld [vmem:[#allocation12 + $0x38] sm:$0xff]  ;;  %v6324_v63 = vld [vmem:[#allocation14 + $0x28] sm:$0xff] }
 0x61f   :  { %v2447_v18 = vmul.f32 %v3402_v15, %v2446_v40  ;;  %v6328_v40 = vld [vmem:[#allocation14 + $0x20] sm:$0xff]  ;;  %v6332_v15 = vld [vmem:[#allocation14 + $0x18] sm:$0xff] }
 0x620   :  { %2540 = vmatpush.msrb.mxu1 %v6250_v30  ;;  %2794 = vmatpush.msrb.mxu0 %v5943_v56  ;;  %v3740_v56 = vld [vmem:[#allocation11 + $0x50] sm:$0xff] }
 0x621   :  { %v6254_v13 = vadd.f32 %v2448_v21, %v2447_v18  ;;  %v6336_v18 = vld [vmem:[#allocation14 + $0x10] sm:$0xff]  ;;  %v3776_v21 = vld [vmem:[#allocation6 + $0x8] sm:$0xff] }
 0x622   :  { %2541 = vmatpush.msrb.mxu1 %v6256_v55  ;;  %2795 = vmatpush.msrb.mxu0 %v3738_v54  ;;  %v6341_v54 = vld [vmem:[#allocation14 + $0x8] sm:$0xff] }
 0x623   :  { %2466 = vmatmul.f32.vlgmr.msra.gmra.mxu1 %v6254_v13  ;;  %2486 = vmatmul.f32.vlgmr.msrb.gmra.mxu2 %v6254_v13 }
 0x624   :  { %2506 = vmatmul.f32.vlgmr.msrb.gmra.mxu3 %v6254_v13  ;;  %2673 = vmatmul.f32.vlgmr.msra.gmra.mxu0 %v6254_v13 }
 0x625   :  { %2737 = vmatpush.msrb.mxu2 %v5964_v36  ;;  %2542 = vmatpush.msrb.mxu1 %v6264_v8  ;;  %v3744_v36 = vld [vmem:[#allocation11 + $0x20] sm:$0xff] }
 0x626   :  { %2796 = vmatpush.msrb.mxu0 %v3740_v56  ;;  %v3778_v56 = vld [vmem:[#allocation11 + $0x178] sm:$0xff] }
 0x627   :  { %2738 = vmatpush.msrb.mxu2 %v5969_v57  ;;  %2543 = vmatpush.msrb.mxu1 %v6268_v46  ;;  %v3746_v57 = vld [vmem:[#allocation6 + $0xf8] sm:$0xff] }
 0x628   :  { %2797 = vmatpush.msrb.mxu0 %v3742_v59  ;;  %v6345_v59 = vld [vmem:[#allocation14] sm:$0xff] }
 0x629   :  { %2739 = vmatpush.msrb.mxu2 %v5974_v33  ;;  %2544 = vmatpush.msrb.mxu1 %v6272_v5  ;;  %v3747_v33 = vld [vmem:[#allocation11 + $0x8] sm:$0xff] }
 0x62a   :  { %2798 = vmatpush.msrb.mxu0 %v3744_v36  ;;  %v3780_v36 = vld [vmem:[#allocation11 + $0x160] sm:$0xff] }
 0x62b   :  { %2740 = vmatpush.msrb.mxu2 %v5979_v52  ;;  %2545 = vmatpush.msrb.mxu1 %v6276_v20  ;;  %v3750_v52 = vld [vmem:[#allocation6 + $0xd8] sm:$0xff] }
 0x62c   :  { %2546 = vmatmul.f32.vlgmr.msrb.gmra.mxu1 %v6205_v39  ;;  %2606 = vmatmul.f32.vlgmr.msra.gmra.mxu2 %v6205_v39 }
 0x62d   :  { %2677 = vmatpush.msra.mxu1 %v3746_v57  ;;  %2741 = vmatpush.msrb.mxu2 %v5985_v58  ;;  %v6291_v58 = vld [vmem:[#allocation14 + $0x68] sm:$0xff] }
 0x62e   :  { %2799 = vmatpush.msrb.mxu0 %v3747_v33  ;;  %v3781_v57 = vld [vmem:[#allocation11 + $0x148] sm:$0xff]  ;;  %v3782_v33 = vld [vmem:[#allocation11 + $0x130] sm:$0xff] }
 0x62f   :  { %2678 = vmatpush.msra.mxu1 %v3748_v1  ;;  %2742 = vmatpush.msrb.mxu2 %v5990_v19  ;;  %v3754_v19 = vld [vmem:[#allocation6 + $0xb8] sm:$0xff] }
 0x630   :  { %2904 = vmatpush.msra.mxu0 %v6283_v47  ;;  %v3783_v1 = vld [vmem:[#allocation11 + $0x118] sm:$0xff] }
 0x631   :  { %2679 = vmatpush.msra.mxu1 %v3750_v52  ;;  %2743 = vmatpush.msrb.mxu2 %v5995_v14  ;;  %v3756_v14 = vld [vmem:[#allocation6 + $0xa8] sm:$0xff] }
 0x632   :  { %2905 = vmatpush.msra.mxu0 %v6287_v61  ;;  %v3784_v52 = vld [vmem:[#allocation11 + $0x100] sm:$0xff] }
 0x633   :  { %2680 = vmatpush.msra.mxu1 %v3752_v38  ;;  %2744 = vmatpush.msrb.mxu2 %v6000_v45  ;;  %v3758_v45 = vld [vmem:[#allocation6 + $0x98] sm:$0xff]  ;;  %v7368_v38 = vld [vmem:[#allocation61_spill] sm:$0xff] }
 0x634   :  { %2906 = vmatpush.msra.mxu0 %v6291_v58 }
 0x635   :  { %2681 = vmatpush.msra.mxu1 %v3754_v19  ;;  %2745 = vmatpush.msrb.mxu2 %v6005_v4  ;;  %v3760_v4 = vld [vmem:[#allocation6 + $0x88] sm:$0xff] }
 0x636   :  { %2907 = vmatpush.msra.mxu0 %v6295_v31  ;;  %v3785_v19 = vld [vmem:[#allocation11 + $0xe8] sm:$0xff] }
 0x637   :  { %2682 = vmatpush.msra.mxu1 %v3756_v14  ;;  %2746 = vmatpush.msrb.mxu2 %v6010_v24  ;;  %v3762_v24 = vld [vmem:[#allocation6 + $0x78] sm:$0xff] }
 0x638   :  { %2908 = vmatpush.msra.mxu0 %v6299_v23  ;;  %v7369_v14 = vld [vmem:[#allocation62_spill] sm:$0xff] }
 0x639   :  { %2683 = vmatpush.msra.mxu1 %v3758_v45  ;;  %2747 = vmatpush.msrb.mxu2 %v6015_v22  ;;  %v3764_v22 = vld [vmem:[#allocation6 + $0x68] sm:$0xff]  ;;  %v3786_v45 = vld [vmem:[#allocation11 + $0xd0] sm:$0xff] }
 0x63a   :  { %2909 = vmatpush.msra.mxu0 %v6303_v28 }
 0x63b   :  { %2684 = vmatpush.msra.mxu1 %v3760_v4  ;;  %2748 = vmatpush.msrb.mxu2 %v6020_v37  ;;  %v3766_v37 = vld [vmem:[#allocation6 + $0x58] sm:$0xff]  ;;  %v7370_v4 = vld [vmem:[#allocation124_spill] sm:$0xff] }
 0x63c   :  { %2910 = vmatpush.msra.mxu0 %v6307_v26 }
 0x63d   :  { %2685 = vmatpush.msra.mxu1 %v3762_v24  ;;  %2749 = vmatpush.msrb.mxu2 %v6025_v7  ;;  %v3768_v7 = vld [vmem:[#allocation6 + $0x48] sm:$0xff]  ;;  %v3787_v24 = vld [vmem:[#allocation11 + $0xb8] sm:$0xff] }
 0x63e   :  { %2911 = vmatpush.msra.mxu0 %v6311_v29 }
 0x63f   :  { %2686 = vmatpush.msra.mxu1 %v3764_v22  ;;  %2750 = vmatpush.msrb.mxu2 %v6030_v17  ;;  %v3770_v17 = vld [vmem:[#allocation6 + $0x38] sm:$0xff]  ;;  %v7371_v22 = vld [vmem:[#allocation92_spill] sm:$0xff] }
 0x640   :  { %2912 = vmatpush.msra.mxu0 %v6315_v53 }
 0x641   :  { %2687 = vmatpush.msra.mxu1 %v3766_v37  ;;  %2751 = vmatpush.msrb.mxu2 %v6035_v44  ;;  %v3772_v44 = vld [vmem:[#allocation6 + $0x28] sm:$0xff] }
 0x642   :  { %2913 = vmatpush.msra.mxu0 %v6319_v49  ;;  %v3788_v37 = vld [vmem:[#allocation11 + $0xa0] sm:$0xff] }
 0x643   :  { %2688 = vmatpush.msra.mxu1 %v3768_v7  ;;  %2752 = vmatpush.msrb.mxu2 %v6040_v11  ;;  %v3774_v11 = vld [vmem:[#allocation6 + $0x18] sm:$0xff]  ;;  %v7372_v7 = vld [vmem:[#allocation89_spill] sm:$0xff] }
 0x644   :  { %2753 = vmatmul.f32.vlgmr.msrb.gmra.mxu2 %v6254_v13  ;;  %2914 = vmatpush.msra.mxu0 %v6324_v63 }
 0x645   :  { %2689 = vmatpush.msra.mxu1 %v3770_v17  ;;  %2824 = vmatpush.msra.mxu2 %v6045_v0  ;;  %v3789_v17 = vld [vmem:[#allocation11 + $0x88] sm:$0xff] }
 0x646   :  { %2915 = vmatpush.msra.mxu0 %v6328_v40 }
 0x647   :  { %2690 = vmatpush.msra.mxu1 %v3772_v44  ;;  %2825 = vmatpush.msra.mxu2 %v6050_v16  ;;  %v7373_v44 = vld [vmem:[#allocation55_spill] sm:$0xff] }
 0x648   :  { %2916 = vmatpush.msra.mxu0 %v6332_v15 }
 0x649   :  { %2691 = vmatpush.msra.mxu1 %v3774_v11  ;;  %2826 = vmatpush.msra.mxu2 %v6055_v10  ;;  %v3790_v11 = vld [vmem:[#allocation11 + $0x70] sm:$0xff] }
 0x64a   :  { %2917 = vmatpush.msra.mxu0 %v6336_v18 }
 0x64b   :  { %2692 = vmatpush.msra.mxu1 %v3776_v21  ;;  %2827 = vmatpush.msra.mxu2 %v6059_v3  ;;  %v3791_v21 = vld [vmem:[#allocation11 + $0x58] sm:$0xff] }
 0x64c   :  { %2693 = vmatmul.f32.vlgmr.msra.gmra.mxu1 %v6254_v13  ;;  %2918 = vmatpush.msra.mxu0 %v6341_v54 }
 0x64d   :  { %2828 = vmatpush.msra.mxu2 %v6063_v62  ;;  %2804 = vmatpush.msrb.mxu1 %v3778_v56  ;;  %v3792_v56 = vld [vmem:[#allocation11 + $0x40] sm:$0xff] }
 0x64e   :  { %2919 = vmatpush.msra.mxu0 %v6345_v59 }
 0x64f   :  { %2829 = vmatpush.msra.mxu2 %v6067_v41  ;;  %2805 = vmatpush.msrb.mxu1 %v3780_v36  ;;  %v3793_v36 = vld [vmem:[#allocation11 + $0x28] sm:$0xff] }
 0x651   :  { %2830 = vmatpush.msra.mxu2 %v6071_v27  ;;  %2806 = vmatpush.msrb.mxu1 %v3781_v57  ;;  %v3794_v57 = vld [vmem:[#allocation11 + $0x10] sm:$0xff] }
 0x653   :  { %2831 = vmatpush.msra.mxu2 %v6075_v60  ;;  %2807 = vmatpush.msrb.mxu1 %v3782_v33  ;;  %v7375_v33 = vld [vmem:[#allocation103_spill] sm:$0xff] }
 0x655   :  { %2832 = vmatpush.msra.mxu2 %v6079_v51  ;;  %2808 = vmatpush.msrb.mxu1 %v3783_v1 }
 0x657   :  { %2833 = vmatpush.msra.mxu2 %v6083_v35  ;;  %2809 = vmatpush.msrb.mxu1 %v3784_v52 }
 0x659   :  { %2834 = vmatpush.msra.mxu2 %v7368_v38  ;;  %2810 = vmatpush.msrb.mxu1 %v3785_v19  ;;  %v2624_v19 = vld [vmem:[#allocation15 + $0x2b8] sm:$0xff] }
 0x65b   :  { %2835 = vmatpush.msra.mxu2 %v7369_v14  ;;  %2811 = vmatpush.msrb.mxu1 %v3786_v45 }
 0x65d   :  { %2836 = vmatpush.msra.mxu2 %v7370_v4  ;;  %2812 = vmatpush.msrb.mxu1 %v3787_v24  ;;  %v2623_v24 = vld [vmem:[#allocation15 + $0x2b0] sm:$0xff] }
 0x65f   :  { %2837 = vmatpush.msra.mxu2 %v7371_v22  ;;  %2813 = vmatpush.msrb.mxu1 %v3788_v37 }
 0x661   :  { %2838 = vmatpush.msra.mxu2 %v7372_v7  ;;  %2814 = vmatpush.msrb.mxu1 %v3789_v17  ;;  %v2620_v17 = vld [vmem:[#allocation15 + $0x298] sm:$0xff] }
 0x663   :  { %2839 = vmatpush.msra.mxu2 %v7373_v44  ;;  %2815 = vmatpush.msrb.mxu1 %v3790_v11  ;;  %v2618_v11 = vld [vmem:[#allocation15 + $0x288] sm:$0xff] }
 0x665   :  { %2968 = vmatpush.msrb.mxu2 %v6045_v0  ;;  %2816 = vmatpush.msrb.mxu1 %v3791_v21  ;;  %v2632_v0 = vld [vmem:[#allocation15 + $0x2f8] sm:$0xff]  ;;  %v2617_v21 = vld [vmem:[#allocation15 + $0x280] sm:$0xff] }
 0x666   :  { %2633 = vmatpush.msra.mxu3 %v2632_v0  ;;  %v7378_v0 = vld [vmem:[#allocation95_spill] sm:$0xff] }
 0x667   :  { %2969 = vmatpush.msrb.mxu2 %v6050_v16  ;;  %2817 = vmatpush.msrb.mxu1 %v3792_v56  ;;  %v2631_v16 = vld [vmem:[#allocation15 + $0x2f0] sm:$0xff] }
 0x668   :  { %2634 = vmatpush.msra.mxu3 %v2631_v16  ;;  %v7379_v16 = vld [vmem:[#allocation24_spill] sm:$0xff] }
 0x669   :  { %2970 = vmatpush.msrb.mxu2 %v6055_v10  ;;  %2818 = vmatpush.msrb.mxu1 %v3793_v36  ;;  %v2630_v10 = vld [vmem:[#allocation15 + $0x2e8] sm:$0xff]  ;;  %v7377_v36 = vld [vmem:[#allocation86_spill] sm:$0xff] }
 0x66a   :  { %2635 = vmatpush.msra.mxu3 %v2630_v10  ;;  %v7380_v10 = vld [vmem:[#allocation83_spill] sm:$0xff] }
 0x66b   :  { %2971 = vmatpush.msrb.mxu2 %v6059_v3  ;;  %2819 = vmatpush.msrb.mxu1 %v3794_v57  ;;  %v2629_v3 = vld [vmem:[#allocation15 + $0x2e0] sm:$0xff] }
 0x66c   :  { %2636 = vmatpush.msra.mxu3 %v2629_v3  ;;  %v339_v3 = vadd.f32 %v7380_v10, %v7379_v16 }
 0x66d   :  { %2972 = vmatpush.msrb.mxu2 %v6063_v62  ;;  %v2628_v62 = vld [vmem:[#allocation15 + $0x2d8] sm:$0xff] }
 0x66e   :  { %2637 = vmatpush.msra.mxu3 %v2628_v62  ;;  %v7381_v62 = vld [vmem:[#allocation97_spill] sm:$0xff] }
 0x66f   :  { %2973 = vmatpush.msrb.mxu2 %v6067_v41  ;;  %v6373_v41 = vpop.f32.mrf.mxu1 }
 0x671   :  { %2974 = vmatpush.msrb.mxu2 %v6071_v27  ;;  %v2627_v27 = vld [vmem:[#allocation15 + $0x2d0] sm:$0xff] }
 0x672   :  { %2638 = vmatpush.msra.mxu3 %v2627_v27  ;;  %v7382_v27 = vld [vmem:[#allocation99_spill] sm:$0xff] }
 0x673   :  { %2975 = vmatpush.msrb.mxu2 %v6075_v60  ;;  %v2626_v60 = vld [vmem:[#allocation15 + $0x2c8] sm:$0xff] }
 0x674   :  { %2639 = vmatpush.msra.mxu3 %v2626_v60  ;;  %v7383_v60 = vld [vmem:[#allocation84_spill] sm:$0xff] }
 0x675   :  { %2976 = vmatpush.msrb.mxu2 %v6079_v51  ;;  %v2625_v51 = vld [vmem:[#allocation15 + $0x2c0] sm:$0xff] }
 0x676   :  { %2640 = vmatpush.msra.mxu3 %v2625_v51  ;;  %v380_v51 = vadd.f32 %v7383_v60, %v339_v3  ;;  %v7394_v60 = vld [vmem:[#allocation87_spill] sm:$0xff] }
 0x677   :  { %2977 = vmatpush.msrb.mxu2 %v6083_v35  ;;  %v7374_v35 = vld [vmem:[#allocation42_spill] sm:$0xff] }
 0x678   :  { %v2154_v1 = vadd.f32 %v7375_v33, %v7374_v35  ;;  %2641 = vmatpush.msra.mxu3 %v2624_v19  ;;  %v7385_v19 = vld [vmem:[#allocation107_spill] sm:$0xff] }
 0x679   :  { %2978 = vmatpush.msrb.mxu2 %v7368_v38 }
 0x67a   :  { %2642 = vmatpush.msra.mxu3 %v2623_v24  ;;  %v7386_v24 = vld [vmem:[#allocation90_spill] sm:$0xff] }
 0x67b   :  { %2979 = vmatpush.msrb.mxu2 %v7369_v14  ;;  %v7376_v14 = vld [vmem:[#allocation28_spill] sm:$0xff] }
 0x67d   :  { %2980 = vmatpush.msrb.mxu2 %v7370_v4 }
 0x67f   :  { %2981 = vmatpush.msrb.mxu2 %v7371_v22  ;;  %v2622_v22 = vld [vmem:[#allocation15 + $0x2a8] sm:$0xff] }
 0x680   :  { %2643 = vmatpush.msra.mxu3 %v2622_v22  ;;  %v7387_v22 = vld [vmem:[#allocation101_spill] sm:$0xff] }
 0x681   :  { %2982 = vmatpush.msrb.mxu2 %v7372_v7  ;;  %v2621_v7 = vld [vmem:[#allocation15 + $0x2a0] sm:$0xff] }
 0x682   :  { %2644 = vmatpush.msra.mxu3 %v2621_v7  ;;  %v7388_v7 = vld [vmem:[#allocation46_spill] sm:$0xff] }
 0x683   :  { %2983 = vmatpush.msrb.mxu2 %v7373_v44  ;;  %v2619_v44 = vld [vmem:[#allocation15 + $0x290] sm:$0xff] }
 0x684   :  { %2645 = vmatpush.msra.mxu3 %v2620_v17  ;;  %v7389_v17 = vld [vmem:[#allocation88_spill] sm:$0xff] }
 0x686   :  { %2646 = vmatpush.msra.mxu3 %v2619_v44  ;;  %v2174_v44 = vadd.f32 %v7389_v17, %v7388_v7 }
 0x688   :  { %v2336_v52 = vpop.f32.mrf.mxu1  ;;  %v2527_v38 = vpop.f32.mrf.mxu0  ;;  %2647 = vmatpush.msra.mxu3 %v2618_v11  ;;  %v7390_v11 = vld [vmem:[#allocation47_spill] sm:$0xff] }
 0x689   :  { %v6380_v45 = vadd.f32 %v2336_v52, %v7376_v14  ;;  %v2550_v4 = vadd.f32 %v2527_v38, %v2154_v1  ;;  %v7384_v1 = vld [vmem:[#allocation49_spill] sm:$0xff] }
 0x68a   :  { %2648 = vmatpush.msra.mxu3 %v2617_v21 }
 0x68b   :  { %v3253_v37 = vmul.f32 -1.442695, %v2550_v4 }
 0x68c   :  { %2764 = vmatpush.msrb.mxu3 %v7377_v36 }
 0x68d   :  { %3403 = vpow2.f32 %v3253_v37 }
 0x68e   :  { %2765 = vmatpush.msrb.mxu3 %v7378_v0  ;;  %v7392_v0 = vld [vmem:[#allocation105_spill] sm:$0xff] }
 0x690   :  { %2766 = vmatpush.msrb.mxu3 %v7381_v62  ;;  %v7393_v62 = vld [vmem:[#allocation48_spill] sm:$0xff] }
 0x692   :  { %2767 = vmatpush.msrb.mxu3 %v7382_v27 }
 0x693   :  { %v3404_v56 = vpop.eup %3403 }
 0x694   :  { %v2554_v57 = vadd.f32 1.0, %v3404_v56  ;;  %2768 = vmatpush.msrb.mxu3 %v7384_v1  ;;  %v7395_v1 = vld [vmem:[#allocation70_spill] sm:$0xff] }
 0x696   :  { %3405 = vrcp.f32 %v2554_v57  ;;  %2769 = vmatpush.msrb.mxu3 %v7385_v19  ;;  %vm2560_vm1 = vweird.f32 %v2554_v57 }
 0x698   :  { %2770 = vmatpush.msrb.mxu3 %v7386_v24 }
 0x69a   :  { %2771 = vmatpush.msrb.mxu3 %v7387_v22  ;;  %v7397_v22 = vld [vmem:[#allocation71_spill] sm:$0xff] }
 0x69c   :  { %v3406_v14 = vpop.eup %3405  ;;  %2772 = vmatpush.msrb.mxu3 %v7390_v11 }
 0x69d   :  { %v2556_v37 = vmul.f32 %v3406_v14, %v2554_v57  ;;  %vm2561_vm0 = vweird.f32 %v3406_v14 }
 0x69e   :  { %2773 = vmatpush.msrb.mxu3 %v7392_v0  ;;  %vm2562_vm2 = vmor %vm2560_vm1, %vm2561_vm0  ;;  %v7399_v0 = vld [vmem:[#allocation63_spill] sm:$0xff] }
 0x69f   :  { %v2557_v16 = vsub.f32 1.0, %v2556_v37 }
 0x6a0   :  { %v6389_v33 = vpop.f32.mrf.mxu1  ;;  %2774 = vmatpush.msrb.mxu3 %v7393_v62 }
 0x6a1   :  { %v2674_v52 = vpop.f32.mrf.mxu0 }
 0x6a2   :  { %v2697_v38 = vadd.f32 %v2674_v52, %v380_v51  ;;  %2775 = vmatpush.msrb.mxu3 %v7394_v60  ;;  %v2558_v51 = vmul.f32 %v3406_v14, %v2557_v16  ;;  %v7396_v52 = vld [vmem:[#allocation59_spill] sm:$0xff] }
 0x6a4   :  { %v3255_v4 = vmul.f32 -1.442695, %v2697_v38  ;;  %2776 = vmatpush.msrb.mxu3 %v7395_v1  ;;  %v2559_v38 = vadd.f32 %v3406_v14, %v2558_v51  ;;  %v7400_v1 = vld [vmem:[#allocation45_spill] sm:$0xff] }
 0x6a6   :  { %3407 = vpow2.f32 %v3255_v4  ;;  %v6398_v56 = vpop.f32.mrf.mxu2  ;;  %2777 = vmatpush.msrb.mxu3 %v7396_v52  ;;  %v2566_v4 = vand.u32 2147483648, %v2554_v57  ;;  %v2194_v52 = vadd.f32 %v6373_v41, %v7400_v1  ;;  %v7408_v1 = vld [vmem:[#allocation41_spill] sm:$0xff] }
 0x6a7   :  { %7391 = vst [vmem:[#allocation112_spill] sm:$0xff] %v6398_v56 }
 0x6a8   :  { %2778 = vmatpush.msrb.mxu3 %v7397_v22 }
 0x6a9   :  { %v2547_v21 = vpop.f32.mrf.mxu1 }
 0x6aa   :  { %v2570_v36 = vadd.f32 %v2547_v21, %v2174_v44  ;;  %v2564_v44 = vand.u32 2147483647, %v2554_v57  ;;  %v7398_v21 = vld [vmem:[#allocation64_spill] sm:$0xff] }
 0x6ab   :  { %2779 = vmatpush.msrb.mxu3 %v7398_v21 }
 0x6ac   :  { %v3408_v10 = vpop.eup %3407  ;;  %v3254_v3 = vmul.f32 -1.442695, %v2570_v36  ;;  %v2563_v36 = vsel %vm2562_vm2, %v3406_v14, %v2559_v38  ;;  %vm2565_vm3 = vcmp.eq.f32.partialorder %v2564_v44, 8.507059e+37  ;;  %v7402_v44 = vld [vmem:[#allocation37_spill] sm:$0xff] }
 0x6ad   :  { %v2701_v27 = vadd.f32 1.0, %v3408_v10  ;;  %v2567_v10 = vor.u32 1.1754944e-38, %v2566_v4 }
 0x6ae   :  { %3409 = vpow2.f32 %v3254_v3 }
 0x6af   :  { %3411 = vrcp.f32 %v2701_v27  ;;  %v2607_v24 = vpop.f32.mrf.mxu2  ;;  %v2568_v3 = vsel %vm2565_vm3, %v2567_v10, %v2563_v36  ;;  %vm2707_vm6 = vweird.f32 %v2701_v27  ;;  %v2713_v4 = vand.u32 2147483648, %v2701_v27  ;;  %v7405_v10 = vld [vmem:[#allocation85_spill] sm:$0xff] }
 0x6b0   :  { %v2608_v16 = vadd.f32 %v7399_v0, %v2607_v24  ;;  %v7401_v24 = vld [vmem:[#allocation30_spill] sm:$0xff] }
 0x6b2   :  { %v2610_v60 = vmul.f32 %v2608_v16, %v2568_v3  ;;  %v2711_v16 = vand.u32 2147483647, %v2701_v27  ;;  %v7406_v3 = vld [vmem:[#allocation33_spill] sm:$0xff] }
 0x6b4   :  { %v3410_v19 = vpop.eup %3409  ;;  %v2611_v57 = vadd.f32 %v2610_v60, %v2194_v52  ;;  %vm2712_vm11 = vcmp.eq.f32.partialorder %v2711_v16, 8.507059e+37 }
 0x6b5   :  { %v3412_v37 = vpop.eup %3411  ;;  %v2574_v17 = vadd.f32 1.0, %v3410_v19 }
 0x6b6   :  { %v2703_v11 = vmul.f32 %v3412_v37, %v2701_v27  ;;  %vm2708_vm4 = vweird.f32 %v3412_v37 }
 0x6b7   :  { %3413 = vrcp.f32 %v2574_v17  ;;  %v2586_v7 = vand.u32 2147483648, %v2574_v17  ;;  %v2584_v14 = vand.u32 2147483647, %v2574_v17  ;;  %vm2580_vm7 = vweird.f32 %v2574_v17  ;;  %vm6412_vm8 = vmor %vm2707_vm6, %vm2708_vm4 }
 0x6b8   :  { %v2704_v62 = vsub.f32 1.0, %v2703_v11  ;;  %3415 = vtanh.f32 %v2611_v57  ;;  %v421_v11 = vadd.f32 %v7402_v44, %v7401_v24 }
 0x6b9   :  { %vm2585_vm10 = vcmp.eq.f32.partialorder %v2584_v14, 8.507059e+37 }
 0x6ba   :  { %v2705_v22 = vmul.f32 %v3412_v37, %v2704_v62  ;;  %v503_v62 = vadd.f32 %v7406_v3, %v7405_v10 }
 0x6bc   :  { %v2706_v38 = vadd.f32 %v3412_v37, %v2705_v22  ;;  %v2714_v22 = vor.u32 1.1754944e-38, %v2713_v4  ;;  %v544_v0 = vadd.f32 %v7408_v1, %v503_v62 }
 0x6bd   :  { %v3414_v51 = vpop.eup %3413 }
 0x6be   :  { %v2576_v19 = vmul.f32 %v3414_v51, %v2574_v17  ;;  %vm2581_vm5 = vweird.f32 %v3414_v51  ;;  %v2710_v52 = vsel %vm6412_vm8, %v3412_v37, %v2706_v38  ;;  %v3416_v27 = vpop.eup %3415 }
 0x6bf   :  { %vm2582_vm9 = vmor %vm2580_vm7, %vm2581_vm5  ;;  %v2715_v10 = vsel %vm2712_vm11, %v2714_v22, %v2710_v52 }
 0x6c0   :  { %v2577_v56 = vsub.f32 1.0, %v2576_v19 }
 0x6c2   :  { %v2578_v21 = vmul.f32 %v3414_v51, %v2577_v56  ;;  %v2587_v56 = vor.u32 1.1754944e-38, %v2586_v7 }
 0x6c4   :  { %v2579_v36 = vadd.f32 %v3414_v51, %v2578_v21  ;;  %v7407_v21 = vld [vmem:[#allocation38_spill] sm:$0xff] }
 0x6c5   :  { %v462_v17 = vadd.f32 %v7407_v21, %v421_v11 }
 0x6c6   :  { %v2583_v60 = vsel %vm2582_vm9, %v3414_v51, %v2579_v36 }
 0x6c7   :  { %v2588_v19 = vsel %vm2585_vm10, %v2587_v56, %v2583_v60  ;;  %v2754_v57 = vpop.f32.mrf.mxu2 }
 0x6c8   :  { %v2613_v24 = vsub.f32 1.0, %v2588_v19  ;;  %v2755_v44 = vadd.f32 %v6199_v9, %v2754_v57  ;;  %v2615_v36 = vmul.f32 %v2588_v19, %v6205_v39 }
 0x6c9   :  { %v2694_v3 = vpop.f32.mrf.mxu1 }
 0x6ca   :  { %v2614_v7 = vmul.f32 %v3416_v27, %v2613_v24  ;;  %v2757_v14 = vmul.f32 %v2755_v44, %v2715_v10  ;;  %v2717_v51 = vadd.f32 %v2694_v3, %v462_v17 }
 0x6cc   :  { %v2758_v37 = vadd.f32 %v2757_v14, %v544_v0  ;;  %v3256_v38 = vmul.f32 -1.442695, %v2717_v51  ;;  %v6424_v4 = vadd.f32 %v2615_v36, %v2614_v7 }
 0x6ce   :  { %2649 = vmatmul.f32.vlgmr.msra.gmra.mxu3 %v6424_v4  ;;  %2840 = vmatmul.f32.vlgmr.msra.gmra.mxu2 %v6424_v4  ;;  %3417 = vpow2.f32 %v3256_v38  ;;  %v7411_v38 = vld [vmem:[#allocation63_spill] sm:$0xff] }
 0x6cf   :  { %2844 = vmatpush.msra.mxu3 %v6209_v48 }
 0x6d1   :  { %2845 = vmatpush.msra.mxu3 %v6213_v32 }
 0x6d3   :  { %2846 = vmatpush.msra.mxu3 %v6217_v42 }
 0x6d4   :  { %v3418_v9 = vpop.eup %3417 }
 0x6d5   :  { %2847 = vmatpush.msra.mxu3 %v6221_v25  ;;  %v2721_v1 = vadd.f32 1.0, %v3418_v9 }
 0x6d7   :  { %2848 = vmatpush.msra.mxu3 %v6225_v2  ;;  %3419 = vrcp.f32 %v2721_v1  ;;  %v2733_v41 = vand.u32 2147483648, %v2721_v1  ;;  %v2731_v62 = vand.u32 2147483647, %v2721_v1  ;;  %vm2727_vm13 = vweird.f32 %v2721_v1 }
 0x6d8   :  { %3421 = vtanh.f32 %v2758_v37 }
 0x6d9   :  { %2849 = vmatpush.msra.mxu3 %v6229_v50  ;;  %v2734_v60 = vor.u32 1.1754944e-38, %v2733_v41  ;;  %vm2732_vm15 = vcmp.eq.f32.partialorder %v2731_v62, 8.507059e+37  ;;  %v7412_v41 = vld [vmem:[#allocation45_spill] sm:$0xff] }
 0x6db   :  { %2850 = vmatpush.msra.mxu3 %v6233_v12 }
 0x6dd   :  { %2851 = vmatpush.msra.mxu3 %v6237_v34  ;;  %v3420_v39 = vpop.eup %3419 }
 0x6de   :  { %v2723_v0 = vmul.f32 %v3420_v39, %v2721_v1  ;;  %vm2728_vm12 = vweird.f32 %v3420_v39  ;;  %v3422_v57 = vpop.eup %3421 }
 0x6df   :  { %2852 = vmatpush.msra.mxu3 %v6241_v43  ;;  %vm2729_vm14 = vmor %vm2727_vm13, %vm2728_vm12 }
 0x6e0   :  { %v2724_v11 = vsub.f32 1.0, %v2723_v0 }
 0x6e1   :  { %2853 = vmatpush.msra.mxu3 %v6245_v6 }
 0x6e2   :  { %v2725_v16 = vmul.f32 %v3420_v39, %v2724_v11 }
 0x6e3   :  { %2854 = vmatpush.msra.mxu3 %v6250_v30 }
 0x6e4   :  { %v2726_v56 = vadd.f32 %v3420_v39, %v2725_v16 }
 0x6e5   :  { %2855 = vmatpush.msra.mxu3 %v6256_v55 }
 0x6e6   :  { %v2730_v52 = vsel %vm2729_vm14, %v3420_v39, %v2726_v56 }
 0x6e7   :  { %2856 = vmatpush.msra.mxu3 %v6264_v8  ;;  %v2735_v19 = vsel %vm2732_vm15, %v2734_v60, %v2730_v52 }
 0x6e8   :  { %v2760_v22 = vsub.f32 1.0, %v2735_v19  ;;  %v2762_v17 = vmul.f32 %v2735_v19, %v6254_v13 }
 0x6e9   :  { %2857 = vmatpush.msra.mxu3 %v6268_v46 }
 0x6ea   :  { %v2761_v21 = vmul.f32 %v3422_v57, %v2760_v22 }
 0x6eb   :  { %2858 = vmatpush.msra.mxu3 %v6272_v5 }
 0x6ec   :  { %v2763_v24 = vadd.f32 %v2762_v17, %v2761_v21 }
 0x6ed   :  { %2859 = vmatpush.msra.mxu3 %v6276_v20 }
 0x6ee   :  { %2780 = vmatmul.f32.vlgmr.msrb.gmra.mxu3 %v2763_v24  ;;  %2800 = vmatmul.f32.vlgmr.msrb.gmra.mxu0 %v2763_v24 }
 0x6ef   :  { %2820 = vmatmul.f32.vlgmr.msrb.gmra.mxu1 %v2763_v24  ;;  %2988 = vmatpush.msrb.mxu3 %v6209_v48  ;;  %v6479_v48 = vpop.f32.mrf.mxu3 }
 0x6f0   :  { %3048 = vmatpush.msrb.mxu0 %v6283_v47  ;;  %v2938_v47 = vld [vmem:[#allocation15 + $0x338] sm:$0xff]  ;;  %v2508_v16 = vadd.f32 %v6479_v48, %v7412_v41 }
 0x6f1   :  { %2989 = vmatpush.msrb.mxu3 %v6213_v32 }
 0x6f2   :  { %3049 = vmatpush.msrb.mxu0 %v6287_v61 }
 0x6f3   :  { %2990 = vmatpush.msrb.mxu3 %v6217_v42 }
 0x6f4   :  { %3050 = vmatpush.msrb.mxu0 %v6291_v58  ;;  %v2937_v58 = vld [vmem:[#allocation15 + $0x330] sm:$0xff] }
 0x6f5   :  { %2991 = vmatpush.msrb.mxu3 %v6221_v25 }
 0x6f6   :  { %2860 = vmatmul.f32.vlgmr.msra.gmra.mxu3 %v6424_v4  ;;  %2920 = vmatmul.f32.vlgmr.msra.gmra.mxu0 %v6424_v4 }
 0x6f7   :  { %3051 = vmatpush.msrb.mxu0 %v6295_v31  ;;  %2992 = vmatpush.msrb.mxu3 %v6225_v2  ;;  %v2468_v2 = vadd.f32 %v6389_v33, %v7374_v35  ;;  %v2936_v31 = vld [vmem:[#allocation15 + $0x328] sm:$0xff]  ;;  %v2931_v33 = vld [vmem:[#allocation15 + $0x300] sm:$0xff] }
 0x6f9   :  { %3052 = vmatpush.msrb.mxu0 %v6299_v23  ;;  %2993 = vmatpush.msrb.mxu3 %v6229_v50 }
 0x6fb   :  { %3053 = vmatpush.msrb.mxu0 %v6303_v28  ;;  %2994 = vmatpush.msrb.mxu3 %v6233_v12  ;;  %v2935_v28 = vld [vmem:[#allocation15 + $0x320] sm:$0xff] }
 0x6fd   :  { %3054 = vmatpush.msrb.mxu0 %v6307_v26  ;;  %2995 = vmatpush.msrb.mxu3 %v6237_v34  ;;  %v2946_v34 = vld [vmem:[#allocation15 + $0x378] sm:$0xff] }
 0x6fe   :  { %2947 = vmatpush.msra.mxu1 %v2946_v34  ;;  %v2934_v26 = vld [vmem:[#allocation15 + $0x318] sm:$0xff]  ;;  %v3089_v34 = vld [vmem:[#allocation15 + $0x3f0] sm:$0xff] }
 0x6ff   :  { %3055 = vmatpush.msrb.mxu0 %v6311_v29  ;;  %2996 = vmatpush.msrb.mxu3 %v6241_v43  ;;  %v2945_v43 = vld [vmem:[#allocation15 + $0x370] sm:$0xff] }
 0x700   :  { %2948 = vmatpush.msra.mxu1 %v2945_v43  ;;  %v3088_v43 = vld [vmem:[#allocation15 + $0x3e8] sm:$0xff] }
 0x701   :  { %3056 = vmatpush.msrb.mxu0 %v6315_v53  ;;  %2997 = vmatpush.msrb.mxu3 %v6245_v6  ;;  %v2944_v6 = vld [vmem:[#allocation15 + $0x368] sm:$0xff]  ;;  %v2933_v53 = vld [vmem:[#allocation15 + $0x310] sm:$0xff] }
 0x702   :  { %2949 = vmatpush.msra.mxu1 %v2944_v6  ;;  %v3087_v6 = vld [vmem:[#allocation15 + $0x3e0] sm:$0xff] }
 0x703   :  { %3057 = vmatpush.msrb.mxu0 %v6319_v49  ;;  %2998 = vmatpush.msrb.mxu3 %v6250_v30  ;;  %v2943_v30 = vld [vmem:[#allocation15 + $0x360] sm:$0xff]  ;;  %v7409_v49 = vld [vmem:[#allocation46_spill] sm:$0xff] }
 0x704   :  { %2950 = vmatpush.msra.mxu1 %v2943_v30  ;;  %v3086_v30 = vld [vmem:[#allocation15 + $0x3d8] sm:$0xff] }
 0x705   :  { %3058 = vmatpush.msrb.mxu0 %v6324_v63  ;;  %2999 = vmatpush.msrb.mxu3 %v6256_v55  ;;  %v2942_v55 = vld [vmem:[#allocation15 + $0x358] sm:$0xff]  ;;  %v7410_v63 = vld [vmem:[#allocation112_spill] sm:$0xff] }
 0x706   :  { %2951 = vmatpush.msra.mxu1 %v2942_v55  ;;  %v3083_v55 = vld [vmem:[#allocation15 + $0x3c0] sm:$0xff] }
 0x707   :  { %3059 = vmatpush.msrb.mxu0 %v6328_v40  ;;  %3000 = vmatpush.msrb.mxu3 %v6264_v8  ;;  %v2941_v8 = vld [vmem:[#allocation15 + $0x350] sm:$0xff]  ;;  %v2488_v40 = vadd.f32 %v7410_v63, %v7409_v49  ;;  %v3078_v63 = vld [vmem:[#allocation15 + $0x398] sm:$0xff] }
 0x708   :  { %2952 = vmatpush.msra.mxu1 %v2941_v8 }
 0x709   :  { %3060 = vmatpush.msrb.mxu0 %v6332_v15  ;;  %3001 = vmatpush.msrb.mxu3 %v6268_v46 }
 0x70b   :  { %3061 = vmatpush.msrb.mxu0 %v6336_v18  ;;  %3002 = vmatpush.msrb.mxu3 %v6272_v5  ;;  %v2940_v5 = vld [vmem:[#allocation15 + $0x348] sm:$0xff] }
 0x70c   :  { %2953 = vmatpush.msra.mxu1 %v2940_v5  ;;  %v2932_v18 = vld [vmem:[#allocation15 + $0x308] sm:$0xff]  ;;  %v3081_v5 = vld [vmem:[#allocation15 + $0x3b0] sm:$0xff] }
 0x70d   :  { %3062 = vmatpush.msrb.mxu0 %v6341_v54  ;;  %3003 = vmatpush.msrb.mxu3 %v6276_v20  ;;  %v2939_v20 = vld [vmem:[#allocation15 + $0x340] sm:$0xff] }
 0x70e   :  { %2954 = vmatpush.msra.mxu1 %v2939_v20 }
 0x70f   :  { %3063 = vmatpush.msrb.mxu0 %v6345_v59 }
 0x710   :  { %2955 = vmatpush.msra.mxu1 %v2938_v47 }
 0x712   :  { %2956 = vmatpush.msra.mxu1 %v2937_v58 }
 0x714   :  { %2957 = vmatpush.msra.mxu1 %v2936_v31 }
 0x716   :  { %2958 = vmatpush.msra.mxu1 %v2935_v28 }
 0x718   :  { %2959 = vmatpush.msra.mxu1 %v2934_v26 }
 0x71a   :  { %2960 = vmatpush.msra.mxu1 %v2933_v53 }
 0x71c   :  { %2961 = vmatpush.msra.mxu1 %v2932_v18 }
 0x71e   :  { %2962 = vmatpush.msra.mxu1 %v2931_v33 }
 0x751   :  { %v2650_v32 = vpop.f32.mrf.mxu3  ;;  %v2841_v25 = vpop.f32.mrf.mxu2 }
 0x752   :  { %v6482_v42 = vadd.f32 %v2650_v32, %v6380_v45  ;;  %v2864_v50 = vadd.f32 %v2841_v25, %v2468_v2 }
 0x754   :  { %v3257_v12 = vmul.f32 -1.442695, %v2864_v50 }
 0x756   :  { %3423 = vpow2.f32 %v3257_v12  ;;  %v3090_v12 = vld [vmem:[#allocation15 + $0x3f8] sm:$0xff] }
 0x757   :  { %3091 = vmatpush.msrb.mxu1 %v3090_v12 }
 0x759   :  { %3092 = vmatpush.msrb.mxu1 %v3089_v34 }
 0x75b   :  { %3093 = vmatpush.msrb.mxu1 %v3088_v43  ;;  %v3279_v43 = vld [vmem:[%s6589_s12] ss:$0 sm:$0xff] }
 0x75c   :  { %v3424_v13 = vpop.eup %3423 }
 0x75d   :  { %v2868_v46 = vadd.f32 1.0, %v3424_v13  ;;  %3094 = vmatpush.msrb.mxu1 %v3087_v6  ;;  %v3084_v13 = vld [vmem:[#allocation15 + $0x3c8] sm:$0xff] }
 0x75f   :  { %3425 = vrcp.f32 %v2868_v46  ;;  %v2880_v7 = vand.u32 2147483648, %v2868_v46  ;;  %vm2874_vm1 = vweird.f32 %v2868_v46  ;;  %v2878_v51 = vand.u32 2147483647, %v2868_v46  ;;  %3095 = vmatpush.msrb.mxu1 %v3086_v30 }
 0x761   :  { %v2881_v1 = vor.u32 1.1754944e-38, %v2880_v7  ;;  %vm2879_vm3 = vcmp.eq.f32.partialorder %v2878_v51, 8.507059e+37 }
 0x765   :  { %v3426_v23 = vpop.eup %3425 }
 0x766   :  { %v2870_v29 = vmul.f32 %v3426_v23, %v2868_v46  ;;  %vm2875_vm0 = vweird.f32 %v3426_v23  ;;  %v3082_v46 = vld [vmem:[#allocation15 + $0x3b8] sm:$0xff] }
 0x767   :  { %vm2876_vm2 = vmor %vm2874_vm1, %vm2875_vm0  ;;  %vm3117_vm0 = vcmask 1041408  }
 0x768   :  { %v2871_v45 = vsub.f32 1.0, %v2870_v29  ;;  %v3079_v29 = vld [vmem:[#allocation15 + $0x3a0] sm:$0xff] }
 0x76a   :  { %v2872_v27 = vmul.f32 %v3426_v23, %v2871_v45 }
 0x76b   :  { %v6490_v54 = vpop.f32.mrf.mxu0 }
 0x76c   :  { %v2873_v10 = vadd.f32 %v3426_v23, %v2872_v27  ;;  %v2802_v20 = vadd.f32 %v6490_v54, %v7409_v49 }
 0x76e   :  { %v2877_v37 = vsel %vm2876_vm2, %v3426_v23, %v2873_v10  ;;  %v3080_v23 = vld [vmem:[#allocation15 + $0x3a8] sm:$0xff] }
 0x76f   :  { %v2882_v39 = vsel %vm2879_vm3, %v2881_v1, %v2877_v37  ;;  %v3795_v1 = vld [vmem:[%s6587_s10] ss:$0 sm:$0xff] }
 0x771   :  { %v6486_v61 = vpop.f32.mrf.mxu3 }
 0x772   :  { %v2782_v8 = vadd.f32 %v6486_v61, %v7374_v35  ;;  %v3077_v35 = vld [vmem:[#allocation15 + $0x390] sm:$0xff]  ;;  %v3076_v61 = vld [vmem:[#allocation15 + $0x388] sm:$0xff] }
 0x773   :  { %v2921_v14 = vpop.f32.mrf.mxu0 }
 0x774   :  { %v2922_v9 = vadd.f32 %v7411_v38, %v2921_v14  ;;  %v2821_v38 = vpop.f32.mrf.mxu1 }
 0x776   :  { %v2924_v0 = vmul.f32 %v2922_v9, %v2882_v39 }
 0x778   :  { %v2925_v56 = vadd.f32 %v2924_v0, %v2508_v16 }
 0x779   :  { %v2861_v15 = vpop.f32.mrf.mxu3 }
 0x77a   :  { %v2884_v59 = vadd.f32 %v2861_v15, %v2488_v40  ;;  %v3075_v40 = vld [vmem:[#allocation15 + $0x380] sm:$0xff] }
 0x77c   :  { %v3258_v44 = vmul.f32 -1.442695, %v2884_v59 }
 0x77e   :  { %3427 = vpow2.f32 %v3258_v44 }
 0x784   :  { %v3428_v3 = vpop.eup %3427 }
 0x785   :  { %v2888_v36 = vadd.f32 1.0, %v3428_v3 }
 0x787   :  { %3429 = vrcp.f32 %v2888_v36  ;;  %v2900_v52 = vand.u32 2147483648, %v2888_v36  ;;  %v2898_v22 = vand.u32 2147483647, %v2888_v36  ;;  %vm2894_vm5 = vweird.f32 %v2888_v36 }
 0x788   :  { %3431 = vtanh.f32 %v2925_v56 }
 0x789   :  { %v2901_v21 = vor.u32 1.1754944e-38, %v2900_v52  ;;  %vm2899_vm7 = vcmp.eq.f32.partialorder %v2898_v22, 8.507059e+37 }
 0x78d   :  { %v3430_v11 = vpop.eup %3429 }
 0x78e   :  { %v2890_v62 = vmul.f32 %v3430_v11, %v2888_v36  ;;  %vm2895_vm4 = vweird.f32 %v3430_v11  ;;  %v3432_v25 = vpop.eup %3431 }
 0x78f   :  { %vm2896_vm6 = vmor %vm2894_vm5, %vm2895_vm4  ;;  %vm3206_vm5 = vcmask 9216  }
 0x790   :  { %v2891_v60 = vsub.f32 1.0, %v2890_v62  ;;  %v2822_v62 = vadd.f32 %v2821_v38, %v7412_v41 }
 0x792   :  { %v2892_v19 = vmul.f32 %v3430_v11, %v2891_v60 }
 0x794   :  { %v2893_v57 = vadd.f32 %v3430_v11, %v2892_v19 }
 0x796   :  { %v2897_v17 = vsel %vm2896_vm6, %v3430_v11, %v2893_v57 }
 0x797   :  { %v2902_v24 = vsel %vm2899_vm7, %v2901_v21, %v2897_v17 }
 0x798   :  { %v2927_v32 = vsub.f32 1.0, %v2902_v24  ;;  %v2929_v48 = vmul.f32 %v2902_v24, %v6424_v4  ;;  %v3085_v4 = vld [vmem:[#allocation15 + $0x3d0] sm:$0xff] }
 0x799   :  { %3096 = vmatpush.msrb.mxu1 %v3085_v4 }
 0x79a   :  { %v2928_v2 = vmul.f32 %v3432_v25, %v2927_v32 }
 0x79b   :  { %3097 = vmatpush.msrb.mxu1 %v3084_v13 }
 0x79c   :  { %v6496_v50 = vadd.f32 %v2929_v48, %v2928_v2  ;;  %v4038_v48 = vmov 2.0  }
 0x79d   :  { %3098 = vmatpush.msrb.mxu1 %v3083_v55 }
 0x79e   :  { %2963 = vmatmul.f32.vlgmr.msra.gmra.mxu1 %v6496_v50  ;;  %2984 = vmatmul.f32.vlgmr.msrb.gmra.mxu2 %v6496_v50 }
 0x79f   :  { %3004 = vmatmul.f32.vlgmr.msrb.gmra.mxu3 %v6496_v50  ;;  %3064 = vmatmul.f32.vlgmr.msrb.gmra.mxu0 %v6496_v50 }
 0x7a0   :  { %3099 = vmatpush.msrb.mxu1 %v3082_v46 }
 0x7a2   :  { %3100 = vmatpush.msrb.mxu1 %v3081_v5  ;;  %v3178_v5 = vld [vmem:[%s6592_s15 + $0x68] sm:$0xff] }
 0x7a4   :  { %3101 = vmatpush.msrb.mxu1 %v3080_v23  ;;  %v3176_v23 = vld [vmem:[%s6592_s15 + $0x58] sm:$0xff] }
 0x7a6   :  { %3102 = vmatpush.msrb.mxu1 %v3079_v29  ;;  %v3175_v29 = vld [vmem:[%s6592_s15 + $0x50] sm:$0xff] }
 0x7a8   :  { %3103 = vmatpush.msrb.mxu1 %v3078_v63  ;;  %v3174_v63 = vld [vmem:[%s6592_s15 + $0x48] sm:$0xff] }
 0x7aa   :  { %3104 = vmatpush.msrb.mxu1 %v3077_v35 }
 0x7ac   :  { %3105 = vmatpush.msrb.mxu1 %v3076_v61 }
 0x7ae   :  { %3106 = vmatpush.msrb.mxu1 %v3075_v40 }
 0x81b   :  { %v2964_v41 = vpop.f32.mrf.mxu1 }
 0x81c   :  { %v3065_v51 = vpop.f32.mrf.mxu0  ;;  %v2967_v34 = vadd.f32 %v2964_v41, %v6482_v42 }
 0x81d   :  { %v3066_v39 = vadd.f32 %v3795_v1, %v3065_v51  ;;  %v3166_v51 = vld [vmem:[%s6592_s15 + $0x8] sm:$0xff] }
 0x821   :  { %v2985_v47 = vpop.f32.mrf.mxu2 }
 0x822   :  { %v3008_v58 = vadd.f32 %v2985_v47, %v2782_v8  ;;  %v3005_v31 = vpop.f32.mrf.mxu3  ;;  %v3179_v8 = vld [vmem:[%s6592_s15 + $0x70] sm:$0xff] }
 0x823   :  { %v3028_v28 = vadd.f32 %v3005_v31, %v2802_v20 }
 0x824   :  { %v3259_v26 = vmul.f32 -1.442695, %v3008_v58  ;;  %v3177_v58 = vld [vmem:[%s6592_s15 + $0x60] sm:$0xff] }
 0x825   :  { %v3260_v53 = vmul.f32 -1.442695, %v3028_v28 }
 0x826   :  { %3433 = vpow2.f32 %v3259_v26 }
 0x827   :  { %3435 = vpow2.f32 %v3260_v53 }
 0x82c   :  { %v3434_v49 = vpop.eup %3433 }
 0x82d   :  { %v3436_v15 = vpop.eup %3435  ;;  %v3012_v18 = vadd.f32 1.0, %v3434_v49  ;;  %v3173_v49 = vld [vmem:[%s6592_s15 + $0x40] sm:$0xff] }
 0x82e   :  { %v3032_v54 = vadd.f32 1.0, %v3436_v15  ;;  %v3172_v15 = vld [vmem:[%s6592_s15 + $0x38] sm:$0xff] }
 0x82f   :  { %3437 = vrcp.f32 %v3012_v18  ;;  %v3024_v10 = vand.u32 2147483648, %v3012_v18  ;;  %v3022_v14 = vand.u32 2147483647, %v3012_v18  ;;  %vm3018_vm9 = vweird.f32 %v3012_v18 }
 0x830   :  { %3439 = vrcp.f32 %v3032_v54  ;;  %v3044_v60 = vand.u32 2147483648, %v3032_v54  ;;  %vm3038_vm13 = vweird.f32 %v3032_v54  ;;  %v3042_v52 = vand.u32 2147483647, %v3032_v54 }
 0x831   :  { %v3025_v9 = vor.u32 1.1754944e-38, %v3024_v10  ;;  %vm3023_vm11 = vcmp.eq.f32.partialorder %v3022_v14, 8.507059e+37  ;;  %v3168_v10 = vld [vmem:[%s6592_s15 + $0x18] sm:$0xff] }
 0x832   :  { %v3045_v57 = vor.u32 1.1754944e-38, %v3044_v60  ;;  %vm3043_vm15 = vcmp.eq.f32.partialorder %v3042_v52, 8.507059e+37  ;;  %v3280_v52 = vld [vmem:[%s6590_s13] ss:$0 sm:$0xff] }
 0x835   :  { %v3438_v59 = vpop.eup %3437 }
 0x836   :  { %v3440_v45 = vpop.eup %3439  ;;  %v3014_v33 = vmul.f32 %v3438_v59, %v3012_v18  ;;  %vm3019_vm8 = vweird.f32 %v3438_v59 }
 0x837   :  { %v3034_v44 = vmul.f32 %v3440_v45, %v3032_v54  ;;  %vm3020_vm10 = vmor %vm3018_vm9, %vm3019_vm8  ;;  %vm3039_vm12 = vweird.f32 %v3440_v45  ;;  %v3171_v54 = vld [vmem:[%s6592_s15 + $0x30] sm:$0xff] }
 0x838   :  { %v3015_v27 = vsub.f32 1.0, %v3014_v33  ;;  %vm3040_vm14 = vmor %vm3038_vm13, %vm3039_vm12 }
 0x839   :  { %v3035_v3 = vsub.f32 1.0, %v3034_v44  ;;  %v3169_v44 = vld [vmem:[%s6592_s15 + $0x20] sm:$0xff] }
 0x83a   :  { %v3016_v7 = vmul.f32 %v3438_v59, %v3015_v27 }
 0x83b   :  { %v3036_v36 = vmul.f32 %v3440_v45, %v3035_v3 }
 0x83c   :  { %v3017_v37 = vadd.f32 %v3438_v59, %v3016_v7  ;;  %v3167_v7 = vld [vmem:[%s6592_s15 + $0x10] sm:$0xff] }
 0x83d   :  { %v3037_v16 = vadd.f32 %v3440_v45, %v3036_v36 }
 0x83e   :  { %v3021_v0 = vsel %vm3020_vm10, %v3438_v59, %v3017_v37  ;;  %v3165_v37 = vld [vmem:[%s6592_s15] sm:$0xff] }
 0x83f   :  { %v3026_v11 = vsel %vm3023_vm11, %v3025_v9, %v3021_v0  ;;  %v3041_v22 = vsel %vm3040_vm14, %v3440_v45, %v3037_v16  ;;  %v3170_v45 = vld [vmem:[%s6592_s15 + $0x28] sm:$0xff] }
 0x840   :  { %v3068_v56 = vmul.f32 %v3066_v39, %v3026_v11  ;;  %v3046_v21 = vsel %vm3043_vm15, %v3045_v57, %v3041_v22  ;;  %v3281_v57 = vld [vmem:[%s6591_s14] ss:$0 sm:$0xff] }
 0x841   :  { %v3071_v17 = vsub.f32 1.0, %v3046_v21  ;;  %v3073_v25 = vmul.f32 %v3046_v21, %v6496_v50  ;;  %v3180_v50 = vld [vmem:[%s6592_s15 + $0x78] sm:$0xff] }
 0x842   :  { %v3069_v19 = vadd.f32 %v3068_v56, %v2822_v62  ;;  %3185 = vmatpush.msra.mxu2 %v3180_v50 }
 0x844   :  { %3441 = vtanh.f32 %v3069_v19  ;;  %3186 = vmatpush.msra.mxu2 %v3179_v8 }
 0x845   :  { %3443 = vrcp.f32 %v4038_v48 }
 0x846   :  { %3187 = vmatpush.msra.mxu2 %v3178_v5 }
 0x848   :  { %3188 = vmatpush.msra.mxu2 %v3177_v58 }
 0x84a   :  { %v3442_v24 = vpop.eup %3441  ;;  %3189 = vmatpush.msra.mxu2 %v3176_v23 }
 0x84b   :  { %v3072_v32 = vmul.f32 %v3442_v24, %v3071_v17  ;;  %v3444_v12 = vpop.eup %3443  ;;  %v3282_v24 = vld [vmem:[%s6593_s16] ss:$0 sm:$0xff] }
 0x84c   :  { %v3126_v6 = vmul.f32 2.0, %v3444_v12  ;;  %vm3130_vm1 = vweird.f32 %v3444_v12  ;;  %3190 = vmatpush.msra.mxu2 %v3175_v29 }
 0x84d   :  { %v3074_v2 = vadd.f32 %v3073_v25, %v3072_v32 }
 0x84e   :  { %v3127_v55 = vsub.f32 1.0, %v3126_v6  ;;  %3191 = vmatpush.msra.mxu2 %v3174_v63 }
 0x84f   :  { %3107 = vmatmul.f32.vlgmr.msrb.gmra.mxu1 %v3074_v2 }
 0x850   :  { %v3128_v20 = vmul.f32 %v3444_v12, %v3127_v55  ;;  %3192 = vmatpush.msra.mxu2 %v3173_v49 }
 0x852   :  { %v3129_v28 = vadd.f32 %v3444_v12, %v3128_v20  ;;  %3193 = vmatpush.msra.mxu2 %v3172_v15 }
 0x854   :  { %v3131_v35 = vsel %vm3130_vm1, %v3444_v12, %v3129_v28  ;;  %3194 = vmatpush.msra.mxu2 %v3171_v54 }
 0x856   :  { %3195 = vmatpush.msra.mxu2 %v3170_v45 }
 0x858   :  { %3196 = vmatpush.msra.mxu2 %v3169_v44 }
 0x85a   :  { %3197 = vmatpush.msra.mxu2 %v3168_v10 }
 0x85c   :  { %3198 = vmatpush.msra.mxu2 %v3167_v7 }
 0x85e   :  { %3199 = vmatpush.msra.mxu2 %v3166_v51 }
 0x860   :  { %3200 = vmatpush.msra.mxu2 %v3165_v37 }
 0x8cc   :  { %v3108_v30 = vpop.f32.mrf.mxu1 }
 0x8cd   :  { %v3111_v4 = vadd.f32 %v3108_v30, %v2967_v34 }
 0x8cf   :  { %v3116_v13 = vadd.f32 %v3279_v43, %v3111_v4 }
 0x8d1   :  { %v3118_v42 = vsel %vm3117_vm0, %v3116_v13, 0.0 }
 0x8d2   :  { %v3119_v46 = vrot.slane %v3118_v42, 4 }
 0x8d4   :  { %v3120_v47 = vadd.f32 %v3119_v46, %v3118_v42 }
 0x8d6   :  { %v3121_v31 = vrot.slane %v3120_v47, 2 }
 0x8d8   :  { %v3122_v26 = vadd.f32 %v3121_v31, %v3120_v47 }
 0x8da   :  { %v3123_v53 = vrot.slane %v3122_v26, 1 }
 0x8dc   :  { %v3124_v61 = vadd.f32 %v3123_v53, %v3122_v26 }
 0x8de   :  { %v3132_v40 = vmul.f32 %v3131_v35, %v3124_v61 }
 0x8e0   :  { %v3133_v18 = vsub.f32 %v3116_v13, %v3132_v40 }
 0x8e2   :  { %v3134_v59 = vmul.f32 %v3133_v18, %v3133_v18 }
 0x8e4   :  { %v3135_v33 = vsel %vm3117_vm0, %v3134_v59, 0.0 }
 0x8e5   :  { %v3136_v27 = vrot.slane %v3135_v33, 4 }
 0x8e7   :  { %v3137_v3 = vadd.f32 %v3136_v27, %v3135_v33 }
 0x8e9   :  { %v3138_v14 = vrot.slane %v3137_v3, 2 }
 0x8eb   :  { %v3139_v36 = vadd.f32 %v3138_v14, %v3137_v3 }
 0x8ed   :  { %v3140_v38 = vrot.slane %v3139_v36, 1 }
 0x8ef   :  { %v3141_v9 = vadd.f32 %v3140_v38, %v3139_v36 }
 0x8f1   :  { %v3142_v1 = vmul.f32 %v3141_v9, %v3131_v35 }
 0x8f3   :  { %v3143_v39 = vadd.f32 1e-05, %v3142_v1 }
 0x8f5   :  { %3445 = vrsqrt.f32 %v3143_v39  ;;  %vm3150_vm3 = vweird.f32 %v3143_v39 }
 0x8fb   :  { %v3446_v0 = vpop.eup %3445 }
 0x8fc   :  { %v3145_v11 = vmul.f32 %v3446_v0, %v3143_v39  ;;  %vm3151_vm2 = vweird.f32 %v3446_v0 }
 0x8fd   :  { %vm3152_vm4 = vmor %vm3150_vm3, %vm3151_vm2 }
 0x8fe   :  { %v3146_v16 = vmul.f32 %v3446_v0, %v3145_v11 }
 0x900   :  { %v3147_v62 = vmul.f32 0.5, %v3146_v16 }
 0x902   :  { %v3148_v56 = vsub.f32 1.5, %v3147_v62 }
 0x904   :  { %v3149_v60 = vmul.f32 %v3446_v0, %v3148_v56 }
 0x906   :  { %v3153_v19 = vsel %vm3152_vm4, %v3446_v0, %v3149_v60 }
 0x907   :  { %v3154_v22 = vmul.f32 %v3153_v19, %v3133_v18 }
 0x909   :  { %v3159_v21 = vmul.f32 %v3280_v52, %v3154_v22 }
 0x90b   :  { %v3164_v17 = vadd.f32 %v3281_v57, %v3159_v21 }
 0x90d   :  { %3201 = vmatmul.f32.vlgmr.msra.gmra.mxu2 %v3164_v17 }
 0x990   :  { %v3202_v32 = vpop.f32.mrf.mxu2 }
 0x991   :  { %v3203_v25 = vadd.f32 %v3282_v24, %v3202_v32 }
 0x993   :  { %3447 = vtanh.f32 %v3203_v25 }
 0x999   :  { %v3448_v2 = vpop.eup %3447 }
 0x99a   :  { %3207 = vst.msk [vmem:[#allocation17] sm:$0x3] %vm3206_vm5, %v3448_v2 }
 0x99b   :  { %3218 = dma.vmem_to_hbm [thread:$0]  %s3214_s24, 32, %s3216_s19, [#allocation5]  }
 0x99c   :  { %4022 = dma.done.wait [#allocation5], 32  }
 0x99d   :  { %4023 = vsyncadd [#allocation5], 4294967264 }
 0x99e   :  { %3223 = vsyncpa [#allocation4], 1 }
 0x99f   :  { %3224 = vsyncpa [#allocation7], 1 }
 0x9a0   :  { %3225 = vsyncpa [#allocation10], 1 }
 0x9a1   :  { %3226 = vsyncpa [#allocation13], 1 }
 0x9a2   :  { %3227 = vsyncpa [#allocation16], 1 }
 0x9a3   :  { %3228 = vsyncpa [#allocation5], 1 }

</bundles_post_ra>
